<compile_context>
chip_gen: v5e
topology: v5e:2x2
jax: 0.10.0
libtpu: 0.0.40
codegen_flags: <defaults>
</compile_context>

<pallas_src>
import jax
import jax.numpy as jnp
from jax.experimental import pallas as pl
from jax.experimental.pallas import tpu as pltpu

EPS = 1e-5      # nn.BatchNorm3d default
SUBLANE = 8     # f32 sublane width


# ---------------------------------------------------------------------------
# Fused Pallas kernel: 3x (conv3x3x3 as GEMM -> BN(train) -> ReLU) + residual
# ---------------------------------------------------------------------------
def _make_fused_kernel(N, D, H, W):
    M = N * D * H * W
    HW = H * W
    offsets = [kd * HW + kh * W + kw
               for kd in (-1, 0, 1) for kh in (-1, 0, 1) for kw in (-1, 0, 1)]

    def kernel(x_ref, w_ref, gb_ref, mask_ref, out_ref):
        x = x_ref[...]  # (C, M) f32 -- also the residual

        def conv_bn(act, s):
            # Build the 27 shifted taps in-register: tap t is `act` shifted by
            # offsets[t] along the flattened (n,d,h,w) lane axis; positions
            # whose source lies outside the zero-padded volume are masked to 0
            # (this also kills the cyclic wrap of the roll across n/d/h/w
            # boundaries, since any wrap necessarily crosses a volume border).
            taps = []
            for t, off in enumerate(offsets):
                if off == 0:
                    taps.append(act)
                else:
                    shifted = pltpu.roll(act, shift=(-off) % M, axis=1)
                    taps.append(shifted * mask_ref[t:t + 1, :])
            cols = jnp.concatenate(taps, axis=0)              # (27C, M)
            # Conv as a single lane-dense GEMM: (C, 27C) @ (27C, M) -> (C, M)
            y = jnp.dot(w_ref[s], cols,
                        preferred_element_type=jnp.float32)
            # Training-mode BatchNorm folded to one FMA.  (Conv bias omitted:
            # it is exactly cancelled by the batch-mean subtraction.)
            mean = jnp.mean(y, axis=-1, keepdims=True)        # (C, 1)
            msq = jnp.mean(y * y, axis=-1, keepdims=True)     # (C, 1)
            var = jnp.maximum(msq - mean * mean, 0.0)
            scale = gb_ref[s, 0] * jax.lax.rsqrt(var + EPS)   # (C, 1)
            shift = gb_ref[s, 1] - mean * scale               # (C, 1)
            return y * scale + shift

        a = jnp.maximum(conv_bn(x, 0), 0.0)                   # relu(bn1(conv1))
        a = jnp.maximum(conv_bn(a, 1), 0.0)                   # relu(bn2(conv2))
        out_ref[...] = jnp.maximum(conv_bn(a, 2) + x, 0.0)    # relu(bn3(conv3)+res)

    return kernel


# ---------------------------------------------------------------------------
# Plain-JAX glue: layout plumbing + parameter packing (cheap, no im2col)
# ---------------------------------------------------------------------------
def _boundary_masks(N, D, H, W):
    """(27, M) f32 validity masks for the 27 shifted taps, m=(n,d,h,w) order."""
    M = N * D * H * W
    m = jnp.arange(M, dtype=jnp.int32)
    w_i = m % W
    h_i = (m // W) % H
    d_i = (m // (H * W)) % D
    rows = []
    for kd in (-1, 0, 1):
        for kh in (-1, 0, 1):
            for kw in (-1, 0, 1):
                valid = ((d_i + kd >= 0) & (d_i + kd < D) &
                         (h_i + kh >= 0) & (h_i + kh < H) &
                         (w_i + kw >= 0) & (w_i + kw < W))
                rows.append(valid.astype(jnp.float32))
    return jnp.stack(rows, axis=0)


def _pack_weights(params, C, Cp):
    # torch Conv3d weight (Co, Ci, kD, kH, kW) -> (Cp, 27*Cp), tap-major with
    # (kd, kh, kw) ordering matching the kernel tap loop, ci innermost.
    # Channel padding (zeros) happens on the raw 5-D weight so the per-tap
    # column blocks stay correctly aligned.
    mats = []
    for i in (1, 2, 3):
        w = params[f"w{i}"].astype(jnp.float32)
        if Cp != C:
            w = jnp.pad(w, ((0, Cp - C), (0, Cp - C), (0, 0), (0, 0), (0, 0)))
        mats.append(jnp.transpose(w, (0, 2, 3, 4, 1)).reshape(Cp, 27 * Cp))
    return jnp.stack(mats, axis=0)                            # (3, Cp, 27*Cp)


def _pack_bn(params, C, Cp):
    rows = []
    for i in (1, 2, 3):
        g = params[f"g{i}"].astype(jnp.float32)
        b = params[f"beta{i}"].astype(jnp.float32)
        if Cp != C:
            g = jnp.pad(g, (0, Cp - C))   # gamma_pad = 0 -> pad channels stay 0
            b = jnp.pad(b, (0, Cp - C))
        rows.append(jnp.stack([g.reshape(Cp, 1), b.reshape(Cp, 1)], axis=0))
    return jnp.stack(rows, axis=0)                            # (3, 2, Cp, 1)


def resblock_forward(x_ncdhw, params):
    N, C, D, H, W = x_ncdhw.shape
    M = N * D * H * W
    Cp = -(-C // SUBLANE) * SUBLANE       # pad channels to sublane multiple

    # NCDHW -> (Cp, M): channels on sublanes, flattened (n,d,h,w) on lanes.
    x_cm = jnp.transpose(x_ncdhw, (1, 0, 2, 3, 4)).reshape(C, M)
    x_cm = x_cm.astype(jnp.float32)
    if Cp != C:
        x_cm = jnp.pad(x_cm, ((0, Cp - C), (0, 0)))

    wg = _pack_weights(params, C, Cp)     # conv biases b1/b2/b3 intentionally
    gb = _pack_bn(params, C, Cp)          # unused: cancelled by training-mode BN
    masks = _boundary_masks(N, D, H, W)

    # Advisory cost hint for XLA's scheduler around the custom call.
    flops = 3 * 2 * Cp * (27 * Cp) * M
    bytes_accessed = 4 * (2 * Cp * M + wg.size + gb.size + masks.size)

    vmem = pl.BlockSpec(memory_space=pltpu.MemorySpace.VMEM)
    out_cm = pl.pallas_call(
        _make_fused_kernel(N, D, H, W),
        out_shape=jax.ShapeDtypeStruct((Cp, M), jnp.float32),
        in_specs=[vmem, vmem, vmem, vmem],
        out_specs=vmem,
        cost_estimate=pl.CostEstimate(flops=flops,
                                      transcendentals=3 * Cp,
                                      bytes_accessed=bytes_accessed),
    )(x_cm, wg, gb, masks)

    out_cm = out_cm[:C]                   # drop pad channels (no-op if Cp == C)
    return jnp.transpose(out_cm.reshape(C, N, D, H, W), (1, 0, 2, 3, 4))


# ---------------------------------------------------------------------------
# Pure-JAX reference (for verification; includes conv bias to confirm the
# bias-cancellation argument)
# ---------------------------------------------------------------------------
def _ref_resblock(x, params):
    def conv3d(x, w, b):
        y = jax.lax.conv_general_dilated(
            x, w, window_strides=(1, 1, 1),
            padding=((1, 1), (1, 1), (1, 1)),
            dimension_numbers=("NCDHW", "OIDHW", "NCDHW"),
            precision=jax.lax.Precision.HIGHEST)
        return y + b[None, :, None, None, None]

    def bn(x, g, beta):
        mean = x.mean(axis=(0, 2, 3, 4), keepdims=True)
        var = jnp.square(x - mean).mean(axis=(0, 2, 3, 4), keepdims=True)
        xh = (x - mean) * jax.lax.rsqrt(var + EPS)
        return xh * g[None, :, None, None, None] + beta[None, :, None, None, None]

    out = jax.nn.relu(bn(conv3d(x, params["w1"], params["b1"]),
                         params["g1"], params["beta1"]))
    out = jax.nn.relu(bn(conv3d(out, params["w2"], params["b2"]),
                         params["g2"], params["beta2"]))
    out = bn(conv3d(out, params["w3"], params["b3"]),
             params["g3"], params["beta3"])
    return jax.nn.relu(out + x)


# ---------------------------------------------------------------------------
if __name__ == "__main__":
    N, C, D, H, W = 2, 8, 8, 8, 8
    key = jax.random.PRNGKey(0)
    keys = jax.random.split(key, 16)

    x = jax.random.normal(keys[0], (N, C, D, H, W), dtype=jnp.float32)

    params = {}
    for i, base in zip((1, 2, 3), (1, 6, 11)):
        params[f"w{i}"] = 0.1 * jax.random.normal(
            keys[base + 0], (C, C, 3, 3, 3), dtype=jnp.float32)
        params[f"b{i}"] = 0.05 * jax.random.normal(
            keys[base + 1], (C,), dtype=jnp.float32)
        params[f"g{i}"] = 1.0 + 0.1 * jax.random.normal(
            keys[base + 2], (C,), dtype=jnp.float32)
        params[f"beta{i}"] = 0.05 * jax.random.normal(
            keys[base + 3], (C,), dtype=jnp.float32)

    fwd = jax.jit(resblock_forward)
    out = jax.block_until_ready(fwd(x, params))
    ref = jax.block_until_ready(_ref_resblock(x, params))

    assert out.shape == (N, C, D, H, W)
    assert jnp.allclose(out, ref, rtol=5e-2, atol=5e-2), (
        float(jnp.max(jnp.abs(out - ref))))
    print("KERNEL_OK")
</pallas_src>

<mosaic_0001>
module attributes {stable_mosaic.version = 11 : i64} {
  func.func @kernel(%arg0: memref<8x1024xf32, #tpu.memory_space<vmem>>, %arg1: memref<3x8x216xf32, #tpu.memory_space<vmem>>, %arg2: memref<3x2x8x1xf32, #tpu.memory_space<vmem>>, %arg3: memref<27x1024xf32, #tpu.memory_space<vmem>>, %arg4: memref<8x1024xf32, #tpu.memory_space<vmem>>) attributes {dimension_semantics = [], scalar_prefetch = 0 : i64, scratch_operands = 0 : i64, tpu.core_type = #tpu.core_type<tc>} {
    %c0 = arith.constant 0 : index
    %c0_0 = arith.constant 0 : index
    %0 = vector.load %arg0[%c0, %c0_0] : memref<8x1024xf32, #tpu.memory_space<vmem>>, vector<8x1024xf32>
    %c73_i32 = arith.constant 73 : i32
    %1 = tpu.dynamic_rotate %0 by %c73_i32 dim 1 : vector<8x1024xf32>, i32 -> vector<8x1024xf32>
    %c0_1 = arith.constant 0 : index
    %c0_2 = arith.constant 0 : index
    %2 = vector.load %arg3[%c0_1, %c0_2] : memref<27x1024xf32, #tpu.memory_space<vmem>>, vector<1x1024xf32>
    %3 = vector.broadcast %2 : vector<1x1024xf32> to vector<8x1024xf32>
    %4 = arith.mulf %1, %3 : vector<8x1024xf32>
    %c72_i32 = arith.constant 72 : i32
    %5 = tpu.dynamic_rotate %0 by %c72_i32 dim 1 : vector<8x1024xf32>, i32 -> vector<8x1024xf32>
    %c1 = arith.constant 1 : index
    %c0_3 = arith.constant 0 : index
    %6 = vector.load %arg3[%c1, %c0_3] : memref<27x1024xf32, #tpu.memory_space<vmem>>, vector<1x1024xf32>
    %7 = vector.broadcast %6 : vector<1x1024xf32> to vector<8x1024xf32>
    %8 = arith.mulf %5, %7 : vector<8x1024xf32>
    %c71_i32 = arith.constant 71 : i32
    %9 = tpu.dynamic_rotate %0 by %c71_i32 dim 1 : vector<8x1024xf32>, i32 -> vector<8x1024xf32>
    %c2 = arith.constant 2 : index
    %c0_4 = arith.constant 0 : index
    %10 = vector.load %arg3[%c2, %c0_4] : memref<27x1024xf32, #tpu.memory_space<vmem>>, vector<1x1024xf32>
    %11 = vector.broadcast %10 : vector<1x1024xf32> to vector<8x1024xf32>
    %12 = arith.mulf %9, %11 : vector<8x1024xf32>
    %c65_i32 = arith.constant 65 : i32
    %13 = tpu.dynamic_rotate %0 by %c65_i32 dim 1 : vector<8x1024xf32>, i32 -> vector<8x1024xf32>
    %c3 = arith.constant 3 : index
    %c0_5 = arith.constant 0 : index
    %14 = vector.load %arg3[%c3, %c0_5] : memref<27x1024xf32, #tpu.memory_space<vmem>>, vector<1x1024xf32>
    %15 = vector.broadcast %14 : vector<1x1024xf32> to vector<8x1024xf32>
    %16 = arith.mulf %13, %15 : vector<8x1024xf32>
    %c64_i32 = arith.constant 64 : i32
    %17 = tpu.dynamic_rotate %0 by %c64_i32 dim 1 : vector<8x1024xf32>, i32 -> vector<8x1024xf32>
    %c4 = arith.constant 4 : index
    %c0_6 = arith.constant 0 : index
    %18 = vector.load %arg3[%c4, %c0_6] : memref<27x1024xf32, #tpu.memory_space<vmem>>, vector<1x1024xf32>
    %19 = vector.broadcast %18 : vector<1x1024xf32> to vector<8x1024xf32>
    %20 = arith.mulf %17, %19 : vector<8x1024xf32>
    %c63_i32 = arith.constant 63 : i32
    %21 = tpu.dynamic_rotate %0 by %c63_i32 dim 1 : vector<8x1024xf32>, i32 -> vector<8x1024xf32>
    %c5 = arith.constant 5 : index
    %c0_7 = arith.constant 0 : index
    %22 = vector.load %arg3[%c5, %c0_7] : memref<27x1024xf32, #tpu.memory_space<vmem>>, vector<1x1024xf32>
    %23 = vector.broadcast %22 : vector<1x1024xf32> to vector<8x1024xf32>
    %24 = arith.mulf %21, %23 : vector<8x1024xf32>
    %c57_i32 = arith.constant 57 : i32
    %25 = tpu.dynamic_rotate %0 by %c57_i32 dim 1 : vector<8x1024xf32>, i32 -> vector<8x1024xf32>
    %c6 = arith.constant 6 : index
    %c0_8 = arith.constant 0 : index
    %26 = vector.load %arg3[%c6, %c0_8] : memref<27x1024xf32, #tpu.memory_space<vmem>>, vector<1x1024xf32>
    %27 = vector.broadcast %26 : vector<1x1024xf32> to vector<8x1024xf32>
    %28 = arith.mulf %25, %27 : vector<8x1024xf32>
    %c56_i32 = arith.constant 56 : i32
    %29 = tpu.dynamic_rotate %0 by %c56_i32 dim 1 : vector<8x1024xf32>, i32 -> vector<8x1024xf32>
    %c7 = arith.constant 7 : index
    %c0_9 = arith.constant 0 : index
    %30 = vector.load %arg3[%c7, %c0_9] : memref<27x1024xf32, #tpu.memory_space<vmem>>, vector<1x1024xf32>
    %31 = vector.broadcast %30 : vector<1x1024xf32> to vector<8x1024xf32>
    %32 = arith.mulf %29, %31 : vector<8x1024xf32>
    %c55_i32 = arith.constant 55 : i32
    %33 = tpu.dynamic_rotate %0 by %c55_i32 dim 1 : vector<8x1024xf32>, i32 -> vector<8x1024xf32>
    %c8 = arith.constant 8 : index
    %c0_10 = arith.constant 0 : index
    %34 = vector.load %arg3[%c8, %c0_10] : memref<27x1024xf32, #tpu.memory_space<vmem>>, vector<1x1024xf32>
    %35 = vector.broadcast %34 : vector<1x1024xf32> to vector<8x1024xf32>
    %36 = arith.mulf %33, %35 : vector<8x1024xf32>
    %c9_i32 = arith.constant 9 : i32
    %37 = tpu.dynamic_rotate %0 by %c9_i32 dim 1 : vector<8x1024xf32>, i32 -> vector<8x1024xf32>
    %c9 = arith.constant 9 : index
    %c0_11 = arith.constant 0 : index
    %38 = vector.load %arg3[%c9, %c0_11] : memref<27x1024xf32, #tpu.memory_space<vmem>>, vector<1x1024xf32>
    %39 = vector.broadcast %38 : vector<1x1024xf32> to vector<8x1024xf32>
    %40 = arith.mulf %37, %39 : vector<8x1024xf32>
    %c8_i32 = arith.constant 8 : i32
    %41 = tpu.dynamic_rotate %0 by %c8_i32 dim 1 : vector<8x1024xf32>, i32 -> vector<8x1024xf32>
    %c10 = arith.constant 10 : index
    %c0_12 = arith.constant 0 : index
    %42 = vector.load %arg3[%c10, %c0_12] : memref<27x1024xf32, #tpu.memory_space<vmem>>, vector<1x1024xf32>
    %43 = vector.broadcast %42 : vector<1x1024xf32> to vector<8x1024xf32>
    %44 = arith.mulf %41, %43 : vector<8x1024xf32>
    %c7_i32 = arith.constant 7 : i32
    %45 = tpu.dynamic_rotate %0 by %c7_i32 dim 1 : vector<8x1024xf32>, i32 -> vector<8x1024xf32>
    %c11 = arith.constant 11 : index
    %c0_13 = arith.constant 0 : index
    %46 = vector.load %arg3[%c11, %c0_13] : memref<27x1024xf32, #tpu.memory_space<vmem>>, vector<1x1024xf32>
    %47 = vector.broadcast %46 : vector<1x1024xf32> to vector<8x1024xf32>
    %48 = arith.mulf %45, %47 : vector<8x1024xf32>
    %c1_i32 = arith.constant 1 : i32
    %49 = tpu.dynamic_rotate %0 by %c1_i32 dim 1 : vector<8x1024xf32>, i32 -> vector<8x1024xf32>
    %c12 = arith.constant 12 : index
    %c0_14 = arith.constant 0 : index
    %50 = vector.load %arg3[%c12, %c0_14] : memref<27x1024xf32, #tpu.memory_space<vmem>>, vector<1x1024xf32>
    %51 = vector.broadcast %50 : vector<1x1024xf32> to vector<8x1024xf32>
    %52 = arith.mulf %49, %51 : vector<8x1024xf32>
    %c1023_i32 = arith.constant 1023 : i32
    %53 = tpu.dynamic_rotate %0 by %c1023_i32 dim 1 : vector<8x1024xf32>, i32 -> vector<8x1024xf32>
    %c14 = arith.constant 14 : index
    %c0_15 = arith.constant 0 : index
    %54 = vector.load %arg3[%c14, %c0_15] : memref<27x1024xf32, #tpu.memory_space<vmem>>, vector<1x1024xf32>
    %55 = vector.broadcast %54 : vector<1x1024xf32> to vector<8x1024xf32>
    %56 = arith.mulf %53, %55 : vector<8x1024xf32>
    %c1017_i32 = arith.constant 1017 : i32
    %57 = tpu.dynamic_rotate %0 by %c1017_i32 dim 1 : vector<8x1024xf32>, i32 -> vector<8x1024xf32>
    %c15 = arith.constant 15 : index
    %c0_16 = arith.constant 0 : index
    %58 = vector.load %arg3[%c15, %c0_16] : memref<27x1024xf32, #tpu.memory_space<vmem>>, vector<1x1024xf32>
    %59 = vector.broadcast %58 : vector<1x1024xf32> to vector<8x1024xf32>
    %60 = arith.mulf %57, %59 : vector<8x1024xf32>
    %c1016_i32 = arith.constant 1016 : i32
    %61 = tpu.dynamic_rotate %0 by %c1016_i32 dim 1 : vector<8x1024xf32>, i32 -> vector<8x1024xf32>
    %c16 = arith.constant 16 : index
    %c0_17 = arith.constant 0 : index
    %62 = vector.load %arg3[%c16, %c0_17] : memref<27x1024xf32, #tpu.memory_space<vmem>>, vector<1x1024xf32>
    %63 = vector.broadcast %62 : vector<1x1024xf32> to vector<8x1024xf32>
    %64 = arith.mulf %61, %63 : vector<8x1024xf32>
    %c1015_i32 = arith.constant 1015 : i32
    %65 = tpu.dynamic_rotate %0 by %c1015_i32 dim 1 : vector<8x1024xf32>, i32 -> vector<8x1024xf32>
    %c17 = arith.constant 17 : index
    %c0_18 = arith.constant 0 : index
    %66 = vector.load %arg3[%c17, %c0_18] : memref<27x1024xf32, #tpu.memory_space<vmem>>, vector<1x1024xf32>
    %67 = vector.broadcast %66 : vector<1x1024xf32> to vector<8x1024xf32>
    %68 = arith.mulf %65, %67 : vector<8x1024xf32>
    %c969_i32 = arith.constant 969 : i32
    %69 = tpu.dynamic_rotate %0 by %c969_i32 dim 1 : vector<8x1024xf32>, i32 -> vector<8x1024xf32>
    %c18 = arith.constant 18 : index
    %c0_19 = arith.constant 0 : index
    %70 = vector.load %arg3[%c18, %c0_19] : memref<27x1024xf32, #tpu.memory_space<vmem>>, vector<1x1024xf32>
    %71 = vector.broadcast %70 : vector<1x1024xf32> to vector<8x1024xf32>
    %72 = arith.mulf %69, %71 : vector<8x1024xf32>
    %c968_i32 = arith.constant 968 : i32
    %73 = tpu.dynamic_rotate %0 by %c968_i32 dim 1 : vector<8x1024xf32>, i32 -> vector<8x1024xf32>
    %c19 = arith.constant 19 : index
    %c0_20 = arith.constant 0 : index
    %74 = vector.load %arg3[%c19, %c0_20] : memref<27x1024xf32, #tpu.memory_space<vmem>>, vector<1x1024xf32>
    %75 = vector.broadcast %74 : vector<1x1024xf32> to vector<8x1024xf32>
    %76 = arith.mulf %73, %75 : vector<8x1024xf32>
    %c967_i32 = arith.constant 967 : i32
    %77 = tpu.dynamic_rotate %0 by %c967_i32 dim 1 : vector<8x1024xf32>, i32 -> vector<8x1024xf32>
    %c20 = arith.constant 20 : index
    %c0_21 = arith.constant 0 : index
    %78 = vector.load %arg3[%c20, %c0_21] : memref<27x1024xf32, #tpu.memory_space<vmem>>, vector<1x1024xf32>
    %79 = vector.broadcast %78 : vector<1x1024xf32> to vector<8x1024xf32>
    %80 = arith.mulf %77, %79 : vector<8x1024xf32>
    %c961_i32 = arith.constant 961 : i32
    %81 = tpu.dynamic_rotate %0 by %c961_i32 dim 1 : vector<8x1024xf32>, i32 -> vector<8x1024xf32>
    %c21 = arith.constant 21 : index
    %c0_22 = arith.constant 0 : index
    %82 = vector.load %arg3[%c21, %c0_22] : memref<27x1024xf32, #tpu.memory_space<vmem>>, vector<1x1024xf32>
    %83 = vector.broadcast %82 : vector<1x1024xf32> to vector<8x1024xf32>
    %84 = arith.mulf %81, %83 : vector<8x1024xf32>
    %c960_i32 = arith.constant 960 : i32
    %85 = tpu.dynamic_rotate %0 by %c960_i32 dim 1 : vector<8x1024xf32>, i32 -> vector<8x1024xf32>
    %c22 = arith.constant 22 : index
    %c0_23 = arith.constant 0 : index
    %86 = vector.load %arg3[%c22, %c0_23] : memref<27x1024xf32, #tpu.memory_space<vmem>>, vector<1x1024xf32>
    %87 = vector.broadcast %86 : vector<1x1024xf32> to vector<8x1024xf32>
    %88 = arith.mulf %85, %87 : vector<8x1024xf32>
    %c959_i32 = arith.constant 959 : i32
    %89 = tpu.dynamic_rotate %0 by %c959_i32 dim 1 : vector<8x1024xf32>, i32 -> vector<8x1024xf32>
    %c23 = arith.constant 23 : index
    %c0_24 = arith.constant 0 : index
    %90 = vector.load %arg3[%c23, %c0_24] : memref<27x1024xf32, #tpu.memory_space<vmem>>, vector<1x1024xf32>
    %91 = vector.broadcast %90 : vector<1x1024xf32> to vector<8x1024xf32>
    %92 = arith.mulf %89, %91 : vector<8x1024xf32>
    %c953_i32 = arith.constant 953 : i32
    %93 = tpu.dynamic_rotate %0 by %c953_i32 dim 1 : vector<8x1024xf32>, i32 -> vector<8x1024xf32>
    %c24 = arith.constant 24 : index
    %c0_25 = arith.constant 0 : index
    %94 = vector.load %arg3[%c24, %c0_25] : memref<27x1024xf32, #tpu.memory_space<vmem>>, vector<1x1024xf32>
    %95 = vector.broadcast %94 : vector<1x1024xf32> to vector<8x1024xf32>
    %96 = arith.mulf %93, %95 : vector<8x1024xf32>
    %c952_i32 = arith.constant 952 : i32
    %97 = tpu.dynamic_rotate %0 by %c952_i32 dim 1 : vector<8x1024xf32>, i32 -> vector<8x1024xf32>
    %c25 = arith.constant 25 : index
    %c0_26 = arith.constant 0 : index
    %98 = vector.load %arg3[%c25, %c0_26] : memref<27x1024xf32, #tpu.memory_space<vmem>>, vector<1x1024xf32>
    %99 = vector.broadcast %98 : vector<1x1024xf32> to vector<8x1024xf32>
    %100 = arith.mulf %97, %99 : vector<8x1024xf32>
    %c951_i32 = arith.constant 951 : i32
    %101 = tpu.dynamic_rotate %0 by %c951_i32 dim 1 : vector<8x1024xf32>, i32 -> vector<8x1024xf32>
    %c26 = arith.constant 26 : index
    %c0_27 = arith.constant 0 : index
    %102 = vector.load %arg3[%c26, %c0_27] : memref<27x1024xf32, #tpu.memory_space<vmem>>, vector<1x1024xf32>
    %103 = vector.broadcast %102 : vector<1x1024xf32> to vector<8x1024xf32>
    %104 = arith.mulf %101, %103 : vector<8x1024xf32>
    %105 = tpu.concatenate %4, %8, %12, %16, %20, %24, %28, %32, %36, %40, %44, %48, %52, %0, %56, %60 in 0 : vector<8x1024xf32>, vector<8x1024xf32>, vector<8x1024xf32>, vector<8x1024xf32>, vector<8x1024xf32>, vector<8x1024xf32>, vector<8x1024xf32>, vector<8x1024xf32>, vector<8x1024xf32>, vector<8x1024xf32>, vector<8x1024xf32>, vector<8x1024xf32>, vector<8x1024xf32>, vector<8x1024xf32>, vector<8x1024xf32>, vector<8x1024xf32> -> vector<128x1024xf32>
    %106 = tpu.concatenate %64, %68, %72, %76, %80, %84, %88, %92, %96, %100, %104 in 0 : vector<8x1024xf32>, vector<8x1024xf32>, vector<8x1024xf32>, vector<8x1024xf32>, vector<8x1024xf32>, vector<8x1024xf32>, vector<8x1024xf32>, vector<8x1024xf32>, vector<8x1024xf32>, vector<8x1024xf32>, vector<8x1024xf32> -> vector<88x1024xf32>
    %107 = tpu.concatenate %105, %106 in 0 : vector<128x1024xf32>, vector<88x1024xf32> -> vector<216x1024xf32>
    %c0_28 = arith.constant 0 : index
    %c0_29 = arith.constant 0 : index
    %c0_30 = arith.constant 0 : index
    %108 = vector.load %arg1[%c0_28, %c0_29, %c0_30] : memref<3x8x216xf32, #tpu.memory_space<vmem>>, vector<1x8x216xf32>
    %109 = vector.shape_cast %108 : vector<1x8x216xf32> to vector<8x216xf32>
    %cst = arith.constant dense<0.000000e+00> : vector<8x1024xf32>
    %110 = tpu.matmul %109, %107, %cst {dimension_numbers = #tpu.dot_dimension_numbers<[1], [0], [0], [1], [0, 0, 1, 1], [], []>} : vector<8x216xf32>, vector<216x1024xf32>, vector<8x1024xf32> -> vector<8x1024xf32>
    %cst_31 = arith.constant dense<0.000000e+00> : vector<8xf32>
    %111 = vector.multi_reduction <add>, %110, %cst_31 [1] : vector<8x1024xf32> to vector<8xf32>
    %112 = vector.shape_cast %111 : vector<8xf32> to vector<8x1xf32>
    %cst_32 = arith.constant 1.024000e+03 : f32
    %113 = vector.broadcast %cst_32 : f32 to vector<8x1xf32>
    %114 = arith.divf %112, %113 : vector<8x1xf32>
    %115 = arith.mulf %110, %110 : vector<8x1024xf32>
    %cst_33 = arith.constant dense<0.000000e+00> : vector<8xf32>
    %116 = vector.multi_reduction <add>, %115, %cst_33 [1] : vector<8x1024xf32> to vector<8xf32>
    %117 = vector.shape_cast %116 : vector<8xf32> to vector<8x1xf32>
    %cst_34 = arith.constant 1.024000e+03 : f32
    %118 = vector.broadcast %cst_34 : f32 to vector<8x1xf32>
    %119 = arith.divf %117, %118 : vector<8x1xf32>
    %120 = arith.mulf %114, %114 : vector<8x1xf32>
    %121 = arith.subf %119, %120 : vector<8x1xf32>
    %cst_35 = arith.constant 0.000000e+00 : f32
    %122 = vector.broadcast %cst_35 : f32 to vector<8x1xf32>
    %123 = arith.maximumf %121, %122 : vector<8x1xf32>
    %c0_36 = arith.constant 0 : index
    %c0_37 = arith.constant 0 : index
    %c0_38 = arith.constant 0 : index
    %c0_39 = arith.constant 0 : index
    %124 = vector.load %arg2[%c0_36, %c0_37, %c0_38, %c0_39] : memref<3x2x8x1xf32, #tpu.memory_space<vmem>>, vector<1x1x8x1xf32>
    %125 = vector.shape_cast %124 : vector<1x1x8x1xf32> to vector<8x1xf32>
    %cst_40 = arith.constant 9.99999974E-6 : f32
    %126 = vector.broadcast %cst_40 : f32 to vector<8x1xf32>
    %127 = arith.addf %123, %126 : vector<8x1xf32>
    %128 = math.rsqrt %127 : vector<8x1xf32>
    %129 = arith.mulf %125, %128 : vector<8x1xf32>
    %c0_41 = arith.constant 0 : index
    %c1_42 = arith.constant 1 : index
    %c0_43 = arith.constant 0 : index
    %c0_44 = arith.constant 0 : index
    %130 = vector.load %arg2[%c0_41, %c1_42, %c0_43, %c0_44] : memref<3x2x8x1xf32, #tpu.memory_space<vmem>>, vector<1x1x8x1xf32>
    %131 = vector.shape_cast %130 : vector<1x1x8x1xf32> to vector<8x1xf32>
    %132 = arith.mulf %114, %129 : vector<8x1xf32>
    %133 = arith.subf %131, %132 : vector<8x1xf32>
    %134 = vector.broadcast %129 : vector<8x1xf32> to vector<8x1024xf32>
    %135 = arith.mulf %110, %134 : vector<8x1024xf32>
    %136 = vector.broadcast %133 : vector<8x1xf32> to vector<8x1024xf32>
    %137 = arith.addf %135, %136 : vector<8x1024xf32>
    %cst_45 = arith.constant 0.000000e+00 : f32
    %138 = vector.broadcast %cst_45 : f32 to vector<8x1024xf32>
    %139 = arith.maximumf %137, %138 : vector<8x1024xf32>
    %c73_i32_46 = arith.constant 73 : i32
    %140 = tpu.dynamic_rotate %139 by %c73_i32_46 dim 1 : vector<8x1024xf32>, i32 -> vector<8x1024xf32>
    %c0_47 = arith.constant 0 : index
    %c0_48 = arith.constant 0 : index
    %141 = vector.load %arg3[%c0_47, %c0_48] : memref<27x1024xf32, #tpu.memory_space<vmem>>, vector<1x1024xf32>
    %142 = vector.broadcast %141 : vector<1x1024xf32> to vector<8x1024xf32>
    %143 = arith.mulf %140, %142 : vector<8x1024xf32>
    %c72_i32_49 = arith.constant 72 : i32
    %144 = tpu.dynamic_rotate %139 by %c72_i32_49 dim 1 : vector<8x1024xf32>, i32 -> vector<8x1024xf32>
    %c1_50 = arith.constant 1 : index
    %c0_51 = arith.constant 0 : index
    %145 = vector.load %arg3[%c1_50, %c0_51] : memref<27x1024xf32, #tpu.memory_space<vmem>>, vector<1x1024xf32>
    %146 = vector.broadcast %145 : vector<1x1024xf32> to vector<8x1024xf32>
    %147 = arith.mulf %144, %146 : vector<8x1024xf32>
    %c71_i32_52 = arith.constant 71 : i32
    %148 = tpu.dynamic_rotate %139 by %c71_i32_52 dim 1 : vector<8x1024xf32>, i32 -> vector<8x1024xf32>
    %c2_53 = arith.constant 2 : index
    %c0_54 = arith.constant 0 : index
    %149 = vector.load %arg3[%c2_53, %c0_54] : memref<27x1024xf32, #tpu.memory_space<vmem>>, vector<1x1024xf32>
    %150 = vector.broadcast %149 : vector<1x1024xf32> to vector<8x1024xf32>
    %151 = arith.mulf %148, %150 : vector<8x1024xf32>
    %c65_i32_55 = arith.constant 65 : i32
    %152 = tpu.dynamic_rotate %139 by %c65_i32_55 dim 1 : vector<8x1024xf32>, i32 -> vector<8x1024xf32>
    %c3_56 = arith.constant 3 : index
    %c0_57 = arith.constant 0 : index
    %153 = vector.load %arg3[%c3_56, %c0_57] : memref<27x1024xf32, #tpu.memory_space<vmem>>, vector<1x1024xf32>
    %154 = vector.broadcast %153 : vector<1x1024xf32> to vector<8x1024xf32>
    %155 = arith.mulf %152, %154 : vector<8x1024xf32>
    %c64_i32_58 = arith.constant 64 : i32
    %156 = tpu.dynamic_rotate %139 by %c64_i32_58 dim 1 : vector<8x1024xf32>, i32 -> vector<8x1024xf32>
    %c4_59 = arith.constant 4 : index
    %c0_60 = arith.constant 0 : index
    %157 = vector.load %arg3[%c4_59, %c0_60] : memref<27x1024xf32, #tpu.memory_space<vmem>>, vector<1x1024xf32>
    %158 = vector.broadcast %157 : vector<1x1024xf32> to vector<8x1024xf32>
    %159 = arith.mulf %156, %158 : vector<8x1024xf32>
    %c63_i32_61 = arith.constant 63 : i32
    %160 = tpu.dynamic_rotate %139 by %c63_i32_61 dim 1 : vector<8x1024xf32>, i32 -> vector<8x1024xf32>
    %c5_62 = arith.constant 5 : index
    %c0_63 = arith.constant 0 : index
    %161 = vector.load %arg3[%c5_62, %c0_63] : memref<27x1024xf32, #tpu.memory_space<vmem>>, vector<1x1024xf32>
    %162 = vector.broadcast %161 : vector<1x1024xf32> to vector<8x1024xf32>
    %163 = arith.mulf %160, %162 : vector<8x1024xf32>
    %c57_i32_64 = arith.constant 57 : i32
    %164 = tpu.dynamic_rotate %139 by %c57_i32_64 dim 1 : vector<8x1024xf32>, i32 -> vector<8x1024xf32>
    %c6_65 = arith.constant 6 : index
    %c0_66 = arith.constant 0 : index
    %165 = vector.load %arg3[%c6_65, %c0_66] : memref<27x1024xf32, #tpu.memory_space<vmem>>, vector<1x1024xf32>
    %166 = vector.broadcast %165 : vector<1x1024xf32> to vector<8x1024xf32>
    %167 = arith.mulf %164, %166 : vector<8x1024xf32>
    %c56_i32_67 = arith.constant 56 : i32
    %168 = tpu.dynamic_rotate %139 by %c56_i32_67 dim 1 : vector<8x1024xf32>, i32 -> vector<8x1024xf32>
    %c7_68 = arith.constant 7 : index
    %c0_69 = arith.constant 0 : index
    %169 = vector.load %arg3[%c7_68, %c0_69] : memref<27x1024xf32, #tpu.memory_space<vmem>>, vector<1x1024xf32>
    %170 = vector.broadcast %169 : vector<1x1024xf32> to vector<8x1024xf32>
    %171 = arith.mulf %168, %170 : vector<8x1024xf32>
    %c55_i32_70 = arith.constant 55 : i32
    %172 = tpu.dynamic_rotate %139 by %c55_i32_70 dim 1 : vector<8x1024xf32>, i32 -> vector<8x1024xf32>
    %c8_71 = arith.constant 8 : index
    %c0_72 = arith.constant 0 : index
    %173 = vector.load %arg3[%c8_71, %c0_72] : memref<27x1024xf32, #tpu.memory_space<vmem>>, vector<1x1024xf32>
    %174 = vector.broadcast %173 : vector<1x1024xf32> to vector<8x1024xf32>
    %175 = arith.mulf %172, %174 : vector<8x1024xf32>
    %c9_i32_73 = arith.constant 9 : i32
    %176 = tpu.dynamic_rotate %139 by %c9_i32_73 dim 1 : vector<8x1024xf32>, i32 -> vector<8x1024xf32>
    %c9_74 = arith.constant 9 : index
    %c0_75 = arith.constant 0 : index
    %177 = vector.load %arg3[%c9_74, %c0_75] : memref<27x1024xf32, #tpu.memory_space<vmem>>, vector<1x1024xf32>
    %178 = vector.broadcast %177 : vector<1x1024xf32> to vector<8x1024xf32>
    %179 = arith.mulf %176, %178 : vector<8x1024xf32>
    %c8_i32_76 = arith.constant 8 : i32
    %180 = tpu.dynamic_rotate %139 by %c8_i32_76 dim 1 : vector<8x1024xf32>, i32 -> vector<8x1024xf32>
    %c10_77 = arith.constant 10 : index
    %c0_78 = arith.constant 0 : index
    %181 = vector.load %arg3[%c10_77, %c0_78] : memref<27x1024xf32, #tpu.memory_space<vmem>>, vector<1x1024xf32>
    %182 = vector.broadcast %181 : vector<1x1024xf32> to vector<8x1024xf32>
    %183 = arith.mulf %180, %182 : vector<8x1024xf32>
    %c7_i32_79 = arith.constant 7 : i32
    %184 = tpu.dynamic_rotate %139 by %c7_i32_79 dim 1 : vector<8x1024xf32>, i32 -> vector<8x1024xf32>
    %c11_80 = arith.constant 11 : index
    %c0_81 = arith.constant 0 : index
    %185 = vector.load %arg3[%c11_80, %c0_81] : memref<27x1024xf32, #tpu.memory_space<vmem>>, vector<1x1024xf32>
    %186 = vector.broadcast %185 : vector<1x1024xf32> to vector<8x1024xf32>
    %187 = arith.mulf %184, %186 : vector<8x1024xf32>
    %c1_i32_82 = arith.constant 1 : i32
    %188 = tpu.dynamic_rotate %139 by %c1_i32_82 dim 1 : vector<8x1024xf32>, i32 -> vector<8x1024xf32>
    %c12_83 = arith.constant 12 : index
    %c0_84 = arith.constant 0 : index
    %189 = vector.load %arg3[%c12_83, %c0_84] : memref<27x1024xf32, #tpu.memory_space<vmem>>, vector<1x1024xf32>
    %190 = vector.broadcast %189 : vector<1x1024xf32> to vector<8x1024xf32>
    %191 = arith.mulf %188, %190 : vector<8x1024xf32>
    %c1023_i32_85 = arith.constant 1023 : i32
    %192 = tpu.dynamic_rotate %139 by %c1023_i32_85 dim 1 : vector<8x1024xf32>, i32 -> vector<8x1024xf32>
    %c14_86 = arith.constant 14 : index
    %c0_87 = arith.constant 0 : index
    %193 = vector.load %arg3[%c14_86, %c0_87] : memref<27x1024xf32, #tpu.memory_space<vmem>>, vector<1x1024xf32>
    %194 = vector.broadcast %193 : vector<1x1024xf32> to vector<8x1024xf32>
    %195 = arith.mulf %192, %194 : vector<8x1024xf32>
    %c1017_i32_88 = arith.constant 1017 : i32
    %196 = tpu.dynamic_rotate %139 by %c1017_i32_88 dim 1 : vector<8x1024xf32>, i32 -> vector<8x1024xf32>
    %c15_89 = arith.constant 15 : index
    %c0_90 = arith.constant 0 : index
    %197 = vector.load %arg3[%c15_89, %c0_90] : memref<27x1024xf32, #tpu.memory_space<vmem>>, vector<1x1024xf32>
    %198 = vector.broadcast %197 : vector<1x1024xf32> to vector<8x1024xf32>
    %199 = arith.mulf %196, %198 : vector<8x1024xf32>
    %c1016_i32_91 = arith.constant 1016 : i32
    %200 = tpu.dynamic_rotate %139 by %c1016_i32_91 dim 1 : vector<8x1024xf32>, i32 -> vector<8x1024xf32>
    %c16_92 = arith.constant 16 : index
    %c0_93 = arith.constant 0 : index
    %201 = vector.load %arg3[%c16_92, %c0_93] : memref<27x1024xf32, #tpu.memory_space<vmem>>, vector<1x1024xf32>
    %202 = vector.broadcast %201 : vector<1x1024xf32> to vector<8x1024xf32>
    %203 = arith.mulf %200, %202 : vector<8x1024xf32>
    %c1015_i32_94 = arith.constant 1015 : i32
    %204 = tpu.dynamic_rotate %139 by %c1015_i32_94 dim 1 : vector<8x1024xf32>, i32 -> vector<8x1024xf32>
    %c17_95 = arith.constant 17 : index
    %c0_96 = arith.constant 0 : index
    %205 = vector.load %arg3[%c17_95, %c0_96] : memref<27x1024xf32, #tpu.memory_space<vmem>>, vector<1x1024xf32>
    %206 = vector.broadcast %205 : vector<1x1024xf32> to vector<8x1024xf32>
    %207 = arith.mulf %204, %206 : vector<8x1024xf32>
    %c969_i32_97 = arith.constant 969 : i32
    %208 = tpu.dynamic_rotate %139 by %c969_i32_97 dim 1 : vector<8x1024xf32>, i32 -> vector<8x1024xf32>
    %c18_98 = arith.constant 18 : index
    %c0_99 = arith.constant 0 : index
    %209 = vector.load %arg3[%c18_98, %c0_99] : memref<27x1024xf32, #tpu.memory_space<vmem>>, vector<1x1024xf32>
    %210 = vector.broadcast %209 : vector<1x1024xf32> to vector<8x1024xf32>
    %211 = arith.mulf %208, %210 : vector<8x1024xf32>
    %c968_i32_100 = arith.constant 968 : i32
    %212 = tpu.dynamic_rotate %139 by %c968_i32_100 dim 1 : vector<8x1024xf32>, i32 -> vector<8x1024xf32>
    %c19_101 = arith.constant 19 : index
    %c0_102 = arith.constant 0 : index
    %213 = vector.load %arg3[%c19_101, %c0_102] : memref<27x1024xf32, #tpu.memory_space<vmem>>, vector<1x1024xf32>
    %214 = vector.broadcast %213 : vector<1x1024xf32> to vector<8x1024xf32>
    %215 = arith.mulf %212, %214 : vector<8x1024xf32>
    %c967_i32_103 = arith.constant 967 : i32
    %216 = tpu.dynamic_rotate %139 by %c967_i32_103 dim 1 : vector<8x1024xf32>, i32 -> vector<8x1024xf32>
    %c20_104 = arith.constant 20 : index
    %c0_105 = arith.constant 0 : index
    %217 = vector.load %arg3[%c20_104, %c0_105] : memref<27x1024xf32, #tpu.memory_space<vmem>>, vector<1x1024xf32>
    %218 = vector.broadcast %217 : vector<1x1024xf32> to vector<8x1024xf32>
    %219 = arith.mulf %216, %218 : vector<8x1024xf32>
    %c961_i32_106 = arith.constant 961 : i32
    %220 = tpu.dynamic_rotate %139 by %c961_i32_106 dim 1 : vector<8x1024xf32>, i32 -> vector<8x1024xf32>
    %c21_107 = arith.constant 21 : index
    %c0_108 = arith.constant 0 : index
    %221 = vector.load %arg3[%c21_107, %c0_108] : memref<27x1024xf32, #tpu.memory_space<vmem>>, vector<1x1024xf32>
    %222 = vector.broadcast %221 : vector<1x1024xf32> to vector<8x1024xf32>
    %223 = arith.mulf %220, %222 : vector<8x1024xf32>
    %c960_i32_109 = arith.constant 960 : i32
    %224 = tpu.dynamic_rotate %139 by %c960_i32_109 dim 1 : vector<8x1024xf32>, i32 -> vector<8x1024xf32>
    %c22_110 = arith.constant 22 : index
    %c0_111 = arith.constant 0 : index
    %225 = vector.load %arg3[%c22_110, %c0_111] : memref<27x1024xf32, #tpu.memory_space<vmem>>, vector<1x1024xf32>
    %226 = vector.broadcast %225 : vector<1x1024xf32> to vector<8x1024xf32>
    %227 = arith.mulf %224, %226 : vector<8x1024xf32>
    %c959_i32_112 = arith.constant 959 : i32
    %228 = tpu.dynamic_rotate %139 by %c959_i32_112 dim 1 : vector<8x1024xf32>, i32 -> vector<8x1024xf32>
    %c23_113 = arith.constant 23 : index
    %c0_114 = arith.constant 0 : index
    %229 = vector.load %arg3[%c23_113, %c0_114] : memref<27x1024xf32, #tpu.memory_space<vmem>>, vector<1x1024xf32>
    %230 = vector.broadcast %229 : vector<1x1024xf32> to vector<8x1024xf32>
    %231 = arith.mulf %228, %230 : vector<8x1024xf32>
    %c953_i32_115 = arith.constant 953 : i32
    %232 = tpu.dynamic_rotate %139 by %c953_i32_115 dim 1 : vector<8x1024xf32>, i32 -> vector<8x1024xf32>
    %c24_116 = arith.constant 24 : index
    %c0_117 = arith.constant 0 : index
    %233 = vector.load %arg3[%c24_116, %c0_117] : memref<27x1024xf32, #tpu.memory_space<vmem>>, vector<1x1024xf32>
    %234 = vector.broadcast %233 : vector<1x1024xf32> to vector<8x1024xf32>
    %235 = arith.mulf %232, %234 : vector<8x1024xf32>
    %c952_i32_118 = arith.constant 952 : i32
    %236 = tpu.dynamic_rotate %139 by %c952_i32_118 dim 1 : vector<8x1024xf32>, i32 -> vector<8x1024xf32>
    %c25_119 = arith.constant 25 : index
    %c0_120 = arith.constant 0 : index
    %237 = vector.load %arg3[%c25_119, %c0_120] : memref<27x1024xf32, #tpu.memory_space<vmem>>, vector<1x1024xf32>
    %238 = vector.broadcast %237 : vector<1x1024xf32> to vector<8x1024xf32>
    %239 = arith.mulf %236, %238 : vector<8x1024xf32>
    %c951_i32_121 = arith.constant 951 : i32
    %240 = tpu.dynamic_rotate %139 by %c951_i32_121 dim 1 : vector<8x1024xf32>, i32 -> vector<8x1024xf32>
    %c26_122 = arith.constant 26 : index
    %c0_123 = arith.constant 0 : index
    %241 = vector.load %arg3[%c26_122, %c0_123] : memref<27x1024xf32, #tpu.memory_space<vmem>>, vector<1x1024xf32>
    %242 = vector.broadcast %241 : vector<1x1024xf32> to vector<8x1024xf32>
    %243 = arith.mulf %240, %242 : vector<8x1024xf32>
    %244 = tpu.concatenate %143, %147, %151, %155, %159, %163, %167, %171, %175, %179, %183, %187, %191, %139, %195, %199 in 0 : vector<8x1024xf32>, vector<8x1024xf32>, vector<8x1024xf32>, vector<8x1024xf32>, vector<8x1024xf32>, vector<8x1024xf32>, vector<8x1024xf32>, vector<8x1024xf32>, vector<8x1024xf32>, vector<8x1024xf32>, vector<8x1024xf32>, vector<8x1024xf32>, vector<8x1024xf32>, vector<8x1024xf32>, vector<8x1024xf32>, vector<8x1024xf32> -> vector<128x1024xf32>
    %245 = tpu.concatenate %203, %207, %211, %215, %219, %223, %227, %231, %235, %239, %243 in 0 : vector<8x1024xf32>, vector<8x1024xf32>, vector<8x1024xf32>, vector<8x1024xf32>, vector<8x1024xf32>, vector<8x1024xf32>, vector<8x1024xf32>, vector<8x1024xf32>, vector<8x1024xf32>, vector<8x1024xf32>, vector<8x1024xf32> -> vector<88x1024xf32>
    %246 = tpu.concatenate %244, %245 in 0 : vector<128x1024xf32>, vector<88x1024xf32> -> vector<216x1024xf32>
    %c1_124 = arith.constant 1 : index
    %c0_125 = arith.constant 0 : index
    %c0_126 = arith.constant 0 : index
    %247 = vector.load %arg1[%c1_124, %c0_125, %c0_126] : memref<3x8x216xf32, #tpu.memory_space<vmem>>, vector<1x8x216xf32>
    %248 = vector.shape_cast %247 : vector<1x8x216xf32> to vector<8x216xf32>
    %cst_127 = arith.constant dense<0.000000e+00> : vector<8x1024xf32>
    %249 = tpu.matmul %248, %246, %cst_127 {dimension_numbers = #tpu.dot_dimension_numbers<[1], [0], [0], [1], [0, 0, 1, 1], [], []>} : vector<8x216xf32>, vector<216x1024xf32>, vector<8x1024xf32> -> vector<8x1024xf32>
    %cst_128 = arith.constant dense<0.000000e+00> : vector<8xf32>
    %250 = vector.multi_reduction <add>, %249, %cst_128 [1] : vector<8x1024xf32> to vector<8xf32>
    %251 = vector.shape_cast %250 : vector<8xf32> to vector<8x1xf32>
    %cst_129 = arith.constant 1.024000e+03 : f32
    %252 = vector.broadcast %cst_129 : f32 to vector<8x1xf32>
    %253 = arith.divf %251, %252 : vector<8x1xf32>
    %254 = arith.mulf %249, %249 : vector<8x1024xf32>
    %cst_130 = arith.constant dense<0.000000e+00> : vector<8xf32>
    %255 = vector.multi_reduction <add>, %254, %cst_130 [1] : vector<8x1024xf32> to vector<8xf32>
    %256 = vector.shape_cast %255 : vector<8xf32> to vector<8x1xf32>
    %cst_131 = arith.constant 1.024000e+03 : f32
    %257 = vector.broadcast %cst_131 : f32 to vector<8x1xf32>
    %258 = arith.divf %256, %257 : vector<8x1xf32>
    %259 = arith.mulf %253, %253 : vector<8x1xf32>
    %260 = arith.subf %258, %259 : vector<8x1xf32>
    %cst_132 = arith.constant 0.000000e+00 : f32
    %261 = vector.broadcast %cst_132 : f32 to vector<8x1xf32>
    %262 = arith.maximumf %260, %261 : vector<8x1xf32>
    %c1_133 = arith.constant 1 : index
    %c0_134 = arith.constant 0 : index
    %c0_135 = arith.constant 0 : index
    %c0_136 = arith.constant 0 : index
    %263 = vector.load %arg2[%c1_133, %c0_134, %c0_135, %c0_136] : memref<3x2x8x1xf32, #tpu.memory_space<vmem>>, vector<1x1x8x1xf32>
    %264 = vector.shape_cast %263 : vector<1x1x8x1xf32> to vector<8x1xf32>
    %cst_137 = arith.constant 9.99999974E-6 : f32
    %265 = vector.broadcast %cst_137 : f32 to vector<8x1xf32>
    %266 = arith.addf %262, %265 : vector<8x1xf32>
    %267 = math.rsqrt %266 : vector<8x1xf32>
    %268 = arith.mulf %264, %267 : vector<8x1xf32>
    %c1_138 = arith.constant 1 : index
    %c1_139 = arith.constant 1 : index
    %c0_140 = arith.constant 0 : index
    %c0_141 = arith.constant 0 : index
    %269 = vector.load %arg2[%c1_138, %c1_139, %c0_140, %c0_141] : memref<3x2x8x1xf32, #tpu.memory_space<vmem>>, vector<1x1x8x1xf32>
    %270 = vector.shape_cast %269 : vector<1x1x8x1xf32> to vector<8x1xf32>
    %271 = arith.mulf %253, %268 : vector<8x1xf32>
    %272 = arith.subf %270, %271 : vector<8x1xf32>
    %273 = vector.broadcast %268 : vector<8x1xf32> to vector<8x1024xf32>
    %274 = arith.mulf %249, %273 : vector<8x1024xf32>
    %275 = vector.broadcast %272 : vector<8x1xf32> to vector<8x1024xf32>
    %276 = arith.addf %274, %275 : vector<8x1024xf32>
    %cst_142 = arith.constant 0.000000e+00 : f32
    %277 = vector.broadcast %cst_142 : f32 to vector<8x1024xf32>
    %278 = arith.maximumf %276, %277 : vector<8x1024xf32>
    %c73_i32_143 = arith.constant 73 : i32
    %279 = tpu.dynamic_rotate %278 by %c73_i32_143 dim 1 : vector<8x1024xf32>, i32 -> vector<8x1024xf32>
    %c0_144 = arith.constant 0 : index
    %c0_145 = arith.constant 0 : index
    %280 = vector.load %arg3[%c0_144, %c0_145] : memref<27x1024xf32, #tpu.memory_space<vmem>>, vector<1x1024xf32>
    %281 = vector.broadcast %280 : vector<1x1024xf32> to vector<8x1024xf32>
    %282 = arith.mulf %279, %281 : vector<8x1024xf32>
    %c72_i32_146 = arith.constant 72 : i32
    %283 = tpu.dynamic_rotate %278 by %c72_i32_146 dim 1 : vector<8x1024xf32>, i32 -> vector<8x1024xf32>
    %c1_147 = arith.constant 1 : index
    %c0_148 = arith.constant 0 : index
    %284 = vector.load %arg3[%c1_147, %c0_148] : memref<27x1024xf32, #tpu.memory_space<vmem>>, vector<1x1024xf32>
    %285 = vector.broadcast %284 : vector<1x1024xf32> to vector<8x1024xf32>
    %286 = arith.mulf %283, %285 : vector<8x1024xf32>
    %c71_i32_149 = arith.constant 71 : i32
    %287 = tpu.dynamic_rotate %278 by %c71_i32_149 dim 1 : vector<8x1024xf32>, i32 -> vector<8x1024xf32>
    %c2_150 = arith.constant 2 : index
    %c0_151 = arith.constant 0 : index
    %288 = vector.load %arg3[%c2_150, %c0_151] : memref<27x1024xf32, #tpu.memory_space<vmem>>, vector<1x1024xf32>
    %289 = vector.broadcast %288 : vector<1x1024xf32> to vector<8x1024xf32>
    %290 = arith.mulf %287, %289 : vector<8x1024xf32>
    %c65_i32_152 = arith.constant 65 : i32
    %291 = tpu.dynamic_rotate %278 by %c65_i32_152 dim 1 : vector<8x1024xf32>, i32 -> vector<8x1024xf32>
    %c3_153 = arith.constant 3 : index
    %c0_154 = arith.constant 0 : index
    %292 = vector.load %arg3[%c3_153, %c0_154] : memref<27x1024xf32, #tpu.memory_space<vmem>>, vector<1x1024xf32>
    %293 = vector.broadcast %292 : vector<1x1024xf32> to vector<8x1024xf32>
    %294 = arith.mulf %291, %293 : vector<8x1024xf32>
    %c64_i32_155 = arith.constant 64 : i32
    %295 = tpu.dynamic_rotate %278 by %c64_i32_155 dim 1 : vector<8x1024xf32>, i32 -> vector<8x1024xf32>
    %c4_156 = arith.constant 4 : index
    %c0_157 = arith.constant 0 : index
    %296 = vector.load %arg3[%c4_156, %c0_157] : memref<27x1024xf32, #tpu.memory_space<vmem>>, vector<1x1024xf32>
    %297 = vector.broadcast %296 : vector<1x1024xf32> to vector<8x1024xf32>
    %298 = arith.mulf %295, %297 : vector<8x1024xf32>
    %c63_i32_158 = arith.constant 63 : i32
    %299 = tpu.dynamic_rotate %278 by %c63_i32_158 dim 1 : vector<8x1024xf32>, i32 -> vector<8x1024xf32>
    %c5_159 = arith.constant 5 : index
    %c0_160 = arith.constant 0 : index
    %300 = vector.load %arg3[%c5_159, %c0_160] : memref<27x1024xf32, #tpu.memory_space<vmem>>, vector<1x1024xf32>
    %301 = vector.broadcast %300 : vector<1x1024xf32> to vector<8x1024xf32>
    %302 = arith.mulf %299, %301 : vector<8x1024xf32>
    %c57_i32_161 = arith.constant 57 : i32
    %303 = tpu.dynamic_rotate %278 by %c57_i32_161 dim 1 : vector<8x1024xf32>, i32 -> vector<8x1024xf32>
    %c6_162 = arith.constant 6 : index
    %c0_163 = arith.constant 0 : index
    %304 = vector.load %arg3[%c6_162, %c0_163] : memref<27x1024xf32, #tpu.memory_space<vmem>>, vector<1x1024xf32>
    %305 = vector.broadcast %304 : vector<1x1024xf32> to vector<8x1024xf32>
    %306 = arith.mulf %303, %305 : vector<8x1024xf32>
    %c56_i32_164 = arith.constant 56 : i32
    %307 = tpu.dynamic_rotate %278 by %c56_i32_164 dim 1 : vector<8x1024xf32>, i32 -> vector<8x1024xf32>
    %c7_165 = arith.constant 7 : index
    %c0_166 = arith.constant 0 : index
    %308 = vector.load %arg3[%c7_165, %c0_166] : memref<27x1024xf32, #tpu.memory_space<vmem>>, vector<1x1024xf32>
    %309 = vector.broadcast %308 : vector<1x1024xf32> to vector<8x1024xf32>
    %310 = arith.mulf %307, %309 : vector<8x1024xf32>
    %c55_i32_167 = arith.constant 55 : i32
    %311 = tpu.dynamic_rotate %278 by %c55_i32_167 dim 1 : vector<8x1024xf32>, i32 -> vector<8x1024xf32>
    %c8_168 = arith.constant 8 : index
    %c0_169 = arith.constant 0 : index
    %312 = vector.load %arg3[%c8_168, %c0_169] : memref<27x1024xf32, #tpu.memory_space<vmem>>, vector<1x1024xf32>
    %313 = vector.broadcast %312 : vector<1x1024xf32> to vector<8x1024xf32>
    %314 = arith.mulf %311, %313 : vector<8x1024xf32>
    %c9_i32_170 = arith.constant 9 : i32
    %315 = tpu.dynamic_rotate %278 by %c9_i32_170 dim 1 : vector<8x1024xf32>, i32 -> vector<8x1024xf32>
    %c9_171 = arith.constant 9 : index
    %c0_172 = arith.constant 0 : index
    %316 = vector.load %arg3[%c9_171, %c0_172] : memref<27x1024xf32, #tpu.memory_space<vmem>>, vector<1x1024xf32>
    %317 = vector.broadcast %316 : vector<1x1024xf32> to vector<8x1024xf32>
    %318 = arith.mulf %315, %317 : vector<8x1024xf32>
    %c8_i32_173 = arith.constant 8 : i32
    %319 = tpu.dynamic_rotate %278 by %c8_i32_173 dim 1 : vector<8x1024xf32>, i32 -> vector<8x1024xf32>
    %c10_174 = arith.constant 10 : index
    %c0_175 = arith.constant 0 : index
    %320 = vector.load %arg3[%c10_174, %c0_175] : memref<27x1024xf32, #tpu.memory_space<vmem>>, vector<1x1024xf32>
    %321 = vector.broadcast %320 : vector<1x1024xf32> to vector<8x1024xf32>
    %322 = arith.mulf %319, %321 : vector<8x1024xf32>
    %c7_i32_176 = arith.constant 7 : i32
    %323 = tpu.dynamic_rotate %278 by %c7_i32_176 dim 1 : vector<8x1024xf32>, i32 -> vector<8x1024xf32>
    %c11_177 = arith.constant 11 : index
    %c0_178 = arith.constant 0 : index
    %324 = vector.load %arg3[%c11_177, %c0_178] : memref<27x1024xf32, #tpu.memory_space<vmem>>, vector<1x1024xf32>
    %325 = vector.broadcast %324 : vector<1x1024xf32> to vector<8x1024xf32>
    %326 = arith.mulf %323, %325 : vector<8x1024xf32>
    %c1_i32_179 = arith.constant 1 : i32
    %327 = tpu.dynamic_rotate %278 by %c1_i32_179 dim 1 : vector<8x1024xf32>, i32 -> vector<8x1024xf32>
    %c12_180 = arith.constant 12 : index
    %c0_181 = arith.constant 0 : index
    %328 = vector.load %arg3[%c12_180, %c0_181] : memref<27x1024xf32, #tpu.memory_space<vmem>>, vector<1x1024xf32>
    %329 = vector.broadcast %328 : vector<1x1024xf32> to vector<8x1024xf32>
    %330 = arith.mulf %327, %329 : vector<8x1024xf32>
    %c1023_i32_182 = arith.constant 1023 : i32
    %331 = tpu.dynamic_rotate %278 by %c1023_i32_182 dim 1 : vector<8x1024xf32>, i32 -> vector<8x1024xf32>
    %c14_183 = arith.constant 14 : index
    %c0_184 = arith.constant 0 : index
    %332 = vector.load %arg3[%c14_183, %c0_184] : memref<27x1024xf32, #tpu.memory_space<vmem>>, vector<1x1024xf32>
    %333 = vector.broadcast %332 : vector<1x1024xf32> to vector<8x1024xf32>
    %334 = arith.mulf %331, %333 : vector<8x1024xf32>
    %c1017_i32_185 = arith.constant 1017 : i32
    %335 = tpu.dynamic_rotate %278 by %c1017_i32_185 dim 1 : vector<8x1024xf32>, i32 -> vector<8x1024xf32>
    %c15_186 = arith.constant 15 : index
    %c0_187 = arith.constant 0 : index
    %336 = vector.load %arg3[%c15_186, %c0_187] : memref<27x1024xf32, #tpu.memory_space<vmem>>, vector<1x1024xf32>
    %337 = vector.broadcast %336 : vector<1x1024xf32> to vector<8x1024xf32>
    %338 = arith.mulf %335, %337 : vector<8x1024xf32>
    %c1016_i32_188 = arith.constant 1016 : i32
    %339 = tpu.dynamic_rotate %278 by %c1016_i32_188 dim 1 : vector<8x1024xf32>, i32 -> vector<8x1024xf32>
    %c16_189 = arith.constant 16 : index
    %c0_190 = arith.constant 0 : index
    %340 = vector.load %arg3[%c16_189, %c0_190] : memref<27x1024xf32, #tpu.memory_space<vmem>>, vector<1x1024xf32>
    %341 = vector.broadcast %340 : vector<1x1024xf32> to vector<8x1024xf32>
    %342 = arith.mulf %339, %341 : vector<8x1024xf32>
    %c1015_i32_191 = arith.constant 1015 : i32
    %343 = tpu.dynamic_rotate %278 by %c1015_i32_191 dim 1 : vector<8x1024xf32>, i32 -> vector<8x1024xf32>
    %c17_192 = arith.constant 17 : index
    %c0_193 = arith.constant 0 : index
    %344 = vector.load %arg3[%c17_192, %c0_193] : memref<27x1024xf32, #tpu.memory_space<vmem>>, vector<1x1024xf32>
    %345 = vector.broadcast %344 : vector<1x1024xf32> to vector<8x1024xf32>
    %346 = arith.mulf %343, %345 : vector<8x1024xf32>
    %c969_i32_194 = arith.constant 969 : i32
    %347 = tpu.dynamic_rotate %278 by %c969_i32_194 dim 1 : vector<8x1024xf32>, i32 -> vector<8x1024xf32>
    %c18_195 = arith.constant 18 : index
    %c0_196 = arith.constant 0 : index
    %348 = vector.load %arg3[%c18_195, %c0_196] : memref<27x1024xf32, #tpu.memory_space<vmem>>, vector<1x1024xf32>
    %349 = vector.broadcast %348 : vector<1x1024xf32> to vector<8x1024xf32>
    %350 = arith.mulf %347, %349 : vector<8x1024xf32>
    %c968_i32_197 = arith.constant 968 : i32
    %351 = tpu.dynamic_rotate %278 by %c968_i32_197 dim 1 : vector<8x1024xf32>, i32 -> vector<8x1024xf32>
    %c19_198 = arith.constant 19 : index
    %c0_199 = arith.constant 0 : index
    %352 = vector.load %arg3[%c19_198, %c0_199] : memref<27x1024xf32, #tpu.memory_space<vmem>>, vector<1x1024xf32>
    %353 = vector.broadcast %352 : vector<1x1024xf32> to vector<8x1024xf32>
    %354 = arith.mulf %351, %353 : vector<8x1024xf32>
    %c967_i32_200 = arith.constant 967 : i32
    %355 = tpu.dynamic_rotate %278 by %c967_i32_200 dim 1 : vector<8x1024xf32>, i32 -> vector<8x1024xf32>
    %c20_201 = arith.constant 20 : index
    %c0_202 = arith.constant 0 : index
    %356 = vector.load %arg3[%c20_201, %c0_202] : memref<27x1024xf32, #tpu.memory_space<vmem>>, vector<1x1024xf32>
    %357 = vector.broadcast %356 : vector<1x1024xf32> to vector<8x1024xf32>
    %358 = arith.mulf %355, %357 : vector<8x1024xf32>
    %c961_i32_203 = arith.constant 961 : i32
    %359 = tpu.dynamic_rotate %278 by %c961_i32_203 dim 1 : vector<8x1024xf32>, i32 -> vector<8x1024xf32>
    %c21_204 = arith.constant 21 : index
    %c0_205 = arith.constant 0 : index
    %360 = vector.load %arg3[%c21_204, %c0_205] : memref<27x1024xf32, #tpu.memory_space<vmem>>, vector<1x1024xf32>
    %361 = vector.broadcast %360 : vector<1x1024xf32> to vector<8x1024xf32>
    %362 = arith.mulf %359, %361 : vector<8x1024xf32>
    %c960_i32_206 = arith.constant 960 : i32
    %363 = tpu.dynamic_rotate %278 by %c960_i32_206 dim 1 : vector<8x1024xf32>, i32 -> vector<8x1024xf32>
    %c22_207 = arith.constant 22 : index
    %c0_208 = arith.constant 0 : index
    %364 = vector.load %arg3[%c22_207, %c0_208] : memref<27x1024xf32, #tpu.memory_space<vmem>>, vector<1x1024xf32>
    %365 = vector.broadcast %364 : vector<1x1024xf32> to vector<8x1024xf32>
    %366 = arith.mulf %363, %365 : vector<8x1024xf32>
    %c959_i32_209 = arith.constant 959 : i32
    %367 = tpu.dynamic_rotate %278 by %c959_i32_209 dim 1 : vector<8x1024xf32>, i32 -> vector<8x1024xf32>
    %c23_210 = arith.constant 23 : index
    %c0_211 = arith.constant 0 : index
    %368 = vector.load %arg3[%c23_210, %c0_211] : memref<27x1024xf32, #tpu.memory_space<vmem>>, vector<1x1024xf32>
    %369 = vector.broadcast %368 : vector<1x1024xf32> to vector<8x1024xf32>
    %370 = arith.mulf %367, %369 : vector<8x1024xf32>
    %c953_i32_212 = arith.constant 953 : i32
    %371 = tpu.dynamic_rotate %278 by %c953_i32_212 dim 1 : vector<8x1024xf32>, i32 -> vector<8x1024xf32>
    %c24_213 = arith.constant 24 : index
    %c0_214 = arith.constant 0 : index
    %372 = vector.load %arg3[%c24_213, %c0_214] : memref<27x1024xf32, #tpu.memory_space<vmem>>, vector<1x1024xf32>
    %373 = vector.broadcast %372 : vector<1x1024xf32> to vector<8x1024xf32>
    %374 = arith.mulf %371, %373 : vector<8x1024xf32>
    %c952_i32_215 = arith.constant 952 : i32
    %375 = tpu.dynamic_rotate %278 by %c952_i32_215 dim 1 : vector<8x1024xf32>, i32 -> vector<8x1024xf32>
    %c25_216 = arith.constant 25 : index
    %c0_217 = arith.constant 0 : index
    %376 = vector.load %arg3[%c25_216, %c0_217] : memref<27x1024xf32, #tpu.memory_space<vmem>>, vector<1x1024xf32>
    %377 = vector.broadcast %376 : vector<1x1024xf32> to vector<8x1024xf32>
    %378 = arith.mulf %375, %377 : vector<8x1024xf32>
    %c951_i32_218 = arith.constant 951 : i32
    %379 = tpu.dynamic_rotate %278 by %c951_i32_218 dim 1 : vector<8x1024xf32>, i32 -> vector<8x1024xf32>
    %c26_219 = arith.constant 26 : index
    %c0_220 = arith.constant 0 : index
    %380 = vector.load %arg3[%c26_219, %c0_220] : memref<27x1024xf32, #tpu.memory_space<vmem>>, vector<1x1024xf32>
    %381 = vector.broadcast %380 : vector<1x1024xf32> to vector<8x1024xf32>
    %382 = arith.mulf %379, %381 : vector<8x1024xf32>
    %383 = tpu.concatenate %282, %286, %290, %294, %298, %302, %306, %310, %314, %318, %322, %326, %330, %278, %334, %338 in 0 : vector<8x1024xf32>, vector<8x1024xf32>, vector<8x1024xf32>, vector<8x1024xf32>, vector<8x1024xf32>, vector<8x1024xf32>, vector<8x1024xf32>, vector<8x1024xf32>, vector<8x1024xf32>, vector<8x1024xf32>, vector<8x1024xf32>, vector<8x1024xf32>, vector<8x1024xf32>, vector<8x1024xf32>, vector<8x1024xf32>, vector<8x1024xf32> -> vector<128x1024xf32>
    %384 = tpu.concatenate %342, %346, %350, %354, %358, %362, %366, %370, %374, %378, %382 in 0 : vector<8x1024xf32>, vector<8x1024xf32>, vector<8x1024xf32>, vector<8x1024xf32>, vector<8x1024xf32>, vector<8x1024xf32>, vector<8x1024xf32>, vector<8x1024xf32>, vector<8x1024xf32>, vector<8x1024xf32>, vector<8x1024xf32> -> vector<88x1024xf32>
    %385 = tpu.concatenate %383, %384 in 0 : vector<128x1024xf32>, vector<88x1024xf32> -> vector<216x1024xf32>
    %c2_221 = arith.constant 2 : index
    %c0_222 = arith.constant 0 : index
    %c0_223 = arith.constant 0 : index
    %386 = vector.load %arg1[%c2_221, %c0_222, %c0_223] : memref<3x8x216xf32, #tpu.memory_space<vmem>>, vector<1x8x216xf32>
    %387 = vector.shape_cast %386 : vector<1x8x216xf32> to vector<8x216xf32>
    %cst_224 = arith.constant dense<0.000000e+00> : vector<8x1024xf32>
    %388 = tpu.matmul %387, %385, %cst_224 {dimension_numbers = #tpu.dot_dimension_numbers<[1], [0], [0], [1], [0, 0, 1, 1], [], []>} : vector<8x216xf32>, vector<216x1024xf32>, vector<8x1024xf32> -> vector<8x1024xf32>
    %cst_225 = arith.constant dense<0.000000e+00> : vector<8xf32>
    %389 = vector.multi_reduction <add>, %388, %cst_225 [1] : vector<8x1024xf32> to vector<8xf32>
    %390 = vector.shape_cast %389 : vector<8xf32> to vector<8x1xf32>
    %cst_226 = arith.constant 1.024000e+03 : f32
    %391 = vector.broadcast %cst_226 : f32 to vector<8x1xf32>
    %392 = arith.divf %390, %391 : vector<8x1xf32>
    %393 = arith.mulf %388, %388 : vector<8x1024xf32>
    %cst_227 = arith.constant dense<0.000000e+00> : vector<8xf32>
    %394 = vector.multi_reduction <add>, %393, %cst_227 [1] : vector<8x1024xf32> to vector<8xf32>
    %395 = vector.shape_cast %394 : vector<8xf32> to vector<8x1xf32>
    %cst_228 = arith.constant 1.024000e+03 : f32
    %396 = vector.broadcast %cst_228 : f32 to vector<8x1xf32>
    %397 = arith.divf %395, %396 : vector<8x1xf32>
    %398 = arith.mulf %392, %392 : vector<8x1xf32>
    %399 = arith.subf %397, %398 : vector<8x1xf32>
    %cst_229 = arith.constant 0.000000e+00 : f32
    %400 = vector.broadcast %cst_229 : f32 to vector<8x1xf32>
    %401 = arith.maximumf %399, %400 : vector<8x1xf32>
    %c2_230 = arith.constant 2 : index
    %c0_231 = arith.constant 0 : index
    %c0_232 = arith.constant 0 : index
    %c0_233 = arith.constant 0 : index
    %402 = vector.load %arg2[%c2_230, %c0_231, %c0_232, %c0_233] : memref<3x2x8x1xf32, #tpu.memory_space<vmem>>, vector<1x1x8x1xf32>
    %403 = vector.shape_cast %402 : vector<1x1x8x1xf32> to vector<8x1xf32>
    %cst_234 = arith.constant 9.99999974E-6 : f32
    %404 = vector.broadcast %cst_234 : f32 to vector<8x1xf32>
    %405 = arith.addf %401, %404 : vector<8x1xf32>
    %406 = math.rsqrt %405 : vector<8x1xf32>
    %407 = arith.mulf %403, %406 : vector<8x1xf32>
    %c2_235 = arith.constant 2 : index
    %c1_236 = arith.constant 1 : index
    %c0_237 = arith.constant 0 : index
    %c0_238 = arith.constant 0 : index
    %408 = vector.load %arg2[%c2_235, %c1_236, %c0_237, %c0_238] : memref<3x2x8x1xf32, #tpu.memory_space<vmem>>, vector<1x1x8x1xf32>
    %409 = vector.shape_cast %408 : vector<1x1x8x1xf32> to vector<8x1xf32>
    %410 = arith.mulf %392, %407 : vector<8x1xf32>
    %411 = arith.subf %409, %410 : vector<8x1xf32>
    %412 = vector.broadcast %407 : vector<8x1xf32> to vector<8x1024xf32>
    %413 = arith.mulf %388, %412 : vector<8x1024xf32>
    %414 = vector.broadcast %411 : vector<8x1xf32> to vector<8x1024xf32>
    %415 = arith.addf %413, %414 : vector<8x1024xf32>
    %416 = arith.addf %415, %0 : vector<8x1024xf32>
    %cst_239 = arith.constant 0.000000e+00 : f32
    %417 = vector.broadcast %cst_239 : f32 to vector<8x1024xf32>
    %418 = arith.maximumf %416, %417 : vector<8x1024xf32>
    %c0_240 = arith.constant 0 : index
    %c0_241 = arith.constant 0 : index
    %419 = vector.load %arg4[%c0_240, %c0_241] : memref<8x1024xf32, #tpu.memory_space<vmem>>, vector<8x1024xf32>
    tpu.vector_store %arg4[%c0_240, %c0_241], %418 {strides = array<i32>} : memref<8x1024xf32, #tpu.memory_space<vmem>>, vector<8x1024xf32>,
    return
  }
}

</mosaic_0001>

<bundles_post_ra>
// kernel: resblock_forward.1
= control target key start
LH: loop header
LB: loop body
LE: loop exit
PB: predicated region body
PF: predicated region fallthrough
CT: control target
= control target key end

     0   :  { %s3818_s21 = smov 73   ;;  %s3819_s6 = smov 72   ;;  %s9437_s0 = inlined_call_operand.vmem [shape: f32[8,1024], index: 0, kind: input, shape index: {}]   ;;  %s9438_s3 = inlined_call_operand.vmem [shape: f32[27,1024], index: 3, kind: input, shape index: {}]   ;;  %s9439_s1 = inlined_call_operand.vmem [shape: f32[3,8,216], index: 1, kind: input, shape index: {}]   ;;  %s9440_s2 = inlined_call_operand.vmem [shape: f32[3,2,8,1], index: 2, kind: input, shape index: {}]   ;;  %s9441_s4 = inlined_call_operand.vmem [shape: f32[8,1024], index: 4, kind: output, shape index: {}]  }
   0x1   :  { %v3865_v0 = vld [vmem:[%s9437_s0 + $0x20] sm:$0xff]  ;;  %v3870_v1 = vld [vmem:[%s9437_s0 + $0x10] sm:$0xff]  ;;  %v3886_v3 = vld [vmem:[%s9437_s0 + $0x28] sm:$0xff]  ;;  %s3820_s7 = smov 71   ;;  %s3821_s8 = smov 65  }
   0x2   :  { %v3875_v2 = vld [vmem:[%s9437_s0] sm:$0xff]  ;;  %33 = vrot.lane.b32.xlu2 %v3865_v0, %s3818_s21  ;;  %29 = vrot.lane.b32.xlu1 %v3870_v1, %s3818_s21  ;;  %v3891_v4 = vld [vmem:[%s9437_s0 + $0x18] sm:$0xff]  ;;  %s3822_s9 = smov 64   ;;  %s3823_s10 = smov 63  }
   0x3   :  { %25 = vrot.lane.b32.xlu0 %v3875_v2, %s3818_s21  ;;  %v3896_v5 = vld [vmem:[%s9437_s0 + $0x8] sm:$0xff]  ;;  %v3907_v6 = vld [vmem:[%s9437_s0 + $0x38] sm:$0xff]  ;;  %v3912_v7 = vld [vmem:[%s9437_s0 + $0x30] sm:$0xff]  ;;  %s3824_s11 = smov 57   ;;  %s3825_s12 = smov 56  }
   0x4   :  { %s3826_s13 = smov 55   ;;  %s3827_s14 = smov 9  }
   0x5   :  { %s3828_s15 = smov 121   ;;  %s3829_s16 = smov 127  }
   0x6   :  { %s3830_s17 = smov 1   ;;  %s3831_s18 = smov 7  }
   0x7   :  { %s3832_s19 = smov 8   ;;  %s3833_s20 = smov 119  }
   0x8   :  { %s3834_s26 = smov 120  }
   0xa   :  { %35 = vrot.lane.b32.xlu2 %v3886_v3, %s3818_s21  ;;  %31 = vrot.lane.b32.xlu1 %v3891_v4, %s3818_s21 }
   0xb   :  { %27 = vrot.lane.b32.xlu0 %v3896_v5, %s3818_s21 }
  0x12   :  { %39 = vrot.lane.b32.xlu1 %v3907_v6, %s3818_s21  ;;  %80 = vrot.lane.b32.xlu2 %v3875_v2, %s3819_s6 }
  0x13   :  { %37 = vrot.lane.b32.xlu0 %v3912_v7, %s3818_s21 }
  0x1a   :  { %84 = vrot.lane.b32.xlu1 %v3870_v1, %s3819_s6  ;;  %86 = vrot.lane.b32.xlu2 %v3891_v4, %s3819_s6 }
  0x1b   :  { %82 = vrot.lane.b32.xlu0 %v3896_v5, %s3819_s6 }
  0x22   :  { %90 = vrot.lane.b32.xlu1 %v3886_v3, %s3819_s6  ;;  %92 = vrot.lane.b32.xlu2 %v3912_v7, %s3819_s6 }
  0x23   :  { %88 = vrot.lane.b32.xlu0 %v3865_v0, %s3819_s6 }
  0x2a   :  { %134 = vrot.lane.b32.xlu1 %v3875_v2, %s3820_s7  ;;  %136 = vrot.lane.b32.xlu2 %v3896_v5, %s3820_s7 }
  0x2b   :  { %94 = vrot.lane.b32.xlu0 %v3907_v6, %s3819_s6 }
  0x32   :  { %140 = vrot.lane.b32.xlu1 %v3891_v4, %s3820_s7  ;;  %142 = vrot.lane.b32.xlu2 %v3865_v0, %s3820_s7 }
  0x33   :  { %138 = vrot.lane.b32.xlu0 %v3870_v1, %s3820_s7 }
  0x3a   :  { %146 = vrot.lane.b32.xlu1 %v3912_v7, %s3820_s7  ;;  %148 = vrot.lane.b32.xlu2 %v3907_v6, %s3820_s7 }
  0x3b   :  { %144 = vrot.lane.b32.xlu0 %v3886_v3, %s3820_s7 }
  0x42   :  { %190 = vrot.lane.b32.xlu1 %v3896_v5, %s3821_s8  ;;  %192 = vrot.lane.b32.xlu2 %v3870_v1, %s3821_s8 }
  0x43   :  { %188 = vrot.lane.b32.xlu0 %v3875_v2, %s3821_s8 }
  0x4a   :  { %196 = vrot.lane.b32.xlu1 %v3865_v0, %s3821_s8  ;;  %198 = vrot.lane.b32.xlu2 %v3886_v3, %s3821_s8 }
  0x4b   :  { %194 = vrot.lane.b32.xlu0 %v3891_v4, %s3821_s8 }
  0x52   :  { %202 = vrot.lane.b32.xlu1 %v3907_v6, %s3821_s8  ;;  %242 = vrot.lane.b32.xlu2 %v3875_v2, %s3822_s9 }
  0x53   :  { %200 = vrot.lane.b32.xlu0 %v3912_v7, %s3821_s8 }
  0x5a   :  { %246 = vrot.lane.b32.xlu1 %v3870_v1, %s3822_s9  ;;  %248 = vrot.lane.b32.xlu2 %v3891_v4, %s3822_s9 }
  0x5b   :  { %244 = vrot.lane.b32.xlu0 %v3896_v5, %s3822_s9 }
  0x5c   :  { %v3974_v8 = vpop.permute.xlu2 %33 }
  0x5d   :  { %10123 = vst [vmem:[#allocation2_spill] sm:$0xff] %v3974_v8  ;;  %v3730_v8 = vld [vmem:[%s9438_s3 + $0x86] ss:$8 sm:$0xf] }
  0x62   :  { %252 = vrot.lane.b32.xlu1 %v3886_v3, %s3822_s9  ;;  %254 = vrot.lane.b32.xlu2 %v3912_v7, %s3822_s9 }
  0x63   :  { %250 = vrot.lane.b32.xlu0 %v3865_v0, %s3822_s9 }
  0x64   :  { %v3982_v9 = vpop.permute.xlu2 %35 }
  0x65   :  { %10124 = vst [vmem:[#allocation3_spill] sm:$0xff] %v3982_v9 }
  0x6a   :  { %296 = vrot.lane.b32.xlu1 %v3875_v2, %s3823_s10  ;;  %298 = vrot.lane.b32.xlu2 %v3896_v5, %s3823_s10 }
  0x6b   :  { %256 = vrot.lane.b32.xlu0 %v3907_v6, %s3822_s9 }
  0x6c   :  { %v3990_v10 = vpop.permute.xlu2 %80 }
  0x72   :  { %302 = vrot.lane.b32.xlu1 %v3891_v4, %s3823_s10  ;;  %304 = vrot.lane.b32.xlu2 %v3865_v0, %s3823_s10 }
  0x73   :  { %300 = vrot.lane.b32.xlu0 %v3870_v1, %s3823_s10 }
  0x74   :  { %v3998_v11 = vpop.permute.xlu1 %29  ;;  %v4000_v12 = vpop.permute.xlu2 %86 }
  0x75   :  { %10125 = vst [vmem:[#allocation4_spill] sm:$0xff] %v3998_v11  ;;  %v4002_v13 = vpop.permute.xlu0 %25 }
  0x76   :  { %10126 = vst [vmem:[#allocation5_spill] sm:$0xff] %v4000_v12 }
  0x77   :  { %10127 = vst [vmem:[#allocation6_spill] sm:$0xff] %v4002_v13 }
  0x7a   :  { %308 = vrot.lane.b32.xlu1 %v3912_v7, %s3823_s10  ;;  %310 = vrot.lane.b32.xlu2 %v3907_v6, %s3823_s10 }
  0x7b   :  { %306 = vrot.lane.b32.xlu0 %v3886_v3, %s3823_s10 }
  0x7c   :  { %v4010_v14 = vpop.permute.xlu1 %31  ;;  %v4012_v15 = vpop.permute.xlu2 %92 }
  0x7d   :  { %10128 = vst [vmem:[#allocation7_spill] sm:$0xff] %v4010_v14  ;;  %v4014_v16 = vpop.permute.xlu0 %27 }
  0x7e   :  { %10129 = vst [vmem:[#allocation8_spill] sm:$0xff] %v4012_v15 }
  0x82   :  { %352 = vrot.lane.b32.xlu1 %v3896_v5, %s3824_s11  ;;  %354 = vrot.lane.b32.xlu2 %v3870_v1, %s3824_s11 }
  0x83   :  { %350 = vrot.lane.b32.xlu0 %v3875_v2, %s3824_s11 }
  0x84   :  { %v4022_v17 = vpop.permute.xlu1 %39  ;;  %v4024_v18 = vpop.permute.xlu2 %136 }
  0x85   :  { %10130 = vst [vmem:[#allocation9_spill] sm:$0xff] %v4022_v17  ;;  %v4026_v19 = vpop.permute.xlu0 %37  ;;  %v3737_v17 = vld [vmem:[%s9438_s3 + $0xc1] ss:$8 sm:$0xf0] }
  0x86   :  { %10131 = vst [vmem:[#allocation10_spill] sm:$0xff] %v4026_v19 }
  0x8a   :  { %358 = vrot.lane.b32.xlu1 %v3865_v0, %s3824_s11  ;;  %360 = vrot.lane.b32.xlu2 %v3886_v3, %s3824_s11 }
  0x8b   :  { %356 = vrot.lane.b32.xlu0 %v3891_v4, %s3824_s11 }
  0x8c   :  { %v4034_v20 = vpop.permute.xlu1 %84  ;;  %v4036_v21 = vpop.permute.xlu2 %142 }
  0x8d   :  { %10132 = vst [vmem:[#allocation11_spill] sm:$0xff] %v4034_v20  ;;  %v4038_v22 = vpop.permute.xlu0 %82 }
  0x8e   :  { %10133 = vst [vmem:[#allocation12_spill] sm:$0xff] %v4036_v21  ;;  %v3728_v21 = vld [vmem:[%s9438_s3 + $0x85] ss:$8 sm:$0xf] }
  0x92   :  { %364 = vrot.lane.b32.xlu1 %v3907_v6, %s3824_s11  ;;  %404 = vrot.lane.b32.xlu2 %v3875_v2, %s3825_s12 }
  0x93   :  { %362 = vrot.lane.b32.xlu0 %v3912_v7, %s3824_s11 }
  0x94   :  { %v4046_v23 = vpop.permute.xlu1 %90  ;;  %v4048_v24 = vpop.permute.xlu2 %148 }
  0x95   :  { %10134 = vst [vmem:[#allocation13_spill] sm:$0xff] %v4046_v23  ;;  %v4050_v25 = vpop.permute.xlu0 %88 }
  0x96   :  { %10135 = vst [vmem:[#allocation14_spill] sm:$0xff] %v4048_v24  ;;  %v3735_v24 = vld [vmem:[%s9438_s3 + $0xc0] ss:$8 sm:$0xf0] }
  0x97   :  { %10136 = vst [vmem:[#allocation15_spill] sm:$0xff] %v4050_v25  ;;  %v3726_v25 = vld [vmem:[%s9438_s3 + $0x84] ss:$8 sm:$0xf] }
  0x9a   :  { %408 = vrot.lane.b32.xlu1 %v3870_v1, %s3825_s12  ;;  %410 = vrot.lane.b32.xlu2 %v3891_v4, %s3825_s12 }
  0x9b   :  { %406 = vrot.lane.b32.xlu0 %v3896_v5, %s3825_s12 }
  0x9c   :  { %v4058_v26 = vpop.permute.xlu1 %134  ;;  %v4060_v27 = vpop.permute.xlu2 %192 }
  0x9d   :  { %10137 = vst [vmem:[#allocation16_spill] sm:$0xff] %v4060_v27  ;;  %v4062_v28 = vpop.permute.xlu0 %94 }
  0x9e   :  { %10138 = vst [vmem:[#allocation17_spill] sm:$0xff] %v4062_v28 }
  0xa2   :  { %414 = vrot.lane.b32.xlu1 %v3886_v3, %s3825_s12  ;;  %416 = vrot.lane.b32.xlu2 %v3912_v7, %s3825_s12 }
  0xa3   :  { %412 = vrot.lane.b32.xlu0 %v3865_v0, %s3825_s12 }
  0xa4   :  { %v4070_v29 = vpop.permute.xlu1 %140  ;;  %v4072_v30 = vpop.permute.xlu2 %198 }
  0xa5   :  { %10139 = vst [vmem:[#allocation18_spill] sm:$0xff] %v4070_v29  ;;  %v4074_v31 = vpop.permute.xlu0 %138 }
  0xa6   :  { %10140 = vst [vmem:[#allocation19_spill] sm:$0xff] %v4072_v30 }
  0xa7   :  { %10141 = vst [vmem:[#allocation20_spill] sm:$0xff] %v4074_v31 }
  0xaa   :  { %458 = vrot.lane.b32.xlu1 %v3875_v2, %s3826_s13  ;;  %460 = vrot.lane.b32.xlu2 %v3896_v5, %s3826_s13 }
  0xab   :  { %418 = vrot.lane.b32.xlu0 %v3907_v6, %s3825_s12 }
  0xac   :  { %v4082_v32 = vpop.permute.xlu1 %146  ;;  %v4084_v33 = vpop.permute.xlu2 %242 }
  0xad   :  { %10142 = vst [vmem:[#allocation21_spill] sm:$0xff] %v4082_v32  ;;  %v4086_v34 = vpop.permute.xlu0 %144 }
  0xae   :  { %10143 = vst [vmem:[#allocation22_spill] sm:$0xff] %v4084_v33 }
  0xaf   :  { %10144 = vst [vmem:[#allocation23_spill] sm:$0xff] %v4086_v34 }
  0xb2   :  { %464 = vrot.lane.b32.xlu1 %v3891_v4, %s3826_s13  ;;  %466 = vrot.lane.b32.xlu2 %v3865_v0, %s3826_s13 }
  0xb3   :  { %462 = vrot.lane.b32.xlu0 %v3870_v1, %s3826_s13 }
  0xb4   :  { %v4094_v35 = vpop.permute.xlu1 %190  ;;  %v4096_v36 = vpop.permute.xlu2 %248 }
  0xb5   :  { %10145 = vst [vmem:[#allocation24_spill] sm:$0xff] %v4096_v36  ;;  %v4098_v37 = vpop.permute.xlu0 %188 }
  0xb6   :  { %10146 = vst [vmem:[#allocation25_spill] sm:$0xff] %v4098_v37 }
  0xba   :  { %470 = vrot.lane.b32.xlu1 %v3912_v7, %s3826_s13  ;;  %472 = vrot.lane.b32.xlu2 %v3907_v6, %s3826_s13 }
  0xbb   :  { %468 = vrot.lane.b32.xlu0 %v3886_v3, %s3826_s13 }
  0xbc   :  { %v4106_v38 = vpop.permute.xlu1 %196  ;;  %v4108_v39 = vpop.permute.xlu2 %254 }
  0xbd   :  { %10147 = vst [vmem:[#allocation26_spill] sm:$0xff] %v4106_v38  ;;  %v4110_v40 = vpop.permute.xlu0 %194 }
  0xbe   :  { %10148 = vst [vmem:[#allocation27_spill] sm:$0xff] %v4108_v39  ;;  %v3739_v39 = vld [vmem:[%s9438_s3 + $0xc2] ss:$8 sm:$0xf0] }
  0xbf   :  { %10149 = vst [vmem:[#allocation28_spill] sm:$0xff] %v4110_v40 }
  0xc2   :  { %514 = vrot.lane.b32.xlu1 %v3896_v5, %s3827_s14  ;;  %516 = vrot.lane.b32.xlu2 %v3870_v1, %s3827_s14 }
  0xc3   :  { %512 = vrot.lane.b32.xlu0 %v3875_v2, %s3827_s14 }
  0xc4   :  { %v4118_v41 = vpop.permute.xlu1 %202  ;;  %v4120_v42 = vpop.permute.xlu2 %298 }
  0xc5   :  { %10150 = vst [vmem:[#allocation29_spill] sm:$0xff] %v4118_v41  ;;  %v4122_v43 = vpop.permute.xlu0 %200  ;;  %v3731_v41 = vld [vmem:[%s9438_s3 + $0x86] ss:$8 sm:$0xf0] }
  0xc6   :  { %10151 = vst [vmem:[#allocation30_spill] sm:$0xff] %v4122_v43  ;;  %v41_v43 = vlaneseq }
  0xc8   :  { %v4258_v28 = vand.u32 127, %v41_v43 }
  0xca   :  { %520 = vrot.lane.b32.xlu1 %v3865_v0, %s3827_s14  ;;  %784 = vrot.lane.b32.xlu2 %v3896_v5, %s3828_s15  ;;  %vm474_vm0 = vcmp.lt.s32.totalorder %v4258_v28, 55  ;;  %vm420_vm1 = vcmp.lt.s32.totalorder %v4258_v28, 56  ;;  %vm366_vm2 = vcmp.lt.s32.totalorder %v4258_v28, 57  ;;  %vm312_vm3 = vcmp.lt.s32.totalorder %v4258_v28, 63 }
  0xcb   :  { %518 = vrot.lane.b32.xlu0 %v3891_v4, %s3827_s14  ;;  %vm10068_vm4 = vcmp.lt.s32.totalorder %v4258_v28, 64  ;;  %vm9690_vm5 = vcmp.lt.s32.totalorder %v4258_v28, 65  ;;  %vm150_vm6 = vcmp.lt.s32.totalorder %v4258_v28, 71  ;;  %vm96_vm7 = vcmp.lt.s32.totalorder %v4258_v28, 72 }
  0xcc   :  { %v4130_v44 = vpop.permute.xlu1 %246  ;;  %v4132_v45 = vpop.permute.xlu2 %304  ;;  %vm43_vm8 = vcmp.lt.s32.totalorder %v4258_v28, 73  ;;  %vm798_vm9 = vcmp.lt.s32.totalorder %v4258_v28, 121  ;;  %vm744_vm10 = vcmp.lt.s32.totalorder %v4258_v28, 127  ;;  %vm690_vm11 = vcmp.lt.s32.totalorder %v4258_v28, 1 }
  0xcd   :  { %10152 = vst [vmem:[#allocation31_spill] sm:$0xff] %v4130_v44  ;;  %v4134_v46 = vpop.permute.xlu0 %244  ;;  %vm636_vm12 = vcmp.lt.s32.totalorder %v4258_v28, 7  ;;  %vm9744_vm13 = vcmp.lt.s32.totalorder %v4258_v28, 9  ;;  %vm582_vm14 = vcmp.lt.s32.totalorder %v4258_v28, 8  ;;  %vm9655_vm15 = vcmp.lt.s32.totalorder %v4258_v28, 119 }
  0xce   :  { %10153 = vst [vmem:[#allocation32_spill] sm:$0xff] %v4132_v45  ;;  %v4388_v36 = vsel %vm10068_vm4, %v4084_v33, %v4134_v46  ;;  %v3723_v33 = vld [vmem:[%s9438_s3 + $0x82] ss:$8 sm:$0xf0] }
  0xd2   :  { %730 = vrot.lane.b32.xlu1 %v3896_v5, %s3829_s16  ;;  %732 = vrot.lane.b32.xlu2 %v3870_v1, %s3829_s16 }
  0xd3   :  { %786 = vrot.lane.b32.xlu0 %v3870_v1, %s3828_s15 }
  0xd4   :  { %v4142_v47 = vpop.permute.xlu1 %252  ;;  %v4144_v48 = vpop.permute.xlu2 %310 }
  0xd5   :  { %10154 = vst [vmem:[#allocation33_spill] sm:$0xff] %v4142_v47  ;;  %v4146_v49 = vpop.permute.xlu0 %250  ;;  %v3738_v47 = vld [vmem:[%s9438_s3 + $0xc2] ss:$8 sm:$0xf] }
  0xd6   :  { %10155 = vst [vmem:[#allocation34_spill] sm:$0xff] %v4144_v48  ;;  %v3727_v48 = vld [vmem:[%s9438_s3 + $0x84] ss:$8 sm:$0xf0] }
  0xd7   :  { %10156 = vst [vmem:[#allocation35_spill] sm:$0xff] %v4146_v49 }
  0xda   :  { %676 = vrot.lane.b32.xlu1 %v3896_v5, %s3830_s17  ;;  %782 = vrot.lane.b32.xlu2 %v3875_v2, %s3828_s15 }
  0xdb   :  { %674 = vrot.lane.b32.xlu0 %v3875_v2, %s3830_s17 }
  0xdc   :  { %v4154_v50 = vpop.permute.xlu1 %296  ;;  %v4156_v51 = vpop.permute.xlu2 %354 }
  0xdd   :  { %10157 = vst [vmem:[#allocation36_spill] sm:$0xff] %v4154_v50  ;;  %v4158_v52 = vpop.permute.xlu0 %256 }
  0xde   :  { %10158 = vst [vmem:[#allocation37_spill] sm:$0xff] %v4156_v51 }
  0xdf   :  { %10159 = vst [vmem:[#allocation38_spill] sm:$0xff] %v4158_v52 }
  0xe2   :  { %622 = vrot.lane.b32.xlu1 %v3896_v5, %s3831_s18  ;;  %728 = vrot.lane.b32.xlu2 %v3875_v2, %s3829_s16 }
  0xe3   :  { %620 = vrot.lane.b32.xlu0 %v3875_v2, %s3831_s18 }
  0xe4   :  { %v4166_v53 = vpop.permute.xlu1 %302  ;;  %v4168_v54 = vpop.permute.xlu2 %360 }
  0xe5   :  { %10160 = vst [vmem:[#allocation39_spill] sm:$0xff] %v4166_v53  ;;  %v4170_v55 = vpop.permute.xlu0 %300 }
  0xe6   :  { %10161 = vst [vmem:[#allocation40_spill] sm:$0xff] %v4168_v54 }
  0xe7   :  { %10162 = vst [vmem:[#allocation41_spill] sm:$0xff] %v4170_v55 }
  0xea   :  { %568 = vrot.lane.b32.xlu1 %v3896_v5, %s3832_s19  ;;  %788 = vrot.lane.b32.xlu2 %v3891_v4, %s3828_s15 }
  0xeb   :  { %566 = vrot.lane.b32.xlu0 %v3875_v2, %s3832_s19 }
  0xec   :  { %v4178_v56 = vpop.permute.xlu1 %308  ;;  %v4180_v57 = vpop.permute.xlu2 %404 }
  0xed   :  { %10163 = vst [vmem:[#allocation42_spill] sm:$0xff] %v4178_v56  ;;  %v4182_v58 = vpop.permute.xlu0 %306 }
  0xee   :  { %10164 = vst [vmem:[#allocation43_spill] sm:$0xff] %v4180_v57 }
  0xef   :  { %10165 = vst [vmem:[#allocation44_spill] sm:$0xff] %v4182_v58 }
  0xf2   :  { %734 = vrot.lane.b32.xlu1 %v3891_v4, %s3829_s16  ;;  %790 = vrot.lane.b32.xlu2 %v3865_v0, %s3828_s15 }
  0xf3   :  { %688 = vrot.lane.b32.xlu0 %v3907_v6, %s3830_s17 }
  0xf4   :  { %v4190_v59 = vpop.permute.xlu1 %352  ;;  %v4192_v60 = vpop.permute.xlu2 %410 }
  0xf5   :  { %v4194_v61 = vpop.permute.xlu0 %350 }
  0xf6   :  { %10166 = vst [vmem:[#allocation45_spill] sm:$0xff] %v4194_v61  ;;  %v4341_v40 = vsel %vm366_vm2, %v4194_v61, %v4190_v59 }
  0xfa   :  { %736 = vrot.lane.b32.xlu1 %v3865_v0, %s3829_s16  ;;  %580 = vrot.lane.b32.xlu2 %v3907_v6, %s3832_s19 }
  0xfb   :  { %634 = vrot.lane.b32.xlu0 %v3907_v6, %s3831_s18 }
  0xfc   :  { %v4202_v62 = vpop.permute.xlu1 %358  ;;  %v4204_v63 = vpop.permute.xlu2 %416 }
  0xfd   :  { %10167 = vst [vmem:[#allocation46_spill] sm:$0xff] %v4202_v62  ;;  %v4206_v9 = vpop.permute.xlu0 %356 }
  0xfe   :  { %10168 = vst [vmem:[#allocation47_spill] sm:$0xff] %v4204_v63  ;;  %v3736_v63 = vld [vmem:[%s9438_s3 + $0xc1] ss:$8 sm:$0xf] }
 0x102   :  { %526 = vrot.lane.b32.xlu1 %v3907_v6, %s3827_s14  ;;  %624 = vrot.lane.b32.xlu2 %v3870_v1, %s3831_s18 }
 0x103   :  { %678 = vrot.lane.b32.xlu0 %v3870_v1, %s3830_s17 }
 0x104   :  { %v4214_v19 = vpop.permute.xlu1 %364  ;;  %v4216_v23 = vpop.permute.xlu2 %460 }
 0x105   :  { %10169 = vst [vmem:[#allocation48_spill] sm:$0xff] %v4214_v19  ;;  %v4218_v15 = vpop.permute.xlu0 %362 }
 0x106   :  { %10170 = vst [vmem:[#allocation49_spill] sm:$0xff] %v4218_v15  ;;  %v4250_v15 = vor.u32 %v3739_v39, %v3738_v47  ;;  %v4266_v39 = vor.u32 %v3737_v17, %v3736_v63  ;;  %v3732_v47 = vld [vmem:[%s9438_s3 + $0x87] ss:$8 sm:$0xf] }
 0x107   :  { %v3733_v17 = vld [vmem:[%s9438_s3 + $0x87] ss:$8 sm:$0xf0] }
 0x108   :  { %10176 = vst [vmem:[#allocation55_spill] sm:$0xff] %v4250_v15  ;;  %v4277_v43 = vperm.slane %v4250_v15, 0 }
 0x109   :  { %10177 = vst [vmem:[#allocation56_spill] sm:$0xff] %v4266_v39 }
 0x10a   :  { %570 = vrot.lane.b32.xlu1 %v3870_v1, %s3832_s19  ;;  %626 = vrot.lane.b32.xlu2 %v3891_v4, %s3831_s18  ;;  %10178 = vst [vmem:[#allocation57_spill] sm:$0xff] %v4277_v43 }
 0x10b   :  { %680 = vrot.lane.b32.xlu0 %v3891_v4, %s3830_s17 }
 0x10c   :  { %v4226_v34 = vpop.permute.xlu1 %408  ;;  %v4228_v32 = vpop.permute.xlu2 %466 }
 0x10d   :  { %10171 = vst [vmem:[#allocation50_spill] sm:$0xff] %v4226_v34  ;;  %v4230_v30 = vpop.permute.xlu0 %406 }
 0x10e   :  { %10172 = vst [vmem:[#allocation51_spill] sm:$0xff] %v4228_v32  ;;  %v4320_v29 = vsel %vm420_vm1, %v4180_v57, %v4230_v30 }
 0x112   :  { %892 = vrot.lane.b32.xlu1 %v3896_v5, %s3833_s20  ;;  %894 = vrot.lane.b32.xlu2 %v3870_v1, %s3833_s20 }
 0x113   :  { %572 = vrot.lane.b32.xlu0 %v3891_v4, %s3832_s19 }
 0x114   :  { %v4244_v58 = vpop.permute.xlu1 %414  ;;  %v4246_v56 = vpop.permute.xlu2 %472 }
 0x115   :  { %10173 = vst [vmem:[#allocation52_spill] sm:$0xff] %v4244_v58  ;;  %v4248_v54 = vpop.permute.xlu0 %412  ;;  %v3734_v58 = vld [vmem:[%s9438_s3 + $0xc0] ss:$8 sm:$0xf] }
 0x116   :  { %10174 = vst [vmem:[#allocation53_spill] sm:$0xff] %v4246_v56  ;;  %v4285_v63 = vor.u32 %v3735_v24, %v3734_v58  ;;  %v4307_v58 = vperm.slane %v4266_v39, 0 }
 0x117   :  { %10175 = vst [vmem:[#allocation54_spill] sm:$0xff] %v4248_v54 }
 0x118   :  { %10181 = vst [vmem:[#allocation60_spill] sm:$0xff] %v4307_v58  ;;  %v1168_v38 = vmul.f32 %v4307_v58, %v4320_v29  ;;  %v3724_v58 = vld [vmem:[%s9438_s3 + $0x83] ss:$8 sm:$0xf] }
 0x11a   :  { %840 = vrot.lane.b32.xlu1 %v3870_v1, %s3834_s26  ;;  %792 = vrot.lane.b32.xlu2 %v3886_v3, %s3828_s15 }
 0x11b   :  { %838 = vrot.lane.b32.xlu0 %v3896_v5, %s3834_s26 }
 0x11c   :  { %v4287_v1 = vpop.permute.xlu1 %458  ;;  %v4289_v14 = vpop.permute.xlu2 %516 }
 0x11d   :  { %10179 = vst [vmem:[#allocation58_spill] sm:$0xff] %v4289_v14  ;;  %v4298_v12 = vpop.permute.xlu0 %418  ;;  %v4304_v24 = vsel %vm474_vm0, %v4287_v1, %v4216_v23  ;;  %v4309_v14 = vor.u32 %v3733_v17, %v3732_v47  ;;  %v3729_v47 = vld [vmem:[%s9438_s3 + $0x85] ss:$8 sm:$0xf0]  ;;  %v4330_v17 = vperm.slane %v4285_v63, 0 }
 0x11e   :  { %10180 = vst [vmem:[#allocation59_spill] sm:$0xff] %v4298_v12  ;;  %v1197_v52 = vmul.f32 %v4277_v43, %v4304_v24  ;;  %v4332_v43 = vor.u32 %v3731_v41, %v3730_v8  ;;  %v4349_v8 = vor.u32 %v3729_v47, %v3728_v21  ;;  %v4359_v41 = vsel %vm312_vm3, %v4154_v50, %v4120_v42  ;;  %v3725_v21 = vld [vmem:[%s9438_s3 + $0x83] ss:$8 sm:$0xf0] }
 0x11f   :  { %10182 = vst [vmem:[#allocation61_spill] sm:$0xff] %v4330_v17  ;;  %v4347_v19 = vperm.slane %v4309_v14, 0  ;;  %v1139_v47 = vmul.f32 %v4330_v17, %v4341_v40  ;;  %v4401_v57 = vor.u32 %v3725_v21, %v3724_v58  ;;  %v4420_v58 = vperm.slane %v4266_v39, 1 }
 0x120   :  { %1236 = vmatpush.msra.mxu1 %v1197_v52  ;;  %10184 = vst [vmem:[#allocation63_spill] sm:$0xff] %v4349_v8  ;;  %v4361_v52 = vor.u32 %v3727_v48, %v3726_v25  ;;  %v4375_v25 = vperm.slane %v4332_v43, 0  ;;  %v4378_v48 = vperm.slane %v4250_v15, 1  ;;  %v4399_v12 = vperm.slane %v4349_v8, 0 }
 0x121   :  { %10183 = vst [vmem:[#allocation62_spill] sm:$0xff] %v4347_v19  ;;  %v1110_v49 = vmul.f32 %v4347_v19, %v4359_v41  ;;  %v4417_v19 = vsel %vm9690_vm5, %v4098_v37, %v4094_v35 }
 0x122   :  { %794 = vrot.lane.b32.xlu1 %v3912_v7, %s3828_s15  ;;  %890 = vrot.lane.b32.xlu2 %v3875_v2, %s3833_s20  ;;  %10185 = vst [vmem:[#allocation64_spill] sm:$0xff] %v4361_v52  ;;  %v1081_v21 = vmul.f32 %v4375_v25, %v4388_v36 }
 0x123   :  { %738 = vrot.lane.b32.xlu0 %v3886_v3, %s3829_s16  ;;  %1237 = vmatpush.msra.mxu1 %v1168_v38  ;;  %10186 = vst [vmem:[#allocation65_spill] sm:$0xff] %v4375_v25  ;;  %v3722_v38 = vld [vmem:[%s9438_s3 + $0x82] ss:$8 sm:$0xf]  ;;  %v4442_v25 = vperm.slane %v4285_v63, 1 }
 0x124   :  { %10187 = vst [vmem:[#allocation66_spill] sm:$0xff] %v4378_v48  ;;  %v4380_v50 = vpop.permute.xlu1 %464  ;;  %v4382_v61 = vpop.permute.xlu2 %784  ;;  %v4444_v37 = vor.u32 %v3723_v33, %v3722_v38 }
 0x125   :  { %1238 = vmatpush.msra.mxu1 %v1139_v47  ;;  %v4394_v17 = vpop.permute.xlu0 %462  ;;  %10189 = vst [vmem:[#allocation68_spill] sm:$0xff] %v4399_v12 }
 0x126   :  { %10188 = vst [vmem:[#allocation67_spill] sm:$0xff] %v4394_v17  ;;  %v4411_v47 = vsel %vm474_vm0, %v4216_v23, %v4394_v17  ;;  %v4430_v23 = vsel %vm420_vm1, %v4230_v30, %v4226_v34  ;;  %v4433_v17 = vperm.slane %v4361_v52, 0  ;;  %v1052_v30 = vmul.f32 %v4399_v12, %v4417_v19 }
 0x127   :  { %10190 = vst [vmem:[#allocation69_spill] sm:$0xff] %v4411_v47  ;;  %1239 = vmatpush.msra.mxu1 %v1110_v49  ;;  %v1198_v53 = vmul.f32 %v4378_v48, %v4411_v47  ;;  %v4439_v49 = vsel %vm150_vm6, %v4058_v26, %v4024_v18  ;;  %v4453_v48 = vsel %vm366_vm2, %v4190_v59, %v4156_v51  ;;  %v4456_v47 = vperm.slane %v4401_v57, 0 }
 0x128   :  { %10191 = vst [vmem:[#allocation70_spill] sm:$0xff] %v4420_v58  ;;  %v1169_v33 = vmul.f32 %v4420_v58, %v4430_v23  ;;  %v4471_v59 = vperm.slane %v4309_v14, 1  ;;  %v4474_v38 = vperm.slane %v4444_v37, 0  ;;  %v4484_v12 = vsel %vm312_vm3, %v4120_v42, %v4170_v55  ;;  %v3716_v58 = vld [vmem:[%s9438_s3 + $0x47] ss:$8 sm:$0xf] }
 0x129   :  { %10192 = vst [vmem:[#allocation71_spill] sm:$0xff] %v4430_v23  ;;  %1240 = vmatpush.msra.mxu1 %v1081_v21  ;;  %1276 = vmatpush.msra.mxu3 %v1198_v53  ;;  %v4468_v53 = vsel %vm96_vm7, %v3990_v10, %v4038_v22  ;;  %v1023_v21 = vmul.f32 %v4433_v17, %v4439_v49  ;;  %v3717_v23 = vld [vmem:[%s9438_s3 + $0x47] ss:$8 sm:$0xf0]  ;;  %v4505_v55 = vperm.slane %v4332_v43, 1 }
 0x12a   :  { %10193 = vst [vmem:[#allocation72_spill] sm:$0xff] %v4433_v17  ;;  %836 = vrot.lane.b32.xlu1 %v3875_v2, %s3834_s26  ;;  %682 = vrot.lane.b32.xlu2 %v3865_v0, %s3830_s17  ;;  %v1140_v17 = vmul.f32 %v4442_v25, %v4453_v48  ;;  %v4502_v42 = vsel %vm43_vm8, %v4002_v13, %v4014_v16 }
 0x12b   :  { %10194 = vst [vmem:[#allocation73_spill] sm:$0xff] %v4442_v25  ;;  %740 = vrot.lane.b32.xlu0 %v3912_v7, %s3829_s16  ;;  %1241 = vmatpush.msra.mxu1 %v1052_v30  ;;  %v4515_v25 = vsel %vm10068_vm4, %v4134_v46, %v4130_v44  ;;  %v4522_v13 = vor.u32 %v3717_v23, %v3716_v58 }
 0x12c   :  { %10195 = vst [vmem:[#allocation74_spill] sm:$0xff] %v4453_v48  ;;  %1277 = vmatpush.msra.mxu3 %v1169_v33  ;;  %v4492_v51 = vpop.permute.xlu1 %470  ;;  %v4494_v30 = vpop.permute.xlu2 %732  ;;  %v994_v33 = vmul.f32 %v4456_v47, %v4468_v53  ;;  %v1111_v48 = vmul.f32 %v4471_v59, %v4484_v12  ;;  %v1082_v46 = vmul.f32 %v4505_v55, %v4515_v25 }
 0x12d   :  { %10196 = vst [vmem:[#allocation75_spill] sm:$0xff] %v4456_v47  ;;  %1242 = vmatpush.msra.mxu1 %v1023_v21  ;;  %v4507_v34 = vpop.permute.xlu0 %468  ;;  %v965_v21 = vmul.f32 %v4474_v38, %v4502_v42  ;;  %v4530_v47 = vsel %vm9690_vm5, %v4094_v35, %v4060_v27  ;;  %v4541_v58 = vsel %vm150_vm6, %v4024_v18, %v4074_v31  ;;  %v4552_v23 = vperm.slane %v4522_v13, 0 }
 0x12e   :  { %10197 = vst [vmem:[#allocation76_spill] sm:$0xff] %v4471_v59  ;;  %1278 = vmatpush.msra.mxu3 %v1140_v17  ;;  %v4535_v17 = vperm.slane %v4361_v52, 1  ;;  %v4562_v18 = vsel %vm96_vm7, %v4038_v22, %v4034_v20  ;;  %v3699_v20 = vld [vmem:[%s9438_s3 + $0x5] ss:$8 sm:$0xf0] }
 0x12f   :  { %10198 = vst [vmem:[#allocation77_spill] sm:$0xff] %v4474_v38  ;;  %1243 = vmatpush.msra.mxu1 %v994_v33  ;;  %v4571_v38 = vperm.slane %v4444_v37, 1 }
 0x130   :  { %10199 = vst [vmem:[#allocation78_spill] sm:$0xff] %v4484_v12  ;;  %1279 = vmatpush.msra.mxu3 %v1111_v48  ;;  %v4548_v48 = vperm.slane %v4401_v57, 1 }
 0x131   :  { %10200 = vst [vmem:[#allocation79_spill] sm:$0xff] %v4492_v51  ;;  %v4520_v51 = vperm.slane %v4349_v8, 1  ;;  %1244 = vmatpush.msra.mxu1 %v965_v21 }
 0x132   :  { %10201 = vst [vmem:[#allocation80_spill] sm:$0xff] %v4494_v30  ;;  %1280 = vmatpush.msra.mxu3 %v1082_v46  ;;  %684 = vrot.lane.b32.xlu1 %v3886_v3, %s3830_s17  ;;  %v1024_v46 = vmul.f32 %v4535_v17, %v4541_v58 }
 0x133   :  { %10202 = vst [vmem:[#allocation81_spill] sm:$0xff] %v4505_v55  ;;  %v1053_v35 = vmul.f32 %v4520_v51, %v4530_v47  ;;  %574 = vrot.lane.b32.xlu2 %v3865_v0, %s3832_s19  ;;  %628 = vrot.lane.b32.xlu0 %v3865_v0, %s3831_s18  ;;  %v4579_v55 = vsel %vm43_vm8, %v4014_v16, %v3998_v11  ;;  %v3714_v16 = vld [vmem:[%s9438_s3 + $0x46] ss:$8 sm:$0xf] }
 0x134   :  { %10203 = vst [vmem:[#allocation82_spill] sm:$0xff] %v4507_v34  ;;  %v4564_v33 = vpop.permute.xlu1 %514  ;;  %v4566_v21 = vpop.permute.xlu2 %782  ;;  %v966_v59 = vmul.f32 %v4571_v38, %v4579_v55 }
 0x135   :  { %10204 = vst [vmem:[#allocation83_spill] sm:$0xff] %v4515_v25  ;;  %1281 = vmatpush.msra.mxu3 %v1053_v35  ;;  %v805_v22 = vsel %vm798_vm9, %v4566_v21, %v4382_v61  ;;  %v995_v35 = vmul.f32 %v4548_v48, %v4562_v18 }
 0x136   :  { %10205 = vst [vmem:[#allocation84_spill] sm:$0xff] %v4520_v51  ;;  %v4573_v51 = vpop.permute.xlu0 %512 }
 0x137   :  { %10206 = vst [vmem:[#allocation85_spill] sm:$0xff] %v4530_v47  ;;  %1282 = vmatpush.msra.mxu3 %v1024_v46  ;;  %v3715_v46 = vld [vmem:[%s9438_s3 + $0x46] ss:$8 sm:$0xf0] }
 0x138   :  { %10207 = vst [vmem:[#allocation86_spill] sm:$0xff] %v4535_v17  ;;  %v828_v17 = vmul.f32 %v4552_v23, %v805_v22 }
 0x139   :  { %10208 = vst [vmem:[#allocation87_spill] sm:$0xff] %v4541_v58  ;;  %1283 = vmatpush.msra.mxu3 %v995_v35  ;;  %v4608_v35 = vor.u32 %v3715_v46, %v3714_v16  ;;  %v3712_v46 = vld [vmem:[%s9438_s3 + $0x44] ss:$8 sm:$0xf] }
 0x13a   :  { %10209 = vst [vmem:[#allocation88_spill] sm:$0xff] %v4548_v48  ;;  %1211 = vmatpush.msra.mxu0 %v828_v17  ;;  %576 = vrot.lane.b32.xlu1 %v3886_v3, %s3832_s19  ;;  %v4621_v48 = vperm.slane %v4522_v13, 1 }
 0x13b   :  { %10210 = vst [vmem:[#allocation89_spill] sm:$0xff] %v4552_v23  ;;  %1284 = vmatpush.msra.mxu3 %v966_v59  ;;  %522 = vrot.lane.b32.xlu2 %v3886_v3, %s3827_s14  ;;  %v4642_v47 = vperm.slane %v4608_v35, 1 }
 0x13c   :  { %10211 = vst [vmem:[#allocation90_spill] sm:$0xff] %v4562_v18  ;;  %630 = vrot.lane.b32.xlu0 %v3886_v3, %s3831_s18  ;;  %v4602_v22 = vpop.permute.xlu1 %520  ;;  %v4604_v59 = vpop.permute.xlu2 %728 }
 0x13d   :  { %10212 = vst [vmem:[#allocation91_spill] sm:$0xff] %v4564_v33 }
 0x13e   :  { %10213 = vst [vmem:[#allocation92_spill] sm:$0xff] %v4566_v21  ;;  %v4606_v17 = vpop.permute.xlu0 %518  ;;  %v3713_v21 = vld [vmem:[%s9438_s3 + $0x44] ss:$8 sm:$0xf0] }
 0x13f   :  { %10214 = vst [vmem:[#allocation93_spill] sm:$0xff] %v4571_v38  ;;  %v4614_v38 = vperm.slane %v4608_v35, 0  ;;  %v4648_v34 = vor.u32 %v3713_v21, %v3712_v46 }
 0x140   :  { %10215 = vst [vmem:[#allocation94_spill] sm:$0xff] %v4579_v55 }
 0x141   :  { %10216 = vst [vmem:[#allocation95_spill] sm:$0xff] %v4602_v22 }
 0x142   :  { %10217 = vst [vmem:[#allocation96_spill] sm:$0xff] %v4604_v59  ;;  %896 = vrot.lane.b32.xlu1 %v3891_v4, %s3833_s20 }
 0x143   :  { %10218 = vst [vmem:[#allocation97_spill] sm:$0xff] %v4606_v17  ;;  %742 = vrot.lane.b32.xlu2 %v3907_v6, %s3829_s16 }
 0x144   :  { %10219 = vst [vmem:[#allocation98_spill] sm:$0xff] %v4614_v38  ;;  %796 = vrot.lane.b32.xlu0 %v3907_v6, %s3828_s15  ;;  %v731_v23 = vpop.permute.xlu1 %730  ;;  %v4623_v16 = vpop.permute.xlu2 %788 }
 0x145   :  { %10220 = vst [vmem:[#allocation99_spill] sm:$0xff] %v4621_v48  ;;  %v751_v55 = vsel %vm744_vm10, %v4604_v59, %v731_v23  ;;  %v750_v12 = vsel %vm744_vm10, %v731_v23, %v4494_v30  ;;  %v3705_v59 = vld [vmem:[%s9438_s3 + $0x40] ss:$8 sm:$0xf0] }
 0x146   :  { %v4631_v22 = vpop.permute.xlu0 %786  ;;  %v774_v18 = vmul.f32 %v4614_v38, %v751_v55  ;;  %10222 = vst [vmem:[#allocation101_spill] sm:$0xff] %v4642_v47  ;;  %v775_v55 = vmul.f32 %v4642_v47, %v750_v12 }
 0x147   :  { %10221 = vst [vmem:[#allocation100_spill] sm:$0xff] %v4631_v22  ;;  %v804_v58 = vsel %vm798_vm9, %v4382_v61, %v4631_v22  ;;  %v4660_v61 = vperm.slane %v4648_v34, 1  ;;  %v3698_v22 = vld [vmem:[%s9438_s3 + $0x5] ss:$8 sm:$0xf] }
 0x148   :  { %v829_v25 = vmul.f32 %v4621_v48, %v804_v58  ;;  %1212 = vmatpush.msra.mxu0 %v774_v18  ;;  %v3704_v48 = vld [vmem:[%s9438_s3 + $0x40] ss:$8 sm:$0xf] }
 0x149   :  { %10223 = vst [vmem:[#allocation102_spill] sm:$0xff] %v4660_v61 }
 0x14a   :  { %1251 = vmatpush.msra.mxu2 %v829_v25  ;;  %898 = vrot.lane.b32.xlu1 %v3865_v0, %s3833_s20 }
 0x14b   :  { %1213 = vmatpush.msra.mxu0 %v3875_v2  ;;  %844 = vrot.lane.b32.xlu2 %v3865_v0, %s3834_s26  ;;  %v3710_v2 = vld [vmem:[%s9438_s3 + $0x43] ss:$8 sm:$0xf] }
 0x14c   :  { %842 = vrot.lane.b32.xlu0 %v3891_v4, %s3834_s26  ;;  %1252 = vmatpush.msra.mxu2 %v775_v55  ;;  %v4662_v25 = vpop.permute.xlu1 %676  ;;  %v4664_v58 = vpop.permute.xlu2 %790  ;;  %v3711_v0 = vld [vmem:[%s9438_s3 + $0x43] ss:$8 sm:$0xf0]  ;;  %v3708_v55 = vld [vmem:[%s9438_s3 + $0x42] ss:$8 sm:$0xf] }
 0x14d   :  { %10224 = vst [vmem:[#allocation103_spill] sm:$0xff] %v4662_v25  ;;  %v4680_v18 = vor.u32 %v3711_v0, %v3710_v2  ;;  %v3709_v2 = vld [vmem:[%s9438_s3 + $0x42] ss:$8 sm:$0xf0] }
 0x14e   :  { %v4672_v12 = vpop.permute.xlu0 %674  ;;  %1253 = vmatpush.msra.mxu2 %v3896_v5  ;;  %v4715_v38 = vor.u32 %v3709_v2, %v3708_v55  ;;  %v3703_v55 = vld [vmem:[%s9438_s3 + $0x7] ss:$8 sm:$0xf0] }
 0x14f   :  { %v697_v4 = vsel %vm690_vm11, %v4672_v12, %v4662_v25  ;;  %v4690_v5 = vperm.slane %v4680_v18, 1  ;;  %v3701_v25 = vld [vmem:[%s9438_s3 + $0x6] ss:$8 sm:$0xf0] }
 0x150   :  { %v721_v23 = vmul.f32 %v4660_v61, %v697_v4  ;;  %v3707_v61 = vld [vmem:[%s9438_s3 + $0x41] ss:$8 sm:$0xf0] }
 0x151   :  { %10225 = vst [vmem:[#allocation104_spill] sm:$0xff] %v4690_v5 }
 0x152   :  { %1254 = vmatpush.msra.mxu2 %v721_v23  ;;  %632 = vrot.lane.b32.xlu1 %v3912_v7, %s3831_s18  ;;  %v3706_v23 = vld [vmem:[%s9438_s3 + $0x41] ss:$8 sm:$0xf] }
 0x153   :  { %578 = vrot.lane.b32.xlu2 %v3912_v7, %s3832_s19 }
 0x154   :  { %686 = vrot.lane.b32.xlu0 %v3912_v7, %s3830_s17  ;;  %v4692_v21 = vpop.permute.xlu1 %622  ;;  %v4694_v46 = vpop.permute.xlu2 %580 }
 0x155   :  { %10226 = vst [vmem:[#allocation105_spill] sm:$0xff] %v4692_v21 }
 0x156   :  { %10227 = vst [vmem:[#allocation106_spill] sm:$0xff] %v4694_v46  ;;  %v4702_v0 = vpop.permute.xlu0 %620 }
 0x157   :  { %v643_v4 = vsel %vm636_vm12, %v4702_v0, %v4692_v21  ;;  %v4723_v21 = vor.u32 %v3707_v61, %v3706_v23  ;;  %v4742_v61 = vor.u32 %v3705_v59, %v3704_v48  ;;  %v535_v59 = vsel %vm9744_vm13, %v4573_v51, %v4564_v33  ;;  %v3697_v33 = vld [vmem:[%s9438_s3 + $0x4] ss:$8 sm:$0xf0] }
 0x158   :  { %v667_v47 = vmul.f32 %v4690_v5, %v643_v4  ;;  %v3702_v4 = vld [vmem:[%s9438_s3 + $0x7] ss:$8 sm:$0xf]  ;;  %v3700_v5 = vld [vmem:[%s9438_s3 + $0x6] ss:$8 sm:$0xf] }
 0x159   :  { %v4757_v11 = vperm.slane %v4723_v21, 1  ;;  %v4779_v31 = vor.u32 %v3701_v25, %v3700_v5  ;;  %v3694_v25 = vld [vmem:[%s9438_s3 + $0x3] ss:$8 sm:$0xf] }
 0x15a   :  { %1255 = vmatpush.msra.mxu2 %v667_v47  ;;  %900 = vrot.lane.b32.xlu1 %v3886_v3, %s3833_s20  ;;  %v4738_v47 = vperm.slane %v4715_v38, 1  ;;  %v3695_v5 = vld [vmem:[%s9438_s3 + $0x3] ss:$8 sm:$0xf0] }
 0x15b   :  { %846 = vrot.lane.b32.xlu2 %v3886_v3, %s3834_s26  ;;  %10231 = vst [vmem:[#allocation110_spill] sm:$0xff] %v4757_v11  ;;  %v4759_v3 = vor.u32 %v3703_v55, %v3702_v4  ;;  %v4777_v55 = vperm.slane %v4742_v61, 1  ;;  %v559_v27 = vmul.f32 %v4757_v11, %v535_v59 }
 0x15c   :  { %524 = vrot.lane.b32.xlu0 %v3912_v7, %s3827_s14  ;;  %10228 = vst [vmem:[#allocation107_spill] sm:$0xff] %v4738_v47  ;;  %v4744_v2 = vpop.permute.xlu1 %568  ;;  %v4746_v23 = vpop.permute.xlu2 %624 }
 0x15d   :  { %10229 = vst [vmem:[#allocation108_spill] sm:$0xff] %v4744_v2  ;;  %v4789_v44 = vperm.slane %v4759_v3, 1  ;;  %v505_v59 = vmul.f32 %v4777_v55, %v4304_v24 }
 0x15e   :  { %10230 = vst [vmem:[#allocation109_spill] sm:$0xff] %v4746_v23  ;;  %v4754_v30 = vpop.permute.xlu0 %566 }
 0x15f   :  { %v589_v48 = vsel %vm582_vm14, %v4754_v30, %v4744_v2  ;;  %10232 = vst [vmem:[#allocation111_spill] sm:$0xff] %v4777_v55  ;;  %v3696_v2 = vld [vmem:[%s9438_s3 + $0x4] ss:$8 sm:$0xf]  ;;  %v4830_v55 = vor.u32 %v3695_v5, %v3694_v25 }
 0x160   :  { %v613_v4 = vmul.f32 %v4738_v47, %v589_v48  ;;  %10233 = vst [vmem:[#allocation112_spill] sm:$0xff] %v4779_v31  ;;  %v4791_v48 = vor.u32 %v3699_v20, %v3698_v22  ;;  %v4806_v20 = vperm.slane %v4648_v34, 0  ;;  %v4809_v22 = vperm.slane %v4779_v31, 1  ;;  %v3692_v47 = vld [vmem:[%s9438_s3 + $0x2] ss:$8 sm:$0xf] }
 0x161   :  { %10234 = vst [vmem:[#allocation113_spill] sm:$0xff] %v4789_v44 }
 0x162   :  { %1256 = vmatpush.msra.mxu2 %v613_v4  ;;  %10235 = vst [vmem:[#allocation114_spill] sm:$0xff] %v4791_v48  ;;  %904 = vrot.lane.b32.xlu1 %v3907_v6, %s3833_s20  ;;  %v4811_v4 = vor.u32 %v3697_v33, %v3696_v2  ;;  %v451_v33 = vmul.f32 %v4789_v44, %v4320_v29  ;;  %v4828_v2 = vperm.slane %v4791_v48, 1  ;;  %v3691_v29 = vld [vmem:[%s9438_s3 + $0x1] ss:$8 sm:$0xf0] }
 0x163   :  { %10236 = vst [vmem:[#allocation115_spill] sm:$0xff] %v4806_v20  ;;  %848 = vrot.lane.b32.xlu2 %v3912_v7, %s3834_s26  ;;  %v397_v25 = vmul.f32 %v4809_v22, %v4341_v40  ;;  %v53_v40 = vld [vmem:[%s9438_s3] ss:$8 sm:$0xf0] }
 0x164   :  { %902 = vrot.lane.b32.xlu0 %v3912_v7, %s3833_s20  ;;  %1257 = vmatpush.msra.mxu2 %v559_v27  ;;  %10237 = vst [vmem:[#allocation116_spill] sm:$0xff] %v4809_v22  ;;  %v4813_v11 = vpop.permute.xlu1 %734  ;;  %v3693_v27 = vld [vmem:[%s9438_s3 + $0x2] ss:$8 sm:$0xf0]  ;;  %v4832_v17 = vpop.permute.xlu2 %626  ;;  %v4848_v5 = vperm.slane %v4811_v4, 1 }
 0x165   :  { %10238 = vst [vmem:[#allocation117_spill] sm:$0xff] %v4811_v4  ;;  %v3690_v7 = vld [vmem:[%s9438_s3 + $0x1] ss:$8 sm:$0xf]  ;;  %v4850_v44 = vor.u32 %v3693_v27, %v3692_v47  ;;  %v4870_v47 = vperm.slane %v4680_v18, 0 }
 0x166   :  { %1258 = vmatpush.msra.mxu2 %v505_v59  ;;  %v4823_v24 = vpop.permute.xlu0 %688  ;;  %10240 = vst [vmem:[#allocation119_spill] sm:$0xff] %v4828_v2 }
 0x167   :  { %10239 = vst [vmem:[#allocation118_spill] sm:$0xff] %v4823_v24  ;;  %v698_v23 = vsel %vm690_vm11, %v4823_v24, %v4672_v12  ;;  %v343_v12 = vmul.f32 %v4828_v2, %v4359_v41  ;;  %v4855_v24 = vperm.slane %v4830_v55, 1  ;;  %v289_v41 = vmul.f32 %v4848_v5, %v4388_v36  ;;  %v10266_v2 = vld [vmem:[#allocation39_spill] sm:$0xff] }
 0x168   :  { %10241 = vst [vmem:[#allocation120_spill] sm:$0xff] %v4830_v55  ;;  %1259 = vmatpush.msra.mxu2 %v451_v33  ;;  %v720_v59 = vmul.f32 %v4806_v20, %v698_v23  ;;  %v52_v23 = vld [vmem:[%s9438_s3] ss:$8 sm:$0xf]  ;;  %v4873_v27 = vperm.slane %v4850_v44, 1  ;;  %v4972_v22 = vsel %vm312_vm3, %v10266_v2, %v4132_v45 }
 0x169   :  { %10242 = vst [vmem:[#allocation121_spill] sm:$0xff] %v4832_v17  ;;  %v4857_v17 = vor.u32 %v3691_v29, %v3690_v7  ;;  %v235_v29 = vmul.f32 %v4855_v24, %v4417_v19  ;;  %v4887_v36 = vor.u32 %v53_v40, %v52_v23  ;;  %v4906_v40 = vperm.slane %v4250_v15, 3  ;;  %v10273_v20 = vld [vmem:[#allocation35_spill] sm:$0xff]  ;;  %v10295_v45 = vld [vmem:[#allocation38_spill] sm:$0xff] }
 0x16a   :  { %10243 = vst [vmem:[#allocation122_spill] sm:$0xff] %v4848_v5  ;;  %1214 = vmatpush.msra.mxu0 %v720_v59  ;;  %1260 = vmatpush.msra.mxu2 %v397_v25  ;;  %v4966_v5 = vperm.slane %v4759_v3, 0 }
 0x16b   :  { %10244 = vst [vmem:[#allocation123_spill] sm:$0xff] %v4855_v24  ;;  %v4885_v59 = vperm.slane %v4857_v17, 1  ;;  %v4901_v24 = vperm.slane %v4887_v36, 1 }
 0x16c   :  { %10245 = vst [vmem:[#allocation124_spill] sm:$0xff] %v4857_v17  ;;  %850 = vrot.lane.b32.xlu0 %v3907_v6, %s3834_s26  ;;  %1261 = vmatpush.msra.mxu2 %v343_v12  ;;  %v4875_v33 = vpop.permute.xlu1 %736  ;;  %v4882_v6 = vperm.slane %v4715_v38, 0  ;;  %v590_v12 = vsel %vm582_vm14, %v4694_v46, %v4754_v30  ;;  %v4903_v23 = vpop.permute.xlu2 %894 }
 0x16d   :  { %10246 = vst [vmem:[#allocation125_spill] sm:$0xff] %v4870_v47  ;;  %v127_v30 = vmul.f32 %v4885_v59, %v4468_v53  ;;  %v4929_v53 = vsel %vm420_vm1, %v4192_v60, %v4248_v54  ;;  %v10303_v54 = vld [vmem:[#allocation25_spill] sm:$0xff] }
 0x16e   :  { %10247 = vst [vmem:[#allocation126_spill] sm:$0xff] %v4873_v27  ;;  %1262 = vmatpush.msra.mxu2 %v289_v41  ;;  %v4877_v7 = vpop.permute.xlu0 %634  ;;  %v181_v41 = vmul.f32 %v4873_v27, %v4439_v49  ;;  %v4915_v49 = vsel %vm474_vm0, %v4380_v50, %v4228_v32  ;;  %v10304_v32 = vld [vmem:[#allocation29_spill] sm:$0xff] }
 0x16f   :  { %10248 = vst [vmem:[#allocation127_spill] sm:$0xff] %v4875_v33  ;;  %v644_v25 = vsel %vm636_vm12, %v4877_v7, %v4702_v0  ;;  %v612_v0 = vmul.f32 %v4882_v6, %v590_v12  ;;  %v73_v12 = vmul.f32 %v4901_v24, %v4502_v42 }
 0x170   :  { %10249 = vst [vmem:[#allocation128_spill] sm:$0xff] %v4877_v7  ;;  %1263 = vmatpush.msra.mxu2 %v235_v29  ;;  %v666_v19 = vmul.f32 %v4870_v47, %v644_v25  ;;  %v4918_v29 = vperm.slane %v4266_v39, 3  ;;  %v4921_v25 = vperm.slane %v4723_v21, 0  ;;  %v4988_v47 = vperm.slane %v4779_v31, 0 }
 0x171   :  { %10250 = vst [vmem:[#allocation129_spill] sm:$0xff] %v4882_v6  ;;  %v10269_v6 = vld [vmem:[#allocation59_spill] sm:$0xff]  ;;  %v5009_v7 = vperm.slane %v4349_v8, 3 }
 0x172   :  { %10251 = vst [vmem:[#allocation130_spill] sm:$0xff] %v4885_v59  ;;  %1215 = vmatpush.msra.mxu0 %v666_v19  ;;  %1264 = vmatpush.msra.mxu2 %v181_v41  ;;  %v1200_v41 = vmul.f32 %v4906_v40, %v4915_v49  ;;  %v4936_v59 = vperm.slane %v4285_v63, 3 }
 0x173   :  { %10252 = vst [vmem:[#allocation131_spill] sm:$0xff] %v4887_v36 }
 0x174   :  { %10253 = vst [vmem:[#allocation132_spill] sm:$0xff] %v4901_v24  ;;  %1216 = vmatpush.msra.mxu0 %v612_v0  ;;  %1265 = vmatpush.msra.mxu2 %v127_v30  ;;  %v4931_v19 = vpop.permute.xlu1 %526  ;;  %v4939_v0 = vperm.slane %v4742_v61, 0  ;;  %v4951_v24 = vsel %vm366_vm2, %v4206_v9, %v4202_v62  ;;  %v5002_v46 = vpop.permute.xlu2 %792  ;;  %v5065_v62 = vperm.slane %v4401_v57, 3 }
 0x175   :  { %10254 = vst [vmem:[#allocation133_spill] sm:$0xff] %v4906_v40  ;;  %v536_v42 = vsel %vm9744_vm13, %v4931_v19, %v4573_v51  ;;  %v4957_v40 = vsel %vm474_vm0, %v4246_v56, %v4287_v1  ;;  %v4963_v51 = vperm.slane %v4309_v14, 3  ;;  %v10268_v1 = vld [vmem:[#allocation43_spill] sm:$0xff]  ;;  %v10282_v56 = vld [vmem:[#allocation26_spill] sm:$0xff] }
 0x176   :  { %10255 = vst [vmem:[#allocation134_spill] sm:$0xff] %v4915_v49  ;;  %1266 = vmatpush.msra.mxu2 %v73_v12  ;;  %v4941_v30 = vpop.permute.xlu0 %678  ;;  %v1171_v12 = vmul.f32 %v4918_v29, %v4929_v53  ;;  %v558_v27 = vmul.f32 %v4921_v25, %v536_v42  ;;  %v1142_v42 = vmul.f32 %v4936_v59, %v4951_v24 }
 0x177   :  { %10256 = vst [vmem:[#allocation135_spill] sm:$0xff] %v4918_v29  ;;  %v504_v29 = vmul.f32 %v4939_v0, %v4957_v40 }
 0x178   :  { %10257 = vst [vmem:[#allocation136_spill] sm:$0xff] %v4921_v25  ;;  %1356 = vmatpush.msrb.mxu2 %v1200_v41  ;;  %v4978_v41 = vsel %vm420_vm1, %v10269_v6, %v10268_v1  ;;  %1217 = vmatpush.msra.mxu0 %v558_v27  ;;  %v4985_v25 = vperm.slane %v4332_v43, 3  ;;  %v10277_v27 = vld [vmem:[#allocation48_spill] sm:$0xff]  ;;  %v5012_v6 = vperm.slane %v4791_v48, 0 }
 0x179   :  { %10258 = vst [vmem:[#allocation137_spill] sm:$0xff] %v4929_v53 }
 0x17a   :  { %10259 = vst [vmem:[#allocation138_spill] sm:$0xff] %v4931_v19  ;;  %1357 = vmatpush.msrb.mxu2 %v1171_v12  ;;  %v10274_v19 = vld [vmem:[#allocation24_spill] sm:$0xff]  ;;  %v10276_v12 = vld [vmem:[#allocation45_spill] sm:$0xff]  ;;  %1218 = vmatpush.msra.mxu0 %v504_v29  ;;  %v10286_v29 = vld [vmem:[#allocation34_spill] sm:$0xff] }
 0x17b   :  { %10260 = vst [vmem:[#allocation139_spill] sm:$0xff] %v4936_v59  ;;  %v4994_v1 = vsel %vm10068_vm4, %v10274_v19, %v10273_v20  ;;  %v5000_v59 = vsel %vm366_vm2, %v10277_v27, %v10276_v12  ;;  %v10292_v20 = vld [vmem:[#allocation18_spill] sm:$0xff] }
 0x17c   :  { %10261 = vst [vmem:[#allocation140_spill] sm:$0xff] %v4939_v0  ;;  %1358 = vmatpush.msrb.mxu2 %v1142_v42  ;;  %v1113_v0 = vmul.f32 %v4963_v51, %v4972_v22  ;;  %v10285_v42 = vld [vmem:[#allocation36_spill] sm:$0xff]  ;;  %v5032_v27 = vpop.permute.xlu1 %570  ;;  %v396_v53 = vmul.f32 %v4988_v47, %v5000_v59 }
 0x17d   :  { %10262 = vst [vmem:[#allocation141_spill] sm:$0xff] %v4951_v24  ;;  %v10283_v24 = vld [vmem:[#allocation28_spill] sm:$0xff] }
 0x17e   :  { %10263 = vst [vmem:[#allocation142_spill] sm:$0xff] %v4957_v40  ;;  %v450_v40 = vmul.f32 %v4966_v5, %v4978_v41  ;;  %v5018_v12 = vsel %vm9690_vm5, %v10283_v24, %v10282_v56  ;;  %1359 = vmatpush.msrb.mxu2 %v1113_v0  ;;  %v5044_v49 = vpop.permute.xlu0 %680  ;;  %v10291_v56 = vld [vmem:[#allocation12_spill] sm:$0xff] }
 0x17f   :  { %10264 = vst [vmem:[#allocation143_spill] sm:$0xff] %v4963_v51  ;;  %v5024_v51 = vsel %vm312_vm3, %v10286_v29, %v10285_v42  ;;  %v5039_v42 = vperm.slane %v4361_v52, 3  ;;  %v5042_v29 = vperm.slane %v4811_v4, 0  ;;  %v5050_v0 = vsel %vm150_vm6, %v10292_v20, %v10291_v56 }
 0x180   :  { %10265 = vst [vmem:[#allocation144_spill] sm:$0xff] %v4966_v5  ;;  %v3720_v5 = vld [vmem:[%s9438_s3 + $0x81] ss:$8 sm:$0xf]  ;;  %1219 = vmatpush.msra.mxu0 %v450_v40  ;;  %v1055_v56 = vmul.f32 %v5009_v7, %v5018_v12 }
 0x181   :  { %10267 = vst [vmem:[#allocation39_spill] sm:$0xff] %v4972_v22  ;;  %v1084_v22 = vmul.f32 %v4985_v25, %v4994_v1  ;;  %v10294_v40 = vld [vmem:[#allocation22_spill] sm:$0xff] }
 0x182   :  { %10270 = vst [vmem:[#allocation43_spill] sm:$0xff] %v4978_v41  ;;  %v3721_v41 = vld [vmem:[%s9438_s3 + $0x81] ss:$8 sm:$0xf0]  ;;  %1220 = vmatpush.msra.mxu0 %v396_v53  ;;  %v1026_v53 = vmul.f32 %v5039_v42, %v5050_v0 }
 0x183   :  { %10271 = vst [vmem:[#allocation145_spill] sm:$0xff] %v4985_v25  ;;  %v5056_v25 = vsel %vm10068_vm4, %v10295_v45, %v10294_v40  ;;  %1360 = vmatpush.msrb.mxu2 %v1084_v22  ;;  %v5072_v40 = vperm.slane %v4830_v55, 0  ;;  %v5074_v45 = vor.u32 %v3721_v41, %v3720_v5  ;;  %v5083_v22 = vperm.slane %v4444_v37, 3  ;;  %v10308_v5 = vld [vmem:[#allocation7_spill] sm:$0xff] }
 0x184   :  { %10272 = vst [vmem:[#allocation146_spill] sm:$0xff] %v4988_v47  ;;  %v10297_v47 = vld [vmem:[#allocation15_spill] sm:$0xff] }
 0x185   :  { %10275 = vst [vmem:[#allocation24_spill] sm:$0xff] %v4994_v1  ;;  %1361 = vmatpush.msrb.mxu2 %v1055_v56  ;;  %v10311_v56 = vld [vmem:[#allocation14_spill] sm:$0xff] }
 0x186   :  { %10278 = vst [vmem:[#allocation45_spill] sm:$0xff] %v5000_v59  ;;  %v10298_v59 = vld [vmem:[#allocation5_spill] sm:$0xff] }
 0x187   :  { %10279 = vst [vmem:[#allocation147_spill] sm:$0xff] %v5002_v46  ;;  %v5062_v1 = vsel %vm96_vm7, %v10298_v59, %v10297_v47  ;;  %v342_v46 = vmul.f32 %v5012_v6, %v5024_v51  ;;  %v5080_v47 = vsel %vm9690_vm5, %v10304_v32, %v10303_v54  ;;  %v5096_v54 = vperm.slane %v4850_v44, 0  ;;  %1362 = vmatpush.msrb.mxu2 %v1026_v53 }
 0x188   :  { %10280 = vst [vmem:[#allocation148_spill] sm:$0xff] %v5009_v7  ;;  %v288_v7 = vmul.f32 %v5042_v29, %v5056_v25  ;;  %v5119_v32 = vperm.slane %v5074_v45, 0 }
 0x189   :  { %10281 = vst [vmem:[#allocation149_spill] sm:$0xff] %v5012_v6  ;;  %1221 = vmatpush.msra.mxu0 %v342_v46  ;;  %v10307_v6 = vld [vmem:[#allocation2_spill] sm:$0xff]  ;;  %v5104_v46 = vsel %vm150_vm6, %v10311_v56, %v4058_v26  ;;  %v5122_v26 = vperm.slane %v5074_v45, 1  ;;  %v5125_v56 = vperm.slane %v4887_v36, 0 }
 0x18a   :  { %10284 = vst [vmem:[#allocation28_spill] sm:$0xff] %v5018_v12  ;;  %v5093_v41 = vsel %vm43_vm8, %v10308_v5, %v10307_v6  ;;  %v180_v53 = vmul.f32 %v5096_v54, %v5104_v46 }
 0x18b   :  { %10287 = vst [vmem:[#allocation36_spill] sm:$0xff] %v5024_v51  ;;  %v997_v51 = vmul.f32 %v5065_v62, %v5062_v1  ;;  %1222 = vmatpush.msra.mxu0 %v288_v7  ;;  %v968_v7 = vmul.f32 %v5083_v22, %v5093_v41 }
 0x18c   :  { %10288 = vst [vmem:[#allocation150_spill] sm:$0xff] %v5039_v42  ;;  %v10313_v42 = vld [vmem:[#allocation17_spill] sm:$0xff] }
 0x18d   :  { %10289 = vst [vmem:[#allocation151_spill] sm:$0xff] %v5042_v29  ;;  %v5110_v29 = vsel %vm96_vm7, %v10313_v42, %v3990_v10  ;;  %v5127_v10 = vpop.permute.xlu2 %890  ;;  %1363 = vmatpush.msrb.mxu2 %v997_v51  ;;  %v893_v42 = vpop.permute.xlu1 %892 }
 0x18e   :  { %10290 = vst [vmem:[#allocation152_spill] sm:$0xff] %v5044_v49  ;;  %v5145_v51 = vpop.permute.xlu0 %572 }
 0x18f   :  { %10293 = vst [vmem:[#allocation18_spill] sm:$0xff] %v5050_v0  ;;  %v3718_v0 = vld [vmem:[%s9438_s3 + $0x80] ss:$8 sm:$0xf]  ;;  %1364 = vmatpush.msrb.mxu2 %v968_v7 }
 0x190   :  { %10296 = vst [vmem:[#allocation22_spill] sm:$0xff] %v5056_v25  ;;  %v5113_v25 = vperm.slane %v4857_v17, 0 }
 0x191   :  { %10299 = vst [vmem:[#allocation5_spill] sm:$0xff] %v5062_v1 }
 0x192   :  { %10300 = vst [vmem:[#allocation153_spill] sm:$0xff] %v5065_v62  ;;  %v234_v62 = vmul.f32 %v5072_v40, %v5080_v47 }
 0x193   :  { %10301 = vst [vmem:[#allocation154_spill] sm:$0xff] %v5072_v40  ;;  %v10320_v40 = vld [vmem:[#allocation6_spill] sm:$0xff] }
 0x194   :  { %10302 = vst [vmem:[#allocation155_spill] sm:$0xff] %v5074_v45  ;;  %1223 = vmatpush.msra.mxu0 %v234_v62  ;;  %v3719_v62 = vld [vmem:[%s9438_s3 + $0x80] ss:$8 sm:$0xf0] }
 0x195   :  { %10305 = vst [vmem:[#allocation25_spill] sm:$0xff] %v5080_v47  ;;  %v10321_v47 = vld [vmem:[#allocation9_spill] sm:$0xff] }
 0x196   :  { %10306 = vst [vmem:[#allocation156_spill] sm:$0xff] %v5083_v22  ;;  %v5137_v1 = vsel %vm43_vm8, %v10321_v47, %v10320_v40  ;;  %v126_v22 = vmul.f32 %v5113_v25, %v5110_v29  ;;  %v912_v40 = vsel %vm9655_vm15, %v893_v42, %v4903_v23  ;;  %1224 = vmatpush.msra.mxu0 %v180_v53  ;;  %v5179_v53 = vld [vmem:[%s9439_s1] sm:$0xff] }
 0x197   :  { %10309 = vst [vmem:[#allocation2_spill] sm:$0xff] %v5093_v41  ;;  %v937_v12 = vmul.f32 %v5122_v26, %v912_v40  ;;  %1267 = vmatmul.f32.vlgmr.msra.gmra.mxu2 %v5179_v53  ;;  %v5200_v40 = vpop.permute.xlu0 %838 }
 0x198   :  { %10310 = vst [vmem:[#allocation7_spill] sm:$0xff] %v5096_v54  ;;  %v913_v54 = vsel %vm9655_vm15, %v5127_v10, %v893_v42  ;;  %1225 = vmatpush.msra.mxu0 %v126_v22  ;;  %v72_v42 = vmul.f32 %v5125_v56, %v5137_v1  ;;  %vm9935_vm15 = vcmp.lt.s32.totalorder %v4258_v28, 120  ;;  %v5193_v22 = vperm.slane %v4250_v15, 2 }
 0x199   :  { %10312 = vst [vmem:[#allocation157_spill] sm:$0xff] %v5104_v46  ;;  %v5156_v46 = vperm.slane %v4522_v13, 3  ;;  %v936_v47 = vmul.f32 %v5119_v32, %v913_v54  ;;  %v748_v54 = vsel %vm744_vm10, %v4813_v11, %v4875_v33  ;;  %1285 = vmatpush.msra.mxu3 %v937_v12  ;;  %v5188_v12 = vperm.slane %v4648_v34, 3 }
 0x19a   :  { %10314 = vst [vmem:[#allocation158_spill] sm:$0xff] %v5110_v29  ;;  %v5167_v29 = vor.u32 %v3719_v62, %v3718_v0  ;;  %1226 = vmatpush.msra.mxu0 %v72_v42  ;;  %v695_v62 = vsel %vm690_vm11, %v4941_v30, %v5044_v49  ;;  %v10330_v42 = vld [vmem:[#allocation67_spill] sm:$0xff]  ;;  %v5230_v49 = vperm.slane %v4715_v38, 3 }
 0x19b   :  { %10315 = vst [vmem:[#allocation159_spill] sm:$0xff] %v5113_v25  ;;  %v802_v25 = vsel %vm798_vm9, %v4623_v16, %v4664_v58  ;;  %1245 = vmatpush.msra.mxu1 %v936_v47  ;;  %1227 = vmatmul.f32.vlgmr.msra.gmra.mxu0 %v5179_v53 }
 0x19c   :  { %10316 = vst [vmem:[#allocation160_spill] sm:$0xff] %v5119_v32  ;;  %v831_v7 = vmul.f32 %v5156_v46, %v802_v25  ;;  %v5185_v0 = vperm.slane %v5167_v29, 1  ;;  %v5190_v25 = vpop.permute.xlu1 %840 }
 0x19d   :  { %10317 = vst [vmem:[#allocation161_spill] sm:$0xff] %v5122_v26  ;;  %v858_v32 = vsel %vm9935_vm15, %v5200_v40, %v5190_v25  ;;  %v10334_v26 = vld [vmem:[#allocation109_spill] sm:$0xff] }
 0x19e   :  { %10318 = vst [vmem:[#allocation162_spill] sm:$0xff] %v5125_v56  ;;  %1331 = vmatpush.msrb.mxu0 %v831_v7  ;;  %v5207_v7 = vperm.slane %v4680_v18, 3  ;;  %v723_v56 = vmul.f32 %v5188_v12, %v695_v62 }
 0x19f   :  { %10319 = vst [vmem:[#allocation163_spill] sm:$0xff] %v5127_v10  ;;  %v5165_v10 = vperm.slane %v4608_v35, 3 }
 0x1a0   :  { %10322 = vst [vmem:[#allocation6_spill] sm:$0xff] %v5137_v1  ;;  %v10335_v1 = vld [vmem:[#allocation50_spill] sm:$0xff] }
 0x1a1   :  { %10323 = vst [vmem:[#allocation164_spill] sm:$0xff] %v5145_v51  ;;  %v777_v47 = vmul.f32 %v5165_v10, %v748_v54  ;;  %v479_v54 = vsel %vm474_vm0, %v10330_v42, %v4380_v50  ;;  %v3802_v50 = vld [vmem:[%s9437_s0 + $0x18] sm:$0xff]  ;;  %v883_v42 = vmul.f32 %v5185_v0, %v858_v32  ;;  %v425_v41 = vsel %vm420_vm1, %v10335_v1, %v4192_v60 }
 0x1a2   :  { %10324 = vst [vmem:[#allocation165_spill] sm:$0xff] %v5156_v46  ;;  %v10333_v46 = vld [vmem:[#allocation121_spill] sm:$0xff]  ;;  %v1199_v33 = vmul.f32 %v5193_v22, %v479_v54  ;;  %v587_v32 = vsel %vm582_vm14, %v5032_v27, %v5145_v51 }
 0x1a3   :  { %10325 = vst [vmem:[#allocation166_spill] sm:$0xff] %v5165_v10  ;;  %1332 = vmatpush.msrb.mxu0 %v777_v47  ;;  %v5214_v10 = vperm.slane %v4266_v39, 2  ;;  %v641_v47 = vsel %vm636_vm12, %v10334_v26, %v10333_v46  ;;  %v5234_v46 = vperm.slane %v4285_v63, 2  ;;  %1286 = vmatpush.msra.mxu3 %v883_v42  ;;  %v10339_v60 = vld [vmem:[#allocation37_spill] sm:$0xff] }
 0x1a4   :  { %10326 = vst [vmem:[#allocation167_spill] sm:$0xff] %v5179_v53  ;;  %v669_v62 = vmul.f32 %v5207_v7, %v641_v47  ;;  %v371_v1 = vsel %vm366_vm2, %v10339_v60, %v4206_v9  ;;  %v10342_v51 = vld [vmem:[#allocation97_spill] sm:$0xff]  ;;  %v615_v47 = vmul.f32 %v5230_v49, %v587_v32  ;;  %v5266_v60 = vpop.permute.xlu1 %794 }
 0x1a5   :  { %10327 = vst [vmem:[#allocation168_spill] sm:$0xff] %v5185_v0  ;;  %1333 = vmatpush.msrb.mxu0 %v3802_v50  ;;  %v5240_v50 = vpop.permute.xlu2 %682  ;;  %1316 = vmatpush.msrb.mxu3 %v1199_v33  ;;  %v1170_v0 = vmul.f32 %v5214_v10, %v425_v41  ;;  %v10344_v42 = vld [vmem:[#allocation41_spill] sm:$0xff]  ;;  %v5264_v33 = vperm.slane %v4742_v61, 3 }
 0x1a6   :  { %10328 = vst [vmem:[#allocation169_spill] sm:$0xff] %v5188_v12  ;;  %v5248_v12 = vperm.slane %v4723_v21, 3  ;;  %v317_v9 = vsel %vm312_vm3, %v10344_v42, %v10266_v2  ;;  %v5280_v42 = vperm.slane %v4759_v3, 3 }
 0x1a7   :  { %10329 = vst [vmem:[#allocation170_spill] sm:$0xff] %v5193_v22  ;;  %1334 = vmatpush.msrb.mxu0 %v723_v56  ;;  %v5252_v22 = vperm.slane %v4309_v14, 2  ;;  %1317 = vmatpush.msrb.mxu3 %v1170_v0 }
 0x1a8   :  { %10331 = vst [vmem:[#allocation67_spill] sm:$0xff] %v5207_v7  ;;  %v1141_v7 = vmul.f32 %v5234_v46, %v371_v1 }
 0x1a9   :  { %10332 = vst [vmem:[#allocation171_spill] sm:$0xff] %v5214_v10  ;;  %1335 = vmatpush.msrb.mxu0 %v669_v62  ;;  %v5270_v10 = vperm.slane %v4332_v43, 2  ;;  %v10347_v62 = vld [vmem:[#allocation31_spill] sm:$0xff]  ;;  %v1112_v0 = vmul.f32 %v5252_v22, %v317_v9 }
 0x1aa   :  { %10336 = vst [vmem:[#allocation109_spill] sm:$0xff] %v5230_v49  ;;  %v263_v2 = vsel %vm10068_vm4, %v10347_v62, %v10274_v19  ;;  %1318 = vmatpush.msrb.mxu3 %v1141_v7  ;;  %v5284_v49 = vperm.slane %v4349_v8, 2  ;;  %v5296_v7 = vperm.slane %v4361_v52, 2  ;;  %v453_v62 = vmul.f32 %v5280_v42, %v425_v41  ;;  %v5316_v41 = vld [vmem:[%s9439_s1 + $0x8] sm:$0xff] }
 0x1ab   :  { %10337 = vst [vmem:[#allocation50_spill] sm:$0xff] %v5234_v46  ;;  %1336 = vmatpush.msrb.mxu0 %v615_v47  ;;  %v507_v46 = vmul.f32 %v5264_v33, %v479_v54  ;;  %v10350_v47 = vld [vmem:[#allocation16_spill] sm:$0xff]  ;;  %v1083_v19 = vmul.f32 %v5270_v10, %v263_v2 }
 0x1ac   :  { %10338 = vst [vmem:[#allocation172_spill] sm:$0xff] %v5240_v50  ;;  %v10343_v50 = vld [vmem:[#allocation58_spill] sm:$0xff]  ;;  %1319 = vmatpush.msrb.mxu3 %v1112_v0  ;;  %v5308_v0 = vperm.slane %v4401_v57, 2 }
 0x1ad   :  { %10340 = vst [vmem:[#allocation37_spill] sm:$0xff] %v5248_v12  ;;  %v533_v56 = vsel %vm9744_vm13, %v10343_v50, %v10342_v51  ;;  %v5272_v51 = vpop.permute.xlu0 %738 }
 0x1ae   :  { %10341 = vst [vmem:[#allocation173_spill] sm:$0xff] %v5252_v22  ;;  %v561_v32 = vmul.f32 %v5248_v12, %v533_v56  ;;  %v209_v56 = vsel %vm9690_vm5, %v10350_v47, %v10283_v24  ;;  %v5292_v12 = vperm.slane %v4779_v31, 3  ;;  %1320 = vmatpush.msrb.mxu3 %v1083_v19  ;;  %v5311_v47 = vperm.slane %v5167_v29, 0  ;;  %v10359_v19 = vld [vmem:[#allocation11_spill] sm:$0xff] }
 0x1af   :  { %10345 = vst [vmem:[#allocation58_spill] sm:$0xff] %v5264_v33  ;;  %v5304_v33 = vperm.slane %v4791_v48, 3  ;;  %v1054_v24 = vmul.f32 %v5284_v49, %v209_v56  ;;  %vm9934_vm5 = vcmask 719872   ;;  %v5345_v22 = vperm.slane %v4444_v37, 2 }
 0x1b0   :  { %10346 = vst [vmem:[#allocation41_spill] sm:$0xff] %v5270_v10  ;;  %1337 = vmatpush.msrb.mxu0 %v561_v32  ;;  %v10353_v32 = vld [vmem:[#allocation20_spill] sm:$0xff]  ;;  %3741 = vmatmul.msk.f32.vlgmr.msra.gmra.mxu3 %vm9934_vm5, %v5316_v41  ;;  %v5333_v10 = vpop.permute.xlu1 %836 }
 0x1b1   :  { %10348 = vst [vmem:[#allocation31_spill] sm:$0xff] %v5280_v42  ;;  %v155_v54 = vsel %vm150_vm6, %v10353_v32, %v10292_v20  ;;  %v399_v20 = vmul.f32 %v5292_v12, %v371_v1  ;;  %v101_v32 = vsel %vm96_vm7, %v10359_v19, %v10298_v59  ;;  %v5326_v42 = vperm.slane %v4522_v13, 2  ;;  %1321 = vmatpush.msrb.mxu3 %v1054_v24  ;;  %v10363_v1 = vld [vmem:[#allocation100_spill] sm:$0xff] }
 0x1b2   :  { %10349 = vst [vmem:[#allocation174_spill] sm:$0xff] %v5284_v49  ;;  %1338 = vmatpush.msrb.mxu0 %v507_v46  ;;  %v5318_v46 = vpop.permute.xlu2 %574  ;;  %v5329_v49 = vperm.slane %v4811_v4, 3  ;;  %v10364_v59 = vld [vmem:[#allocation4_spill] sm:$0xff]  ;;  %v345_v24 = vmul.f32 %v5304_v33, %v317_v9 }
 0x1b3   :  { %10351 = vst [vmem:[#allocation16_spill] sm:$0xff] %v5292_v12  ;;  %v803_v12 = vsel %vm798_vm9, %v10363_v1, %v4623_v16  ;;  %v48_v19 = vsel %vm43_vm8, %v10364_v59, %v10308_v5  ;;  %v5355_v16 = vperm.slane %v4608_v35, 2  ;;  %v5358_v1 = vperm.slane %v4830_v55, 3 }
 0x1b4   :  { %10352 = vst [vmem:[#allocation175_spill] sm:$0xff] %v5296_v7  ;;  %1339 = vmatpush.msrb.mxu0 %v453_v62  ;;  %v1025_v62 = vmul.f32 %v5296_v7, %v155_v54  ;;  %v859_v7 = vsel %vm9935_vm15, %v5333_v10, %v5200_v40  ;;  %v996_v5 = vmul.f32 %v5308_v0, %v101_v32 }
 0x1b5   :  { %10354 = vst [vmem:[#allocation20_spill] sm:$0xff] %v5304_v33  ;;  %v882_v59 = vmul.f32 %v5311_v47, %v859_v7  ;;  %v830_v33 = vmul.f32 %v5326_v42, %v803_v12  ;;  %v291_v40 = vmul.f32 %v5329_v49, %v263_v2  ;;  %v5378_v12 = vperm.slane %v4857_v17, 3  ;;  %v10372_v2 = vld [vmem:[#allocation103_spill] sm:$0xff] }
 0x1b6   :  { %10355 = vst [vmem:[#allocation176_spill] sm:$0xff] %v5308_v0  ;;  %1340 = vmatpush.msrb.mxu0 %v399_v20  ;;  %1322 = vmatpush.msrb.mxu3 %v1025_v62  ;;  %v10368_v20 = vld [vmem:[#allocation80_spill] sm:$0xff]  ;;  %v967_v62 = vmul.f32 %v5345_v22, %v48_v19 }
 0x1b7   :  { %10356 = vst [vmem:[#allocation177_spill] sm:$0xff] %v5311_v47  ;;  %v749_v9 = vsel %vm744_vm10, %v10368_v20, %v4813_v11  ;;  %1246 = vmatpush.msra.mxu1 %v882_v59  ;;  %v237_v47 = vmul.f32 %v5358_v1, %v209_v56  ;;  %v5375_v11 = vperm.slane %v4648_v34, 2  ;;  %v5388_v56 = vperm.slane %v4680_v18, 2 }
 0x1b8   :  { %10357 = vst [vmem:[#allocation178_spill] sm:$0xff] %v5316_v41  ;;  %1341 = vmatpush.msrb.mxu0 %v345_v24  ;;  %1323 = vmatpush.msrb.mxu3 %v996_v5  ;;  %v776_v7 = vmul.f32 %v5355_v16, %v749_v9  ;;  %v696_v24 = vsel %vm690_vm11, %v10372_v2, %v4941_v30  ;;  %v5391_v5 = vperm.slane %v4887_v36, 3  ;;  %v5394_v59 = vperm.slane %v4250_v15, 5  ;;  %v5396_v20 = vpop.permute.xlu1 %684  ;;  %v10376_v30 = vld [vmem:[#allocation105_spill] sm:$0xff]  ;;  %v3803_v2 = vld [vmem:[%s9437_s0 + $0x10] sm:$0xff] }
 0x1b9   :  { %10358 = vst [vmem:[#allocation179_spill] sm:$0xff] %v5318_v46  ;;  %v5347_v46 = vpop.permute.xlu0 %740  ;;  %1291 = vmatpush.msrb.mxu1 %v830_v33  ;;  %v642_v9 = vsel %vm636_vm12, %v10376_v30, %v10334_v26  ;;  %v129_v26 = vmul.f32 %v5378_v12, %v101_v32  ;;  %v5418_v30 = vperm.slane %v4715_v38, 2 }
 0x1ba   :  { %10360 = vst [vmem:[#allocation11_spill] sm:$0xff] %v5326_v42  ;;  %1342 = vmatpush.msrb.mxu0 %v291_v40  ;;  %1324 = vmatpush.msrb.mxu3 %v967_v62  ;;  %v10377_v40 = vld [vmem:[#allocation79_spill] sm:$0xff]  ;;  %v5408_v62 = vpop.permute.xlu2 %522  ;;  %v668_v32 = vmul.f32 %v5388_v56, %v642_v9 }
 0x1bb   :  { %10361 = vst [vmem:[#allocation180_spill] sm:$0xff] %v5329_v49  ;;  %3740 = vmatmul.msk.f32.vlgmr.msra.gmra.mxu1 %vm9934_vm5, %v5316_v41  ;;  %v5425_v49 = vperm.slane %v4266_v39, 5  ;;  %v10383_v42 = vld [vmem:[#allocation47_spill] sm:$0xff] }
 0x1bc   :  { %10362 = vst [vmem:[#allocation181_spill] sm:$0xff] %v5333_v10  ;;  %v5369_v10 = vperm.slane %v4850_v44, 3  ;;  %1292 = vmatpush.msrb.mxu1 %v776_v7  ;;  %1343 = vmatpush.msrb.mxu0 %v237_v47  ;;  %v10378_v47 = vld [vmem:[#allocation82_spill] sm:$0xff] }
 0x1bd   :  { %10365 = vst [vmem:[#allocation100_spill] sm:$0xff] %v5345_v22  ;;  %v10384_v22 = vld [vmem:[#allocation52_spill] sm:$0xff] }
 0x1be   :  { %10366 = vst [vmem:[#allocation4_spill] sm:$0xff] %v5355_v16  ;;  %v183_v33 = vmul.f32 %v5369_v10, %v155_v54  ;;  %v5406_v54 = vsel %vm474_vm0, %v10378_v47, %v10377_v40  ;;  %1293 = vmatpush.msrb.mxu1 %v3803_v2  ;;  %v5436_v2 = vperm.slane %v4723_v21, 2  ;;  %v10414_v40 = vld [vmem:[#allocation23_spill] sm:$0xff] }
 0x1bf   :  { %10367 = vst [vmem:[#allocation182_spill] sm:$0xff] %v5358_v1  ;;  %v10381_v1 = vld [vmem:[#allocation108_spill] sm:$0xff] }
 0x1c0   :  { %10369 = vst [vmem:[#allocation80_spill] sm:$0xff] %v5369_v10  ;;  %1344 = vmatpush.msrb.mxu0 %v183_v33  ;;  %v722_v10 = vmul.f32 %v5375_v11, %v696_v24  ;;  %v588_v16 = vsel %vm582_vm14, %v10381_v1, %v5032_v27  ;;  %v5431_v33 = vsel %vm420_vm1, %v10384_v22, %v10383_v42  ;;  %v10387_v1 = vld [vmem:[#allocation91_spill] sm:$0xff]  ;;  %v10413_v42 = vld [vmem:[#allocation21_spill] sm:$0xff] }
 0x1c1   :  { %10370 = vst [vmem:[#allocation183_spill] sm:$0xff] %v5375_v11  ;;  %v5410_v7 = vpop.permute.xlu0 %628  ;;  %v75_v24 = vmul.f32 %v5391_v5, %v48_v19  ;;  %v1202_v27 = vmul.f32 %v5394_v59, %v5406_v54  ;;  %v5445_v11 = vperm.slane %v4285_v63, 5  ;;  %v614_v19 = vmul.f32 %v5418_v30, %v588_v16 }
 0x1c2   :  { %10371 = vst [vmem:[#allocation184_spill] sm:$0xff] %v5378_v12  ;;  %1294 = vmatpush.msrb.mxu1 %v722_v10  ;;  %1345 = vmatpush.msrb.mxu0 %v129_v26  ;;  %v534_v12 = vsel %vm9744_vm13, %v10387_v1, %v10343_v50  ;;  %v10389_v10 = vld [vmem:[#allocation49_spill] sm:$0xff]  ;;  %v10390_v26 = vld [vmem:[#allocation40_spill] sm:$0xff]  ;;  %v1173_v50 = vmul.f32 %v5425_v49, %v5431_v33  ;;  %v5460_v1 = vperm.slane %v4309_v14, 5  ;;  %v5470_v16 = vperm.slane %v4759_v3, 2 }
 0x1c3   :  { %10373 = vst [vmem:[#allocation103_spill] sm:$0xff] %v5388_v56  ;;  %v5451_v9 = vsel %vm366_vm2, %v10390_v26, %v10389_v10  ;;  %v10395_v56 = vld [vmem:[#allocation44_spill] sm:$0xff]  ;;  %v10406_v10 = vld [vmem:[#allocation19_spill] sm:$0xff]  ;;  %vm10407_vm13 = vcmp.lt.s32.totalorder %v4258_v28, 65 }
 0x1c4   :  { %10374 = vst [vmem:[#allocation185_spill] sm:$0xff] %v5391_v5  ;;  %1295 = vmatpush.msrb.mxu1 %v668_v32  ;;  %1346 = vmatpush.msrb.mxu0 %v75_v24  ;;  %v10394_v5 = vld [vmem:[#allocation42_spill] sm:$0xff]  ;;  %v560_v32 = vmul.f32 %v5436_v2, %v534_v12  ;;  %v5473_v24 = vpop.permute.xlu1 %576 }
 0x1c5   :  { %10375 = vst [vmem:[#allocation186_spill] sm:$0xff] %v5394_v59  ;;  %v5455_v59 = vperm.slane %v4742_v61, 2  ;;  %v5466_v0 = vsel %vm312_vm3, %v10395_v56, %v10394_v5  ;;  %1347 = vmatmul.f32.vlgmr.msrb.gmra.mxu0 %v5179_v53  ;;  %v10405_v5 = vld [vmem:[#allocation30_spill] sm:$0xff] }
 0x1c6   :  { %10379 = vst [vmem:[#allocation105_spill] sm:$0xff] %v5406_v54  ;;  %1436 = vmatpush.msra.mxu0 %v1202_v27  ;;  %1296 = vmatpush.msrb.mxu1 %v614_v19  ;;  %v1144_v27 = vmul.f32 %v5445_v11, %v5451_v9 }
 0x1c7   :  { %10380 = vst [vmem:[#allocation82_spill] sm:$0xff] %v5418_v30  ;;  %v10399_v30 = vld [vmem:[#allocation27_spill] sm:$0xff] }
 0x1c8   :  { %10382 = vst [vmem:[#allocation108_spill] sm:$0xff] %v5425_v49  ;;  %1437 = vmatpush.msra.mxu0 %v1173_v50  ;;  %v5478_v49 = vperm.slane %v4332_v43, 5  ;;  %1297 = vmatpush.msrb.mxu1 %v560_v32  ;;  %v5491_v50 = vperm.slane %v4779_v31, 2  ;;  %v5504_v32 = vpop.permute.xlu2 %742  ;;  %v10427_v31 = vld [vmem:[#allocation3_spill] sm:$0xff] }
 0x1c9   :  { %10385 = vst [vmem:[#allocation52_spill] sm:$0xff] %v5431_v33  ;;  %v10400_v33 = vld [vmem:[#allocation33_spill] sm:$0xff]  ;;  %v5486_v12 = vpop.permute.xlu0 %630 }
 0x1ca   :  { %10386 = vst [vmem:[#allocation187_spill] sm:$0xff] %v5436_v2  ;;  %v5484_v19 = vsel %vm10068_vm4, %v10400_v33, %v10399_v30  ;;  %v10402_v2 = vld [vmem:[#allocation69_spill] sm:$0xff]  ;;  %1438 = vmatpush.msra.mxu0 %v1144_v27  ;;  %v5502_v30 = vsel %vm10407_vm13, %v10406_v10, %v10405_v5  ;;  %v5509_v27 = vperm.slane %v4791_v48, 2  ;;  %v5520_v5 = vsel %vm150_vm6, %v10414_v40, %v10413_v42  ;;  %v10426_v48 = vld [vmem:[#allocation10_spill] sm:$0xff] }
 0x1cb   :  { %10388 = vst [vmem:[#allocation91_spill] sm:$0xff] %v5445_v11  ;;  %v506_v54 = vmul.f32 %v5455_v59, %v10402_v2  ;;  %v1115_v11 = vmul.f32 %v5460_v1, %v5466_v0  ;;  %v10410_v2 = vld [vmem:[#allocation71_spill] sm:$0xff]  ;;  %v10421_v42 = vld [vmem:[#allocation13_spill] sm:$0xff]  ;;  %vm10430_vm13 = vcmp.lt.s32.totalorder %v4258_v28, 119 }
 0x1cc   :  { %10391 = vst [vmem:[#allocation40_spill] sm:$0xff] %v5451_v9  ;;  %v5496_v9 = vperm.slane %v4349_v8, 5 }
 0x1cd   :  { %10392 = vst [vmem:[#allocation188_spill] sm:$0xff] %v5455_v59  ;;  %1298 = vmatpush.msrb.mxu1 %v506_v54  ;;  %v452_v59 = vmul.f32 %v5470_v16, %v10410_v2  ;;  %1439 = vmatpush.msra.mxu0 %v1115_v11  ;;  %v10416_v54 = vld [vmem:[#allocation74_spill] sm:$0xff] }
 0x1ce   :  { %10393 = vst [vmem:[#allocation189_spill] sm:$0xff] %v5460_v1  ;;  %v1086_v1 = vmul.f32 %v5478_v49, %v5484_v19  ;;  %v398_v2 = vmul.f32 %v5491_v50, %v10416_v54  ;;  %v1057_v11 = vmul.f32 %v5496_v9, %v5502_v30  ;;  %v10423_v54 = vld [vmem:[#allocation78_spill] sm:$0xff] }
 0x1cf   :  { %10396 = vst [vmem:[#allocation44_spill] sm:$0xff] %v5466_v0  ;;  %v5514_v0 = vperm.slane %v4361_v52, 5  ;;  %1299 = vmatpush.msrb.mxu1 %v452_v59 }
 0x1d0   :  { %10397 = vst [vmem:[#allocation190_spill] sm:$0xff] %v5470_v16  ;;  %v5525_v16 = vperm.slane %v4811_v4, 2  ;;  %1440 = vmatpush.msra.mxu0 %v1086_v1  ;;  %v5544_v1 = vperm.slane %v4830_v55, 2  ;;  %v5549_v4 = vperm.slane %v4444_v37, 5  ;;  %v5571_v55 = vperm.slane %v4444_v37, 4 }
 0x1d1   :  { %10398 = vst [vmem:[#allocation191_spill] sm:$0xff] %v5478_v49  ;;  %v5530_v49 = vperm.slane %v5074_v45, 2  ;;  %1300 = vmatpush.msrb.mxu1 %v398_v2  ;;  %v5557_v2 = vpop.permute.xlu0 %796 }
 0x1d2   :  { %10401 = vst [vmem:[#allocation33_spill] sm:$0xff] %v5484_v19  ;;  %v5533_v19 = vperm.slane %v4401_v57, 5  ;;  %1441 = vmatpush.msra.mxu0 %v1057_v11 }
 0x1d3   :  { %10403 = vst [vmem:[#allocation69_spill] sm:$0xff] %v5491_v50  ;;  %v344_v50 = vmul.f32 %v5509_v27, %v10423_v54  ;;  %v10429_v54 = vld [vmem:[#allocation83_spill] sm:$0xff] }
 0x1d4   :  { %10404 = vst [vmem:[#allocation192_spill] sm:$0xff] %v5496_v9  ;;  %v897_v9 = vpop.permute.xlu1 %896 }
 0x1d5   :  { %10408 = vst [vmem:[#allocation19_spill] sm:$0xff] %v5502_v30  ;;  %v1028_v30 = vmul.f32 %v5514_v0, %v5520_v5  ;;  %1301 = vmatpush.msrb.mxu1 %v344_v50  ;;  %v911_v11 = vsel %vm10430_vm13, %v4903_v23, %v897_v9  ;;  %v5574_v50 = vperm.slane %v4887_v36, 5  ;;  %v46_v23 = vsel %vm43_vm8, %v10307_v6, %v10427_v31  ;;  %v5596_v6 = vpop.permute.xlu2 %844 }
 0x1d6   :  { %10409 = vst [vmem:[#allocation193_spill] sm:$0xff] %v5504_v32  ;;  %v10420_v32 = vld [vmem:[#allocation8_spill] sm:$0xff] }
 0x1d7   :  { %10411 = vst [vmem:[#allocation71_spill] sm:$0xff] %v5509_v27  ;;  %v5539_v59 = vsel %vm96_vm7, %v10421_v42, %v10420_v32  ;;  %v5555_v32 = vsel %vm43_vm8, %v10427_v31, %v10426_v48  ;;  %v290_v27 = vmul.f32 %v5525_v16, %v10429_v54  ;;  %1442 = vmatpush.msra.mxu0 %v1028_v30  ;;  %v10434_v54 = vld [vmem:[#allocation85_spill] sm:$0xff]  ;;  %v5594_v31 = vperm.slane %v4887_v36, 4 }
 0x1d8   :  { %10412 = vst [vmem:[#allocation194_spill] sm:$0xff] %v5514_v0  ;;  %v5565_v0 = vperm.slane %v4850_v44, 2  ;;  %v999_v48 = vmul.f32 %v5533_v19, %v5539_v59  ;;  %v236_v30 = vmul.f32 %v5544_v1, %v10434_v54 }
 0x1d9   :  { %10415 = vst [vmem:[#allocation23_spill] sm:$0xff] %v5520_v5  ;;  %v938_v5 = vmul.f32 %v5530_v49, %v911_v11  ;;  %1302 = vmatpush.msrb.mxu1 %v290_v27  ;;  %v5583_v11 = vperm.slane %v4857_v17, 2  ;;  %v10439_v27 = vld [vmem:[#allocation87_spill] sm:$0xff] }
 0x1da   :  { %10417 = vst [vmem:[#allocation74_spill] sm:$0xff] %v5525_v16  ;;  %1443 = vmatpush.msra.mxu0 %v999_v48  ;;  %v970_v16 = vmul.f32 %v5549_v4, %v5555_v32  ;;  %v182_v54 = vmul.f32 %v5565_v0, %v10439_v27 }
 0x1db   :  { %10418 = vst [vmem:[#allocation195_spill] sm:$0xff] %v5530_v49  ;;  %1325 = vmatpush.msrb.mxu3 %v938_v5  ;;  %v5591_v49 = vperm.slane %v4250_v15, 4  ;;  %1303 = vmatpush.msrb.mxu1 %v236_v30  ;;  %v5607_v5 = vperm.slane %v4444_v37, 7  ;;  %v10443_v30 = vld [vmem:[#allocation90_spill] sm:$0xff] }
 0x1dc   :  { %10419 = vst [vmem:[#allocation196_spill] sm:$0xff] %v5533_v19  ;;  %v5586_v19 = vperm.slane %v4887_v36, 2  ;;  %1444 = vmatpush.msra.mxu0 %v970_v16  ;;  %v128_v27 = vmul.f32 %v5583_v11, %v10443_v30  ;;  %v10447_v16 = vld [vmem:[#allocation54_spill] sm:$0xff]  ;;  %v5637_v30 = vperm.slane %v5167_v29, 3 }
 0x1dd   :  { %10422 = vst [vmem:[#allocation13_spill] sm:$0xff] %v5539_v59  ;;  %1304 = vmatpush.msrb.mxu1 %v182_v54  ;;  %v5632_v54 = vperm.slane %v4522_v13, 4 }
 0x1de   :  { %10424 = vst [vmem:[#allocation78_spill] sm:$0xff] %v5544_v1  ;;  %v10440_v1 = vld [vmem:[#allocation51_spill] sm:$0xff] }
 0x1df   :  { %10425 = vst [vmem:[#allocation197_spill] sm:$0xff] %v5549_v4  ;;  %v5604_v48 = vsel %vm474_vm0, %v10440_v1, %v10378_v47  ;;  %v5610_v4 = vperm.slane %v5074_v45, 3  ;;  %v5620_v47 = vperm.slane %v5167_v29, 2  ;;  %v5623_v1 = vmul.f32 %v5574_v50, %v46_v23  ;;  %1305 = vmatpush.msrb.mxu1 %v128_v27 }
 0x1e0   :  { %10428 = vst [vmem:[#allocation3_spill] sm:$0xff] %v5555_v32  ;;  %v5613_v32 = vmul.f32 %v5571_v55, %v46_v23  ;;  %v1201_v23 = vmul.f32 %v5591_v49, %v5604_v48 }
 0x1e1   :  { %10431 = vst [vmem:[#allocation83_spill] sm:$0xff] %v5565_v0  ;;  %v10444_v0 = vld [vmem:[#allocation94_spill] sm:$0xff] }
 0x1e2   :  { %10432 = vst [vmem:[#allocation198_spill] sm:$0xff] %v5571_v55  ;;  %v74_v59 = vmul.f32 %v5586_v19, %v10444_v0  ;;  %v5634_v55 = vpop.permute.xlu1 %898  ;;  %v5640_v0 = vperm.slane %v4266_v39, 4 }
 0x1e3   :  { %10433 = vst [vmem:[#allocation199_spill] sm:$0xff] %v5574_v50  ;;  %v10451_v50 = vld [vmem:[#allocation147_spill] sm:$0xff] }
 0x1e4   :  { %10435 = vst [vmem:[#allocation85_spill] sm:$0xff] %v5583_v11  ;;  %v910_v11 = vsel %vm10430_vm13, %v897_v9, %v5634_v55  ;;  %v800_v27 = vsel %vm798_vm9, %v10451_v50, %v5266_v60  ;;  %v10454_v9 = vld [vmem:[#allocation127_spill] sm:$0xff]  ;;  %1306 = vmatpush.msrb.mxu1 %v74_v59  ;;  %vm10472_vm13 = vcmp.lt.s32.totalorder %v4258_v28, 65 }
 0x1e5   :  { %10436 = vst [vmem:[#allocation200_spill] sm:$0xff] %v5586_v19  ;;  %v843_v19 = vpop.permute.xlu0 %842  ;;  %v747_v39 = vsel %vm744_vm10, %v10454_v9, %v5272_v51  ;;  %v5685_v9 = vperm.slane %v4608_v35, 5  ;;  %1307 = vmatmul.f32.vlgmr.msrb.gmra.mxu1 %v5179_v53  ;;  %v10499_v53 = vld [vmem:[#allocation2_spill] sm:$0xff] }
 0x1e6   :  { %10437 = vst [vmem:[#allocation201_spill] sm:$0xff] %v5591_v49  ;;  %v857_v36 = vsel %vm9935_vm15, %v5190_v25, %v843_v19  ;;  %v939_v49 = vmul.f32 %v5610_v4, %v910_v11  ;;  %v5674_v11 = vperm.slane %v4285_v63, 4  ;;  %1396 = vmatpush.msra.mxu1 %v1201_v23 }
 0x1e7   :  { %10438 = vst [vmem:[#allocation202_spill] sm:$0xff] %v5594_v31  ;;  %v884_v25 = vmul.f32 %v5620_v47, %v857_v36  ;;  %v746_v36 = vsel %vm744_vm10, %v5272_v51, %v5347_v46 }
 0x1e8   :  { %10441 = vst [vmem:[#allocation87_spill] sm:$0xff] %v5607_v5  ;;  %v5629_v5 = vsel %vm420_vm1, %v10447_v16, %v10384_v22  ;;  %v801_v22 = vsel %vm798_vm9, %v4664_v58, %v10451_v50  ;;  %v5649_v16 = vperm.slane %v4522_v13, 5  ;;  %v5662_v58 = vperm.slane %v4608_v35, 4  ;;  %1365 = vmatpush.msrb.mxu2 %v939_v49 }
 0x1e9   :  { %10442 = vst [vmem:[#allocation51_spill] sm:$0xff] %v5610_v4  ;;  %v832_v15 = vmul.f32 %v5632_v54, %v801_v22  ;;  %1326 = vmatpush.msrb.mxu3 %v884_v25  ;;  %v1172_v59 = vmul.f32 %v5640_v0, %v5629_v5  ;;  %v5698_v49 = vperm.slane %v4401_v57, 4  ;;  %v5709_v25 = vperm.slane %v4648_v34, 4 }
 0x1ea   :  { %10445 = vst [vmem:[#allocation90_spill] sm:$0xff] %v5620_v47  ;;  %v833_v51 = vmul.f32 %v5649_v16, %v800_v27  ;;  %v778_v22 = vmul.f32 %v5662_v58, %v747_v39  ;;  %3742 = vmatmul.msk.f32.vlgmr.msrb.gmra.mxu3 %vm9934_vm5, %v5316_v41  ;;  %v5725_v39 = vperm.slane %v4361_v52, 4  ;;  %v10466_v27 = vld [vmem:[#allocation35_spill] sm:$0xff]  ;;  %v10475_v47 = vld [vmem:[#allocation12_spill] sm:$0xff] }
 0x1eb   :  { %10446 = vst [vmem:[#allocation94_spill] sm:$0xff] %v5623_v1  ;;  %v856_v1 = vsel %vm9935_vm15, %v843_v19, %v5596_v6  ;;  %v10456_v19 = vld [vmem:[#allocation46_spill] sm:$0xff]  ;;  %1371 = vmatpush.msra.mxu3 %v832_v15  ;;  %1397 = vmatpush.msra.mxu1 %v1172_v59  ;;  %v779_v59 = vmul.f32 %v5685_v9, %v746_v36 }
 0x1ec   :  { %10448 = vst [vmem:[#allocation54_spill] sm:$0xff] %v5632_v54  ;;  %v5680_v4 = vsel %vm366_vm2, %v10456_v19, %v10390_v26  ;;  %v885_v50 = vmul.f32 %v5637_v30, %v856_v1  ;;  %v5694_v26 = vperm.slane %v4309_v14, 4  ;;  %v10460_v1 = vld [vmem:[#allocation32_spill] sm:$0xff]  ;;  %v5715_v54 = vpop.permute.xlu2 %578 }
 0x1ed   :  { %10449 = vst [vmem:[#allocation203_spill] sm:$0xff] %v5637_v30  ;;  %v5704_v23 = vsel %vm312_vm3, %v10460_v1, %v10395_v56  ;;  %v10462_v19 = vld [vmem:[#allocation172_spill] sm:$0xff]  ;;  %v1143_v15 = vmul.f32 %v5674_v11, %v5680_v4  ;;  %v5722_v56 = vperm.slane %v4332_v43, 4  ;;  %1372 = vmatpush.msra.mxu3 %v778_v22  ;;  %v5737_v1 = vperm.slane %v4680_v18, 4  ;;  %v5750_v22 = vpop.permute.xlu0 %686 }
 0x1ee   :  { %10450 = vst [vmem:[#allocation204_spill] sm:$0xff] %v5640_v0  ;;  %1366 = vmatpush.msrb.mxu2 %v885_v50  ;;  %v10463_v0 = vld [vmem:[#allocation152_spill] sm:$0xff]  ;;  %v5733_v50 = vpop.permute.xlu1 %632  ;;  %v1114_v36 = vmul.f32 %v5694_v26, %v5704_v23 }
 0x1ef   :  { %10452 = vst [vmem:[#allocation147_spill] sm:$0xff] %v5649_v16  ;;  %v694_v30 = vsel %vm690_vm11, %v10463_v0, %v10462_v19  ;;  %v5731_v0 = vsel %vm10068_vm4, %v10466_v27, %v10400_v33  ;;  %v693_v16 = vsel %vm690_vm11, %v10462_v19, %v5396_v20  ;;  %v10469_v33 = vld [vmem:[#allocation121_spill] sm:$0xff]  ;;  %1398 = vmatpush.msra.mxu1 %v1143_v15  ;;  %v5757_v27 = vperm.slane %v4349_v8, 4  ;;  %v3804_v15 = vld [vmem:[%s9437_s0 + $0x20] sm:$0xff] }
 0x1f0   :  { %10453 = vst [vmem:[#allocation205_spill] sm:$0xff] %v5662_v58  ;;  %1411 = vmatpush.msra.mxu2 %v833_v51  ;;  %v640_v51 = vsel %vm636_vm12, %v10469_v33, %v5410_v7  ;;  %1373 = vmatpush.msra.mxu3 %v3804_v15  ;;  %v724_v33 = vmul.f32 %v5709_v25, %v694_v30  ;;  %v5770_v58 = vperm.slane %v4715_v38, 4  ;;  %v5800_v8 = vperm.slane %v4715_v38, 5 }
 0x1f1   :  { %10455 = vst [vmem:[#allocation127_spill] sm:$0xff] %v5674_v11  ;;  %v5740_v11 = vperm.slane %v4648_v34, 5  ;;  %3743 = vmatmul.msk.f32.vlgmr.msrb.gmra.mxu2 %vm9934_vm5, %v5316_v41  ;;  %v10477_v41 = vld [vmem:[#allocation164_spill] sm:$0xff]  ;;  %v639_v30 = vsel %vm636_vm12, %v5410_v7, %v5486_v12  ;;  %1399 = vmatpush.msra.mxu1 %v1114_v36  ;;  %v10480_v7 = vld [vmem:[#allocation15_spill] sm:$0xff] }
 0x1f2   :  { %10457 = vst [vmem:[#allocation46_spill] sm:$0xff] %v5685_v9  ;;  %v10471_v9 = vld [vmem:[#allocation26_spill] sm:$0xff]  ;;  %1412 = vmatpush.msra.mxu2 %v779_v59  ;;  %v1085_v59 = vmul.f32 %v5722_v56, %v5731_v0  ;;  %1374 = vmatpush.msra.mxu3 %v724_v33  ;;  %v5806_v36 = vsel %vm96_vm7, %v10480_v7, %v10421_v42  ;;  %v10481_v33 = vld [vmem:[#allocation95_spill] sm:$0xff] }
 0x1f3   :  { %10458 = vst [vmem:[#allocation206_spill] sm:$0xff] %v5694_v26  ;;  %v5763_v19 = vsel %vm10472_vm13, %v10471_v9, %v10406_v10  ;;  %v5773_v26 = vperm.slane %v4680_v18, 5  ;;  %v5779_v10 = vsel %vm150_vm6, %v10475_v47, %v10414_v40  ;;  %v10476_v9 = vld [vmem:[#allocation179_spill] sm:$0xff]  ;;  %v670_v47 = vmul.f32 %v5737_v1, %v640_v51 }
 0x1f4   :  { %10459 = vst [vmem:[#allocation207_spill] sm:$0xff] %v5698_v49  ;;  %v586_v15 = vsel %vm582_vm14, %v10477_v41, %v10476_v9  ;;  %v3805_v40 = vld [vmem:[%s9437_s0 + $0x28] sm:$0xff]  ;;  %v5797_v41 = vperm.slane %v4723_v21, 4  ;;  %vm10483_vm13 = vcmp.lt.s32.totalorder %v4258_v28, 9  ;;  %1400 = vmatpush.msra.mxu1 %v1085_v59  ;;  %v1056_v51 = vmul.f32 %v5757_v27, %v5763_v19  ;;  %v5833_v59 = vpop.permute.xlu2 %846 }
 0x1f5   :  { %10461 = vst [vmem:[#allocation32_spill] sm:$0xff] %v5709_v25  ;;  %1413 = vmatpush.msra.mxu2 %v3805_v40  ;;  %v725_v25 = vmul.f32 %v5740_v11, %v693_v16  ;;  %v585_v16 = vsel %vm582_vm14, %v10476_v9, %v5473_v24  ;;  %1375 = vmatpush.msra.mxu3 %v670_v47 }
 0x1f6   :  { %10464 = vst [vmem:[#allocation172_spill] sm:$0xff] %v5722_v56  ;;  %v10482_v56 = vld [vmem:[#allocation97_spill] sm:$0xff]  ;;  %v616_v42 = vmul.f32 %v5770_v58, %v586_v15  ;;  %v671_v7 = vmul.f32 %v5773_v26, %v639_v30  ;;  %v531_v9 = vsel %vm10483_vm13, %v10481_v33, %v5408_v62  ;;  %1401 = vmatpush.msra.mxu1 %v1056_v51  ;;  %v5838_v15 = vperm.slane %v4444_v37, 6  ;;  %v901_v47 = vpop.permute.xlu1 %900  ;;  %v10490_v51 = vld [vmem:[#allocation112_spill] sm:$0xff] }
 0x1f7   :  { %10465 = vst [vmem:[#allocation152_spill] sm:$0xff] %v5725_v39  ;;  %v532_v40 = vsel %vm10483_vm13, %v10482_v56, %v10481_v33  ;;  %1414 = vmatpush.msra.mxu2 %v725_v25  ;;  %v5824_v56 = vperm.slane %v4723_v21, 5  ;;  %v1027_v25 = vmul.f32 %v5725_v39, %v5779_v10  ;;  %v5841_v30 = vperm.slane %v4759_v3, 4  ;;  %v5851_v39 = vpop.permute.xlu0 %524 }
 0x1f8   :  { %10467 = vst [vmem:[#allocation35_spill] sm:$0xff] %v5737_v1  ;;  %v5827_v1 = vperm.slane %v4857_v17, 4  ;;  %1376 = vmatpush.msra.mxu3 %v616_v42  ;;  %v5846_v33 = vperm.slane %v4742_v61, 5  ;;  %v998_v37 = vmul.f32 %v5698_v49, %v5806_v36  ;;  %v5856_v42 = vperm.slane %v5074_v45, 4  ;;  %v10497_v49 = vld [vmem:[#allocation114_spill] sm:$0xff] }
 0x1f9   :  { %10468 = vst [vmem:[#allocation208_spill] sm:$0xff] %v5740_v11  ;;  %v5819_v11 = vperm.slane %v4742_v61, 4  ;;  %1415 = vmatpush.msra.mxu2 %v671_v7  ;;  %1402 = vmatpush.msra.mxu1 %v1027_v25  ;;  %v5859_v7 = vperm.slane %v4857_v17, 5  ;;  %vm10495_vm13 = vcmp.lt.s32.totalorder %v4258_v28, 119  ;;  %v563_v25 = vmul.f32 %v5824_v56, %v531_v9 }
 0x1fa   :  { %10470 = vst [vmem:[#allocation121_spill] sm:$0xff] %v5757_v27  ;;  %v562_v27 = vmul.f32 %v5797_v41, %v532_v40  ;;  %v10494_v40 = vld [vmem:[#allocation134_spill] sm:$0xff]  ;;  %v5875_v17 = vmul.f32 %v5594_v31, %v10499_v53  ;;  %v855_v9 = vsel %vm9935_vm15, %v5596_v6, %v5833_v59  ;;  %v509_v53 = vmul.f32 %v5846_v33, %v5604_v48 }
 0x1fb   :  { %10473 = vst [vmem:[#allocation26_spill] sm:$0xff] %v5770_v58  ;;  %v5849_v58 = vperm.slane %v10490_v51, 4  ;;  %1403 = vmatpush.msra.mxu1 %v998_v37  ;;  %v5892_v31 = vperm.slane %v10490_v51, 5  ;;  %v10504_v37 = vld [vmem:[#allocation117_spill] sm:$0xff]  ;;  %v799_v48 = vsel %vm798_vm9, %v5266_v60, %v5557_v2  ;;  %v5926_v60 = vperm.slane %v5074_v45, 5  ;;  %v10518_v45 = vld [vmem:[#allocation28_spill] sm:$0xff] }
 0x1fc   :  { %10474 = vst [vmem:[#allocation209_spill] sm:$0xff] %v5773_v26  ;;  %v617_v26 = vmul.f32 %v5800_v8, %v585_v16  ;;  %v508_v16 = vmul.f32 %v5819_v11, %v10494_v40  ;;  %1377 = vmatpush.msra.mxu3 %v562_v27  ;;  %v5878_v40 = vperm.slane %v4361_v52, 7 }
 0x1fd   :  { %10478 = vst [vmem:[#allocation12_spill] sm:$0xff] %v5797_v41  ;;  %v5868_v41 = vperm.slane %v4759_v3, 5  ;;  %1404 = vmatpush.msra.mxu1 %v5613_v32  ;;  %v5917_v32 = vperm.slane %v4850_v44, 4 }
 0x1fe   :  { %10479 = vst [vmem:[#allocation179_spill] sm:$0xff] %v5800_v8  ;;  %v909_v8 = vsel %vm10495_vm13, %v5634_v55, %v901_v47  ;;  %1416 = vmatpush.msra.mxu2 %v617_v26  ;;  %v5881_v55 = vperm.slane %v5167_v29, 4  ;;  %v10502_v26 = vld [vmem:[#allocation137_spill] sm:$0xff]  ;;  %1378 = vmatpush.msra.mxu3 %v508_v16 }
 0x1ff   :  { %10484 = vst [vmem:[#allocation164_spill] sm:$0xff] %v5819_v11  ;;  %v454_v27 = vmul.f32 %v5841_v30, %v10502_v26  ;;  %v10506_v11 = vld [vmem:[#allocation120_spill] sm:$0xff]  ;;  %v5901_v26 = vperm.slane %v4522_v13, 6  ;;  %v940_v6 = vmul.f32 %v5856_v42, %v909_v8  ;;  %v10509_v16 = vld [vmem:[#allocation141_spill] sm:$0xff]  ;;  %v5919_v8 = vpop.permute.xlu2 %848 }
 0x200   :  { %10485 = vst [vmem:[#allocation15_spill] sm:$0xff] %v5824_v56  ;;  %1417 = vmatpush.msra.mxu2 %v563_v25  ;;  %v5895_v56 = vperm.slane %v10504_v37, 4  ;;  %v400_v25 = vmul.f32 %v5849_v58, %v10509_v16  ;;  %v886_v16 = vmul.f32 %v5881_v55, %v855_v9  ;;  %v5937_v9 = vperm.slane %v10504_v37, 5 }
 0x201   :  { %10486 = vst [vmem:[#allocation95_spill] sm:$0xff] %v5827_v1  ;;  %1379 = vmatpush.msra.mxu3 %v454_v27  ;;  %1405 = vmatpush.msra.mxu1 %v940_v6  ;;  %v10514_v27 = vld [vmem:[#allocation39_spill] sm:$0xff]  ;;  %v401_v6 = vmul.f32 %v5892_v31, %v5680_v4  ;;  %v854_v4 = vsel %vm9935_vm15, %v5833_v59, %v5919_v8 }
 0x202   :  { %10487 = vst [vmem:[#allocation97_spill] sm:$0xff] %v5838_v15  ;;  %v5871_v15 = vperm.slane %v10497_v49, 4  ;;  %1418 = vmatpush.msra.mxu2 %v509_v53  ;;  %v10515_v53 = vld [vmem:[#allocation193_spill] sm:$0xff] }
 0x203   :  { %10488 = vst [vmem:[#allocation210_spill] sm:$0xff] %v5841_v30  ;;  %v5914_v30 = vperm.slane %v10497_v49, 5  ;;  %1380 = vmatpush.msra.mxu3 %v400_v25  ;;  %1406 = vmatpush.msra.mxu1 %v886_v16  ;;  %v5962_v25 = vperm.slane %v4522_v13, 7  ;;  %v5967_v16 = vperm.slane %v4648_v34, 6  ;;  %v293_v13 = vmul.f32 %v5937_v9, %v5731_v0 }
 0x204   :  { %10489 = vst [vmem:[#allocation211_spill] sm:$0xff] %v5846_v33  ;;  %v455_v33 = vmul.f32 %v5868_v41, %v5629_v5  ;;  %v346_v5 = vmul.f32 %v5871_v15, %v10514_v27  ;;  %v834_v27 = vmul.f32 %v5901_v26, %v799_v48 }
 0x205   :  { %10491 = vst [vmem:[#allocation112_spill] sm:$0xff] %v5849_v58 }
 0x206   :  { %10492 = vst [vmem:[#allocation212_spill] sm:$0xff] %v5856_v42  ;;  %v5923_v42 = vperm.slane %v4608_v35, 6  ;;  %1419 = vmatpush.msra.mxu2 %v455_v33  ;;  %1381 = vmatpush.msra.mxu3 %v346_v5 }
 0x207   :  { %10493 = vst [vmem:[#allocation213_spill] sm:$0xff] %v5859_v7  ;;  %1451 = vmatpush.msrb.mxu1 %v834_v27 }
 0x208   :  { %10496 = vst [vmem:[#allocation134_spill] sm:$0xff] %v5868_v41  ;;  %v745_v41 = vsel %vm744_vm10, %v5347_v46, %v10515_v53  ;;  %v5947_v46 = vperm.slane %v5167_v29, 5  ;;  %1420 = vmatpush.msra.mxu2 %v401_v6  ;;  %v10525_v6 = vld [vmem:[#allocation18_spill] sm:$0xff] }
 0x209   :  { %10498 = vst [vmem:[#allocation114_spill] sm:$0xff] %v5871_v15  ;;  %v5944_v15 = vpop.permute.xlu0 %902  ;;  %v780_v48 = vmul.f32 %v5923_v42, %v745_v41  ;;  %v5980_v41 = vperm.slane %v4850_v44, 5  ;;  %v184_v27 = vmul.f32 %v5917_v32, %v10525_v6  ;;  %v6023_v6 = vperm.slane %v4332_v43, 6 }
 0x20a   :  { %10500 = vst [vmem:[#allocation2_spill] sm:$0xff] %v5878_v40  ;;  %v5898_v40 = vperm.slane %v10506_v11, 4  ;;  %v908_v33 = vsel %vm10495_vm13, %v901_v47, %v5944_v15  ;;  %v10523_v47 = vld [vmem:[#allocation92_spill] sm:$0xff]  ;;  %vm10538_vm13 = vcmp.lt.s32.totalorder %v4258_v28, 9 }
 0x20b   :  { %10501 = vst [vmem:[#allocation214_spill] sm:$0xff] %v5881_v55  ;;  %v10517_v55 = vld [vmem:[#allocation24_spill] sm:$0xff]  ;;  %v941_v59 = vmul.f32 %v5926_v60, %v908_v33  ;;  %v806_v5 = vsel %vm798_vm9, %v5557_v2, %v10523_v47  ;;  %1452 = vmatpush.msrb.mxu1 %v780_v48  ;;  %v887_v2 = vmul.f32 %v5947_v46, %v854_v4  ;;  %v5986_v33 = vperm.slane %v4680_v18, 6 }
 0x20c   :  { %10503 = vst [vmem:[#allocation137_spill] sm:$0xff] %v5892_v31  ;;  %v292_v58 = vmul.f32 %v5895_v56, %v10517_v55  ;;  %v238_v52 = vmul.f32 %v5898_v40, %v10518_v45  ;;  %v347_v45 = vmul.f32 %v5914_v30, %v5704_v23  ;;  %v5959_v55 = vperm.slane %v10506_v11, 5 }
 0x20d   :  { %10505 = vst [vmem:[#allocation117_spill] sm:$0xff] %v5895_v56  ;;  %v692_v23 = vsel %vm690_vm11, %v5396_v20, %v5750_v22  ;;  %1445 = vmatpush.msra.mxu0 %v941_v59  ;;  %v5989_v20 = vperm.slane %v4608_v35, 7  ;;  %v6002_v48 = vperm.slane %v4401_v57, 6  ;;  %v10530_v35 = vld [vmem:[#allocation5_spill] sm:$0xff]  ;;  %v835_v47 = vmul.f32 %v5962_v25, %v806_v5 }
 0x20e   :  { %10507 = vst [vmem:[#allocation120_spill] sm:$0xff] %v5898_v40  ;;  %1382 = vmatpush.msra.mxu3 %v292_v58  ;;  %1421 = vmatpush.msra.mxu2 %v347_v45  ;;  %v10528_v58 = vld [vmem:[#allocation96_spill] sm:$0xff]  ;;  %v638_v45 = vsel %vm636_vm12, %v5486_v12, %v5733_v50  ;;  %v239_v4 = vmul.f32 %v5959_v55, %v5763_v19  ;;  %v6012_v12 = vperm.slane %v4715_v38, 6 }
 0x20f   :  { %10508 = vst [vmem:[#allocation215_spill] sm:$0xff] %v5901_v26  ;;  %v752_v0 = vsel %vm744_vm10, %v10515_v53, %v10528_v58  ;;  %v130_v59 = vmul.f32 %v5827_v1, %v10530_v35  ;;  %v3806_v53 = vld [vmem:[%s9437_s0 + $0x30] sm:$0xff]  ;;  %1446 = vmatpush.msra.mxu0 %v887_v2  ;;  %v584_v19 = vsel %vm582_vm14, %v5473_v24, %v5715_v54 }
 0x210   :  { %10510 = vst [vmem:[#allocation141_spill] sm:$0xff] %v5914_v30  ;;  %1383 = vmatpush.msra.mxu3 %v238_v52  ;;  %1422 = vmatpush.msra.mxu2 %v293_v13  ;;  %v726_v52 = vmul.f32 %v5967_v16, %v692_v23  ;;  %v185_v5 = vmul.f32 %v5980_v41, %v5779_v10  ;;  %v10533_v23 = vld [vmem:[#allocation55_spill] sm:$0xff] }
 0x211   :  { %10511 = vst [vmem:[#allocation216_spill] sm:$0xff] %v5917_v32  ;;  %1453 = vmatpush.msrb.mxu1 %v3806_v53  ;;  %v131_v13 = vmul.f32 %v5859_v7, %v5806_v36  ;;  %v6026_v2 = vperm.slane %v10533_v23, 6  ;;  %1491 = vmatpush.msrb.mxu0 %v835_v47  ;;  %v672_v58 = vmul.f32 %v5986_v33, %v638_v45  ;;  %v10537_v10 = vld [vmem:[#allocation79_spill] sm:$0xff]  ;;  %v6044_v45 = vperm.slane %v4648_v34, 7  ;;  %v10542_v53 = vld [vmem:[#allocation118_spill] sm:$0xff]  ;;  %v10670_v32 = vld [vmem:[#allocation89_spill] sm:$0xff] }
 0x212   :  { %10512 = vst [vmem:[#allocation217_spill] sm:$0xff] %v5923_v42  ;;  %1384 = vmatpush.msra.mxu3 %v184_v27  ;;  %1423 = vmatpush.msra.mxu2 %v239_v4  ;;  %v781_v24 = vmul.f32 %v5989_v20, %v752_v0  ;;  %v6031_v27 = vperm.slane %v4723_v21, 6  ;;  %v10536_v4 = vld [vmem:[#allocation53_spill] sm:$0xff]  ;;  %v530_v35 = vsel %vm10538_vm13, %v5408_v62, %v5851_v39  ;;  %v6047_v0 = vperm.slane %v4309_v14, 6  ;;  %v10545_v34 = vld [vmem:[#allocation59_spill] sm:$0xff] }
 0x213   :  { %10513 = vst [vmem:[#allocation218_spill] sm:$0xff] %v5926_v60  ;;  %1454 = vmatpush.msrb.mxu1 %v726_v52  ;;  %v6037_v36 = vsel %vm474_vm0, %v10537_v10, %v10536_v4  ;;  %v6050_v47 = vperm.slane %v10533_v23, 7  ;;  %v691_v52 = vsel %vm690_vm11, %v5750_v22, %v10542_v53  ;;  %v618_v62 = vmul.f32 %v6012_v12, %v584_v19  ;;  %v10546_v4 = vld [vmem:[#allocation47_spill] sm:$0xff]  ;;  %v10551_v53 = vld [vmem:[#allocation128_spill] sm:$0xff]  ;;  %v10619_v60 = vld [vmem:[#allocation13_spill] sm:$0xff] }
 0x214   :  { %10516 = vst [vmem:[#allocation39_spill] sm:$0xff] %v5937_v9  ;;  %1385 = vmatpush.msra.mxu3 %v130_v59  ;;  %1424 = vmatpush.msra.mxu2 %v185_v5  ;;  %v10543_v59 = vld [vmem:[#allocation56_spill] sm:$0xff]  ;;  %v6064_v10 = vsel %vm420_vm1, %v10546_v4, %v10545_v34  ;;  %v6068_v23 = vperm.slane %v4742_v61, 6  ;;  %v6071_v22 = vperm.slane %v4680_v18, 7  ;;  %v6074_v19 = vperm.slane %v4285_v63, 6  ;;  %v3807_v18 = vld [vmem:[%s9437_s0 + $0x38] sm:$0xff] }
 0x215   :  { %10519 = vst [vmem:[#allocation193_spill] sm:$0xff] %v5947_v46  ;;  %1455 = vmatpush.msrb.mxu1 %v672_v58  ;;  %1492 = vmatpush.msrb.mxu0 %v781_v24  ;;  %v6058_v5 = vperm.slane %v10543_v59, 6  ;;  %v1203_v58 = vmul.f32 %v6026_v2, %v6037_v36  ;;  %v6079_v24 = vperm.slane %v10543_v59, 7  ;;  %v10552_v34 = vld [vmem:[#allocation48_spill] sm:$0xff]  ;;  %v10553_v4 = vld [vmem:[#allocation49_spill] sm:$0xff]  ;;  %v10554_v59 = vld [vmem:[#allocation167_spill] sm:$0xff] }
 0x216   :  { %10520 = vst [vmem:[#allocation24_spill] sm:$0xff] %v5959_v55  ;;  %1386 = vmatpush.msra.mxu3 %v5875_v17  ;;  %1425 = vmatpush.msra.mxu2 %v131_v13  ;;  %v637_v17 = vsel %vm636_vm12, %v5733_v50, %v10551_v53  ;;  %v564_v13 = vmul.f32 %v6031_v27, %v530_v35  ;;  %v6102_v53 = vperm.slane %v4715_v38, 7  ;;  %v10596_v46 = vld [vmem:[#allocation22_spill] sm:$0xff] }
 0x217   :  { %10521 = vst [vmem:[#allocation28_spill] sm:$0xff] %v5962_v25  ;;  %1456 = vmatpush.msrb.mxu1 %v618_v62  ;;  %1493 = vmatpush.msrb.mxu0 %v3807_v18  ;;  %v727_v50 = vmul.f32 %v6044_v45, %v691_v52  ;;  %v6099_v62 = vperm.slane %v4759_v3, 6  ;;  %v10558_v18 = vld [vmem:[#allocation142_spill] sm:$0xff]  ;;  %v673_v25 = vmul.f32 %v6071_v22, %v637_v17  ;;  %v6142_v17 = vperm.slane %v4309_v14, 7 }
 0x218   :  { %10522 = vst [vmem:[#allocation219_spill] sm:$0xff] %v5967_v16  ;;  %1387 = vmatmul.f32.vlgmr.msra.gmra.mxu3 %v10554_v59  ;;  %v1204_v35 = vmul.f32 %v6050_v47, %v10558_v18  ;;  %v10561_v52 = vld [vmem:[#allocation34_spill] sm:$0xff]  ;;  %v6154_v14 = vperm.slane %v10497_v49, 6 }
 0x219   :  { %10524 = vst [vmem:[#allocation92_spill] sm:$0xff] %v5980_v41  ;;  %1476 = vmatpush.msrb.mxu3 %v1203_v58  ;;  %1457 = vmatpush.msrb.mxu1 %v564_v13  ;;  %v10565_v58 = vld [vmem:[#allocation38_spill] sm:$0xff]  ;;  %v10566_v13 = vld [vmem:[#allocation27_spill] sm:$0xff] }
 0x21a   :  { %10526 = vst [vmem:[#allocation18_spill] sm:$0xff] %v5986_v33  ;;  %1494 = vmatpush.msrb.mxu0 %v727_v50  ;;  %v10567_v33 = vld [vmem:[#allocation43_spill] sm:$0xff]  ;;  %v6139_v50 = vperm.slane %v4723_v21, 7 }
 0x21b   :  { %10527 = vst [vmem:[#allocation220_spill] sm:$0xff] %v5989_v20  ;;  %v6093_v20 = vsel %vm366_vm2, %v10553_v4, %v10552_v34  ;;  %v10560_v34 = vld [vmem:[#allocation106_spill] sm:$0xff]  ;;  %v10659_v41 = vld [vmem:[#allocation99_spill] sm:$0xff] }
 0x21c   :  { %10529 = vst [vmem:[#allocation96_spill] sm:$0xff] %v6002_v48  ;;  %v583_v4 = vsel %vm582_vm14, %v5715_v54, %v10560_v34  ;;  %v6126_v54 = vperm.slane %v10490_v51, 6  ;;  %v6132_v34 = vsel %vm10068_vm4, %v10566_v13, %v10565_v58  ;;  %1495 = vmatpush.msrb.mxu0 %v673_v25  ;;  %v10571_v58 = vld [vmem:[#allocation52_spill] sm:$0xff]  ;;  %v10574_v13 = vld [vmem:[#allocation63_spill] sm:$0xff]  ;;  %v10576_v25 = vld [vmem:[#allocation45_spill] sm:$0xff] }
 0x21d   :  { %10531 = vst [vmem:[#allocation5_spill] sm:$0xff] %v6012_v12  ;;  %v10555_v12 = vld [vmem:[#allocation94_spill] sm:$0xff] }
 0x21e   :  { %10532 = vst [vmem:[#allocation221_spill] sm:$0xff] %v6023_v6  ;;  %1426 = vmatpush.msra.mxu2 %v10555_v12  ;;  %v1174_v12 = vmul.f32 %v6058_v5, %v6064_v10 }
 0x21f   :  { %10534 = vst [vmem:[#allocation55_spill] sm:$0xff] %v6026_v2  ;;  %1427 = vmatmul.f32.vlgmr.msra.gmra.mxu2 %v10554_v59  ;;  %v1145_v59 = vmul.f32 %v6074_v19, %v6093_v20 }
 0x220   :  { %10535 = vst [vmem:[#allocation222_spill] sm:$0xff] %v6031_v27  ;;  %v6107_v27 = vperm.slane %v4285_v63, 7  ;;  %v10563_v63 = vld [vmem:[#allocation105_spill] sm:$0xff]  ;;  %1477 = vmatpush.msrb.mxu3 %v1174_v12  ;;  %1516 = vmatpush.msrb.mxu2 %v1204_v35  ;;  %v619_v35 = vmul.f32 %v6102_v53, %v583_v4  ;;  %v6157_v12 = vperm.slane %v4742_v61, 7  ;;  %v10578_v4 = vld [vmem:[#allocation40_spill] sm:$0xff]  ;;  %v10581_v61 = vld [vmem:[#allocation30_spill] sm:$0xff] }
 0x221   :  { %10539 = vst [vmem:[#allocation53_spill] sm:$0xff] %v6044_v45  ;;  %v10562_v45 = vld [vmem:[#allocation42_spill] sm:$0xff]  ;;  %v510_v18 = vmul.f32 %v6068_v23, %v10563_v63 }
 0x222   :  { %10540 = vst [vmem:[#allocation79_spill] sm:$0xff] %v6047_v0  ;;  %v6119_v38 = vsel %vm312_vm3, %v10562_v45, %v10561_v52  ;;  %v1175_v45 = vmul.f32 %v6079_v24, %v10567_v33  ;;  %v10570_v52 = vld [vmem:[#allocation138_spill] sm:$0xff]  ;;  %v456_v33 = vmul.f32 %v6099_v62, %v10571_v58  ;;  %1478 = vmatpush.msrb.mxu3 %v1145_v59  ;;  %v6170_v59 = vperm.slane %v10504_v37, 6  ;;  %v10580_v58 = vld [vmem:[#allocation29_spill] sm:$0xff] }
 0x223   :  { %10541 = vst [vmem:[#allocation223_spill] sm:$0xff] %v6050_v47  ;;  %v529_v63 = vsel %vm10538_vm13, %v5851_v39, %v10570_v52  ;;  %1458 = vmatpush.msrb.mxu1 %v510_v18  ;;  %v1116_v21 = vmul.f32 %v6047_v0, %v6119_v38  ;;  %v6160_v39 = vperm.slane %v10574_v13, 6  ;;  %v1146_v18 = vmul.f32 %v6107_v27, %v10576_v25  ;;  %v10585_v25 = vld [vmem:[#allocation36_spill] sm:$0xff] }
 0x224   :  { %10544 = vst [vmem:[#allocation118_spill] sm:$0xff] %v6058_v5  ;;  %1517 = vmatpush.msrb.mxu2 %v1175_v45  ;;  %v6165_v52 = vperm.slane %v4332_v43, 7  ;;  %1496 = vmatpush.msrb.mxu0 %v619_v35  ;;  %v402_v45 = vmul.f32 %v6126_v54, %v10578_v4  ;;  %vm10582_vm13 = vcmp.lt.s32.totalorder %v4258_v28, 65  ;;  %v565_v43 = vmul.f32 %v6139_v50, %v529_v63  ;;  %v10590_v63 = vld [vmem:[#allocation14_spill] sm:$0xff] }
 0x225   :  { %10547 = vst [vmem:[#allocation56_spill] sm:$0xff] %v6068_v23  ;;  %1459 = vmatpush.msrb.mxu1 %v456_v33  ;;  %1479 = vmatpush.msrb.mxu3 %v1116_v21  ;;  %v1087_v33 = vmul.f32 %v6023_v6, %v6132_v34  ;;  %v6184_v35 = vperm.slane %v4759_v3, 7  ;;  %v1117_v4 = vmul.f32 %v6142_v17, %v10585_v25  ;;  %v6195_v21 = vperm.slane %v10506_v11, 6  ;;  %v10592_v25 = vld [vmem:[#allocation44_spill] sm:$0xff] }
 0x226   :  { %10548 = vst [vmem:[#allocation59_spill] sm:$0xff] %v6071_v22  ;;  %v10583_v22 = vld [vmem:[#allocation178_spill] sm:$0xff]  ;;  %1518 = vmatpush.msrb.mxu2 %v1146_v18  ;;  %1497 = vmatpush.msrb.mxu0 %v565_v43  ;;  %v511_v18 = vmul.f32 %v6157_v12, %v6037_v36  ;;  %v6223_v36 = vperm.slane %v4850_v44, 6 }
 0x227   :  { %10549 = vst [vmem:[#allocation47_spill] sm:$0xff] %v6074_v19  ;;  %3744 = vmatmul.msk.f32.vlgmr.msra.gmra.mxu1 %vm9934_vm5, %v10583_v22  ;;  %1480 = vmatpush.msrb.mxu3 %v1087_v33  ;;  %v10599_v33 = vld [vmem:[#allocation8_spill] sm:$0xff] }
 0x228   :  { %10550 = vst [vmem:[#allocation224_spill] sm:$0xff] %v6079_v24  ;;  %1460 = vmatpush.msrb.mxu1 %v402_v45  ;;  %v6208_v45 = vperm.slane %v10490_v51, 7  ;;  %3745 = vmatmul.msk.f32.vlgmr.msra.gmra.mxu0 %vm9934_vm5, %v10583_v22  ;;  %v10598_v51 = vld [vmem:[#allocation17_spill] sm:$0xff] }
 0x229   :  { %10556 = vst [vmem:[#allocation128_spill] sm:$0xff] %v6099_v62  ;;  %v10595_v62 = vld [vmem:[#allocation10_spill] sm:$0xff]  ;;  %1519 = vmatpush.msrb.mxu2 %v1117_v4  ;;  %1498 = vmatpush.msrb.mxu0 %v511_v18  ;;  %v457_v4 = vmul.f32 %v6184_v35, %v6064_v10  ;;  %v10604_v18 = vld [vmem:[#allocation124_spill] sm:$0xff]  ;;  %v10606_v10 = vld [vmem:[#allocation19_spill] sm:$0xff] }
 0x22a   :  { %10557 = vst [vmem:[#allocation48_spill] sm:$0xff] %v6102_v53  ;;  %v6176_v53 = vsel %vm10582_vm13, %v10581_v61, %v10580_v58  ;;  %v10587_v58 = vld [vmem:[#allocation64_spill] sm:$0xff]  ;;  %vm10615_vm13 = vcmp.lt.s32.totalorder %v4258_v28, 119 }
 0x22b   :  { %10559 = vst [vmem:[#allocation49_spill] sm:$0xff] %v6107_v27  ;;  %v6192_v61 = vperm.slane %v10587_v58, 6  ;;  %v10594_v58 = vld [vmem:[#allocation9_spill] sm:$0xff]  ;;  %v1058_v43 = vmul.f32 %v6160_v39, %v6176_v53  ;;  %1499 = vmatpush.msrb.mxu0 %v457_v4 }
 0x22c   :  { %10564 = vst [vmem:[#allocation167_spill] sm:$0xff] %v6126_v54  ;;  %v6189_v54 = vperm.slane %v10574_v13, 7  ;;  %v348_v13 = vmul.f32 %v6154_v14, %v10592_v25  ;;  %v6214_v23 = vsel %vm43_vm8, %v10595_v62, %v10594_v58  ;;  %v10600_v62 = vld [vmem:[#allocation33_spill] sm:$0xff]  ;;  %v6236_v25 = vperm.slane %v10497_v49, 7 }
 0x22d   :  { %10568 = vst [vmem:[#allocation94_spill] sm:$0xff] %v6139_v50  ;;  %v10591_v50 = vld [vmem:[#allocation21_spill] sm:$0xff]  ;;  %1481 = vmatpush.msrb.mxu3 %v1058_v43  ;;  %v240_v49 = vmul.f32 %v6195_v21, %v10606_v10 }
 0x22e   :  { %10569 = vst [vmem:[#allocation142_spill] sm:$0xff] %v6142_v17  ;;  %v6201_v3 = vsel %vm150_vm6, %v10591_v50, %v10590_v63  ;;  %v1088_v50 = vmul.f32 %v6165_v52, %v10596_v46  ;;  %v6229_v63 = vsel %vm96_vm7, %v10599_v33, %v10598_v51  ;;  %1461 = vmatpush.msrb.mxu1 %v348_v13  ;;  %v10602_v58 = vld [vmem:[#allocation25_spill] sm:$0xff]  ;;  %v6246_v51 = vperm.slane %v10604_v18, 6 }
 0x22f   :  { %10572 = vst [vmem:[#allocation106_spill] sm:$0xff] %v6154_v14  ;;  %v294_v46 = vmul.f32 %v6170_v59, %v10600_v62  ;;  %v6241_v14 = vperm.slane %v4401_v57, 7  ;;  %v1029_v13 = vmul.f32 %v6192_v61, %v6201_v3  ;;  %v403_v33 = vmul.f32 %v6208_v45, %v6093_v20  ;;  %v10608_v57 = vld [vmem:[#allocation131_spill] sm:$0xff]  ;;  %v10612_v4 = vld [vmem:[#allocation97_spill] sm:$0xff] }
 0x230   :  { %10573 = vst [vmem:[#allocation34_spill] sm:$0xff] %v6157_v12  ;;  %v1059_v12 = vmul.f32 %v6189_v54, %v10602_v58  ;;  %1520 = vmatpush.msrb.mxu2 %v1088_v50  ;;  %v6253_v62 = vperm.slane %v10504_v37, 7  ;;  %v6256_v43 = vperm.slane %v10608_v57, 6  ;;  %v10610_v50 = vld [vmem:[#allocation157_spill] sm:$0xff]  ;;  %v10611_v58 = vld [vmem:[#allocation2_spill] sm:$0xff]  ;;  %v971_v10 = vmul.f32 %v10612_v4, %v6214_v23  ;;  %v10613_v20 = vld [vmem:[#allocation155_spill] sm:$0xff] }
 0x231   :  { %10575 = vst [vmem:[#allocation42_spill] sm:$0xff] %v6160_v39  ;;  %1462 = vmatpush.msrb.mxu1 %v294_v46  ;;  %1482 = vmatpush.msrb.mxu3 %v1029_v13  ;;  %v1000_v46 = vmul.f32 %v6002_v48, %v6229_v63  ;;  %v6275_v13 = vperm.slane %v10506_v11, 7 }
 0x232   :  { %10577 = vst [vmem:[#allocation105_spill] sm:$0xff] %v6165_v52  ;;  %1521 = vmatpush.msrb.mxu2 %v1059_v12  ;;  %1500 = vmatpush.msrb.mxu0 %v403_v33  ;;  %v349_v12 = vmul.f32 %v6236_v25, %v6119_v38  ;;  %v132_v52 = vmul.f32 %v6246_v51, %v10619_v60  ;;  %v10622_v33 = vld [vmem:[#allocation163_spill] sm:$0xff]  ;;  %v6296_v60 = vperm.slane %v4850_v44, 7 }
 0x233   :  { %10579 = vst [vmem:[#allocation38_spill] sm:$0xff] %v6170_v59  ;;  %v905_v59 = vpop.permute.xlu1 %904  ;;  %1463 = vmatpush.msrb.mxu1 %v240_v49  ;;  %1483 = vmatpush.msrb.mxu3 %v1000_v46  ;;  %v6285_v49 = vperm.slane %v10613_v20, 7  ;;  %v10625_v46 = vld [vmem:[#allocation87_spill] sm:$0xff] }
 0x234   :  { %10584 = vst [vmem:[#allocation27_spill] sm:$0xff] %v6184_v35  ;;  %v1030_v35 = vmul.f32 %v10611_v58, %v10610_v50  ;;  %v907_v37 = vsel %vm10615_vm13, %v5944_v15, %v905_v59  ;;  %v10616_v50 = vld [vmem:[#allocation23_spill] sm:$0xff]  ;;  %v10618_v58 = vld [vmem:[#allocation158_spill] sm:$0xff]  ;;  %v6282_v15 = vperm.slane %v5167_v29, 6  ;;  %v914_v38 = vsel %vm10615_vm13, %v905_v59, %v10622_v33  ;;  %1501 = vmatpush.msrb.mxu0 %v349_v12  ;;  %v10627_v33 = vld [vmem:[#allocation181_spill] sm:$0xff]  ;;  %v1228_v12 = vpop.f32.mrf.mxu0 }
 0x235   :  { %10586 = vst [vmem:[#allocation43_spill] sm:$0xff] %v6189_v54  ;;  %v851_v54 = vpop.permute.xlu0 %850  ;;  %v1001_v16 = vmul.f32 %v6241_v14, %v10618_v58  ;;  %v10624_v58 = vld [vmem:[#allocation6_spill] sm:$0xff]  ;;  %1484 = vmatpush.msrb.mxu3 %v971_v10  ;;  %v6302_v59 = vperm.slane %v5167_v29, 7  ;;  %v6312_v10 = vperm.slane %v10604_v18, 7 }
 0x236   :  { %10588 = vst [vmem:[#allocation138_spill] sm:$0xff] %v6192_v61  ;;  %1522 = vmatpush.msrb.mxu2 %v1030_v35  ;;  %v853_v11 = vsel %vm9935_vm15, %v5919_v8, %v851_v54  ;;  %v295_v35 = vmul.f32 %v6253_v62, %v6132_v34  ;;  %v860_v8 = vsel %vm9935_vm15, %v851_v54, %v10627_v33  ;;  %v10628_v34 = vld [vmem:[#allocation3_spill] sm:$0xff] }
 0x237   :  { %10589 = vst [vmem:[#allocation52_spill] sm:$0xff] %v6195_v21  ;;  %v186_v21 = vmul.f32 %v6223_v36, %v10616_v50  ;;  %v78_v44 = vmul.f32 %v6256_v43, %v10628_v34  ;;  %v888_v29 = vmul.f32 %v6282_v15, %v853_v11  ;;  %v187_v54 = vmul.f32 %v6296_v60, %v6201_v3  ;;  %v3809_v3 = vld [vmem:[%s9439_s1 + $0x8] sm:$0xff] }
 0x238   :  { %10593 = vst [vmem:[#allocation63_spill] sm:$0xff] %v6208_v45  ;;  %v6265_v45 = vperm.slane %v10613_v20, 6  ;;  %v972_v20 = vmul.f32 %v10625_v46, %v10624_v58  ;;  %1523 = vmatpush.msrb.mxu2 %v1001_v16  ;;  %1502 = vmatpush.msrb.mxu0 %v295_v35  ;;  %v943_v16 = vmul.f32 %v6285_v49, %v914_v38  ;;  %v1268_v38 = vpop.f32.mrf.mxu2 }
 0x239   :  { %10597 = vst [vmem:[#allocation45_spill] sm:$0xff] %v6223_v36  ;;  %1464 = vmatpush.msrb.mxu1 %v186_v21  ;;  %v241_v21 = vmul.f32 %v6275_v13, %v6176_v53  ;;  %v889_v53 = vmul.f32 %v6302_v59, %v860_v8  ;;  %v133_v18 = vmul.f32 %v6312_v10, %v6229_v63  ;;  %v1288_v63 = vpop.f32.mrf.mxu3 }
 0x23a   :  { %10601 = vst [vmem:[#allocation40_spill] sm:$0xff] %v6236_v25  ;;  %v942_v50 = vmul.f32 %v6265_v45, %v907_v37  ;;  %1524 = vmatpush.msrb.mxu2 %v972_v20  ;;  %v3808_v37 = vld [vmem:[%s9439_s1] sm:$0xff]  ;;  %v6337_v20 = vadd.f32 %v1288_v63, %v1268_v38 }
 0x23b   :  { %10603 = vst [vmem:[#allocation29_spill] sm:$0xff] %v6241_v14  ;;  %1465 = vmatpush.msrb.mxu1 %v132_v52  ;;  %1503 = vmatpush.msrb.mxu0 %v241_v21  ;;  %v6319_v52 = vperm.slane %v10608_v57, 7  ;;  %v1248_v57 = vpop.f32.mrf.mxu1 }
 0x23c   :  { %10605 = vst [vmem:[#allocation30_spill] sm:$0xff] %v6246_v51  ;;  %1485 = vmatpush.msrb.mxu3 %v942_v50  ;;  %1525 = vmatpush.msrb.mxu2 %v943_v16  ;;  %v6335_v58 = vadd.f32 %v1248_v57, %v1228_v12 }
 0x23d   :  { %10607 = vst [vmem:[#allocation178_spill] sm:$0xff] %v6253_v62  ;;  %1466 = vmatpush.msrb.mxu1 %v78_v44  ;;  %1504 = vmatpush.msrb.mxu0 %v187_v54 }
 0x23e   :  { %10609 = vst [vmem:[#allocation36_spill] sm:$0xff] %v6256_v43  ;;  %1486 = vmatpush.msrb.mxu3 %v888_v29  ;;  %1526 = vmatpush.msrb.mxu2 %v889_v53  ;;  %v1548_v8 = vmul.f32 %v6335_v58, %v6335_v58  ;;  %v1531_v44 = vadd.f32 %v6337_v20, %v6335_v58 }
 0x23f   :  { %10614 = vst [vmem:[#allocation64_spill] sm:$0xff] %v6265_v45  ;;  %3746 = vmatmul.msk.f32.vlgmr.msrb.gmra.mxu3 %vm9934_vm5, %v10583_v22  ;;  %1467 = vmatmul.f32.vlgmr.msrb.gmra.mxu1 %v3808_v37  ;;  %v79_v22 = vmul.f32 %v6319_v52, %v6214_v23  ;;  %v1549_v23 = vmul.f32 %v6337_v20, %v6337_v20 }
 0x240   :  { %10617 = vst [vmem:[#allocation14_spill] sm:$0xff] %v6275_v13  ;;  %1505 = vmatpush.msrb.mxu0 %v133_v18  ;;  %3747 = vmatmul.msk.f32.vlgmr.msrb.gmra.mxu2 %vm9934_vm5, %v3809_v3 }
 0x241   :  { %10620 = vst [vmem:[#allocation21_spill] sm:$0xff] %v6282_v15  ;;  %v1556_v16 = vadd.f32 %v1549_v23, %v1548_v8 }
 0x242   :  { %10621 = vst [vmem:[#allocation44_spill] sm:$0xff] %v6285_v49  ;;  %1506 = vmatpush.msrb.mxu0 %v79_v22  ;;  %v1348_v50 = vpop.f32.mrf.mxu0 }
 0x243   :  { %10623 = vst [vmem:[#allocation9_spill] sm:$0xff] %v6296_v60  ;;  %1507 = vmatmul.f32.vlgmr.msrb.gmra.mxu0 %v3808_v37  ;;  %v3836_v60 = vmov 0  }
 0x244   :  { %10626 = vst [vmem:[#allocation10_spill] sm:$0xff] %v6302_v59  ;;  %3792 = vset.pattern.permute.xlu0 %v3836_v60  ;;  %3793 = vset.pattern.permute.xlu1 %v3836_v60 }
 0x245   :  { %10629 = vst [vmem:[#allocation22_spill] sm:$0xff] %v6312_v10 }
 0x246   :  { %10630 = vst [vmem:[#allocation17_spill] sm:$0xff] %v6319_v52  ;;  %v3835_v52 = vmov 1024.0  }
 0x247   :  { %3794 = vrcp.f32 %v3835_v52 }
 0x24d   :  { %v3795_v10 = vpop.eup %3794 }
 0x24e   :  { %vm1545_vm13 = vweird.f32 %v3795_v10 }
 0x262   :  { %v1308_v11 = vpop.f32.mrf.mxu1 }
 0x26d   :  { %v1328_v35 = vpop.f32.mrf.mxu3 }
 0x26e   :  { %v6343_v34 = vadd.f32 %v1328_v35, %v1308_v11 }
 0x270   :  { %v1550_v54 = vmul.f32 %v6343_v34, %v6343_v34  ;;  %v1532_v18 = vadd.f32 %v1531_v44, %v6343_v34 }
 0x272   :  { %v1557_v57 = vadd.f32 %v1556_v16, %v1550_v54 }
 0x274   :  { %v1368_v33 = vpop.f32.mrf.mxu2 }
 0x275   :  { %v6349_v53 = vadd.f32 %v1368_v33, %v1348_v50 }
 0x277   :  { %v1551_v63 = vmul.f32 %v6349_v53, %v6349_v53  ;;  %v1533_v12 = vadd.f32 %v1532_v18, %v6349_v53 }
 0x279   :  { %v1558_v35 = vadd.f32 %v1557_v57, %v1551_v63 }
 0x29b   :  { %v1388_v21 = vpop.f32.mrf.mxu3 }
 0x2a2   :  { %v1428_v3 = vpop.f32.mrf.mxu2 }
 0x2a4   :  { %v1408_v29 = vpop.f32.mrf.mxu1 }
 0x2a5   :  { %v6352_v37 = vadd.f32 %v1408_v29, %v1388_v21  ;;  %v1448_v22 = vpop.f32.mrf.mxu0 }
 0x2a6   :  { %v6359_v11 = vadd.f32 %v1448_v22, %v1428_v3 }
 0x2a7   :  { %v1552_v38 = vmul.f32 %v6352_v37, %v6352_v37  ;;  %v1534_v50 = vadd.f32 %v1533_v12, %v6352_v37 }
 0x2a8   :  { %v1553_v23 = vmul.f32 %v6359_v11, %v6359_v11 }
 0x2a9   :  { %v1559_v8 = vadd.f32 %v1558_v35, %v1552_v38  ;;  %v1535_v29 = vadd.f32 %v1534_v50, %v6359_v11  ;;  %v1541_v50 = vmul.f32 1024.0, %v3795_v10 }
 0x2ab   :  { %v1560_v57 = vadd.f32 %v1559_v8, %v1553_v23 }
 0x2bc   :  { %v1468_v33 = vpop.f32.mrf.mxu1 }
 0x2c0   :  { %v1508_v21 = vpop.f32.mrf.mxu0 }
 0x2c2   :  { %v1488_v44 = vpop.f32.mrf.mxu3 }
 0x2c3   :  { %v6365_v16 = vadd.f32 %v1488_v44, %v1468_v33  ;;  %v1528_v54 = vpop.f32.mrf.mxu2  ;;  %v1542_v33 = vsub.f32 1.0, %v1541_v50 }
 0x2c4   :  { %v1529_v3 = vadd.f32 %v1528_v54, %v1508_v21 }
 0x2c5   :  { %v1554_v18 = vmul.f32 %v6365_v16, %v6365_v16  ;;  %v1536_v22 = vadd.f32 %v1535_v29, %v6365_v16  ;;  %v1543_v44 = vmul.f32 %v3795_v10, %v1542_v33 }
 0x2c6   :  { %v1555_v12 = vmul.f32 %v1529_v3, %v1529_v3 }
 0x2c7   :  { %v1537_v63 = vadd.f32 %v1536_v22, %v1529_v3  ;;  %v1561_v38 = vadd.f32 %v1560_v57, %v1554_v18  ;;  %v1544_v13 = vadd.f32 %v3795_v10, %v1543_v44 }
 0x2c9   :  { %1538 = vadd.xlane.f32.xlu1 %v1537_v63  ;;  %v1562_v35 = vadd.f32 %v1561_v38, %v1555_v12  ;;  %v6370_v21 = vsel %vm1545_vm13, %v3795_v10, %v1544_v13  ;;  %v1569_v13 = vld [vmem:[%s9440_s2] sm:$0xff] }
 0x2ca   :  { %10631 = vst [vmem:[#allocation8_spill] sm:$0xff] %v6370_v21 }
 0x2cb   :  { %1563 = vadd.xlane.f32.xlu2 %v1562_v35 }
 0x33c   :  { %v1539_v8 = vpop.xlane.xlu1 %1538 }
 0x33d   :  { %v1547_v23 = vmul.f32 %v6370_v21, %v1539_v8  ;;  %v3748_v8 = vld [vmem:[%s9440_s2 + $0x8] sm:$0xff] }
 0x33e   :  { %v1564_v29 = vpop.xlane.xlu2 %1563 }
 0x33f   :  { %v1566_v54 = vmul.f32 %v1547_v23, %v1547_v23  ;;  %v1565_v18 = vmul.f32 %v1564_v29, %v6370_v21 }
 0x341   :  { %v1567_v22 = vsub.f32 %v1565_v18, %v1566_v54 }
 0x343   :  { %v1568_v52 = vmax.f32 %v1567_v22, 0.0 }
 0x345   :  { %v1570_v57 = vadd.f32 1e-05, %v1568_v52 }
 0x347   :  { %3796 = vrsqrt.f32 %v1570_v57  ;;  %vm1577_vm13 = vweird.f32 %v1570_v57 }
 0x34d   :  { %v3797_v63 = vpop.eup %3796 }
 0x34e   :  { %v1572_v12 = vmul.f32 %v3797_v63, %v1570_v57  ;;  %vm1578_vm5 = vweird.f32 %v3797_v63 }
 0x34f   :  { %vm1579_vm15 = vmor %vm1577_vm13, %vm1578_vm5  ;;  %vm10677_vm5 = vcmp.lt.s32.totalorder %v4258_v28, 9  ;;  %vm10702_vm13 = vcmp.lt.s32.totalorder %v4258_v28, 65 }
 0x350   :  { %v1573_v38 = vmul.f32 %v3797_v63, %v1572_v12 }
 0x352   :  { %v1574_v35 = vmul.f32 0.5, %v1573_v38 }
 0x354   :  { %v1575_v60 = vsub.f32 1.5, %v1574_v35 }
 0x356   :  { %v1576_v10 = vmul.f32 %v3797_v63, %v1575_v60 }
 0x358   :  { %v1580_v50 = vsel %vm1579_vm15, %v3797_v63, %v1576_v10  ;;  %vm10688_vm15 = vmmov %vm10677_vm5 }
 0x359   :  { %v1581_v33 = vmul.f32 %v1580_v50, %v1569_v13 }
 0x35b   :  { %1588 = vperm.xlu0 %3792, %v1581_v33   ;;  %v1584_v44 = vmul.f32 %v1581_v33, %v1547_v23 }
 0x35d   :  { %v1585_v29 = vsub.f32 %v3748_v8, %v1584_v44 }
 0x363   :  { %1601 = vperm.xlu0 %3792, %v1585_v29  }
 0x3cd   :  { %v1589_v54 = vpop.permute.xlu0 %1588 }
 0x3ce   :  { %v1591_v18 = vmul.f32 %v1589_v54, %v6335_v58  ;;  %v1593_v22 = vmul.f32 %v1589_v54, %v6343_v34  ;;  %v1594_v52 = vmul.f32 %v1589_v54, %v6349_v53  ;;  %v1598_v13 = vmul.f32 %v1589_v54, %v1529_v3 }
 0x3cf   :  { %v1592_v58 = vmul.f32 %v1589_v54, %v6337_v20  ;;  %v1595_v3 = vmul.f32 %v1589_v54, %v6352_v37  ;;  %v1596_v44 = vmul.f32 %v1589_v54, %v6359_v11  ;;  %v1597_v8 = vmul.f32 %v1589_v54, %v6365_v16 }
 0x3d5   :  { %v1602_v12 = vpop.permute.xlu0 %1601 }
 0x3d6   :  { %v1604_v57 = vadd.f32 %v1602_v12, %v1591_v18  ;;  %v1606_v38 = vadd.f32 %v1602_v12, %v1593_v22  ;;  %v1607_v63 = vadd.f32 %v1602_v12, %v1594_v52  ;;  %v1611_v34 = vadd.f32 %v1602_v12, %v1598_v13 }
 0x3d7   :  { %v1605_v53 = vadd.f32 %v1602_v12, %v1592_v58  ;;  %v1608_v20 = vadd.f32 %v1602_v12, %v1595_v3  ;;  %v1609_v37 = vadd.f32 %v1602_v12, %v1596_v44  ;;  %v1610_v29 = vadd.f32 %v1602_v12, %v1597_v8 }
 0x3d8   :  { %v6383_v35 = vmax.f32 %v1604_v57, 0.0  ;;  %v6385_v23 = vmax.f32 %v1606_v38, 0.0  ;;  %v6387_v60 = vmax.f32 %v1607_v63, 0.0  ;;  %v6396_v10 = vmax.f32 %v1611_v34, 0.0 }
 0x3d9   :  { %v6398_v50 = vmax.f32 %v1605_v53, 0.0  ;;  %v6407_v33 = vmax.f32 %v1608_v20, 0.0  ;;  %v6417_v18 = vmax.f32 %v1609_v37, 0.0  ;;  %v6419_v22 = vmax.f32 %v1610_v29, 0.0 }
 0x3da   :  { %10632 = vst [vmem:[#allocation33_spill] sm:$0xff] %v6385_v23  ;;  %1626 = vrot.lane.b32.xlu1 %v6387_v60, %s3818_s21  ;;  %1624 = vrot.lane.b32.xlu2 %v6385_v23, %s3818_s21 }
 0x3db   :  { %1620 = vrot.lane.b32.xlu0 %v6383_v35, %s3818_s21  ;;  %10633 = vst [vmem:[#allocation25_spill] sm:$0xff] %v6396_v10 }
 0x3dc   :  { %10634 = vst [vmem:[#allocation124_spill] sm:$0xff] %v6417_v18 }
 0x3dd   :  { %10635 = vst [vmem:[#allocation19_spill] sm:$0xff] %v6419_v22 }
 0x3e2   :  { %1634 = vrot.lane.b32.xlu2 %v6396_v10, %s3818_s21  ;;  %1652 = vrot.lane.b32.xlu1 %v6383_v35, %s3819_s6 }
 0x3e3   :  { %1622 = vrot.lane.b32.xlu0 %v6398_v50, %s3818_s21 }
 0x3ea   :  { %1656 = vrot.lane.b32.xlu2 %v6385_v23, %s3819_s6  ;;  %1658 = vrot.lane.b32.xlu1 %v6387_v60, %s3819_s6 }
 0x3eb   :  { %1628 = vrot.lane.b32.xlu0 %v6407_v33, %s3818_s21 }
 0x3f2   :  { %1662 = vrot.lane.b32.xlu2 %v6417_v18, %s3819_s6  ;;  %1664 = vrot.lane.b32.xlu1 %v6419_v22, %s3819_s6 }
 0x3f3   :  { %1630 = vrot.lane.b32.xlu0 %v6417_v18, %s3818_s21 }
 0x3fa   :  { %1684 = vrot.lane.b32.xlu2 %v6383_v35, %s3820_s7  ;;  %1686 = vrot.lane.b32.xlu1 %v6398_v50, %s3820_s7 }
 0x3fb   :  { %1632 = vrot.lane.b32.xlu0 %v6419_v22, %s3818_s21 }
 0x402   :  { %1690 = vrot.lane.b32.xlu2 %v6387_v60, %s3820_s7  ;;  %1692 = vrot.lane.b32.xlu1 %v6407_v33, %s3820_s7 }
 0x403   :  { %1654 = vrot.lane.b32.xlu0 %v6398_v50, %s3819_s6 }
 0x40a   :  { %1696 = vrot.lane.b32.xlu2 %v6419_v22, %s3820_s7  ;;  %1698 = vrot.lane.b32.xlu1 %v6396_v10, %s3820_s7 }
 0x40b   :  { %1660 = vrot.lane.b32.xlu0 %v6407_v33, %s3819_s6 }
 0x412   :  { %1718 = vrot.lane.b32.xlu2 %v6398_v50, %s3821_s8  ;;  %1720 = vrot.lane.b32.xlu1 %v6385_v23, %s3821_s8 }
 0x413   :  { %1666 = vrot.lane.b32.xlu0 %v6396_v10, %s3819_s6 }
 0x41a   :  { %1724 = vrot.lane.b32.xlu2 %v6407_v33, %s3821_s8  ;;  %1726 = vrot.lane.b32.xlu1 %v6417_v18, %s3821_s8 }
 0x41b   :  { %1688 = vrot.lane.b32.xlu0 %v6385_v23, %s3820_s7 }
 0x422   :  { %1730 = vrot.lane.b32.xlu2 %v6396_v10, %s3821_s8  ;;  %1748 = vrot.lane.b32.xlu1 %v6383_v35, %s3822_s9 }
 0x423   :  { %1694 = vrot.lane.b32.xlu0 %v6417_v18, %s3820_s7 }
 0x42a   :  { %1752 = vrot.lane.b32.xlu2 %v6385_v23, %s3822_s9  ;;  %1754 = vrot.lane.b32.xlu1 %v6387_v60, %s3822_s9 }
 0x42b   :  { %1716 = vrot.lane.b32.xlu0 %v6383_v35, %s3821_s8 }
 0x432   :  { %1758 = vrot.lane.b32.xlu2 %v6417_v18, %s3822_s9  ;;  %1760 = vrot.lane.b32.xlu1 %v6419_v22, %s3822_s9 }
 0x433   :  { %1722 = vrot.lane.b32.xlu0 %v6387_v60, %s3821_s8 }
 0x434   :  { %v6475_v11 = vpop.permute.xlu2 %1624 }
 0x43a   :  { %1780 = vrot.lane.b32.xlu2 %v6383_v35, %s3823_s10  ;;  %1782 = vrot.lane.b32.xlu1 %v6398_v50, %s3823_s10 }
 0x43b   :  { %1728 = vrot.lane.b32.xlu0 %v6419_v22, %s3821_s8 }
 0x43c   :  { %v6483_v16 = vpop.permute.xlu2 %1634 }
 0x43d   :  { %10636 = vst [vmem:[#allocation131_spill] sm:$0xff] %v6483_v16 }
 0x442   :  { %1786 = vrot.lane.b32.xlu2 %v6387_v60, %s3823_s10  ;;  %1788 = vrot.lane.b32.xlu1 %v6407_v33, %s3823_s10 }
 0x443   :  { %1750 = vrot.lane.b32.xlu0 %v6398_v50, %s3822_s9 }
 0x444   :  { %v6491_v54 = vpop.permute.xlu2 %1656 }
 0x44a   :  { %1792 = vrot.lane.b32.xlu2 %v6419_v22, %s3823_s10  ;;  %1794 = vrot.lane.b32.xlu1 %v6396_v10, %s3823_s10 }
 0x44b   :  { %1756 = vrot.lane.b32.xlu0 %v6407_v33, %s3822_s9 }
 0x44c   :  { %v6499_v52 = vpop.permute.xlu1 %1626  ;;  %v6501_v12 = vpop.permute.xlu2 %1662 }
 0x44d   :  { %10637 = vst [vmem:[#allocation157_spill] sm:$0xff] %v6501_v12  ;;  %v6503_v57 = vpop.permute.xlu0 %1620 }
 0x452   :  { %1814 = vrot.lane.b32.xlu2 %v6398_v50, %s3824_s11  ;;  %1816 = vrot.lane.b32.xlu1 %v6385_v23, %s3824_s11 }
 0x453   :  { %1762 = vrot.lane.b32.xlu0 %v6396_v10, %s3822_s9 }
 0x454   :  { %v6511_v38 = vpop.permute.xlu2 %1684  ;;  %v6513_v63 = vpop.permute.xlu1 %1652 }
 0x455   :  { %v6515_v13 = vpop.permute.xlu0 %1622 }
 0x45a   :  { %2070 = vrot.lane.b32.xlu2 %v6398_v50, %s3828_s15  ;;  %2036 = vrot.lane.b32.xlu1 %v6383_v35, %s3829_s16 }
 0x45b   :  { %1784 = vrot.lane.b32.xlu0 %v6385_v23, %s3823_s10 }
 0x45c   :  { %v6523_v58 = vpop.permute.xlu2 %1690  ;;  %v6525_v34 = vpop.permute.xlu1 %1658 }
 0x45d   :  { %v6527_v53 = vpop.permute.xlu0 %1628 }
 0x45e   :  { %10638 = vst [vmem:[#allocation155_spill] sm:$0xff] %v6527_v53 }
 0x462   :  { %2072 = vrot.lane.b32.xlu2 %v6385_v23, %s3828_s15  ;;  %2040 = vrot.lane.b32.xlu1 %v6385_v23, %s3829_s16 }
 0x463   :  { %1790 = vrot.lane.b32.xlu0 %v6417_v18, %s3823_s10 }
 0x464   :  { %v6535_v3 = vpop.permute.xlu2 %1696  ;;  %v6537_v20 = vpop.permute.xlu1 %1664 }
 0x465   :  { %10639 = vst [vmem:[#allocation23_spill] sm:$0xff] %v6535_v3  ;;  %v6539_v44 = vpop.permute.xlu0 %1630 }
 0x466   :  { %10640 = vst [vmem:[#allocation158_spill] sm:$0xff] %v6537_v20 }
 0x467   :  { %10641 = vst [vmem:[#allocation13_spill] sm:$0xff] %v6539_v44 }
 0x46a   :  { %2018 = vrot.lane.b32.xlu2 %v6396_v10, %s3830_s17  ;;  %1972 = vrot.lane.b32.xlu1 %v6383_v35, %s3831_s18 }
 0x46b   :  { %1812 = vrot.lane.b32.xlu0 %v6383_v35, %s3824_s11 }
 0x46c   :  { %v6547_v8 = vpop.permute.xlu2 %1718  ;;  %v6549_v37 = vpop.permute.xlu1 %1686 }
 0x46d   :  { %v6551_v29 = vpop.permute.xlu0 %1632 }
 0x46e   :  { %10642 = vst [vmem:[#allocation163_spill] sm:$0xff] %v6551_v29 }
 0x472   :  { %2006 = vrot.lane.b32.xlu2 %v6398_v50, %s3830_s17  ;;  %1940 = vrot.lane.b32.xlu1 %v6383_v35, %s3832_s19 }
 0x473   :  { %2068 = vrot.lane.b32.xlu0 %v6383_v35, %s3828_s15 }
 0x474   :  { %v6559_v21 = vpop.permute.xlu2 %1724  ;;  %v6561_v62 = vpop.permute.xlu1 %1692 }
 0x475   :  { %10643 = vst [vmem:[#allocation6_spill] sm:$0xff] %v6559_v21  ;;  %v6563_v25 = vpop.permute.xlu0 %1654 }
 0x476   :  { %10644 = vst [vmem:[#allocation181_spill] sm:$0xff] %v6561_v62  ;;  %v10676_v62 = vld [vmem:[#allocation104_spill] sm:$0xff] }
 0x47a   :  { %1974 = vrot.lane.b32.xlu2 %v6398_v50, %s3831_s18  ;;  %1908 = vrot.lane.b32.xlu1 %v6383_v35, %s3827_s14 }
 0x47b   :  { %2038 = vrot.lane.b32.xlu0 %v6398_v50, %s3829_s16 }
 0x47c   :  { %v6571_v43 = vpop.permute.xlu2 %1730  ;;  %v6573_v51 = vpop.permute.xlu1 %1698 }
 0x47d   :  { %10645 = vst [vmem:[#allocation3_spill] sm:$0xff] %v6571_v43  ;;  %v6575_v36 = vpop.permute.xlu0 %1660 }
 0x47e   :  { %10646 = vst [vmem:[#allocation225_spill] sm:$0xff] %v6573_v51 }
 0x47f   :  { %10647 = vst [vmem:[#allocation226_spill] sm:$0xff] %v6575_v36 }
 0x482   :  { %1942 = vrot.lane.b32.xlu2 %v6398_v50, %s3832_s19  ;;  %1876 = vrot.lane.b32.xlu1 %v6383_v35, %s3826_s13 }
 0x483   :  { %2004 = vrot.lane.b32.xlu0 %v6383_v35, %s3830_s17 }
 0x484   :  { %v6583_v59 = vpop.permute.xlu2 %1752  ;;  %v6585_v49 = vpop.permute.xlu1 %1720 }
 0x485   :  { %v6587_v15 = vpop.permute.xlu0 %1666 }
 0x486   :  { %10648 = vst [vmem:[#allocation227_spill] sm:$0xff] %v6587_v15 }
 0x48a   :  { %1910 = vrot.lane.b32.xlu2 %v6398_v50, %s3827_s14  ;;  %2074 = vrot.lane.b32.xlu1 %v6387_v60, %s3828_s15 }
 0x48b   :  { %1986 = vrot.lane.b32.xlu0 %v6396_v10, %s3831_s18 }
 0x48c   :  { %v6595_v46 = vpop.permute.xlu2 %1758  ;;  %v6597_v14 = vpop.permute.xlu1 %1726 }
 0x48d   :  { %10649 = vst [vmem:[#allocation228_spill] sm:$0xff] %v6595_v46  ;;  %v6599_v45 = vpop.permute.xlu0 %1688 }
 0x48e   :  { %10650 = vst [vmem:[#allocation229_spill] sm:$0xff] %v6597_v14 }
 0x492   :  { %1858 = vrot.lane.b32.xlu2 %v6396_v10, %s3825_s12  ;;  %1878 = vrot.lane.b32.xlu1 %v6398_v50, %s3826_s13 }
 0x493   :  { %1954 = vrot.lane.b32.xlu0 %v6396_v10, %s3832_s19 }
 0x494   :  { %v6607_v4 = vpop.permute.xlu2 %1780  ;;  %v6609_v42 = vpop.permute.xlu1 %1748 }
 0x495   :  { %v6611_v17 = vpop.permute.xlu0 %1694 }
 0x496   :  { %10651 = vst [vmem:[#allocation230_spill] sm:$0xff] %v6611_v17 }
 0x49a   :  { %2076 = vrot.lane.b32.xlu2 %v6407_v33, %s3828_s15  ;;  %1826 = vrot.lane.b32.xlu1 %v6396_v10, %s3824_s11 }
 0x49b   :  { %1922 = vrot.lane.b32.xlu0 %v6396_v10, %s3827_s14 }
 0x49c   :  { %v6619_v48 = vpop.permute.xlu2 %1786  ;;  %v6621_v26 = vpop.permute.xlu1 %1754 }
 0x49d   :  { %v6623_v27 = vpop.permute.xlu0 %1716 }
 0x4a2   :  { %2044 = vrot.lane.b32.xlu2 %v6407_v33, %s3829_s16  ;;  %1880 = vrot.lane.b32.xlu1 %v6385_v23, %s3826_s13 }
 0x4a3   :  { %1890 = vrot.lane.b32.xlu0 %v6396_v10, %s3826_s13 }
 0x4a4   :  { %v6631_v29 = vpop.permute.xlu2 %1792  ;;  %v6633_v61 = vpop.permute.xlu1 %1760 }
 0x4a5   :  { %10652 = vst [vmem:[#allocation231_spill] sm:$0xff] %v6631_v29  ;;  %v6635_v24 = vpop.permute.xlu0 %1722 }
 0x4a6   :  { %10653 = vst [vmem:[#allocation232_spill] sm:$0xff] %v6633_v61 }
 0x4aa   :  { %1848 = vrot.lane.b32.xlu2 %v6385_v23, %s3825_s12  ;;  %1976 = vrot.lane.b32.xlu1 %v6385_v23, %s3831_s18 }
 0x4ab   :  { %1844 = vrot.lane.b32.xlu0 %v6383_v35, %s3825_s12 }
 0x4ac   :  { %v6643_v39 = vpop.permute.xlu2 %1814  ;;  %v6645_v20 = vpop.permute.xlu1 %1782 }
 0x4ad   :  { %v6647_v47 = vpop.permute.xlu0 %1728 }
 0x4ae   :  { %10654 = vst [vmem:[#allocation233_spill] sm:$0xff] %v6647_v47 }
 0x4b2   :  { %1944 = vrot.lane.b32.xlu2 %v6385_v23, %s3832_s19  ;;  %1978 = vrot.lane.b32.xlu1 %v6387_v60, %s3831_s18 }
 0x4b3   :  { %2042 = vrot.lane.b32.xlu0 %v6387_v60, %s3829_s16 }
 0x4b4   :  { %v2071_v6 = vpop.permute.xlu2 %2070  ;;  %v6655_v3 = vpop.permute.xlu1 %1788 }
 0x4b5   :  { %10655 = vst [vmem:[#allocation234_spill] sm:$0xff] %v6655_v3  ;;  %v6657_v0 = vpop.permute.xlu0 %1750 }
 0x4ba   :  { %1946 = vrot.lane.b32.xlu2 %v6387_v60, %s3832_s19  ;;  %1882 = vrot.lane.b32.xlu1 %v6387_v60, %s3826_s13 }
 0x4bb   :  { %1846 = vrot.lane.b32.xlu0 %v6398_v50, %s3825_s12 }
 0x4bc   :  { %v6665_v47 = vpop.permute.xlu2 %2072  ;;  %v6667_v7 = vpop.permute.xlu1 %1794 }
 0x4bd   :  { %10656 = vst [vmem:[#allocation235_spill] sm:$0xff] %v6665_v47  ;;  %v2089_v61 = vsel %vm798_vm9, %v2071_v6, %v6665_v47  ;;  %v6672_v19 = vpop.permute.xlu0 %1756 }
 0x4be   :  { %10657 = vst [vmem:[#allocation236_spill] sm:$0xff] %v6667_v7  ;;  %v2093_v29 = vmul.f32 %v2089_v61, %v10659_v41 }
 0x4bf   :  { %10658 = vst [vmem:[#allocation237_spill] sm:$0xff] %v6672_v19 }
 0x4c0   :  { %2282 = vmatpush.msra.mxu2 %v2093_v29 }
 0x4c2   :  { %1850 = vrot.lane.b32.xlu2 %v6387_v60, %s3825_s12  ;;  %1884 = vrot.lane.b32.xlu1 %v6407_v33, %s3826_s13 }
 0x4c3   :  { %2008 = vrot.lane.b32.xlu0 %v6385_v23, %s3830_s17 }
 0x4c4   :  { %v6681_v55 = vpop.permute.xlu2 %2018  ;;  %v6683_v12 = vpop.permute.xlu1 %1816 }
 0x4c5   :  { %10660 = vst [vmem:[#allocation238_spill] sm:$0xff] %v6681_v55  ;;  %v6685_v44 = vpop.permute.xlu0 %1762 }
 0x4c6   :  { %10661 = vst [vmem:[#allocation239_spill] sm:$0xff] %v6685_v44 }
 0x4ca   :  { %1852 = vrot.lane.b32.xlu2 %v6407_v33, %s3825_s12  ;;  %2078 = vrot.lane.b32.xlu1 %v6417_v18, %s3828_s15 }
 0x4cb   :  { %2010 = vrot.lane.b32.xlu0 %v6387_v60, %s3830_s17 }
 0x4cc   :  { %v6693_v61 = vpop.permute.xlu2 %2006  ;;  %v6695_v29 = vpop.permute.xlu1 %2036 }
 0x4cd   :  { %10662 = vst [vmem:[#allocation240_spill] sm:$0xff] %v6693_v61  ;;  %v6697_v41 = vpop.permute.xlu0 %1784 }
 0x4ce   :  { %10663 = vst [vmem:[#allocation241_spill] sm:$0xff] %v6695_v29 }
 0x4d2   :  { %2046 = vrot.lane.b32.xlu2 %v6417_v18, %s3829_s16  ;;  %2080 = vrot.lane.b32.xlu1 %v6419_v22, %s3828_s15 }
 0x4d3   :  { %1912 = vrot.lane.b32.xlu0 %v6385_v23, %s3827_s14 }
 0x4d4   :  { %v6705_v9 = vpop.permute.xlu2 %1974  ;;  %v6707_v17 = vpop.permute.xlu1 %2040 }
 0x4d5   :  { %10664 = vst [vmem:[#allocation242_spill] sm:$0xff] %v6705_v9  ;;  %v6709_v14 = vpop.permute.xlu0 %1790 }
 0x4d6   :  { %10665 = vst [vmem:[#allocation243_spill] sm:$0xff] %v6707_v17 }
 0x4d7   :  { %10666 = vst [vmem:[#allocation244_spill] sm:$0xff] %v6709_v14 }
 0x4da   :  { %2134 = vrot.lane.b32.xlu2 %v6398_v50, %s3833_s20  ;;  %2048 = vrot.lane.b32.xlu1 %v6419_v22, %s3829_s16 }
 0x4db   :  { %1914 = vrot.lane.b32.xlu0 %v6387_v60, %s3827_s14 }
 0x4dc   :  { %v6717_v30 = vpop.permute.xlu2 %1942  ;;  %v1973_v46 = vpop.permute.xlu1 %1972 }
 0x4dd   :  { %10667 = vst [vmem:[#allocation245_spill] sm:$0xff] %v6717_v30  ;;  %v6719_v31 = vpop.permute.xlu0 %1812 }
 0x4e2   :  { %2102 = vrot.lane.b32.xlu2 %v6398_v50, %s3834_s26  ;;  %2136 = vrot.lane.b32.xlu1 %v6385_v23, %s3833_s20 }
 0x4e3   :  { %1818 = vrot.lane.b32.xlu0 %v6387_v60, %s3824_s11 }
 0x4e4   :  { %v6727_v14 = vpop.permute.xlu2 %1910  ;;  %v1941_v5 = vpop.permute.xlu1 %1940 }
 0x4e5   :  { %10668 = vst [vmem:[#allocation246_spill] sm:$0xff] %v6727_v14  ;;  %v6729_v2 = vpop.permute.xlu0 %2068  ;;  %v1962_v36 = vsel %vm582_vm14, %v1941_v5, %v6717_v30  ;;  %v6975_v30 = vsel %vm366_vm2, %v6643_v39, %v6683_v12 }
 0x4e6   :  { %10669 = vst [vmem:[#allocation247_spill] sm:$0xff] %v6729_v2  ;;  %v2090_v1 = vsel %vm798_vm9, %v6729_v2, %v2071_v6  ;;  %v10673_v2 = vld [vmem:[#allocation101_spill] sm:$0xff] }
 0x4e7   :  { %v2092_v40 = vmul.f32 %v2090_v1, %v10670_v32 }
 0x4e9   :  { %2242 = vmatpush.msra.mxu3 %v2092_v40  ;;  %v10672_v40 = vld [vmem:[#allocation98_spill] sm:$0xff] }
 0x4ea   :  { %2104 = vrot.lane.b32.xlu2 %v6385_v23, %s3834_s26  ;;  %1980 = vrot.lane.b32.xlu1 %v6407_v33, %s3831_s18 }
 0x4eb   :  { %1820 = vrot.lane.b32.xlu0 %v6407_v33, %s3824_s11 }
 0x4ec   :  { %v6741_v56 = vpop.permute.xlu2 %1858  ;;  %v1909_v47 = vpop.permute.xlu1 %1908 }
 0x4ed   :  { %10671 = vst [vmem:[#allocation248_spill] sm:$0xff] %v6741_v56  ;;  %v2039_v53 = vpop.permute.xlu0 %2038 }
 0x4ee   :  { %v2057_v6 = vsel %vm744_vm10, %v2039_v53, %v6707_v17  ;;  %v2058_v1 = vsel %vm744_vm10, %v6695_v29, %v2039_v53  ;;  %v10675_v17 = vld [vmem:[#allocation102_spill] sm:$0xff] }
 0x4ef   :  { %v2060_v32 = vmul.f32 %v2058_v1, %v10672_v40  ;;  %v2061_v23 = vmul.f32 %v2057_v6, %v10673_v2  ;;  %v10674_v2 = vld [vmem:[#allocation115_spill] sm:$0xff] }
 0x4f1   :  { %2243 = vmatpush.msra.mxu3 %v2060_v32  ;;  %2283 = vmatpush.msra.mxu2 %v2061_v23  ;;  %v1994_v32 = vsel %vm636_vm12, %v1973_v46, %v6705_v9 }
 0x4f2   :  { %1948 = vrot.lane.b32.xlu2 %v6407_v33, %s3832_s19  ;;  %1982 = vrot.lane.b32.xlu1 %v6417_v18, %s3831_s18  ;;  %v1997_v9 = vmul.f32 %v1994_v32, %v10676_v62 }
 0x4f3   :  { %2132 = vrot.lane.b32.xlu0 %v6383_v35, %s3833_s20  ;;  %2244 = vmatpush.msra.mxu3 %v6383_v35 }
 0x4f4   :  { %2284 = vmatpush.msra.mxu2 %v6398_v50  ;;  %v6759_v53 = vpop.permute.xlu2 %2076  ;;  %v1877_v1 = vpop.permute.xlu1 %1876 }
 0x4f5   :  { %v2005_v40 = vpop.permute.xlu0 %2004 }
 0x4f6   :  { %v2026_v23 = vsel %vm690_vm11, %v2005_v40, %v6693_v61  ;;  %v2027_v6 = vsel %vm690_vm11, %v6681_v55, %v2005_v40  ;;  %v1930_v61 = vsel %vm10677_vm5, %v1909_v47, %v6727_v14  ;;  %v10678_v40 = vld [vmem:[#allocation107_spill] sm:$0xff]  ;;  %v10716_v14 = vld [vmem:[#allocation70_spill] sm:$0xff]  ;;  %vm10724_vm5 = vmmov %vm10702_vm13 }
 0x4f7   :  { %v2028_v29 = vmul.f32 %v2027_v6, %v10674_v2  ;;  %v2029_v50 = vmul.f32 %v2026_v23, %v10675_v17  ;;  %v1965_v23 = vmul.f32 %v1962_v36, %v10678_v40  ;;  %v10681_v2 = vld [vmem:[#allocation125_spill] sm:$0xff] }
 0x4f9   :  { %2245 = vmatpush.msra.mxu3 %v2028_v29  ;;  %2285 = vmatpush.msra.mxu2 %v2029_v50  ;;  %v10680_v50 = vld [vmem:[#allocation110_spill] sm:$0xff] }
 0x4fa   :  { %1950 = vrot.lane.b32.xlu2 %v6417_v18, %s3832_s19  ;;  %1918 = vrot.lane.b32.xlu1 %v6417_v18, %s3827_s14  ;;  %v1933_v62 = vmul.f32 %v1930_v61, %v10680_v50  ;;  %v10684_v61 = vld [vmem:[#allocation111_spill] sm:$0xff] }
 0x4fb   :  { %2100 = vrot.lane.b32.xlu0 %v6383_v35, %s3834_s26  ;;  %2286 = vmatpush.msra.mxu2 %v1997_v9 }
 0x4fc   :  { %v6786_v29 = vpop.permute.xlu2 %2044  ;;  %v6788_v6 = vpop.permute.xlu1 %2074 }
 0x4fd   :  { %2287 = vmatpush.msra.mxu2 %v1965_v23  ;;  %v6790_v32 = vpop.permute.xlu0 %1986 }
 0x4fe   :  { %10679 = vst [vmem:[#allocation249_spill] sm:$0xff] %v6790_v32  ;;  %v1995_v17 = vsel %vm636_vm12, %v6790_v32, %v1973_v46  ;;  %v6881_v32 = vsel %vm312_vm3, %v6667_v7, %v6607_v4  ;;  %v10705_v7 = vld [vmem:[#allocation151_spill] sm:$0xff] }
 0x4ff   :  { %2288 = vmatpush.msra.mxu2 %v1933_v62  ;;  %v1996_v55 = vmul.f32 %v1995_v17, %v10681_v2  ;;  %v10683_v62 = vld [vmem:[#allocation57_spill] sm:$0xff]  ;;  %10698 = vst [vmem:[#allocation258_spill] sm:$0xff] %v6881_v32 }
 0x500   :  { %v10685_v2 = vld [vmem:[#allocation129_spill] sm:$0xff] }
 0x501   :  { %2246 = vmatpush.msra.mxu3 %v1996_v55 }
 0x502   :  { %2138 = vrot.lane.b32.xlu2 %v6387_v60, %s3833_s20  ;;  %1886 = vrot.lane.b32.xlu1 %v6417_v18, %s3826_s13 }
 0x503   :  { %2012 = vrot.lane.b32.xlu0 %v6407_v33, %s3830_s17 }
 0x504   :  { %v6803_v9 = vpop.permute.xlu2 %1848  ;;  %v1879_v36 = vpop.permute.xlu1 %1878 }
 0x505   :  { %v1898_v35 = vsel %vm474_vm0, %v1877_v1, %v1879_v36  ;;  %v6807_v46 = vpop.permute.xlu0 %1954 }
 0x506   :  { %10682 = vst [vmem:[#allocation250_spill] sm:$0xff] %v6807_v46  ;;  %v2228_v17 = vmul.f32 %v1898_v35, %v10683_v62  ;;  %v1963_v55 = vsel %vm582_vm14, %v6807_v46, %v1941_v5  ;;  %v1901_v23 = vmul.f32 %v1898_v35, %v10684_v61  ;;  %v10694_v61 = vld [vmem:[#allocation140_spill] sm:$0xff] }
 0x507   :  { %v1964_v50 = vmul.f32 %v1963_v55, %v10685_v2 }
 0x508   :  { %2267 = vmatpush.msra.mxu1 %v2228_v17  ;;  %2289 = vmatpush.msra.mxu2 %v1901_v23 }
 0x509   :  { %2247 = vmatpush.msra.mxu3 %v1964_v50  ;;  %v10689_v50 = vld [vmem:[#allocation136_spill] sm:$0xff] }
 0x50a   :  { %2106 = vrot.lane.b32.xlu2 %v6387_v60, %s3834_s26  ;;  %2140 = vrot.lane.b32.xlu1 %v6407_v33, %s3833_s20 }
 0x50b   :  { %2014 = vrot.lane.b32.xlu0 %v6417_v18, %s3830_s17 }
 0x50c   :  { %v6821_v62 = vpop.permute.xlu2 %1944  ;;  %v6823_v40 = vpop.permute.xlu1 %1826 }
 0x50d   :  { %10686 = vst [vmem:[#allocation251_spill] sm:$0xff] %v6823_v40  ;;  %v6825_v5 = vpop.permute.xlu0 %1922 }
 0x50e   :  { %10687 = vst [vmem:[#allocation252_spill] sm:$0xff] %v6825_v5  ;;  %v1931_v35 = vsel %vm10688_vm15, %v6825_v5, %v1909_v47  ;;  %vm10726_vm15 = vmmov %vm10724_vm5 }
 0x50f   :  { %v1932_v17 = vmul.f32 %v1931_v35, %v10689_v50  ;;  %v10692_v35 = vld [vmem:[#allocation66_spill] sm:$0xff] }
 0x511   :  { %2248 = vmatpush.msra.mxu3 %v1932_v17 }
 0x512   :  { %1888 = vrot.lane.b32.xlu2 %v6419_v22, %s3826_s13  ;;  %2108 = vrot.lane.b32.xlu1 %v6407_v33, %s3834_s26 }
 0x513   :  { %1916 = vrot.lane.b32.xlu0 %v6407_v33, %s3827_s14 }
 0x514   :  { %v6837_v55 = vpop.permute.xlu2 %1946  ;;  %v1881_v23 = vpop.permute.xlu1 %1880 }
 0x515   :  { %v6841_v2 = vsel %vm474_vm0, %v1879_v36, %v1881_v23  ;;  %v6843_v47 = vpop.permute.xlu0 %1890 }
 0x516   :  { %10690 = vst [vmem:[#allocation253_spill] sm:$0xff] %v6841_v2  ;;  %v2229_v17 = vmul.f32 %v6841_v2, %v10692_v35  ;;  %v6850_v50 = vsel %vm474_vm0, %v6843_v47, %v1877_v1 }
 0x517   :  { %10691 = vst [vmem:[#allocation254_spill] sm:$0xff] %v6843_v47  ;;  %v1900_v5 = vmul.f32 %v6850_v50, %v10694_v61  ;;  %v10697_v61 = vld [vmem:[#allocation144_spill] sm:$0xff] }
 0x518   :  { %10693 = vst [vmem:[#allocation255_spill] sm:$0xff] %v6850_v50  ;;  %2307 = vmatpush.msra.mxu0 %v2229_v17  ;;  %v6868_v17 = vsel %vm366_vm2, %v6823_v40, %v6719_v31  ;;  %v10699_v50 = vld [vmem:[#allocation146_spill] sm:$0xff]  ;;  %v6889_v40 = vsel %vm10068_vm4, %v6685_v44, %v6609_v42 }
 0x519   :  { %2249 = vmatpush.msra.mxu3 %v1900_v5  ;;  %10695 = vst [vmem:[#allocation256_spill] sm:$0xff] %v6868_v17  ;;  %v1836_v47 = vmul.f32 %v6868_v17, %v10699_v50  ;;  %v6903_v50 = vsel %vm10702_vm13, %v6571_v43, %v6623_v27  ;;  %v10709_v43 = vld [vmem:[#allocation7_spill] sm:$0xff]  ;;  %vm10748_vm13 = vcmp.lt.s32.totalorder %v4258_v28, 120 }
 0x51a   :  { %1856 = vrot.lane.b32.xlu2 %v6419_v22, %s3825_s12  ;;  %2016 = vrot.lane.b32.xlu1 %v6419_v22, %s3830_s17  ;;  %10700 = vst [vmem:[#allocation259_spill] sm:$0xff] %v6889_v40 }
 0x51b   :  { %2082 = vrot.lane.b32.xlu0 %v6396_v10, %s3828_s15  ;;  %10703 = vst [vmem:[#allocation260_spill] sm:$0xff] %v6903_v50 }
 0x51c   :  { %v6860_v36 = vpop.permute.xlu2 %1850  ;;  %v6862_v35 = vpop.permute.xlu1 %1976 }
 0x51d   :  { %v1845_v1 = vpop.permute.xlu0 %1844 }
 0x51e   :  { %v6873_v5 = vsel %vm420_vm1, %v6741_v56, %v1845_v1  ;;  %v1772_v56 = vmul.f32 %v6889_v40, %v10705_v7  ;;  %v6933_v40 = vsel %vm43_vm8, %v6483_v16, %v6503_v57  ;;  %v10712_v16 = vld [vmem:[#allocation162_spill] sm:$0xff] }
 0x51f   :  { %10696 = vst [vmem:[#allocation257_spill] sm:$0xff] %v6873_v5  ;;  %v1868_v46 = vmul.f32 %v6873_v5, %v10697_v61 }
 0x520   :  { %10710 = vst [vmem:[#allocation264_spill] sm:$0xff] %v6933_v40 }
 0x521   :  { %2250 = vmatpush.msra.mxu3 %v1868_v46  ;;  %v10701_v46 = vld [vmem:[#allocation149_spill] sm:$0xff] }
 0x522   :  { %1984 = vrot.lane.b32.xlu2 %v6419_v22, %s3831_s18  ;;  %1952 = vrot.lane.b32.xlu1 %v6419_v22, %s3832_s19  ;;  %v1804_v61 = vmul.f32 %v6881_v32, %v10701_v46  ;;  %v10707_v46 = vld [vmem:[#allocation154_spill] sm:$0xff] }
 0x523   :  { %2050 = vrot.lane.b32.xlu0 %v6396_v10, %s3829_s16  ;;  %2251 = vmatpush.msra.mxu3 %v1836_v47  ;;  %v6917_v47 = vsel %vm150_vm6, %v6573_v51, %v6511_v38  ;;  %v1740_v32 = vmul.f32 %v6903_v50, %v10707_v46  ;;  %v10713_v51 = vld [vmem:[#allocation170_spill] sm:$0xff] }
 0x524   :  { %v6905_v17 = vpop.permute.xlu2 %1852  ;;  %v6907_v5 = vpop.permute.xlu1 %1978  ;;  %10706 = vst [vmem:[#allocation262_spill] sm:$0xff] %v6917_v47  ;;  %v1708_v7 = vmul.f32 %v6917_v47, %v10709_v43 }
 0x525   :  { %10704 = vst [vmem:[#allocation261_spill] sm:$0xff] %v6905_v17  ;;  %2252 = vmatpush.msra.mxu3 %v1804_v61  ;;  %v6909_v44 = vpop.permute.xlu0 %2042  ;;  %v6925_v61 = vsel %vm96_vm7, %v6587_v15, %v6513_v63  ;;  %v1644_v15 = vmul.f32 %v6933_v40, %v10712_v16  ;;  %v10715_v16 = vld [vmem:[#allocation113_spill] sm:$0xff] }
 0x526   :  { %10708 = vst [vmem:[#allocation263_spill] sm:$0xff] %v6925_v61 }
 0x527   :  { %2253 = vmatpush.msra.mxu3 %v1772_v56  ;;  %v10711_v56 = vld [vmem:[#allocation159_spill] sm:$0xff] }
 0x529   :  { %2254 = vmatpush.msra.mxu3 %v1740_v32  ;;  %v1676_v32 = vmul.f32 %v6925_v61, %v10711_v56 }
 0x52a   :  { %2142 = vrot.lane.b32.xlu2 %v6417_v18, %s3833_s20  ;;  %2110 = vrot.lane.b32.xlu1 %v6417_v18, %s3834_s26 }
 0x52b   :  { %1854 = vrot.lane.b32.xlu0 %v6417_v18, %s3825_s12  ;;  %2255 = vmatpush.msra.mxu3 %v1708_v7 }
 0x52c   :  { %v6943_v43 = vpop.permute.xlu2 %2046  ;;  %v6945_v46 = vpop.permute.xlu1 %1882 }
 0x52d   :  { %v6950_v47 = vsel %vm474_vm0, %v1881_v23, %v6945_v46  ;;  %2256 = vmatpush.msra.mxu3 %v1676_v32  ;;  %v1847_v50 = vpop.permute.xlu0 %1846  ;;  %v1834_v23 = vsel %vm366_vm2, %v6719_v31, %v6643_v39  ;;  %v10714_v32 = vld [vmem:[#allocation60_spill] sm:$0xff]  ;;  %v1802_v31 = vsel %vm312_vm3, %v6607_v4, %v6645_v20  ;;  %v6991_v39 = vsel %vm312_vm3, %v6645_v20, %v6697_v41  ;;  %v10719_v4 = vld [vmem:[#allocation73_spill] sm:$0xff]  ;;  %v10720_v20 = vld [vmem:[#allocation171_spill] sm:$0xff] }
 0x52e   :  { %v2230_v7 = vmul.f32 %v6950_v47, %v10713_v51  ;;  %v6959_v56 = vsel %vm420_vm1, %v1847_v50, %v6803_v9  ;;  %v1866_v61 = vsel %vm420_vm1, %v1845_v1, %v1847_v50  ;;  %v6981_v50 = vsel %vm420_vm1, %v6803_v9, %v6860_v36  ;;  %v10718_v1 = vld [vmem:[#allocation116_spill] sm:$0xff] }
 0x52f   :  { %2257 = vmatpush.msra.mxu3 %v1644_v15  ;;  %v2220_v2 = vmul.f32 %v1866_v61, %v10714_v32  ;;  %v1869_v40 = vmul.f32 %v1866_v61, %v10715_v16  ;;  %v2221_v51 = vmul.f32 %v6959_v56, %v10716_v14  ;;  %v10717_v15 = vld [vmem:[#allocation61_spill] sm:$0xff]  ;;  %v1837_v61 = vmul.f32 %v1834_v23, %v10718_v1  ;;  %v10723_v14 = vld [vmem:[#allocation119_spill] sm:$0xff] }
 0x530   :  { %v2212_v9 = vmul.f32 %v1834_v23, %v10717_v15  ;;  %v10722_v15 = vld [vmem:[#allocation62_spill] sm:$0xff]  ;;  %v1805_v32 = vmul.f32 %v1802_v31, %v10723_v14 }
 0x531   :  { %2347 = vmatpush.msrb.mxu3 %v2230_v7  ;;  %2268 = vmatpush.msra.mxu1 %v2220_v2  ;;  %v1770_v2 = vsel %vm10068_vm4, %v6609_v42, %v6657_v0  ;;  %v7013_v7 = vsel %vm10068_vm4, %v6657_v0, %v6583_v59  ;;  %v2204_v1 = vmul.f32 %v1802_v31, %v10722_v15  ;;  %v10727_v31 = vld [vmem:[#allocation65_spill] sm:$0xff]  ;;  %v10728_v15 = vld [vmem:[#allocation122_spill] sm:$0xff] }
 0x532   :  { %2290 = vmatpush.msra.mxu2 %v1869_v40  ;;  %2308 = vmatpush.msra.mxu0 %v2221_v51  ;;  %v2213_v51 = vmul.f32 %v6975_v30, %v10719_v4  ;;  %v2222_v40 = vmul.f32 %v6981_v50, %v10720_v20  ;;  %v1738_v20 = vsel %vm10724_vm5, %v6623_v27, %v6547_v8  ;;  %v10725_v4 = vld [vmem:[#allocation76_spill] sm:$0xff]  ;;  %vm10749_vm5 = vcmp.lt.s32.totalorder %v4258_v28, 119 }
 0x533   :  { %2146 = vrot.lane.b32.xlu2 %v6396_v10, %s3833_s20  ;;  %2112 = vrot.lane.b32.xlu1 %v6419_v22, %s3834_s26  ;;  %v2205_v0 = vmul.f32 %v6991_v39, %v10725_v4  ;;  %v2196_v14 = vmul.f32 %v1770_v2, %v10727_v31  ;;  %v1773_v16 = vmul.f32 %v1770_v2, %v10728_v15  ;;  %v10731_v2 = vld [vmem:[#allocation123_spill] sm:$0xff]  ;;  %v10743_v15 = vld [vmem:[#allocation132_spill] sm:$0xff]  ;;  %v10744_v4 = vld [vmem:[#allocation133_spill] sm:$0xff] }
 0x534   :  { %1822 = vrot.lane.b32.xlu0 %v6417_v18, %s3824_s11  ;;  %2269 = vmatpush.msra.mxu1 %v2212_v9  ;;  %v7015_v42 = vpop.permute.xlu2 %2134  ;;  %v7017_v23 = vpop.permute.xlu1 %1884  ;;  %v1706_v27 = vsel %vm150_vm6, %v6511_v38, %v6549_v37  ;;  %v1741_v31 = vmul.f32 %v1738_v20, %v10731_v2  ;;  %v1674_v38 = vsel %vm96_vm7, %v6513_v63, %v6563_v25 }
 0x535   :  { %2291 = vmatpush.msra.mxu2 %v1837_v61  ;;  %10721 = vst [vmem:[#allocation265_spill] sm:$0xff] %v7017_v23  ;;  %2309 = vmatpush.msra.mxu0 %v2213_v51  ;;  %v7027_v9 = vpop.permute.xlu0 %2008  ;;  %v7033_v61 = vsel %vm10726_vm15, %v6547_v8, %v6585_v49  ;;  %v10729_v51 = vld [vmem:[#allocation81_spill] sm:$0xff]  ;;  %v7047_v8 = vsel %vm150_vm6, %v6549_v37, %v6599_v45 }
 0x536   :  { %2348 = vmatpush.msrb.mxu3 %v2222_v40  ;;  %2270 = vmatpush.msra.mxu1 %v2204_v1  ;;  %v2197_v40 = vmul.f32 %v7013_v7, %v10729_v51  ;;  %v7061_v37 = vsel %vm96_vm7, %v6563_v25, %v6491_v54  ;;  %v7069_v63 = vsel %vm43_vm8, %v6515_v13, %v6475_v11  ;;  %v10737_v25 = vld [vmem:[#allocation86_spill] sm:$0xff] }
 0x537   :  { %2292 = vmatpush.msra.mxu2 %v1805_v32  ;;  %2310 = vmatpush.msra.mxu0 %v2205_v0  ;;  %v10730_v32 = vld [vmem:[#allocation68_spill] sm:$0xff]  ;;  %10733 = vst [vmem:[#allocation266_spill] sm:$0xff] %v7061_v37  ;;  %v2055_v18 = vsel %vm744_vm10, %v6909_v44, %v6786_v29 }
 0x538   :  { %2271 = vmatpush.msra.mxu1 %v2196_v14  ;;  %v2188_v1 = vmul.f32 %v1738_v20, %v10730_v32  ;;  %v10732_v0 = vld [vmem:[#allocation84_spill] sm:$0xff]  ;;  %v10735_v20 = vld [vmem:[#allocation126_spill] sm:$0xff]  ;;  %10736 = vst [vmem:[#allocation267_spill] sm:$0xff] %v7069_v63 }
 0x539   :  { %2293 = vmatpush.msra.mxu2 %v1773_v16  ;;  %2311 = vmatpush.msra.mxu0 %v2197_v40  ;;  %v2189_v51 = vmul.f32 %v7033_v61, %v10732_v0  ;;  %v10734_v14 = vld [vmem:[#allocation72_spill] sm:$0xff]  ;;  %v1709_v2 = vmul.f32 %v1706_v27, %v10735_v20  ;;  %v1642_v40 = vsel %vm43_vm8, %v6503_v57, %v6515_v13  ;;  %v10738_v57 = vld [vmem:[#allocation75_spill] sm:$0xff] }
 0x53a   :  { %2272 = vmatpush.msra.mxu1 %v2188_v1  ;;  %v2180_v16 = vmul.f32 %v1706_v27, %v10734_v14  ;;  %v7083_v27 = vsel %vm474_vm0, %v6945_v46, %v7017_v23  ;;  %v2172_v13 = vmul.f32 %v1674_v38, %v10738_v57  ;;  %v10740_v14 = vld [vmem:[#allocation88_spill] sm:$0xff]  ;;  %v7099_v46 = vsel %vm420_vm1, %v6860_v36, %v6905_v17  ;;  %v10753_v23 = vld [vmem:[#allocation165_spill] sm:$0xff] }
 0x53b   :  { %2294 = vmatpush.msra.mxu2 %v1741_v31  ;;  %2312 = vmatpush.msra.mxu0 %v2189_v51  ;;  %v2181_v31 = vmul.f32 %v7047_v8, %v10737_v25  ;;  %v10739_v51 = vld [vmem:[#allocation130_spill] sm:$0xff]  ;;  %v2173_v25 = vmul.f32 %v7061_v37, %v10740_v14  ;;  %10741 = vst [vmem:[#allocation268_spill] sm:$0xff] %v7099_v46  ;;  %v10752_v37 = vld [vmem:[#allocation168_spill] sm:$0xff] }
 0x53c   :  { %1824 = vrot.lane.b32.xlu0 %v6419_v22, %s3824_s11  ;;  %2273 = vmatpush.msra.mxu1 %v2180_v16  ;;  %v7085_v1 = vpop.permute.xlu2 %2102  ;;  %v7087_v0 = vpop.permute.xlu1 %2078  ;;  %v1677_v20 = vmul.f32 %v1674_v38, %v10739_v51  ;;  %v1645_v57 = vmul.f32 %v1642_v40, %v10743_v15  ;;  %v2231_v38 = vmul.f32 %v7083_v27, %v10744_v4  ;;  %v10746_v51 = vld [vmem:[#allocation135_spill] sm:$0xff] }
 0x53d   :  { %2295 = vmatpush.msra.mxu2 %v1709_v2  ;;  %2313 = vmatpush.msra.mxu0 %v2181_v31  ;;  %v7093_v32 = vpop.permute.xlu0 %2010  ;;  %v10742_v2 = vld [vmem:[#allocation77_spill] sm:$0xff]  ;;  %v2223_v36 = vmul.f32 %v7099_v46, %v10746_v51  ;;  %v7147_v15 = vsel %vm312_vm3, %v6697_v41, %v6619_v48  ;;  %v7165_v41 = vsel %vm10068_vm4, %v6583_v59, %v6621_v26 }
 0x53e   :  { %2274 = vmatpush.msra.mxu1 %v2172_v13  ;;  %v2164_v16 = vmul.f32 %v1642_v40, %v10742_v2  ;;  %v10745_v31 = vld [vmem:[#allocation93_spill] sm:$0xff]  ;;  %v2087_v2 = vsel %vm798_vm9, %v6788_v6, %v6759_v53  ;;  %v7179_v59 = vsel %vm10726_vm15, %v6585_v49, %v6635_v24 }
 0x53f   :  { %2296 = vmatpush.msra.mxu2 %v1677_v20  ;;  %2314 = vmatpush.msra.mxu0 %v2173_v25  ;;  %v2165_v14 = vmul.f32 %v7069_v63, %v10745_v31  ;;  %v7120_v25 = vld [vmem:[%s9439_s1 + $0x10] sm:$0xff]  ;;  %v2095_v46 = vmul.f32 %v2087_v2, %v10753_v23  ;;  %v7193_v23 = vsel %vm150_vm6, %v6599_v45, %v6523_v58 }
 0x540   :  { %2275 = vmatpush.msra.mxu1 %v2164_v16  ;;  %2258 = vmatmul.f32.vlgmr.msra.gmra.mxu3 %v7120_v25 }
 0x541   :  { %2297 = vmatpush.msra.mxu2 %v1645_v57  ;;  %2315 = vmatpush.msra.mxu0 %v2165_v14 }
 0x542   :  { %2298 = vmatmul.f32.vlgmr.msra.gmra.mxu2 %v7120_v25 }
 0x543   :  { %2387 = vmatpush.msrb.mxu2 %v2231_v38 }
 0x544   :  { %1920 = vrot.lane.b32.xlu0 %v6419_v22, %s3827_s14  ;;  %v7111_v20 = vpop.permute.xlu2 %2104  ;;  %v7113_v40 = vpop.permute.xlu1 %2080 }
 0x545   :  { %2388 = vmatpush.msrb.mxu2 %v2223_v36  ;;  %v7115_v13 = vpop.permute.xlu0 %1912  ;;  %v2121_v51 = vsel %vm10748_vm13, %v7085_v1, %v7111_v20  ;;  %vm10757_vm13 = vcmask 719872  }
 0x54c   :  { %2144 = vrot.lane.b32.xlu0 %v6419_v22, %s3833_s20  ;;  %v7125_v14 = vpop.permute.xlu2 %1948  ;;  %v7127_v57 = vpop.permute.xlu1 %2048  ;;  %v10750_v22 = vld [vmem:[#allocation161_spill] sm:$0xff] }
 0x54d   :  { %v7130_v16 = vpop.permute.xlu0 %1914 }
 0x554   :  { %2114 = vrot.lane.b32.xlu0 %v6396_v10, %s3834_s26  ;;  %v7134_v38 = vpop.permute.xlu2 %1950  ;;  %v2137_v36 = vpop.permute.xlu1 %2136 }
 0x555   :  { %10747 = vst [vmem:[#allocation269_spill] sm:$0xff] %v7134_v38  ;;  %v2153_v4 = vsel %vm10749_vm5, %v7015_v42, %v2137_v36  ;;  %v1819_v31 = vpop.permute.xlu0 %1818  ;;  %v10751_v38 = vld [vmem:[#allocation50_spill] sm:$0xff]  ;;  %vm10767_vm5 = vmmov %vm10726_vm15  ;;  %vm10768_vm15 = vcmp.lt.s32.totalorder %v4258_v28, 119 }
 0x556   :  { %v7156_v10 = vsel %vm366_vm2, %v6683_v12, %v1819_v31  ;;  %v2157_v17 = vmul.f32 %v2153_v4, %v10750_v22  ;;  %v2125_v12 = vmul.f32 %v2121_v51, %v10752_v37  ;;  %v10754_v4 = vld [vmem:[#allocation173_spill] sm:$0xff]  ;;  %v10756_v51 = vld [vmem:[#allocation166_spill] sm:$0xff]  ;;  %v7219_v37 = vsel %vm312_vm3, %v6619_v48, %v6655_v3 }
 0x557   :  { %v2214_v63 = vmul.f32 %v7156_v10, %v10751_v38  ;;  %v2206_v38 = vmul.f32 %v7147_v15, %v10754_v4  ;;  %v7184_v22 = vld [vmem:[%s9439_s1 + $0x18] sm:$0xff]  ;;  %v2063_v2 = vmul.f32 %v2055_v18, %v10756_v51  ;;  %v7213_v51 = vsel %vm96_vm7, %v6491_v54, %v6525_v34  ;;  %10760 = vst [vmem:[#allocation271_spill] sm:$0xff] %v7219_v37  ;;  %v10761_v54 = vld [vmem:[#allocation175_spill] sm:$0xff] }
 0x558   :  { %2316 = vmatpush.msra.mxu0 %v2157_v17  ;;  %v10755_v17 = vld [vmem:[#allocation41_spill] sm:$0xff]  ;;  %v7245_v4 = vsel %vm10068_vm4, %v6621_v26, %v6672_v19  ;;  %v7260_v26 = vsel %vm10767_vm5, %v6635_v24, %v6559_v21  ;;  %vm10775_vm5 = vcmp.lt.s32.totalorder %v4258_v28, 120 }
 0x559   :  { %2349 = vmatpush.msrb.mxu3 %v2214_v63  ;;  %v2198_v63 = vmul.f32 %v7165_v41, %v10755_v17  ;;  %v10762_v17 = vld [vmem:[#allocation139_spill] sm:$0xff]  ;;  %10763 = vst [vmem:[#allocation272_spill] sm:$0xff] %v7245_v4  ;;  %v10772_v19 = vld [vmem:[#allocation145_spill] sm:$0xff] }
 0x55a   :  { %2317 = vmatpush.msra.mxu0 %v2125_v12  ;;  %v2199_v24 = vmul.f32 %v7245_v4, %v10772_v19  ;;  %v10773_v21 = vld [vmem:[#allocation181_spill] sm:$0xff] }
 0x55b   :  { %2350 = vmatpush.msrb.mxu3 %v2206_v38  ;;  %3752 = vmatmul.msk.f32.vlgmr.msra.gmra.mxu0 %vm10757_vm13, %v7184_v22  ;;  %v10759_v38 = vld [vmem:[#allocation174_spill] sm:$0xff]  ;;  %vm10770_vm13 = vcmp.lt.s32.totalorder %v4258_v28, 9 }
 0x55c   :  { %2362 = vmatpush.msrb.mxu0 %v2095_v46  ;;  %v7195_v49 = vpop.permute.xlu2 %2138  ;;  %v7197_v12 = vpop.permute.xlu1 %1980  ;;  %v2024_v46 = vsel %vm690_vm11, %v7027_v9, %v7093_v32  ;;  %v2190_v45 = vmul.f32 %v7179_v59, %v10759_v38  ;;  %v2182_v38 = vmul.f32 %v7193_v23, %v10761_v54  ;;  %v1960_v54 = vsel %vm582_vm14, %v6821_v62, %v6837_v55 }
 0x55d   :  { %2351 = vmatpush.msrb.mxu3 %v2198_v63  ;;  %v7205_v18 = vpop.permute.xlu0 %1820 }
 0x55e   :  { %10758 = vst [vmem:[#allocation270_spill] sm:$0xff] %v7205_v18  ;;  %2363 = vmatpush.msrb.mxu0 %v2063_v2  ;;  %v7224_v63 = vsel %vm366_vm2, %v1819_v31, %v7205_v18  ;;  %v1992_v2 = vsel %vm636_vm12, %v6862_v35, %v6907_v5  ;;  %v7239_v31 = vsel %vm43_vm8, %v6475_v11, %v6499_v52  ;;  %v10766_v11 = vld [vmem:[#allocation143_spill] sm:$0xff] }
 0x55f   :  { %2352 = vmatpush.msrb.mxu3 %v2190_v45  ;;  %v2215_v48 = vmul.f32 %v7224_v63, %v10762_v17  ;;  %v10764_v45 = vld [vmem:[#allocation169_spill] sm:$0xff]  ;;  %v10765_v17 = vld [vmem:[#allocation176_spill] sm:$0xff]  ;;  %v2207_v3 = vmul.f32 %v7219_v37, %v10766_v11  ;;  %v10780_v37 = vld [vmem:[#allocation226_spill] sm:$0xff] }
 0x560   :  { %2364 = vmatpush.msrb.mxu0 %v6387_v60  ;;  %v2031_v60 = vmul.f32 %v2024_v46, %v10764_v45  ;;  %v2174_v18 = vmul.f32 %v7213_v51, %v10765_v17  ;;  %v2152_v46 = vsel %vm10768_vm15, %v2137_v36, %v7195_v49  ;;  %v10769_v45 = vld [vmem:[#allocation67_spill] sm:$0xff]  ;;  %v10771_v11 = vld [vmem:[#allocation100_spill] sm:$0xff]  ;;  %v7278_v36 = vsel %vm150_vm6, %v6523_v58, %v10773_v21 }
 0x561   :  { %2353 = vmatpush.msrb.mxu3 %v2182_v38  ;;  %2389 = vmatpush.msrb.mxu2 %v2215_v48  ;;  %v1999_v38 = vmul.f32 %v1992_v2, %v10769_v45  ;;  %v1928_v48 = vsel %vm10770_vm13, %v7115_v13, %v7130_v16  ;;  %v2166_v17 = vmul.f32 %v7239_v31, %v10771_v11  ;;  %v10774_v45 = vld [vmem:[#allocation109_spill] sm:$0xff]  ;;  %v10776_v11 = vld [vmem:[#allocation195_spill] sm:$0xff]  ;;  %v10777_v58 = vld [vmem:[#allocation148_spill] sm:$0xff] }
 0x562   :  { %2365 = vmatpush.msrb.mxu0 %v2031_v60  ;;  %v2158_v4 = vmul.f32 %v2152_v46, %v10776_v11  ;;  %v2086_v21 = vsel %vm798_vm9, %v6759_v53, %v7087_v0  ;;  %v7308_v46 = vsel %vm96_vm7, %v6525_v34, %v10780_v37  ;;  %v10781_v11 = vld [vmem:[#allocation160_spill] sm:$0xff]  ;;  %vm10792_vm13 = vmmov %vm10775_vm5 }
 0x563   :  { %2354 = vmatpush.msrb.mxu3 %v2174_v18  ;;  %2390 = vmatpush.msrb.mxu2 %v2207_v3  ;;  %v1967_v18 = vmul.f32 %v1960_v54, %v10774_v45 }
 0x564   :  { %2366 = vmatpush.msrb.mxu0 %v1999_v38  ;;  %v7280_v2 = vpop.permute.xlu2 %2106  ;;  %v7282_v60 = vpop.permute.xlu1 %1982  ;;  %v2191_v38 = vmul.f32 %v7260_v26, %v10777_v58  ;;  %v10784_v58 = vld [vmem:[#allocation155_spill] sm:$0xff] }
 0x565   :  { %v2120_v3 = vsel %vm10775_vm5, %v7111_v20, %v7280_v2  ;;  %2355 = vmatpush.msrb.mxu3 %v2166_v17  ;;  %2391 = vmatpush.msrb.mxu2 %v2199_v24  ;;  %v7289_v19 = vpop.permute.xlu0 %2132  ;;  %v10778_v20 = vld [vmem:[#allocation37_spill] sm:$0xff]  ;;  %v10779_v24 = vld [vmem:[#allocation90_spill] sm:$0xff]  ;;  %v7323_v34 = vsel %vm43_vm8, %v6499_v52, %v10784_v58  ;;  %v10789_v52 = vld [vmem:[#allocation156_spill] sm:$0xff]  ;;  %vm10798_vm5 = vcmask 719872  }
 0x566   :  { %v2154_v54 = vsel %vm10768_vm15, %v7289_v19, %v7015_v42  ;;  %2367 = vmatpush.msrb.mxu0 %v1967_v18  ;;  %v1935_v17 = vmul.f32 %v1928_v48, %v10778_v20  ;;  %v2126_v45 = vmul.f32 %v2120_v3, %v10779_v24  ;;  %v2054_v42 = vsel %vm744_vm10, %v6786_v29, %v6943_v43  ;;  %v10782_v18 = vld [vmem:[#allocation150_spill] sm:$0xff]  ;;  %v10786_v29 = vld [vmem:[#allocation153_spill] sm:$0xff]  ;;  %vm10802_vm15 = vmmov %vm10798_vm5 }
 0x567   :  { %2356 = vmatpush.msrb.mxu3 %v2158_v4  ;;  %2392 = vmatpush.msrb.mxu2 %v2191_v38  ;;  %v2156_v53 = vmul.f32 %v2154_v54, %v10781_v11  ;;  %v2183_v48 = vmul.f32 %v7278_v36, %v10782_v18  ;;  %v10783_v3 = vld [vmem:[#allocation58_spill] sm:$0xff]  ;;  %v2175_v54 = vmul.f32 %v7308_v46, %v10786_v29  ;;  %v10899_v29 = vld [vmem:[#allocation232_spill] sm:$0xff] }
 0x568   :  { %2368 = vmatpush.msrb.mxu0 %v1935_v17  ;;  %v1903_v24 = vmul.f32 %v6950_v47, %v10783_v3  ;;  %v10785_v4 = vld [vmem:[#allocation54_spill] sm:$0xff]  ;;  %v10787_v17 = vld [vmem:[#allocation31_spill] sm:$0xff]  ;;  %v10788_v47 = vld [vmem:[#allocation205_spill] sm:$0xff] }
 0x569   :  { %v2096_v38 = vmul.f32 %v2086_v21, %v10785_v4  ;;  %2276 = vmatpush.msra.mxu1 %v2156_v53  ;;  %2357 = vmatpush.msrb.mxu3 %v2126_v45  ;;  %v1871_v18 = vmul.f32 %v6981_v50, %v10787_v17  ;;  %v2064_v3 = vmul.f32 %v2054_v42, %v10788_v47  ;;  %v10790_v53 = vld [vmem:[#allocation16_spill] sm:$0xff] }
 0x56a   :  { %2393 = vmatpush.msrb.mxu2 %v2183_v48  ;;  %2369 = vmatpush.msrb.mxu0 %v1903_v24  ;;  %v2167_v21 = vmul.f32 %v7323_v34, %v10789_v52  ;;  %v1839_v45 = vmul.f32 %v7156_v10, %v10790_v53  ;;  %v10791_v24 = vld [vmem:[#allocation235_spill] sm:$0xff]  ;;  %v10797_v47 = vld [vmem:[#allocation180_spill] sm:$0xff] }
 0x56b   :  { %2402 = vmatpush.msra.mxu3 %v2096_v38  ;;  %v2088_v48 = vsel %vm798_vm9, %v10791_v24, %v6788_v6  ;;  %v10794_v10 = vld [vmem:[#allocation243_spill] sm:$0xff]  ;;  %v10795_v6 = vld [vmem:[#allocation177_spill] sm:$0xff]  ;;  %v1775_v4 = vmul.f32 %v7165_v41, %v10797_v47 }
 0x56c   :  { %2394 = vmatpush.msrb.mxu2 %v2175_v54  ;;  %2370 = vmatpush.msrb.mxu0 %v1871_v18  ;;  %v7331_v20 = vpop.permute.xlu1 %1918  ;;  %v10793_v18 = vld [vmem:[#allocation20_spill] sm:$0xff]  ;;  %v2056_v54 = vsel %vm744_vm10, %v10794_v10, %v6909_v44  ;;  %v10796_v24 = vld [vmem:[#allocation11_spill] sm:$0xff]  ;;  %v10804_v10 = vld [vmem:[#allocation242_spill] sm:$0xff] }
 0x56d   :  { %2403 = vmatpush.msra.mxu3 %v2064_v3  ;;  %v7341_v50 = vpop.permute.xlu0 %2100  ;;  %v1807_v38 = vmul.f32 %v7147_v15, %v10793_v18  ;;  %v10799_v15 = vld [vmem:[#allocation240_spill] sm:$0xff]  ;;  %v10897_v18 = vld [vmem:[#allocation198_spill] sm:$0xff] }
 0x56e   :  { %2395 = vmatpush.msrb.mxu2 %v2167_v21  ;;  %v2122_v42 = vsel %vm10792_vm13, %v7341_v50, %v7085_v1  ;;  %2371 = vmatpush.msrb.mxu0 %v1839_v45  ;;  %v2094_v21 = vmul.f32 %v2088_v48, %v10796_v24  ;;  %v2025_v1 = vsel %vm690_vm11, %v10799_v15, %v7027_v9  ;;  %v10801_v45 = vld [vmem:[#allocation182_spill] sm:$0xff]  ;;  %vm10813_vm13 = vcmp.lt.s32.totalorder %v4258_v28, 9 }
 0x56f   :  { %2404 = vmatpush.msra.mxu3 %v6407_v33  ;;  %v2124_v3 = vmul.f32 %v2122_v42, %v10795_v6  ;;  %v10800_v33 = vld [vmem:[#allocation4_spill] sm:$0xff]  ;;  %v1743_v48 = vmul.f32 %v7179_v59, %v10801_v45  ;;  %v1993_v9 = vsel %vm636_vm12, %v10804_v10, %v6862_v35 }
 0x570   :  { %2372 = vmatpush.msrb.mxu0 %v1807_v38  ;;  %3753 = vmatmul.msk.f32.vlgmr.msrb.gmra.mxu3 %vm10798_vm5, %v7184_v22  ;;  %v2062_v44 = vmul.f32 %v2056_v54, %v10800_v33  ;;  %v10803_v42 = vld [vmem:[#allocation80_spill] sm:$0xff]  ;;  %vm10819_vm5 = vcmp.lt.s32.totalorder %v4258_v28, 119 }
 0x571   :  { %2277 = vmatpush.msra.mxu1 %v2124_v3  ;;  %v1711_v38 = vmul.f32 %v7193_v23, %v10803_v42  ;;  %v10805_v3 = vld [vmem:[#allocation183_spill] sm:$0xff]  ;;  %v10809_v10 = vld [vmem:[#allocation32_spill] sm:$0xff] }
 0x572   :  { %2373 = vmatpush.msrb.mxu0 %v1775_v4  ;;  %3751 = vmatmul.msk.f32.vlgmr.msra.gmra.mxu1 %vm10802_vm15, %v7184_v22  ;;  %v7377_v4 = vpop.permute.xlu2 %1888  ;;  %v2030_v59 = vmul.f32 %v2025_v1, %v10805_v3  ;;  %v10810_v42 = vld [vmem:[#allocation103_spill] sm:$0xff]  ;;  %vm10826_vm15 = vcmp.lt.s32.totalorder %v4258_v28, 120 }
 0x573   :  { %2322 = vmatpush.msrb.mxu1 %v2094_v21  ;;  %v10806_v21 = vld [vmem:[#allocation184_spill] sm:$0xff]  ;;  %v1998_v45 = vmul.f32 %v1993_v9, %v10810_v42  ;;  %v10817_v9 = vld [vmem:[#allocation26_spill] sm:$0xff] }
 0x574   :  { %2374 = vmatpush.msrb.mxu0 %v1743_v48  ;;  %v7369_v41 = vpop.permute.xlu1 %1886  ;;  %v1679_v15 = vmul.f32 %v7213_v51, %v10806_v21  ;;  %v10807_v48 = vld [vmem:[#allocation33_spill] sm:$0xff]  ;;  %v1959_v21 = vsel %vm582_vm14, %v6837_v55, %v7125_v14  ;;  %v10816_v55 = vld [vmem:[#allocation82_spill] sm:$0xff] }
 0x575   :  { %2323 = vmatpush.msrb.mxu1 %v2062_v44  ;;  %v2013_v54 = vpop.permute.xlu0 %2012  ;;  %v1991_v44 = vsel %vm636_vm12, %v6907_v5, %v7197_v12  ;;  %v7390_v23 = vsel %vm474_vm0, %v7369_v41, %v7377_v4  ;;  %v10808_v51 = vld [vmem:[#allocation245_spill] sm:$0xff] }
 0x576   :  { %v2023_v35 = vsel %vm690_vm11, %v7093_v32, %v2013_v54  ;;  %2375 = vmatpush.msrb.mxu0 %v1711_v38  ;;  %v1961_v1 = vsel %vm582_vm14, %v10808_v51, %v6821_v62  ;;  %v10811_v32 = vld [vmem:[#allocation185_spill] sm:$0xff]  ;;  %v10812_v38 = vld [vmem:[#allocation246_spill] sm:$0xff]  ;;  %v10815_v51 = vld [vmem:[#allocation35_spill] sm:$0xff] }
 0x577   :  { %2324 = vmatpush.msrb.mxu1 %v10807_v48  ;;  %v2032_v5 = vmul.f32 %v2023_v35, %v10809_v10  ;;  %v1647_v48 = vmul.f32 %v7239_v31, %v10811_v32  ;;  %v1929_v47 = vsel %vm10813_vm13, %v10812_v38, %v7115_v13  ;;  %v10814_v62 = vld [vmem:[#allocation186_spill] sm:$0xff]  ;;  %v2000_v10 = vmul.f32 %v1991_v44, %v10815_v51  ;;  %v10818_v32 = vld [vmem:[#allocation187_spill] sm:$0xff]  ;;  %v10820_v44 = vld [vmem:[#allocation188_spill] sm:$0xff] }
 0x578   :  { %2376 = vmatpush.msrb.mxu0 %v1679_v15  ;;  %v2233_v35 = vmul.f32 %v7390_v23, %v10814_v62  ;;  %v1968_v15 = vmul.f32 %v1959_v21, %v10817_v9  ;;  %v1934_v52 = vmul.f32 %v1929_v47, %v10818_v32  ;;  %v10822_v21 = vld [vmem:[#allocation51_spill] sm:$0xff]  ;;  %v10824_v38 = vld [vmem:[#allocation69_spill] sm:$0xff]  ;;  %v10830_v9 = vld [vmem:[#allocation12_spill] sm:$0xff] }
 0x579   :  { %2325 = vmatpush.msrb.mxu1 %v2030_v59  ;;  %2405 = vmatpush.msra.mxu3 %v2032_v5  ;;  %v1966_v59 = vmul.f32 %v1961_v1, %v10816_v55  ;;  %v10821_v1 = vld [vmem:[#allocation253_spill] sm:$0xff]  ;;  %v10831_v51 = vld [vmem:[#allocation78_spill] sm:$0xff] }
 0x57a   :  { %2377 = vmatpush.msrb.mxu0 %v1647_v48  ;;  %v10823_v48 = vld [vmem:[#allocation190_spill] sm:$0xff]  ;;  %v1742_v62 = vmul.f32 %v7033_v61, %v10831_v51  ;;  %v11067_v32 = vld [vmem:[#allocation73_spill] sm:$0xff] }
 0x57b   :  { %2326 = vmatpush.msrb.mxu1 %v1998_v45  ;;  %2406 = vmatpush.msra.mxu3 %v2000_v10  ;;  %v1902_v10 = vmul.f32 %v10821_v1, %v10820_v44  ;;  %v1870_v47 = vmul.f32 %v6959_v56, %v10823_v48  ;;  %v10827_v1 = vld [vmem:[#allocation74_spill] sm:$0xff] }
 0x57c   :  { %2467 = vmatpush.msra.mxu0 %v2233_v35  ;;  %v7417_v31 = vpop.permute.xlu1 %2140  ;;  %v1838_v35 = vmul.f32 %v6975_v30, %v10824_v38  ;;  %v2053_v30 = vsel %vm744_vm10, %v6943_v43, %v7127_v57  ;;  %v10832_v43 = vld [vmem:[#allocation164_spill] sm:$0xff]  ;;  %v10836_v61 = vld [vmem:[#allocation210_spill] sm:$0xff] }
 0x57d   :  { %2327 = vmatpush.msrb.mxu1 %v1966_v59  ;;  %2378 = vmatmul.f32.vlgmr.msrb.gmra.mxu0 %v7120_v25  ;;  %v2151_v13 = vsel %vm10819_vm5, %v7195_v49, %v7417_v31  ;;  %v7425_v45 = vpop.permute.xlu0 %2014  ;;  %v2085_v49 = vsel %vm798_vm9, %v7087_v0, %v7113_v40  ;;  %v10825_v59 = vld [vmem:[#allocation71_spill] sm:$0xff]  ;;  %vm10835_vm5 = vcmask 719872   ;;  %v11068_v55 = vld [vmem:[#allocation62_spill] sm:$0xff] }
 0x57e   :  { %2407 = vmatpush.msra.mxu3 %v1968_v15  ;;  %v2159_v5 = vmul.f32 %v2151_v13, %v10822_v21  ;;  %v1806_v15 = vmul.f32 %v6991_v39, %v10825_v59  ;;  %v10828_v39 = vld [vmem:[#allocation203_spill] sm:$0xff] }
 0x57f   :  { %2328 = vmatpush.msrb.mxu1 %v1934_v52 }
 0x580   :  { %2396 = vmatpush.msrb.mxu2 %v2159_v5 }
 0x581   :  { %2329 = vmatpush.msrb.mxu1 %v1902_v10  ;;  %v1774_v10 = vmul.f32 %v7013_v7, %v10827_v1  ;;  %v2022_v7 = vsel %vm690_vm11, %v2013_v54, %v7425_v45  ;;  %v10840_v54 = vld [vmem:[#allocation266_spill] sm:$0xff] }
 0x583   :  { %2330 = vmatpush.msrb.mxu1 %v1870_v47  ;;  %v10829_v47 = vld [vmem:[#allocation147_spill] sm:$0xff] }
 0x584   :  { %v7438_v52 = vpop.permute.xlu1 %2108 }
 0x585   :  { %2331 = vmatpush.msrb.mxu1 %v1838_v35  ;;  %v2119_v56 = vsel %vm10826_vm15, %v7280_v2, %v7438_v52  ;;  %v1917_v13 = vpop.permute.xlu0 %1916  ;;  %v2097_v35 = vmul.f32 %v2085_v49, %v10829_v47  ;;  %v10834_v49 = vld [vmem:[#allocation83_spill] sm:$0xff]  ;;  %vm10851_vm15 = vmmov %vm10813_vm13 }
 0x586   :  { %v1927_v0 = vsel %vm10813_vm13, %v7130_v16, %v1917_v13  ;;  %v2127_v5 = vmul.f32 %v2119_v56, %v10828_v39  ;;  %v1904_v16 = vmul.f32 %v7083_v27, %v10832_v43  ;;  %v1710_v56 = vmul.f32 %v7047_v8, %v10834_v49  ;;  %v10838_v27 = vld [vmem:[#allocation265_spill] sm:$0xff] }
 0x587   :  { %2332 = vmatpush.msrb.mxu1 %v1806_v15  ;;  %v1936_v2 = vmul.f32 %v1927_v0, %v10830_v9  ;;  %v10833_v15 = vld [vmem:[#allocation46_spill] sm:$0xff]  ;;  %v10837_v0 = vld [vmem:[#allocation268_spill] sm:$0xff]  ;;  %v1990_v8 = vsel %vm636_vm12, %v7197_v12, %v7282_v60  ;;  %v10847_v12 = vld [vmem:[#allocation201_spill] sm:$0xff]  ;;  %vm10880_vm13 = vcmp.lt.s32.totalorder %v4258_v28, 65 }
 0x588   :  { %2397 = vmatpush.msrb.mxu2 %v2127_v5  ;;  %v2065_v21 = vmul.f32 %v2053_v30, %v10833_v15  ;;  %v1894_v30 = vsel %vm474_vm0, %v10838_v27, %v7369_v41  ;;  %v10839_v5 = vld [vmem:[#allocation85_spill] sm:$0xff]  ;;  %v10844_v41 = vld [vmem:[#allocation200_spill] sm:$0xff]  ;;  %v10848_v9 = vld [vmem:[#allocation114_spill] sm:$0xff] }
 0x589   :  { %2333 = vmatpush.msrb.mxu1 %v1774_v10  ;;  %2408 = vmatpush.msra.mxu3 %v1936_v2  ;;  %v1872_v10 = vmul.f32 %v10837_v0, %v10836_v61  ;;  %v10842_v2 = vld [vmem:[#allocation112_spill] sm:$0xff]  ;;  %v10878_v39 = vld [vmem:[#allocation229_spill] sm:$0xff] }
 0x58a   :  { %2442 = vmatpush.msra.mxu2 %v2097_v35  ;;  %v10843_v0 = vld [vmem:[#allocation208_spill] sm:$0xff] }
 0x58b   :  { %2334 = vmatpush.msrb.mxu1 %v1742_v62  ;;  %3754 = vmatmul.msk.f32.vlgmr.msrb.gmra.mxu2 %vm10835_vm5, %v7184_v22  ;;  %v1678_v62 = vmul.f32 %v10840_v54, %v10839_v5  ;;  %v2033_v61 = vmul.f32 %v2022_v7, %v10843_v0  ;;  %v10846_v54 = vld [vmem:[#allocation269_spill] sm:$0xff]  ;;  %v1926_v7 = vsel %vm10851_vm15, %v1917_v13, %v7331_v20  ;;  %v10857_v13 = vld [vmem:[#allocation216_spill] sm:$0xff]  ;;  %vm10902_vm5 = vcmp.lt.s32.totalorder %v4258_v28, 119  ;;  %vm10909_vm15 = vmmov %vm10880_vm13 }
 0x58c   :  { %2409 = vmatpush.msra.mxu3 %v1904_v16  ;;  %2443 = vmatpush.msra.mxu2 %v2065_v21  ;;  %v10841_v21 = vld [vmem:[#allocation124_spill] sm:$0xff]  ;;  %v1840_v16 = vmul.f32 %v7224_v63, %v10842_v2  ;;  %v1958_v43 = vsel %vm582_vm14, %v7125_v14, %v10846_v54  ;;  %v10850_v63 = vld [vmem:[#allocation209_spill] sm:$0xff]  ;;  %v10854_v14 = vld [vmem:[#allocation179_spill] sm:$0xff] }
 0x58d   :  { %2335 = vmatpush.msrb.mxu1 %v1710_v56  ;;  %v7482_v35 = vpop.permute.xlu0 %2082  ;;  %v10845_v56 = vld [vmem:[#allocation267_spill] sm:$0xff]  ;;  %v2001_v2 = vmul.f32 %v1990_v8, %v10850_v63  ;;  %v1969_v47 = vmul.f32 %v1958_v43, %v10854_v14  ;;  %v10859_v43 = vld [vmem:[#allocation254_spill] sm:$0xff] }
 0x58e   :  { %2410 = vmatpush.msra.mxu3 %v1872_v10  ;;  %2444 = vmatpush.msra.mxu2 %v10841_v21  ;;  %v1646_v27 = vmul.f32 %v10845_v56, %v10844_v41  ;;  %v2232_v10 = vmul.f32 %v1894_v30, %v10847_v12  ;;  %v10849_v21 = vld [vmem:[#allocation271_spill] sm:$0xff]  ;;  %v10853_v56 = vld [vmem:[#allocation272_spill] sm:$0xff]  ;;  %v10881_v12 = vld [vmem:[#allocation230_spill] sm:$0xff] }
 0x58f   :  { %2336 = vmatpush.msrb.mxu1 %v1678_v62  ;;  %v1808_v15 = vmul.f32 %v10849_v21, %v10848_v9  ;;  %v10852_v62 = vld [vmem:[#allocation117_spill] sm:$0xff]  ;;  %v10856_v8 = vld [vmem:[#allocation15_spill] sm:$0xff] }
 0x590   :  { %2411 = vmatpush.msra.mxu3 %v1840_v16  ;;  %2445 = vmatpush.msra.mxu2 %v2033_v61  ;;  %v1776_v0 = vmul.f32 %v10853_v56, %v10852_v62  ;;  %v10855_v61 = vld [vmem:[#allocation120_spill] sm:$0xff]  ;;  %v10870_v62 = vld [vmem:[#allocation234_spill] sm:$0xff]  ;;  %v10885_v41 = vld [vmem:[#allocation13_spill] sm:$0xff] }
 0x591   :  { %2337 = vmatpush.msrb.mxu1 %v1646_v27  ;;  %v1744_v16 = vmul.f32 %v7260_v26, %v10855_v61  ;;  %v1937_v27 = vmul.f32 %v1926_v7, %v10856_v8  ;;  %v10860_v26 = vld [vmem:[#allocation95_spill] sm:$0xff]  ;;  %v10861_v7 = vld [vmem:[#allocation248_spill] sm:$0xff]  ;;  %v10876_v8 = vld [vmem:[#allocation206_spill] sm:$0xff] }
 0x592   :  { %2412 = vmatpush.msra.mxu3 %v1808_v15  ;;  %2446 = vmatpush.msra.mxu2 %v2001_v2  ;;  %v1712_v15 = vmul.f32 %v7278_v36, %v10857_v13  ;;  %v10858_v2 = vld [vmem:[#allocation211_spill] sm:$0xff]  ;;  %v10862_v36 = vld [vmem:[#allocation202_spill] sm:$0xff] }
 0x593   :  { %2427 = vmatpush.msra.mxu1 %v2232_v10  ;;  %v1857_v10 = vpop.permute.xlu2 %1856  ;;  %v1905_v56 = vmul.f32 %v1894_v30, %v10858_v2  ;;  %v1648_v30 = vmul.f32 %v7323_v34, %v10862_v36  ;;  %v10868_v36 = vld [vmem:[#allocation108_spill] sm:$0xff]  ;;  %v10873_v2 = vld [vmem:[#allocation137_spill] sm:$0xff] }
 0x594   :  { %2338 = vmatmul.f32.vlgmr.msrb.gmra.mxu1 %v7120_v25  ;;  %2413 = vmatpush.msra.mxu3 %v1776_v0  ;;  %v7517_v0 = vsel %vm474_vm0, %v7377_v4, %v10859_v43  ;;  %v10864_v4 = vld [vmem:[#allocation118_spill] sm:$0xff]  ;;  %v7532_v43 = vpop.permute.xlu1 %2016 }
 0x595   :  { %2447 = vmatpush.msra.mxu2 %v1969_v47  ;;  %v7508_v21 = vpop.permute.xlu0 %2050  ;;  %v1680_v47 = vmul.f32 %v7308_v46, %v10860_v26 }
 0x596   :  { %2414 = vmatpush.msra.mxu3 %v1744_v16  ;;  %v7524_v16 = vsel %vm420_vm1, %v1857_v10, %v10861_v7  ;;  %v10866_v7 = vld [vmem:[#allocation204_spill] sm:$0xff] }
 0x597   :  { %2448 = vmatpush.msra.mxu2 %v1937_v27  ;;  %v10863_v27 = vld [vmem:[#allocation55_spill] sm:$0xff] }
 0x598   :  { %2415 = vmatpush.msra.mxu3 %v1712_v15  ;;  %v2234_v13 = vmul.f32 %v7517_v0, %v10863_v27  ;;  %v2226_v15 = vmul.f32 %v7524_v16, %v10864_v4 }
 0x599   :  { %2449 = vmatpush.msra.mxu2 %v1905_v56 }
 0x59a   :  { %2416 = vmatpush.msra.mxu3 %v1680_v47  ;;  %v10865_v47 = vld [vmem:[#allocation261_spill] sm:$0xff] }
 0x59b   :  { %v7546_v26 = vpop.permute.xlu2 %1984 }
 0x59c   :  { %2417 = vmatpush.msra.mxu3 %v1648_v30 }
 0x59d   :  { %v1855_v46 = vpop.permute.xlu0 %1854  ;;  %2418 = vmatmul.f32.vlgmr.msra.gmra.mxu3 %v7120_v25 }
 0x59e   :  { %2507 = vmatpush.msrb.mxu3 %v2234_v13  ;;  %v7537_v56 = vsel %vm420_vm1, %v1855_v46, %v1857_v10  ;;  %v1862_v34 = vsel %vm420_vm1, %v10865_v47, %v1855_v46  ;;  %v10867_v13 = vld [vmem:[#allocation134_spill] sm:$0xff]  ;;  %v10869_v10 = vld [vmem:[#allocation244_spill] sm:$0xff]  ;;  %v7555_v47 = vpop.permute.xlu1 %1952 }
 0x59f   :  { %v2224_v30 = vmul.f32 %v1862_v34, %v10866_v7  ;;  %v1873_v27 = vmul.f32 %v1862_v34, %v10867_v13  ;;  %v2225_v4 = vmul.f32 %v7537_v56, %v10868_v36  ;;  %v1798_v9 = vsel %vm312_vm3, %v10870_v62, %v10869_v10  ;;  %v10871_v46 = vld [vmem:[#allocation270_spill] sm:$0xff]  ;;  %v10872_v34 = vld [vmem:[#allocation127_spill] sm:$0xff]  ;;  %v10877_v62 = vld [vmem:[#allocation141_spill] sm:$0xff] }
 0x5a0   :  { %2508 = vmatpush.msrb.mxu3 %v2226_v15  ;;  %v2208_v14 = vmul.f32 %v1798_v9, %v10876_v8  ;;  %v1809_v63 = vmul.f32 %v1798_v9, %v10877_v62  ;;  %v10879_v7 = vld [vmem:[#allocation6_spill] sm:$0xff]  ;;  %v1638_v9 = vsel %vm43_vm8, %v10784_v58, %v10885_v41  ;;  %v10886_v62 = vld [vmem:[#allocation157_spill] sm:$0xff]  ;;  %v10892_v58 = vld [vmem:[#allocation251_spill] sm:$0xff] }
 0x5a1   :  { %2428 = vmatpush.msra.mxu1 %v2224_v30  ;;  %2450 = vmatpush.msra.mxu2 %v1873_v27  ;;  %v10874_v27 = vld [vmem:[#allocation228_spill] sm:$0xff] }
 0x5a2   :  { %2468 = vmatpush.msra.mxu0 %v2225_v4  ;;  %v10875_v4 = vld [vmem:[#allocation237_spill] sm:$0xff] }
 0x5a3   :  { %v1766_v36 = vsel %vm10068_vm4, %v10875_v4, %v10874_v27 }
 0x5a6   :  { %v1823_v61 = vpop.permute.xlu0 %1822 }
 0x5a7   :  { %v1830_v15 = vsel %vm366_vm2, %v10871_v46, %v1823_v61  ;;  %v1734_v46 = vsel %vm10880_vm13, %v10879_v7, %v10878_v39  ;;  %v1670_v7 = vsel %vm96_vm7, %v10780_v37, %v10886_v62 }
 0x5a8   :  { %v2216_v13 = vmul.f32 %v1830_v15, %v10872_v34  ;;  %v1841_v30 = vmul.f32 %v1830_v15, %v10873_v2  ;;  %v10882_v34 = vld [vmem:[#allocation181_spill] sm:$0xff]  ;;  %v10883_v2 = vld [vmem:[#allocation172_spill] sm:$0xff] }
 0x5a9   :  { %v1702_v15 = vsel %vm150_vm6, %v10882_v34, %v10881_v12  ;;  %v2200_v4 = vmul.f32 %v1766_v36, %v10883_v2  ;;  %v10887_v34 = vld [vmem:[#allocation121_spill] sm:$0xff]  ;;  %v10889_v2 = vld [vmem:[#allocation152_spill] sm:$0xff] }
 0x5aa   :  { %2429 = vmatpush.msra.mxu1 %v2216_v13  ;;  %2451 = vmatpush.msra.mxu2 %v1841_v30  ;;  %v10884_v13 = vld [vmem:[#allocation39_spill] sm:$0xff]  ;;  %v2184_v49 = vmul.f32 %v1702_v15, %v10889_v2 }
 0x5ab   :  { %v1777_v30 = vmul.f32 %v1766_v36, %v10884_v13  ;;  %v10890_v36 = vld [vmem:[#allocation236_spill] sm:$0xff]  ;;  %v10891_v13 = vld [vmem:[#allocation231_spill] sm:$0xff] }
 0x5ac   :  { %2430 = vmatpush.msra.mxu1 %v2208_v14  ;;  %2452 = vmatpush.msra.mxu2 %v1809_v63  ;;  %v2192_v14 = vmul.f32 %v1734_v46, %v10887_v34  ;;  %v10888_v63 = vld [vmem:[#allocation24_spill] sm:$0xff]  ;;  %v7590_v51 = vsel %vm312_vm3, %v10891_v13, %v10890_v36  ;;  %v10894_v36 = vld [vmem:[#allocation91_spill] sm:$0xff] }
 0x5ad   :  { %v1745_v5 = vmul.f32 %v1734_v46, %v10888_v63  ;;  %v7606_v46 = vsel %vm312_vm3, %v10869_v10, %v10891_v13  ;;  %v7608_v63 = vpop.permute.xlu2 %2142  ;;  %v10895_v2 = vld [vmem:[#allocation47_spill] sm:$0xff]  ;;  %v7621_v10 = vsel %vm10068_vm4, %v10874_v27, %v10899_v29  ;;  %v10903_v27 = vld [vmem:[#allocation189_spill] sm:$0xff] }
 0x5ae   :  { %2431 = vmatpush.msra.mxu1 %v2200_v4  ;;  %2453 = vmatpush.msra.mxu2 %v1777_v30  ;;  %v1825_v8 = vpop.permute.xlu0 %1824  ;;  %v10893_v4 = vld [vmem:[#allocation92_spill] sm:$0xff]  ;;  %v10900_v13 = vld [vmem:[#allocation239_spill] sm:$0xff] }
 0x5af   :  { %v7595_v1 = vsel %vm366_vm2, %v1825_v8, %v10892_v58  ;;  %v7599_v37 = vsel %vm366_vm2, %v1823_v61, %v1825_v8  ;;  %v1713_v30 = vmul.f32 %v1702_v15, %v10893_v4  ;;  %v10896_v61 = vld [vmem:[#allocation207_spill] sm:$0xff]  ;;  %v2168_v15 = vmul.f32 %v1638_v9, %v10897_v18 }
 0x5b0   :  { %2432 = vmatpush.msra.mxu1 %v2192_v14  ;;  %2454 = vmatpush.msra.mxu2 %v1745_v5  ;;  %v2217_v58 = vmul.f32 %v7599_v37, %v10894_v36  ;;  %v2218_v34 = vmul.f32 %v7595_v1, %v10895_v2  ;;  %v2176_v8 = vmul.f32 %v1670_v7, %v10896_v61  ;;  %v10898_v4 = vld [vmem:[#allocation199_spill] sm:$0xff]  ;;  %v7629_v14 = vpop.permute.xlu1 %2110  ;;  %v10901_v2 = vld [vmem:[#allocation213_spill] sm:$0xff] }
 0x5b1   :  { %v1649_v59 = vmul.f32 %v1638_v9, %v10898_v4  ;;  %v7627_v5 = vsel %vm10068_vm4, %v10899_v29, %v10900_v13  ;;  %v1681_v36 = vmul.f32 %v1670_v7, %v10901_v2  ;;  %v2150_v9 = vsel %vm10902_vm5, %v7417_v31, %v7608_v63  ;;  %v10904_v18 = vld [vmem:[#allocation79_spill] sm:$0xff]  ;;  %v10905_v13 = vld [vmem:[#allocation225_spill] sm:$0xff] }
 0x5b2   :  { %2433 = vmatpush.msra.mxu1 %v2184_v49  ;;  %2455 = vmatpush.msra.mxu2 %v1713_v30  ;;  %v2209_v4 = vmul.f32 %v7606_v46, %v10903_v27  ;;  %v2210_v29 = vmul.f32 %v7590_v51, %v10904_v18  ;;  %v10906_v61 = vld [vmem:[#allocation23_spill] sm:$0xff]  ;;  %v10908_v30 = vld [vmem:[#allocation233_spill] sm:$0xff]  ;;  %vm10910_vm5 = vcmp.lt.s32.totalorder %v4258_v28, 120  ;;  %v10915_v27 = vld [vmem:[#allocation212_spill] sm:$0xff] }
 0x5b3   :  { %2469 = vmatpush.msra.mxu0 %v2217_v58  ;;  %2509 = vmatpush.msrb.mxu3 %v2218_v34  ;;  %v7644_v49 = vsel %vm150_vm6, %v10906_v61, %v10905_v13  ;;  %v10907_v7 = vld [vmem:[#allocation3_spill] sm:$0xff]  ;;  %v7656_v31 = vsel %vm10880_vm13, %v10878_v39, %v10908_v30  ;;  %v2118_v34 = vsel %vm10910_vm5, %v7438_v52, %v7629_v14  ;;  %vm10940_vm13 = vmmov %vm10910_vm5  ;;  %vm10941_vm5 = vcmp.lt.s32.totalorder %v4258_v28, 119 }
 0x5b4   :  { %v7650_v2 = vsel %vm10909_vm15, %v10908_v30, %v10907_v7  ;;  %2434 = vmatpush.msra.mxu1 %v2176_v8  ;;  %2456 = vmatpush.msra.mxu2 %v1681_v36  ;;  %v10911_v58 = vld [vmem:[#allocation191_spill] sm:$0xff]  ;;  %v10912_v7 = vld [vmem:[#allocation221_spill] sm:$0xff]  ;;  %v7670_v39 = vsel %vm150_vm6, %v10881_v12, %v10906_v61  ;;  %v2160_v53 = vmul.f32 %v2150_v9, %v10915_v27  ;;  %v10918_v61 = vld [vmem:[#allocation42_spill] sm:$0xff]  ;;  %vm10931_vm15 = vcmask 719872  }
 0x5b5   :  { %2470 = vmatpush.msra.mxu0 %v2209_v4  ;;  %2510 = vmatpush.msrb.mxu3 %v2210_v29  ;;  %v2201_v13 = vmul.f32 %v7621_v10, %v10911_v58  ;;  %v2202_v18 = vmul.f32 %v7627_v5, %v10912_v7  ;;  %v10913_v36 = vld [vmem:[#allocation223_spill] sm:$0xff]  ;;  %v10916_v4 = vld [vmem:[#allocation158_spill] sm:$0xff]  ;;  %v10917_v7 = vld [vmem:[#allocation192_spill] sm:$0xff] }
 0x5b6   :  { %v10914_v8 = vld [vmem:[#allocation255_spill] sm:$0xff]  ;;  %2435 = vmatpush.msra.mxu1 %v2168_v15  ;;  %2457 = vmatpush.msra.mxu2 %v1649_v59  ;;  %v7675_v52 = vpop.permute.xlu0 %1920  ;;  %v7681_v29 = vsel %vm96_vm7, %v10886_v62, %v10916_v4  ;;  %v2193_v12 = vmul.f32 %v7656_v31, %v10917_v7  ;;  %v2084_v59 = vsel %vm798_vm9, %v7113_v40, %v7482_v35  ;;  %v10919_v15 = vld [vmem:[#allocation214_spill] sm:$0xff]  ;;  %v10920_v27 = vld [vmem:[#allocation224_spill] sm:$0xff] }
 0x5b7   :  { %v2235_v30 = vmul.f32 %v10914_v8, %v10913_v36  ;;  %2471 = vmatpush.msra.mxu0 %v2201_v13  ;;  %2511 = vmatpush.msrb.mxu3 %v2202_v18  ;;  %v2194_v8 = vmul.f32 %v7650_v2, %v10918_v61  ;;  %v2128_v9 = vmul.f32 %v2118_v34, %v10919_v15  ;;  %v10921_v62 = vld [vmem:[#allocation257_spill] sm:$0xff]  ;;  %v10922_v13 = vld [vmem:[#allocation227_spill] sm:$0xff]  ;;  %v10923_v61 = vld [vmem:[#allocation194_spill] sm:$0xff] }
 0x5b8   :  { %2436 = vmatpush.msra.mxu1 %v2160_v53  ;;  %v2227_v58 = vmul.f32 %v10921_v62, %v10920_v27  ;;  %v7698_v18 = vsel %vm96_vm7, %v10916_v4, %v10922_v13  ;;  %v2185_v7 = vmul.f32 %v7670_v39, %v10923_v61  ;;  %v10924_v36 = vld [vmem:[#allocation138_spill] sm:$0xff]  ;;  %v10925_v34 = vld [vmem:[#allocation163_spill] sm:$0xff]  ;;  %v10926_v4 = vld [vmem:[#allocation49_spill] sm:$0xff]  ;;  %v2113_v27 = vpop.permute.xlu1 %2112  ;;  %2458 = vmatmul.f32.vlgmr.msra.gmra.mxu2 %v7120_v25 }
 0x5b9   :  { %2547 = vmatpush.msrb.mxu2 %v2235_v30  ;;  %2472 = vmatpush.msra.mxu0 %v2193_v12  ;;  %v2186_v40 = vmul.f32 %v7644_v49, %v10924_v36  ;;  %v7708_v53 = vsel %vm43_vm8, %v10885_v41, %v10925_v34  ;;  %v2052_v30 = vsel %vm744_vm10, %v7127_v57, %v7508_v21  ;;  %v10927_v12 = vld [vmem:[#allocation256_spill] sm:$0xff]  ;;  %v10928_v62 = vld [vmem:[#allocation131_spill] sm:$0xff] }
 0x5ba   :  { %2512 = vmatpush.msrb.mxu3 %v2194_v8  ;;  %2437 = vmatpush.msra.mxu1 %v2128_v9  ;;  %v2219_v8 = vmul.f32 %v10927_v12, %v10926_v4  ;;  %v7720_v13 = vsel %vm43_vm8, %v10925_v34, %v10928_v62  ;;  %v10929_v15 = vld [vmem:[#allocation215_spill] sm:$0xff]  ;;  %v10930_v41 = vld [vmem:[#allocation196_spill] sm:$0xff]  ;;  %v10933_v9 = vld [vmem:[#allocation142_spill] sm:$0xff]  ;;  %v2147_v62 = vpop.permute.xlu2 %2146 }
 0x5bb   :  { %2548 = vmatpush.msrb.mxu2 %v2227_v58  ;;  %v2098_v36 = vmul.f32 %v2084_v59, %v10929_v15  ;;  %2473 = vmatpush.msra.mxu0 %v2185_v7  ;;  %v2177_v61 = vmul.f32 %v7681_v29, %v10930_v41  ;;  %v10932_v57 = vld [vmem:[#allocation96_spill] sm:$0xff]  ;;  %v10934_v12 = vld [vmem:[#allocation258_spill] sm:$0xff]  ;;  %v10935_v34 = vld [vmem:[#allocation217_spill] sm:$0xff]  ;;  %v2021_v15 = vsel %vm690_vm11, %v7425_v45, %v7532_v43 }
 0x5bc   :  { %2513 = vmatpush.msrb.mxu3 %v2186_v40  ;;  %3755 = vmatmul.msk.f32.vlgmr.msra.gmra.mxu1 %vm10931_vm15, %v7184_v22  ;;  %v2178_v58 = vmul.f32 %v7698_v18, %v10932_v57  ;;  %v2211_v4 = vmul.f32 %v10934_v12, %v10933_v9  ;;  %v2066_v59 = vmul.f32 %v2052_v30, %v10935_v34  ;;  %v10936_v7 = vld [vmem:[#allocation197_spill] sm:$0xff]  ;;  %vm10942_vm15 = vmmov %vm10941_vm5  ;;  %v10948_v9 = vld [vmem:[#allocation260_spill] sm:$0xff] }
 0x5bd   :  { %2549 = vmatpush.msrb.mxu2 %v2219_v8  ;;  %2482 = vmatpush.msrb.mxu1 %v2098_v36  ;;  %v2169_v40 = vmul.f32 %v7708_v53, %v10936_v7  ;;  %v10937_v8 = vld [vmem:[#allocation97_spill] sm:$0xff]  ;;  %v10939_v36 = vld [vmem:[#allocation259_spill] sm:$0xff]  ;;  %v2117_v30 = vsel %vm10940_vm13, %v7629_v14, %v2113_v27  ;;  %v10944_v14 = vld [vmem:[#allocation64_spill] sm:$0xff]  ;;  %vm10955_vm13 = vcmp.lt.s32.totalorder %v4258_v28, 9 }
 0x5be   :  { %2474 = vmatpush.msra.mxu0 %v2177_v61  ;;  %2514 = vmatpush.msrb.mxu3 %v2178_v58  ;;  %v2170_v57 = vmul.f32 %v7720_v13, %v10937_v8  ;;  %v2145_v41 = vpop.permute.xlu0 %2144  ;;  %v10938_v12 = vld [vmem:[#allocation105_spill] sm:$0xff]  ;;  %v10943_v58 = vld [vmem:[#allocation218_spill] sm:$0xff]  ;;  %v10946_v8 = vld [vmem:[#allocation219_spill] sm:$0xff] }
 0x5bf   :  { %2550 = vmatpush.msrb.mxu2 %v2211_v4  ;;  %v2203_v61 = vmul.f32 %v10939_v36, %v10938_v12  ;;  %2483 = vmatpush.msrb.mxu1 %v2066_v59  ;;  %v2148_v34 = vsel %vm10941_vm5, %v2145_v41, %v2147_v62  ;;  %v2149_v45 = vsel %vm10942_vm15, %v7608_v63, %v2145_v41  ;;  %v10947_v12 = vld [vmem:[#allocation43_spill] sm:$0xff]  ;;  %vm10958_vm15 = vcmask 719872  }
 0x5c0   :  { %2475 = vmatpush.msra.mxu0 %v2169_v40  ;;  %v1989_v4 = vsel %vm636_vm12, %v7282_v60, %v7546_v26  ;;  %2515 = vmatpush.msrb.mxu3 %v2170_v57  ;;  %v2161_v36 = vmul.f32 %v2149_v45, %v10943_v58  ;;  %v2162_v59 = vmul.f32 %v2148_v34, %v10944_v14  ;;  %v10945_v40 = vld [vmem:[#allocation19_spill] sm:$0xff]  ;;  %v10950_v45 = vld [vmem:[#allocation193_spill] sm:$0xff] }
 0x5c1   :  { %2484 = vmatpush.msrb.mxu1 %v10945_v40  ;;  %2551 = vmatpush.msrb.mxu2 %v2203_v61  ;;  %v2034_v7 = vmul.f32 %v2021_v15, %v10946_v8  ;;  %v2195_v63 = vmul.f32 %v10948_v9, %v10947_v12  ;;  %v10949_v41 = vld [vmem:[#allocation247_spill] sm:$0xff]  ;;  %v1957_v57 = vsel %vm582_vm14, %v10846_v54, %v7555_v47  ;;  %v10951_v61 = vld [vmem:[#allocation18_spill] sm:$0xff]  ;;  %v10952_v15 = vld [vmem:[#allocation241_spill] sm:$0xff] }
 0x5c2   :  { %v2091_v60 = vsel %vm798_vm9, %v7482_v35, %v10949_v41  ;;  %v2129_v34 = vmul.f32 %v2117_v30, %v10950_v45  ;;  %2476 = vmatpush.msra.mxu0 %v2161_v36  ;;  %2516 = vmatpush.msrb.mxu3 %v2162_v59  ;;  %v2002_v40 = vmul.f32 %v1989_v4, %v10951_v61  ;;  %v10953_v8 = vld [vmem:[#allocation2_spill] sm:$0xff]  ;;  %v10956_v30 = vld [vmem:[#allocation28_spill] sm:$0xff]  ;;  %v10957_v4 = vld [vmem:[#allocation5_spill] sm:$0xff] }
 0x5c3   :  { %v2059_v9 = vsel %vm744_vm10, %v7508_v21, %v10952_v15  ;;  %2485 = vmatpush.msrb.mxu1 %v2034_v7  ;;  %2552 = vmatpush.msrb.mxu2 %v2195_v63  ;;  %v10954_v35 = vld [vmem:[#allocation262_spill] sm:$0xff]  ;;  %v1925_v54 = vsel %vm10955_vm13, %v7331_v20, %v7675_v52  ;;  %v2099_v36 = vmul.f32 %v2091_v60, %v10956_v30  ;;  %v10959_v7 = vld [vmem:[#allocation29_spill] sm:$0xff]  ;;  %v10960_v63 = vld [vmem:[#allocation263_spill] sm:$0xff]  ;;  %vm10962_vm13 = vcmp.lt.s32.totalorder %v4258_v28, 120 }
 0x5c4   :  { %v2187_v41 = vmul.f32 %v10954_v35, %v10953_v8  ;;  %2477 = vmatpush.msra.mxu0 %v2129_v34  ;;  %v1970_v59 = vmul.f32 %v1957_v57, %v10957_v4  ;;  %v2155_v21 = vsel %vm10941_vm5, %v2147_v62, %v7289_v19  ;;  %v2179_v15 = vmul.f32 %v10960_v63, %v10959_v7  ;;  %v10961_v61 = vld [vmem:[#allocation220_spill] sm:$0xff]  ;;  %vm10963_vm4 = vmmov %vm10962_vm13  ;;  %v10964_v34 = vld [vmem:[#allocation222_spill] sm:$0xff] }
 0x5c5   :  { %2486 = vmatpush.msrb.mxu1 %v2002_v40  ;;  %3756 = vmatmul.msk.f32.vlgmr.msra.gmra.mxu0 %vm10958_vm15, %v7184_v22  ;;  %v2067_v20 = vmul.f32 %v2059_v9, %v10961_v61  ;;  %v1938_v19 = vmul.f32 %v1925_v54, %v10964_v34  ;;  %v10965_v62 = vld [vmem:[#allocation238_spill] sm:$0xff]  ;;  %v10967_v63 = vld [vmem:[#allocation264_spill] sm:$0xff]  ;;  %v10970_v61 = vld [vmem:[#allocation249_spill] sm:$0xff]  ;;  %vm10981_vm5 = vcmp.lt.s32.totalorder %v4258_v28, 9 }
 0x5c6   :  { %2553 = vmatpush.msrb.mxu2 %v2187_v41  ;;  %v2115_v35 = vpop.permute.xlu0 %2114  ;;  %2522 = vmatpush.msrb.mxu0 %v2099_v36  ;;  %v2020_v40 = vsel %vm690_vm11, %v7532_v43, %v10965_v62  ;;  %v10966_v41 = vld [vmem:[#allocation87_spill] sm:$0xff]  ;;  %v10971_v54 = vld [vmem:[#allocation44_spill] sm:$0xff]  ;;  %v10972_v43 = vld [vmem:[#allocation10_spill] sm:$0xff] }
 0x5c7   :  { %2487 = vmatpush.msrb.mxu1 %v1970_v59  ;;  %v2116_v60 = vsel %vm10962_vm13, %v2113_v27, %v2115_v35  ;;  %v2123_v57 = vsel %vm10963_vm4, %v2115_v35, %v7341_v50  ;;  %v2171_v9 = vmul.f32 %v10967_v63, %v10966_v41  ;;  %v10968_v59 = vld [vmem:[#allocation21_spill] sm:$0xff]  ;;  %v10969_v27 = vld [vmem:[#allocation56_spill] sm:$0xff]  ;;  %v1988_v50 = vsel %vm636_vm12, %v7546_v26, %v10970_v61  ;;  %vm10977_vm4 = vmmov %vm10958_vm15 }
 0x5c8   :  { %2554 = vmatpush.msrb.mxu2 %v2179_v15  ;;  %v2130_v36 = vmul.f32 %v2116_v60, %v10968_v59  ;;  %2523 = vmatpush.msrb.mxu0 %v2067_v20  ;;  %v1906_v4 = vmul.f32 %v7390_v23, %v10969_v27  ;;  %v2163_v35 = vmul.f32 %v2155_v21, %v10971_v54  ;;  %v10973_v62 = vld [vmem:[#allocation25_spill] sm:$0xff]  ;;  %v10974_v60 = vld [vmem:[#allocation128_spill] sm:$0xff]  ;;  %v10976_v23 = vld [vmem:[#allocation250_spill] sm:$0xff] }
 0x5c9   :  { %2488 = vmatpush.msrb.mxu1 %v1938_v19  ;;  %v2131_v15 = vmul.f32 %v2123_v57, %v10972_v43  ;;  %v1874_v20 = vmul.f32 %v7537_v56, %v10974_v60  ;;  %v10975_v19 = vld [vmem:[#allocation53_spill] sm:$0xff]  ;;  %v1956_v27 = vsel %vm582_vm14, %v7555_v47, %v10976_v23  ;;  %v10978_v26 = vld [vmem:[#allocation59_spill] sm:$0xff]  ;;  %v10980_v57 = vld [vmem:[#allocation252_spill] sm:$0xff] }
 0x5ca   :  { %2555 = vmatpush.msrb.mxu2 %v2171_v9  ;;  %2517 = vmatpush.msrb.mxu3 %v2130_v36  ;;  %v2035_v63 = vmul.f32 %v2020_v40, %v10975_v19  ;;  %v2003_v61 = vmul.f32 %v1988_v50, %v10978_v26  ;;  %v1924_v56 = vsel %vm10981_vm5, %v7675_v52, %v10980_v57  ;;  %v10982_v47 = vld [vmem:[#allocation106_spill] sm:$0xff]  ;;  %v10983_v9 = vld [vmem:[#allocation48_spill] sm:$0xff]  ;;  %vm10984_vm15 = vmmov %vm10977_vm4 }
 0x5cb   :  { %2489 = vmatpush.msrb.mxu1 %v1906_v4  ;;  %2524 = vmatpush.msrb.mxu0 %v10973_v62  ;;  %v10979_v4 = vld [vmem:[#allocation167_spill] sm:$0xff]  ;;  %v1810_v40 = vmul.f32 %v7606_v46, %v10982_v47  ;;  %v1971_v36 = vmul.f32 %v1956_v27, %v10983_v9  ;;  %v10985_v50 = vld [vmem:[#allocation38_spill] sm:$0xff]  ;;  %v10987_v52 = vld [vmem:[#allocation52_spill] sm:$0xff] }
 0x5cc   :  { %2556 = vmatpush.msrb.mxu2 %v2163_v35  ;;  %3757 = vmatmul.msk.f32.vlgmr.msrb.gmra.mxu3 %vm10977_vm4, %v7184_v22  ;;  %v1842_v21 = vmul.f32 %v7599_v37, %v10979_v4  ;;  %v1778_v37 = vmul.f32 %v7621_v10, %v10985_v50  ;;  %v10986_v35 = vld [vmem:[#allocation94_spill] sm:$0xff]  ;;  %v10989_v27 = vld [vmem:[#allocation45_spill] sm:$0xff]  ;;  %v11014_v34 = vld [vmem:[#allocation99_spill] sm:$0xff] }
 0x5cd   :  { %2490 = vmatpush.msrb.mxu1 %v1874_v20  ;;  %2525 = vmatpush.msrb.mxu0 %v2035_v63  ;;  %v1939_v62 = vmul.f32 %v1924_v56, %v10986_v35  ;;  %v10988_v20 = vld [vmem:[#allocation34_spill] sm:$0xff]  ;;  %v10990_v63 = vld [vmem:[#allocation27_spill] sm:$0xff]  ;;  %v10994_v56 = vld [vmem:[#allocation40_spill] sm:$0xff] }
 0x5ce   :  { %2557 = vmatpush.msrb.mxu2 %v2131_v15  ;;  %v1746_v15 = vmul.f32 %v7656_v31, %v10987_v52  ;;  %v1907_v46 = vmul.f32 %v7517_v0, %v10988_v20  ;;  %v1875_v23 = vmul.f32 %v7524_v16, %v10990_v63  ;;  %v10991_v10 = vld [vmem:[#allocation30_spill] sm:$0xff]  ;;  %v10993_v31 = vld [vmem:[#allocation36_spill] sm:$0xff] }
 0x5cf   :  { %2491 = vmatpush.msrb.mxu1 %v1842_v21  ;;  %2526 = vmatpush.msrb.mxu0 %v2003_v61  ;;  %v1682_v61 = vmul.f32 %v7681_v29, %v10991_v10  ;;  %v10992_v21 = vld [vmem:[#allocation63_spill] sm:$0xff]  ;;  %v1650_v0 = vmul.f32 %v7708_v53, %v10993_v31  ;;  %v10996_v29 = vld [vmem:[#allocation14_spill] sm:$0xff] }
 0x5d0   :  { %3758 = vmatmul.msk.f32.vlgmr.msrb.gmra.mxu2 %vm10984_vm15, %v7184_v22  ;;  %v1714_v22 = vmul.f32 %v7670_v39, %v10989_v27  ;;  %v1843_v57 = vmul.f32 %v7595_v1, %v10992_v21  ;;  %v10995_v39 = vld [vmem:[#allocation178_spill] sm:$0xff]  ;;  %v10997_v1 = vld [vmem:[#allocation9_spill] sm:$0xff] }
 0x5d1   :  { %2492 = vmatpush.msrb.mxu1 %v1810_v40  ;;  %2527 = vmatpush.msrb.mxu0 %v1971_v36  ;;  %v1811_v40 = vmul.f32 %v7590_v51, %v10994_v56  ;;  %v1779_v16 = vmul.f32 %v7627_v5, %v10995_v39  ;;  %v1747_v36 = vmul.f32 %v7650_v2, %v10996_v29  ;;  %v10998_v53 = vld [vmem:[#allocation22_spill] sm:$0xff]  ;;  %v10999_v51 = vld [vmem:[#allocation17_spill] sm:$0xff]  ;;  %v2259_v5 = vpop.f32.mrf.mxu3 }
 0x5d3   :  { %2493 = vmatpush.msrb.mxu1 %v1778_v37  ;;  %2528 = vmatpush.msrb.mxu0 %v1939_v62  ;;  %v1715_v37 = vmul.f32 %v7644_v49, %v10997_v1  ;;  %v1683_v62 = vmul.f32 %v7698_v18, %v10998_v53 }
 0x5d5   :  { %2494 = vmatpush.msrb.mxu1 %v1746_v15  ;;  %2529 = vmatpush.msrb.mxu0 %v1907_v46  ;;  %v1651_v15 = vmul.f32 %v7720_v13, %v10999_v51 }
 0x5d7   :  { %2495 = vmatpush.msrb.mxu1 %v1714_v22  ;;  %2530 = vmatpush.msrb.mxu0 %v1875_v23  ;;  %v2299_v22 = vpop.f32.mrf.mxu2 }
 0x5d8   :  { %v2319_v23 = vpop.f32.mrf.mxu0 }
 0x5d9   :  { %2496 = vmatpush.msrb.mxu1 %v1682_v61  ;;  %2531 = vmatpush.msrb.mxu0 %v1843_v57  ;;  %v7867_v49 = vadd.f32 %v2319_v23, %v2299_v22 }
 0x5db   :  { %2497 = vmatpush.msrb.mxu1 %v1650_v0  ;;  %2532 = vmatpush.msrb.mxu0 %v1811_v40 }
 0x5dc   :  { %2498 = vmatmul.f32.vlgmr.msrb.gmra.mxu1 %v7120_v25 }
 0x5dd   :  { %2533 = vmatpush.msrb.mxu0 %v1779_v16 }
 0x5df   :  { %2534 = vmatpush.msrb.mxu0 %v1747_v36 }
 0x5e1   :  { %2535 = vmatpush.msrb.mxu0 %v1715_v37 }
 0x5e3   :  { %2536 = vmatpush.msrb.mxu0 %v1683_v62 }
 0x5e5   :  { %2537 = vmatpush.msrb.mxu0 %v1651_v15 }
 0x5e6   :  { %2538 = vmatmul.f32.vlgmr.msrb.gmra.mxu0 %v7120_v25  ;;  %v2573_v25 = vmul.f32 %v7867_v49, %v7867_v49 }
 0x5ef   :  { %v2279_v46 = vpop.f32.mrf.mxu1 }
 0x5f0   :  { %v7865_v57 = vadd.f32 %v2279_v46, %v2259_v5 }
 0x5f2   :  { %v2572_v13 = vmul.f32 %v7865_v57, %v7865_v57  ;;  %v2562_v37 = vadd.f32 %v7867_v49, %v7865_v57 }
 0x5f3   :  { %v2359_v61 = vpop.f32.mrf.mxu3 }
 0x5f4   :  { %v2580_v62 = vadd.f32 %v2573_v25, %v2572_v13 }
 0x5fa   :  { %v2379_v0 = vpop.f32.mrf.mxu0 }
 0x60e   :  { %v2399_v40 = vpop.f32.mrf.mxu2 }
 0x60f   :  { %v2400_v5 = vadd.f32 %v2399_v40, %v2379_v0 }
 0x611   :  { %v2339_v2 = vpop.f32.mrf.mxu1  ;;  %v2575_v10 = vmul.f32 %v2400_v5, %v2400_v5 }
 0x612   :  { %v7873_v36 = vadd.f32 %v2359_v61, %v2339_v2 }
 0x614   :  { %v2574_v15 = vmul.f32 %v7873_v36, %v7873_v36  ;;  %v2563_v23 = vadd.f32 %v2562_v37, %v7873_v36 }
 0x616   :  { %v2581_v1 = vadd.f32 %v2580_v62, %v2574_v15  ;;  %v2564_v2 = vadd.f32 %v2563_v23, %v2400_v5  ;;  %v11000_v23 = vld [vmem:[#allocation8_spill] sm:$0xff] }
 0x618   :  { %v2582_v13 = vadd.f32 %v2581_v1, %v2575_v10 }
 0x620   :  { %v2419_v18 = vpop.f32.mrf.mxu3 }
 0x639   :  { %v2439_v16 = vpop.f32.mrf.mxu1 }
 0x63a   :  { %v2440_v51 = vadd.f32 %v2439_v16, %v2419_v18 }
 0x63b   :  { %v2459_v46 = vpop.f32.mrf.mxu2 }
 0x63c   :  { %v2576_v61 = vmul.f32 %v2440_v51, %v2440_v51  ;;  %v2565_v25 = vadd.f32 %v2564_v2, %v2440_v51 }
 0x63e   :  { %v2583_v39 = vadd.f32 %v2582_v13, %v2576_v61 }
 0x642   :  { %v2479_v22 = vpop.f32.mrf.mxu0 }
 0x643   :  { %v7880_v29 = vadd.f32 %v2479_v22, %v2459_v46 }
 0x645   :  { %v2577_v0 = vmul.f32 %v7880_v29, %v7880_v29  ;;  %v2566_v37 = vadd.f32 %v2565_v25, %v7880_v29 }
 0x647   :  { %v2584_v62 = vadd.f32 %v2583_v39, %v2577_v0 }
 0x64f   :  { %v2519_v31 = vpop.f32.mrf.mxu3 }
 0x653   :  { %v2559_v40 = vpop.f32.mrf.mxu2 }
 0x659   :  { %v2499_v53 = vpop.f32.mrf.mxu1 }
 0x65a   :  { %v7882_v27 = vadd.f32 %v2519_v31, %v2499_v53 }
 0x65c   :  { %v2578_v18 = vmul.f32 %v7882_v27, %v7882_v27  ;;  %v2567_v15 = vadd.f32 %v2566_v37, %v7882_v27 }
 0x65e   :  { %v2585_v53 = vadd.f32 %v2584_v62, %v2578_v18  ;;  %v3759_v18 = vld [vmem:[%s9440_s2 + $0x10] sm:$0xff] }
 0x663   :  { %v2539_v16 = vpop.f32.mrf.mxu0 }
 0x664   :  { %v2560_v46 = vadd.f32 %v2559_v40, %v2539_v16 }
 0x666   :  { %v2579_v22 = vmul.f32 %v2560_v46, %v2560_v46  ;;  %v2568_v31 = vadd.f32 %v2567_v15, %v2560_v46 }
 0x668   :  { %2569 = vadd.xlane.f32.xlu2 %v2568_v31  ;;  %v2586_v10 = vadd.f32 %v2585_v53, %v2579_v22 }
 0x66a   :  { %2587 = vadd.xlane.f32.xlu1 %v2586_v10 }
 0x6db   :  { %v2570_v1 = vpop.xlane.xlu2 %2569 }
 0x6dc   :  { %v2571_v2 = vmul.f32 %v2570_v1, %v11000_v23 }
 0x6dd   :  { %v2588_v61 = vpop.xlane.xlu1 %2587 }
 0x6de   :  { %v2590_v13 = vmul.f32 %v2571_v2, %v2571_v2  ;;  %v2589_v25 = vmul.f32 %v2588_v61, %v11000_v23 }
 0x6e0   :  { %v2591_v52 = vsub.f32 %v2589_v25, %v2590_v13 }
 0x6e2   :  { %v2592_v56 = vmax.f32 %v2591_v52, 0.0  ;;  %v3760_v52 = vld [vmem:[%s9440_s2 + $0x18] sm:$0xff] }
 0x6e4   :  { %v2595_v50 = vadd.f32 1e-05, %v2592_v56 }
 0x6e6   :  { %3798 = vrsqrt.f32 %v2595_v50  ;;  %vm2602_vm4 = vweird.f32 %v2595_v50 }
 0x6ec   :  { %v3799_v39 = vpop.eup %3798 }
 0x6ed   :  { %v2597_v0 = vmul.f32 %v3799_v39, %v2595_v50  ;;  %vm2603_vm13 = vweird.f32 %v3799_v39 }
 0x6ee   :  { %vm2604_vm5 = vmor %vm2602_vm4, %vm2603_vm13  ;;  %vm11075_vm13 = vcmp.lt.s32.totalorder %v4258_v28, 65 }
 0x6ef   :  { %v2598_v40 = vmul.f32 %v3799_v39, %v2597_v0 }
 0x6f1   :  { %v2599_v37 = vmul.f32 0.5, %v2598_v40 }
 0x6f3   :  { %v2600_v16 = vsub.f32 1.5, %v2599_v37 }
 0x6f5   :  { %v2601_v62 = vmul.f32 %v3799_v39, %v2600_v16 }
 0x6f7   :  { %v2605_v15 = vsel %vm2604_vm5, %v3799_v39, %v2601_v62  ;;  %vm11089_vm5 = vmmov %vm11075_vm13 }
 0x6f8   :  { %v2606_v22 = vmul.f32 %v3759_v18, %v2605_v15 }
 0x6fa   :  { %2613 = vperm.xlu0 %3792, %v2606_v22   ;;  %v2609_v31 = vmul.f32 %v2606_v22, %v2571_v2 }
 0x6fc   :  { %v2610_v56 = vsub.f32 %v3760_v52, %v2609_v31 }
 0x702   :  { %2626 = vperm.xlu0 %3792, %v2610_v56  }
 0x76c   :  { %v2614_v53 = vpop.permute.xlu0 %2613 }
 0x76d   :  { %v2616_v10 = vmul.f32 %v2614_v53, %v7865_v57  ;;  %v2619_v50 = vmul.f32 %v2614_v53, %v2400_v5  ;;  %v2620_v1 = vmul.f32 %v2614_v53, %v2440_v51  ;;  %v2617_v37 = vmul.f32 %v2614_v53, %v7867_v49 }
 0x76e   :  { %v2618_v5 = vmul.f32 %v2614_v53, %v7873_v36  ;;  %v2621_v18 = vmul.f32 %v2614_v53, %v7880_v29  ;;  %v2622_v62 = vmul.f32 %v2614_v53, %v7882_v27  ;;  %v2623_v36 = vmul.f32 %v2614_v53, %v2560_v46 }
 0x774   :  { %v2627_v61 = vpop.permute.xlu0 %2626 }
 0x775   :  { %v2629_v13 = vadd.f32 %v2627_v61, %v2616_v10  ;;  %v2632_v25 = vadd.f32 %v2627_v61, %v2619_v50  ;;  %v2633_v0 = vadd.f32 %v2627_v61, %v2620_v1  ;;  %v2630_v51 = vadd.f32 %v2627_v61, %v2617_v37 }
 0x776   :  { %v2631_v49 = vadd.f32 %v2627_v61, %v2618_v5  ;;  %v2634_v15 = vadd.f32 %v2627_v61, %v2621_v18  ;;  %v2635_v22 = vadd.f32 %v2627_v61, %v2622_v62  ;;  %v2636_v31 = vadd.f32 %v2627_v61, %v2623_v36 }
 0x777   :  { %v7899_v40 = vmax.f32 %v2629_v13, 0.0  ;;  %v7901_v39 = vmax.f32 %v2632_v25, 0.0  ;;  %v7903_v2 = vmax.f32 %v2633_v0, 0.0  ;;  %v7912_v57 = vmax.f32 %v2630_v51, 0.0 }
 0x778   :  { %v7921_v16 = vmax.f32 %v2631_v49, 0.0  ;;  %v7931_v52 = vmax.f32 %v2634_v15, 0.0  ;;  %v7933_v56 = vmax.f32 %v2635_v22, 0.0  ;;  %v7935_v29 = vmax.f32 %v2636_v31, 0.0 }
 0x779   :  { %11001 = vst [vmem:[#allocation226_spill] sm:$0xff] %v7903_v2  ;;  %2651 = vrot.lane.b32.xlu2 %v7901_v39, %s3818_s21  ;;  %2645 = vrot.lane.b32.xlu0 %v7899_v40, %s3818_s21 }
 0x77a   :  { %2653 = vrot.lane.b32.xlu1 %v7903_v2, %s3818_s21  ;;  %11002 = vst [vmem:[#allocation160_spill] sm:$0xff] %v7931_v52 }
 0x77b   :  { %11003 = vst [vmem:[#allocation155_spill] sm:$0xff] %v7933_v56 }
 0x77c   :  { %11004 = vst [vmem:[#allocation235_spill] sm:$0xff] %v7935_v29 }
 0x781   :  { %2677 = vrot.lane.b32.xlu2 %v7899_v40, %s3819_s6  ;;  %2647 = vrot.lane.b32.xlu0 %v7912_v57, %s3818_s21 }
 0x782   :  { %2679 = vrot.lane.b32.xlu1 %v7912_v57, %s3819_s6 }
 0x789   :  { %2683 = vrot.lane.b32.xlu2 %v7901_v39, %s3819_s6  ;;  %2649 = vrot.lane.b32.xlu0 %v7921_v16, %s3818_s21 }
 0x78a   :  { %2685 = vrot.lane.b32.xlu1 %v7903_v2, %s3819_s6 }
 0x791   :  { %2689 = vrot.lane.b32.xlu2 %v7933_v56, %s3819_s6  ;;  %2655 = vrot.lane.b32.xlu0 %v7931_v52, %s3818_s21 }
 0x792   :  { %2691 = vrot.lane.b32.xlu1 %v7935_v29, %s3819_s6 }
 0x799   :  { %2711 = vrot.lane.b32.xlu2 %v7912_v57, %s3820_s7  ;;  %2657 = vrot.lane.b32.xlu0 %v7933_v56, %s3818_s21 }
 0x79a   :  { %2713 = vrot.lane.b32.xlu1 %v7921_v16, %s3820_s7 }
 0x7a1   :  { %2717 = vrot.lane.b32.xlu2 %v7903_v2, %s3820_s7  ;;  %2659 = vrot.lane.b32.xlu0 %v7935_v29, %s3818_s21 }
 0x7a2   :  { %2719 = vrot.lane.b32.xlu1 %v7931_v52, %s3820_s7 }
 0x7a9   :  { %2723 = vrot.lane.b32.xlu2 %v7935_v29, %s3820_s7  ;;  %2681 = vrot.lane.b32.xlu0 %v7921_v16, %s3819_s6 }
 0x7aa   :  { %2741 = vrot.lane.b32.xlu1 %v7899_v40, %s3821_s8 }
 0x7b1   :  { %3095 = vrot.lane.b32.xlu2 %v7912_v57, %s3828_s15  ;;  %2687 = vrot.lane.b32.xlu0 %v7931_v52, %s3819_s6 }
 0x7b2   :  { %3061 = vrot.lane.b32.xlu1 %v7899_v40, %s3829_s16 }
 0x7b9   :  { %3097 = vrot.lane.b32.xlu2 %v7921_v16, %s3828_s15  ;;  %2709 = vrot.lane.b32.xlu0 %v7899_v40, %s3820_s7 }
 0x7ba   :  { %3065 = vrot.lane.b32.xlu1 %v7921_v16, %s3829_s16 }
 0x7c1   :  { %3043 = vrot.lane.b32.xlu2 %v7935_v29, %s3830_s17  ;;  %2715 = vrot.lane.b32.xlu0 %v7901_v39, %s3820_s7 }
 0x7c2   :  { %2997 = vrot.lane.b32.xlu1 %v7899_v40, %s3831_s18 }
 0x7c9   :  { %3031 = vrot.lane.b32.xlu2 %v7912_v57, %s3830_s17  ;;  %2721 = vrot.lane.b32.xlu0 %v7933_v56, %s3820_s7 }
 0x7ca   :  { %2965 = vrot.lane.b32.xlu1 %v7899_v40, %s3832_s19 }
 0x7d1   :  { %2999 = vrot.lane.b32.xlu2 %v7912_v57, %s3831_s18  ;;  %3093 = vrot.lane.b32.xlu0 %v7899_v40, %s3828_s15 }
 0x7d2   :  { %2933 = vrot.lane.b32.xlu1 %v7899_v40, %s3827_s14 }
 0x7d3   :  { %v2652_v27 = vpop.permute.xlu2 %2651 }
 0x7d9   :  { %2967 = vrot.lane.b32.xlu2 %v7912_v57, %s3832_s19  ;;  %3063 = vrot.lane.b32.xlu0 %v7912_v57, %s3829_s16 }
 0x7da   :  { %2901 = vrot.lane.b32.xlu1 %v7899_v40, %s3826_s13 }
 0x7db   :  { %v2678_v46 = vpop.permute.xlu2 %2677 }
 0x7e1   :  { %2935 = vrot.lane.b32.xlu2 %v7912_v57, %s3827_s14  ;;  %3029 = vrot.lane.b32.xlu0 %v7899_v40, %s3830_s17 }
 0x7e2   :  { %3099 = vrot.lane.b32.xlu1 %v7901_v39, %s3828_s15 }
 0x7e3   :  { %v2684_v53 = vpop.permute.xlu2 %2683 }
 0x7e9   :  { %2883 = vrot.lane.b32.xlu2 %v7935_v29, %s3825_s12  ;;  %3011 = vrot.lane.b32.xlu0 %v7935_v29, %s3831_s18 }
 0x7ea   :  { %2903 = vrot.lane.b32.xlu1 %v7912_v57, %s3826_s13 }
 0x7eb   :  { %v8009_v10 = vpop.permute.xlu2 %2689  ;;  %v2646_v50 = vpop.permute.xlu0 %2645 }
 0x7ec   :  { %v2654_v1 = vpop.permute.xlu1 %2653 }
 0x7ed   :  { %v8013_v61 = vsel %vm43_vm8, %v2652_v27, %v2654_v1 }
 0x7ee   :  { %11005 = vst [vmem:[#allocation243_spill] sm:$0xff] %v8013_v61  ;;  %v11038_v61 = vld [vmem:[#allocation57_spill] sm:$0xff] }
 0x7f1   :  { %3101 = vrot.lane.b32.xlu2 %v7903_v2, %s3828_s15  ;;  %2979 = vrot.lane.b32.xlu0 %v7935_v29, %s3832_s19 }
 0x7f2   :  { %2837 = vrot.lane.b32.xlu1 %v7899_v40, %s3824_s11 }
 0x7f3   :  { %v8021_v13 = vpop.permute.xlu2 %2711  ;;  %v2648_v25 = vpop.permute.xlu0 %2647 }
 0x7f4   :  { %v2680_v0 = vpop.permute.xlu1 %2679  ;;  %v8025_v37 = vsel %vm43_vm8, %v2646_v50, %v2648_v25 }
 0x7f5   :  { %v8029_v51 = vsel %vm96_vm7, %v2678_v46, %v2680_v0 }
 0x7f9   :  { %2871 = vrot.lane.b32.xlu2 %v7912_v57, %s3825_s12  ;;  %2947 = vrot.lane.b32.xlu0 %v7935_v29, %s3827_s14 }
 0x7fa   :  { %3069 = vrot.lane.b32.xlu1 %v7903_v2, %s3829_s16 }
 0x7fb   :  { %v8037_v5 = vpop.permute.xlu2 %2717  ;;  %v2650_v49 = vpop.permute.xlu0 %2649 }
 0x7fc   :  { %v2686_v18 = vpop.permute.xlu1 %2685  ;;  %v8041_v62 = vsel %vm43_vm8, %v2650_v49, %v2652_v27  ;;  %v8045_v36 = vsel %vm43_vm8, %v2648_v25, %v2650_v49 }
 0x7fd   :  { %v8049_v15 = vsel %vm96_vm7, %v2684_v53, %v2686_v18 }
 0x7fe   :  { %11006 = vst [vmem:[#allocation177_spill] sm:$0xff] %v8049_v15 }
 0x801   :  { %2805 = vrot.lane.b32.xlu2 %v7899_v40, %s3823_s10  ;;  %2915 = vrot.lane.b32.xlu0 %v7935_v29, %s3826_s13 }
 0x802   :  { %2819 = vrot.lane.b32.xlu1 %v7935_v29, %s3823_s10 }
 0x803   :  { %v8057_v22 = vpop.permute.xlu2 %2723  ;;  %v2656_v31 = vpop.permute.xlu0 %2655 }
 0x804   :  { %v2692_v27 = vpop.permute.xlu1 %2691  ;;  %v8061_v25 = vsel %vm43_vm8, %v2654_v1, %v2656_v31 }
 0x805   :  { %11007 = vst [vmem:[#allocation11_spill] sm:$0xff] %v8061_v25  ;;  %v8066_v49 = vsel %vm96_vm7, %v8009_v10, %v2692_v27  ;;  %v8070_v23 = vsel %vm96_vm7, %v2692_v27, %v2678_v46  ;;  %v11031_v25 = vld [vmem:[#allocation104_spill] sm:$0xff] }
 0x806   :  { %11008 = vst [vmem:[#allocation240_spill] sm:$0xff] %v8066_v49 }
 0x807   :  { %11009 = vst [vmem:[#allocation4_spill] sm:$0xff] %v8070_v23 }
 0x809   :  { %3033 = vrot.lane.b32.xlu2 %v7921_v16, %s3830_s17  ;;  %2869 = vrot.lane.b32.xlu0 %v7899_v40, %s3825_s12 }
 0x80a   :  { %2873 = vrot.lane.b32.xlu1 %v7921_v16, %s3825_s12 }
 0x80b   :  { %v8078_v1 = vpop.permute.xlu2 %3095  ;;  %v2658_v21 = vpop.permute.xlu0 %2657 }
 0x80c   :  { %v2714_v47 = vpop.permute.xlu1 %2713  ;;  %v8082_v63 = vsel %vm43_vm8, %v2656_v31, %v2658_v21 }
 0x80d   :  { %11010 = vst [vmem:[#allocation242_spill] sm:$0xff] %v8082_v63  ;;  %v8087_v46 = vsel %vm150_vm6, %v8021_v13, %v2714_v47 }
 0x811   :  { %2787 = vrot.lane.b32.xlu2 %v7935_v29, %s3822_s9  ;;  %3067 = vrot.lane.b32.xlu0 %v7901_v39, %s3829_s16 }
 0x812   :  { %2807 = vrot.lane.b32.xlu1 %v7912_v57, %s3823_s10 }
 0x813   :  { %v8095_v27 = vpop.permute.xlu2 %3097  ;;  %v2660_v4 = vpop.permute.xlu0 %2659 }
 0x814   :  { %v2720_v20 = vpop.permute.xlu1 %2719  ;;  %v3114_v31 = vsel %vm798_vm9, %v8078_v1, %v8095_v27  ;;  %v8103_v60 = vsel %vm43_vm8, %v2658_v21, %v2660_v4  ;;  %v8107_v35 = vsel %vm43_vm8, %v2660_v4, %v2646_v50  ;;  %vm11072_vm8 = vcmp.lt.s32.totalorder %v4258_v28, 64 }
 0x815   :  { %11011 = vst [vmem:[#allocation183_spill] sm:$0xff] %v8103_v60  ;;  %v8112_v9 = vsel %vm150_vm6, %v8037_v5, %v2720_v20  ;;  %v3118_v26 = vmul.f32 %v3114_v31, %v11014_v34  ;;  %vm11073_vm15 = vmmov %vm11072_vm8 }
 0x816   :  { %11012 = vst [vmem:[#allocation33_spill] sm:$0xff] %v8107_v35  ;;  %vm11076_vm4 = vmmov %vm11072_vm8 }
 0x817   :  { %11013 = vst [vmem:[#allocation245_spill] sm:$0xff] %v8112_v9  ;;  %3307 = vmatpush.msra.mxu2 %v3118_v26 }
 0x819   :  { %3035 = vrot.lane.b32.xlu2 %v7901_v39, %s3830_s17  ;;  %2851 = vrot.lane.b32.xlu0 %v7935_v29, %s3824_s11 }
 0x81a   :  { %2841 = vrot.lane.b32.xlu1 %v7921_v16, %s3824_s11 }
 0x81b   :  { %v8121_v21 = vpop.permute.xlu2 %3043  ;;  %v2682_v4 = vpop.permute.xlu0 %2681 }
 0x81c   :  { %11015 = vst [vmem:[#allocation103_spill] sm:$0xff] %v8121_v21  ;;  %v8123_v50 = vpop.permute.xlu1 %2741  ;;  %v8127_v19 = vsel %vm96_vm7, %v2682_v4, %v2684_v53  ;;  %v8131_v34 = vsel %vm96_vm7, %v2680_v0, %v2682_v4 }
 0x821   :  { %2775 = vrot.lane.b32.xlu2 %v7912_v57, %s3822_s9  ;;  %2905 = vrot.lane.b32.xlu0 %v7921_v16, %s3826_s13 }
 0x822   :  { %2969 = vrot.lane.b32.xlu1 %v7921_v16, %s3832_s19 }
 0x823   :  { %v8139_v26 = vpop.permute.xlu2 %3031  ;;  %v2688_v31 = vpop.permute.xlu0 %2687 }
 0x824   :  { %v8141_v43 = vpop.permute.xlu1 %3061  ;;  %v8146_v53 = vsel %vm96_vm7, %v2688_v31, %v8009_v10  ;;  %v8150_v0 = vsel %vm96_vm7, %v2686_v18, %v2688_v31 }
 0x825   :  { %11016 = vst [vmem:[#allocation246_spill] sm:$0xff] %v8141_v43 }
 0x826   :  { %11017 = vst [vmem:[#allocation253_spill] sm:$0xff] %v8146_v53 }
 0x827   :  { %11018 = vst [vmem:[#allocation268_spill] sm:$0xff] %v8150_v0 }
 0x829   :  { %2809 = vrot.lane.b32.xlu2 %v7921_v16, %s3823_s10  ;;  %2839 = vrot.lane.b32.xlu0 %v7912_v57, %s3824_s11 }
 0x82a   :  { %2743 = vrot.lane.b32.xlu1 %v7912_v57, %s3821_s8 }
 0x82b   :  { %v8158_v4 = vpop.permute.xlu2 %2999  ;;  %v2710_v59 = vpop.permute.xlu0 %2709 }
 0x82c   :  { %v8160_v54 = vpop.permute.xlu1 %3065  ;;  %v8165_v10 = vsel %vm150_vm6, %v2710_v59, %v8021_v13  ;;  %v8170_v18 = vsel %vm150_vm6, %v8057_v22, %v2710_v59 }
 0x82d   :  { %11019 = vst [vmem:[#allocation265_spill] sm:$0xff] %v8170_v18 }
 0x831   :  { %2971 = vrot.lane.b32.xlu2 %v7901_v39, %s3832_s19  ;;  %2773 = vrot.lane.b32.xlu0 %v7899_v40, %s3822_s9 }
 0x832   :  { %2777 = vrot.lane.b32.xlu1 %v7921_v16, %s3822_s9 }
 0x833   :  { %v8178_v31 = vpop.permute.xlu2 %2967  ;;  %v2716_v14 = vpop.permute.xlu0 %2715 }
 0x834   :  { %v2998_v30 = vpop.permute.xlu1 %2997  ;;  %v8183_v13 = vsel %vm150_vm6, %v2716_v14, %v8037_v5  ;;  %v8187_v59 = vsel %vm150_vm6, %v2714_v47, %v2716_v14 }
 0x835   :  { %11020 = vst [vmem:[#allocation266_spill] sm:$0xff] %v8183_v13 }
 0x839   :  { %2939 = vrot.lane.b32.xlu2 %v7901_v39, %s3827_s14  ;;  %3001 = vrot.lane.b32.xlu0 %v7921_v16, %s3831_s18 }
 0x83a   :  { %2745 = vrot.lane.b32.xlu1 %v7921_v16, %s3821_s8 }
 0x83b   :  { %v8195_v45 = vpop.permute.xlu2 %2935  ;;  %v2722_v58 = vpop.permute.xlu0 %2721 }
 0x83c   :  { %11021 = vst [vmem:[#allocation124_spill] sm:$0xff] %v8195_v45  ;;  %v8197_v41 = vpop.permute.xlu1 %2965  ;;  %v8202_v5 = vsel %vm150_vm6, %v2722_v58, %v8057_v22  ;;  %v8206_v14 = vsel %vm150_vm6, %v2720_v20, %v2722_v58  ;;  %v11026_v20 = vld [vmem:[#allocation89_spill] sm:$0xff]  ;;  %vm11032_vm6 = vcmp.lt.s32.totalorder %v4258_v28, 9 }
 0x83d   :  { %11022 = vst [vmem:[#allocation267_spill] sm:$0xff] %v8202_v5  ;;  %v11030_v5 = vld [vmem:[#allocation102_spill] sm:$0xff]  ;;  %vm11043_vm7 = vmmov %vm11032_vm6 }
 0x83e   :  { %11023 = vst [vmem:[#allocation269_spill] sm:$0xff] %v8206_v14  ;;  %v2987_v14 = vsel %vm582_vm14, %v8197_v41, %v8178_v31 }
 0x841   :  { %2909 = vrot.lane.b32.xlu2 %v7903_v2, %s3826_s13  ;;  %2755 = vrot.lane.b32.xlu0 %v7935_v29, %s3821_s8 }
 0x842   :  { %2843 = vrot.lane.b32.xlu1 %v7901_v39, %s3824_s11 }
 0x843   :  { %v8214_v47 = vpop.permute.xlu2 %2883  ;;  %v8216_v60 = vpop.permute.xlu0 %3093 }
 0x844   :  { %11024 = vst [vmem:[#allocation271_spill] sm:$0xff] %v8214_v47  ;;  %v8218_v63 = vpop.permute.xlu1 %2933  ;;  %v3115_v58 = vsel %vm798_vm9, %v8216_v60, %v8078_v1 }
 0x845   :  { %11025 = vst [vmem:[#allocation272_spill] sm:$0xff] %v8216_v60  ;;  %v3117_v22 = vmul.f32 %v3115_v58, %v11026_v20  ;;  %v11027_v20 = vld [vmem:[#allocation98_spill] sm:$0xff]  ;;  %v11028_v60 = vld [vmem:[#allocation101_spill] sm:$0xff] }
 0x847   :  { %3267 = vmatpush.msra.mxu3 %v3117_v22 }
 0x849   :  { %3103 = vrot.lane.b32.xlu2 %v7931_v52, %s3828_s15  ;;  %3003 = vrot.lane.b32.xlu0 %v7901_v39, %s3831_s18 }
 0x84a   :  { %2811 = vrot.lane.b32.xlu1 %v7901_v39, %s3823_s10 }
 0x84b   :  { %v8231_v7 = vpop.permute.xlu2 %3101  ;;  %v3064_v49 = vpop.permute.xlu0 %3063 }
 0x84c   :  { %v8233_v8 = vpop.permute.xlu1 %2901  ;;  %v3082_v1 = vsel %vm744_vm10, %v3064_v49, %v8160_v54  ;;  %v3083_v58 = vsel %vm744_vm10, %v8141_v43, %v3064_v49 }
 0x84d   :  { %v3085_v22 = vmul.f32 %v3083_v58, %v11027_v20  ;;  %v3086_v53 = vmul.f32 %v3082_v1, %v11028_v60  ;;  %v3019_v1 = vsel %vm636_vm12, %v2998_v30, %v8158_v4 }
 0x84e   :  { %v3022_v0 = vmul.f32 %v3019_v1, %v11031_v25  ;;  %v11035_v25 = vld [vmem:[#allocation110_spill] sm:$0xff] }
 0x84f   :  { %3268 = vmatpush.msra.mxu3 %v3085_v22  ;;  %3308 = vmatpush.msra.mxu2 %v3086_v53  ;;  %v11029_v22 = vld [vmem:[#allocation115_spill] sm:$0xff] }
 0x851   :  { %3071 = vrot.lane.b32.xlu2 %v7931_v52, %s3829_s16  ;;  %2937 = vrot.lane.b32.xlu0 %v7921_v16, %s3827_s14 }
 0x852   :  { %3105 = vrot.lane.b32.xlu1 %v7933_v56, %s3828_s15  ;;  %3269 = vmatpush.msra.mxu3 %v7899_v40 }
 0x853   :  { %3309 = vmatpush.msra.mxu2 %v7912_v57  ;;  %v8251_v49 = vpop.permute.xlu2 %2871  ;;  %v3030_v58 = vpop.permute.xlu0 %3029 }
 0x854   :  { %v8253_v20 = vpop.permute.xlu1 %3099  ;;  %v3051_v60 = vsel %vm690_vm11, %v3030_v58, %v8139_v26  ;;  %v3052_v53 = vsel %vm690_vm11, %v8121_v21, %v3030_v58  ;;  %v2955_v58 = vsel %vm11032_vm6, %v8218_v63, %v8195_v45  ;;  %v11037_v21 = vld [vmem:[#allocation111_spill] sm:$0xff]  ;;  %vm11096_vm6 = vmmov %vm11089_vm5 }
 0x855   :  { %v3053_v43 = vmul.f32 %v3052_v53, %v11029_v22  ;;  %v3054_v12 = vmul.f32 %v3051_v60, %v11030_v5  ;;  %v11033_v5 = vld [vmem:[#allocation107_spill] sm:$0xff]  ;;  %v2958_v53 = vmul.f32 %v2955_v58, %v11035_v25 }
 0x856   :  { %v2990_v60 = vmul.f32 %v2987_v14, %v11033_v5  ;;  %v11036_v5 = vld [vmem:[#allocation125_spill] sm:$0xff] }
 0x857   :  { %3270 = vmatpush.msra.mxu3 %v3053_v43  ;;  %3310 = vmatpush.msra.mxu2 %v3054_v12 }
 0x859   :  { %3159 = vrot.lane.b32.xlu2 %v7912_v57, %s3833_s20  ;;  %2907 = vrot.lane.b32.xlu0 %v7901_v39, %s3826_s13 }
 0x85a   :  { %2779 = vrot.lane.b32.xlu1 %v7901_v39, %s3822_s9  ;;  %3311 = vmatpush.msra.mxu2 %v3022_v0 }
 0x85b   :  { %v8282_v12 = vpop.permute.xlu2 %2805  ;;  %v8284_v43 = vpop.permute.xlu0 %3011 }
 0x85c   :  { %11034 = vst [vmem:[#allocation254_spill] sm:$0xff] %v8284_v43  ;;  %v8287_v1 = vpop.permute.xlu1 %2903  ;;  %3312 = vmatpush.msra.mxu2 %v2990_v60  ;;  %v3020_v22 = vsel %vm636_vm12, %v8284_v43, %v2998_v30  ;;  %v11052_v43 = vld [vmem:[#allocation60_spill] sm:$0xff] }
 0x85d   :  { %v2923_v14 = vsel %vm474_vm0, %v8233_v8, %v8287_v1  ;;  %v3021_v0 = vmul.f32 %v3020_v22, %v11036_v5  ;;  %v11044_v22 = vld [vmem:[#allocation136_spill] sm:$0xff] }
 0x85e   :  { %v2926_v9 = vmul.f32 %v2923_v14, %v11037_v21  ;;  %v3253_v15 = vmul.f32 %v2923_v14, %v11038_v61  ;;  %3313 = vmatpush.msra.mxu2 %v2958_v53 }
 0x85f   :  { %3271 = vmatpush.msra.mxu3 %v3021_v0 }
 0x860   :  { %3292 = vmatpush.msra.mxu1 %v3253_v15  ;;  %3314 = vmatpush.msra.mxu2 %v2926_v9  ;;  %v11040_v15 = vld [vmem:[#allocation129_spill] sm:$0xff] }
 0x861   :  { %3073 = vrot.lane.b32.xlu2 %v7933_v56, %s3829_s16  ;;  %2875 = vrot.lane.b32.xlu0 %v7901_v39, %s3825_s12 }
 0x862   :  { %3125 = vrot.lane.b32.xlu1 %v7899_v40, %s3834_s26 }
 0x863   :  { %v8305_v30 = vpop.permute.xlu2 %3033  ;;  %v8307_v58 = vpop.permute.xlu0 %2979 }
 0x864   :  { %11039 = vst [vmem:[#allocation248_spill] sm:$0xff] %v8307_v58  ;;  %v8309_v21 = vpop.permute.xlu1 %2837  ;;  %v8315_v9 = vsel %vm690_vm11, %v8139_v26, %v8305_v30  ;;  %v2988_v61 = vsel %vm582_vm14, %v8307_v58, %v8197_v41 }
 0x865   :  { %v2989_v60 = vmul.f32 %v2988_v61, %v11040_v15  ;;  %v11048_v15 = vld [vmem:[#allocation140_spill] sm:$0xff] }
 0x867   :  { %3272 = vmatpush.msra.mxu3 %v2989_v60 }
 0x869   :  { %3161 = vrot.lane.b32.xlu2 %v7921_v16, %s3833_s20  ;;  %2877 = vrot.lane.b32.xlu0 %v7903_v2, %s3825_s12 }
 0x86a   :  { %2747 = vrot.lane.b32.xlu1 %v7901_v39, %s3821_s8 }
 0x86b   :  { %v8328_v25 = vpop.permute.xlu2 %2787  ;;  %v8330_v26 = vpop.permute.xlu0 %2947 }
 0x86c   :  { %11041 = vst [vmem:[#allocation261_spill] sm:$0xff] %v8328_v25  ;;  %v8332_v53 = vpop.permute.xlu1 %3069  ;;  %v2956_v41 = vsel %vm11043_vm7, %v8330_v26, %v8218_v63  ;;  %vm11105_vm7 = vcmp.lt.s32.totalorder %v4258_v28, 119 }
 0x86d   :  { %11042 = vst [vmem:[#allocation244_spill] sm:$0xff] %v8330_v26  ;;  %v2957_v14 = vmul.f32 %v2956_v41, %v11044_v22  ;;  %v11051_v26 = vld [vmem:[#allocation113_spill] sm:$0xff] }
 0x86f   :  { %3273 = vmatpush.msra.mxu3 %v2957_v14 }
 0x871   :  { %3037 = vrot.lane.b32.xlu2 %v7903_v2, %s3830_s17  ;;  %2845 = vrot.lane.b32.xlu0 %v7903_v2, %s3824_s11 }
 0x872   :  { %3129 = vrot.lane.b32.xlu1 %v7921_v16, %s3834_s26 }
 0x873   :  { %v8345_v5 = vpop.permute.xlu2 %3035  ;;  %v8347_v0 = vpop.permute.xlu0 %2915 }
 0x874   :  { %11045 = vst [vmem:[#allocation234_spill] sm:$0xff] %v8347_v0  ;;  %v8349_v61 = vpop.permute.xlu1 %2819  ;;  %v8355_v63 = vsel %vm474_vm0, %v8347_v0, %v8233_v8  ;;  %v11057_v0 = vld [vmem:[#allocation149_spill] sm:$0xff] }
 0x875   :  { %11046 = vst [vmem:[#allocation270_spill] sm:$0xff] %v8349_v61  ;;  %v2925_v60 = vmul.f32 %v8355_v63, %v11048_v15 }
 0x876   :  { %11047 = vst [vmem:[#allocation228_spill] sm:$0xff] %v8355_v63 }
 0x877   :  { %3274 = vmatpush.msra.mxu3 %v2925_v60  ;;  %v11050_v60 = vld [vmem:[#allocation144_spill] sm:$0xff] }
 0x879   :  { %3005 = vrot.lane.b32.xlu2 %v7903_v2, %s3831_s18  ;;  %3157 = vrot.lane.b32.xlu0 %v7899_v40, %s3833_s20 }
 0x87a   :  { %3039 = vrot.lane.b32.xlu1 %v7931_v52, %s3830_s17 }
 0x87b   :  { %v8365_v41 = vpop.permute.xlu2 %2775  ;;  %v2870_v22 = vpop.permute.xlu0 %2869 }
 0x87c   :  { %v8367_v14 = vpop.permute.xlu1 %2873  ;;  %v2891_v8 = vsel %vm420_vm1, %v2870_v22, %v8251_v49  ;;  %v8375_v15 = vsel %vm420_vm1, %v8214_v47, %v2870_v22 }
 0x87d   :  { %11049 = vst [vmem:[#allocation237_spill] sm:$0xff] %v8375_v15  ;;  %v2893_v40 = vmul.f32 %v8375_v15, %v11050_v60  ;;  %v2894_v58 = vmul.f32 %v2891_v8, %v11051_v26  ;;  %v3245_v63 = vmul.f32 %v2891_v8, %v11052_v43 }
 0x87f   :  { %3275 = vmatpush.msra.mxu3 %v2893_v40  ;;  %3293 = vmatpush.msra.mxu1 %v3245_v63  ;;  %v11056_v40 = vld [vmem:[#allocation146_spill] sm:$0xff] }
 0x880   :  { %3315 = vmatpush.msra.mxu2 %v2894_v58 }
 0x881   :  { %3007 = vrot.lane.b32.xlu2 %v7931_v52, %s3831_s18  ;;  %2813 = vrot.lane.b32.xlu0 %v7903_v2, %s3823_s10 }
 0x882   :  { %2941 = vrot.lane.b32.xlu1 %v7903_v2, %s3827_s14 }
 0x883   :  { %v8387_v22 = vpop.permute.xlu2 %2809  ;;  %v8389_v47 = vpop.permute.xlu0 %3067 }
 0x884   :  { %v2808_v60 = vpop.permute.xlu1 %2807  ;;  %v8395_v43 = vsel %vm744_vm10, %v8389_v47, %v8332_v53 }
 0x885   :  { %v8477_v44 = vsel %vm312_vm3, %v2808_v60, %v8387_v22 }
 0x886   :  { %11066 = vst [vmem:[#allocation231_spill] sm:$0xff] %v8477_v44 }
 0x889   :  { %2943 = vrot.lane.b32.xlu2 %v7931_v52, %s3827_s14  ;;  %3127 = vrot.lane.b32.xlu0 %v7912_v57, %s3834_s26  ;;  %v8419_v57 = vsel %vm312_vm3, %v8349_v61, %v8282_v12 }
 0x88a   :  { %3107 = vrot.lane.b32.xlu1 %v7935_v29, %s3828_s15  ;;  %11055 = vst [vmem:[#allocation230_spill] sm:$0xff] %v8419_v57  ;;  %v2829_v38 = vmul.f32 %v8419_v57, %v11057_v0  ;;  %v11062_v57 = vld [vmem:[#allocation70_spill] sm:$0xff] }
 0x88b   :  { %v8403_v58 = vpop.permute.xlu2 %2971  ;;  %v8405_v26 = vpop.permute.xlu0 %2851 }
 0x88c   :  { %11053 = vst [vmem:[#allocation229_spill] sm:$0xff] %v8405_v26  ;;  %v8407_v63 = vpop.permute.xlu1 %2841  ;;  %v8413_v8 = vsel %vm366_vm2, %v8405_v26, %v8309_v21 }
 0x88d   :  { %11054 = vst [vmem:[#allocation6_spill] sm:$0xff] %v8413_v8  ;;  %v2861_v15 = vmul.f32 %v8413_v8, %v11056_v40  ;;  %v11061_v40 = vld [vmem:[#allocation66_spill] sm:$0xff] }
 0x88f   :  { %3276 = vmatpush.msra.mxu3 %v2861_v15  ;;  %v8447_v15 = vsel %vm420_vm1, %v8251_v49, %v8367_v14 }
 0x890   :  { %11060 = vst [vmem:[#allocation157_spill] sm:$0xff] %v8447_v15  ;;  %v3246_v8 = vmul.f32 %v8447_v15, %v11062_v57  ;;  %v11064_v15 = vld [vmem:[#allocation116_spill] sm:$0xff] }
 0x891   :  { %2911 = vrot.lane.b32.xlu2 %v7931_v52, %s3826_s13  ;;  %2781 = vrot.lane.b32.xlu0 %v7903_v2, %s3822_s9 }
 0x892   :  { %3075 = vrot.lane.b32.xlu1 %v7935_v29, %s3829_s16  ;;  %3277 = vmatpush.msra.mxu3 %v2829_v38 }
 0x893   :  { %v8431_v26 = vpop.permute.xlu2 %2939  ;;  %v8433_v61 = vpop.permute.xlu0 %2905 }
 0x894   :  { %11058 = vst [vmem:[#allocation181_spill] sm:$0xff] %v8431_v26  ;;  %v8435_v13 = vpop.permute.xlu1 %2969  ;;  %v8441_v0 = vsel %vm474_vm0, %v8287_v1, %v8433_v61 }
 0x895   :  { %11059 = vst [vmem:[#allocation13_spill] sm:$0xff] %v8441_v0  ;;  %v3254_v38 = vmul.f32 %v8441_v0, %v11061_v40 }
 0x897   :  { %3332 = vmatpush.msra.mxu0 %v3254_v38  ;;  %v2827_v38 = vsel %vm312_vm3, %v8282_v12, %v2808_v60  ;;  %v11070_v12 = vld [vmem:[#allocation76_spill] sm:$0xff] }
 0x899   :  { %3165 = vrot.lane.b32.xlu2 %v7903_v2, %s3833_s20  ;;  %2749 = vrot.lane.b32.xlu0 %v7903_v2, %s3821_s8 }
 0x89a   :  { %2879 = vrot.lane.b32.xlu1 %v7931_v52, %s3825_s12  ;;  %3333 = vmatpush.msra.mxu0 %v3246_v8  ;;  %v11065_v8 = vld [vmem:[#allocation61_spill] sm:$0xff] }
 0x89b   :  { %v8459_v1 = vpop.permute.xlu2 %2909  ;;  %v2840_v49 = vpop.permute.xlu0 %2839 }
 0x89c   :  { %v2744_v17 = vpop.permute.xlu1 %2743  ;;  %v8464_v40 = vsel %vm366_vm2, %v2840_v49, %v8407_v63  ;;  %v2859_v57 = vsel %vm366_vm2, %v8309_v21, %v2840_v49  ;;  %v3229_v21 = vmul.f32 %v2827_v38, %v11068_v55  ;;  %v11069_v49 = vld [vmem:[#allocation119_spill] sm:$0xff] }
 0x89d   :  { %11063 = vst [vmem:[#allocation236_spill] sm:$0xff] %v8464_v40  ;;  %v2862_v48 = vmul.f32 %v2859_v57, %v11064_v15  ;;  %v3237_v0 = vmul.f32 %v2859_v57, %v11065_v8  ;;  %v3238_v26 = vmul.f32 %v8464_v40, %v11067_v32  ;;  %v2830_v45 = vmul.f32 %v2827_v38, %v11069_v49  ;;  %v11077_v57 = vld [vmem:[#allocation151_spill] sm:$0xff]  ;;  %v11078_v8 = vld [vmem:[#allocation122_spill] sm:$0xff]  ;;  %v11079_v49 = vld [vmem:[#allocation81_spill] sm:$0xff] }
 0x89e   :  { %v3230_v15 = vmul.f32 %v8477_v44, %v11070_v12  ;;  %v11082_v44 = vld [vmem:[#allocation123_spill] sm:$0xff] }
 0x89f   :  { %3294 = vmatpush.msra.mxu1 %v3237_v0  ;;  %3316 = vmatpush.msra.mxu2 %v2862_v48  ;;  %v2763_v0 = vsel %vm11075_vm13, %v8123_v50, %v2744_v17  ;;  %vm11126_vm13 = vmmov %vm11105_vm7 }
 0x8a0   :  { %3334 = vmatpush.msra.mxu0 %v3238_v26  ;;  %v2766_v40 = vmul.f32 %v2763_v0, %v11082_v44 }
 0x8a1   :  { %3133 = vrot.lane.b32.xlu2 %v7903_v2, %s3834_s26  ;;  %2973 = vrot.lane.b32.xlu0 %v7903_v2, %s3832_s19 }
 0x8a2   :  { %2847 = vrot.lane.b32.xlu1 %v7931_v52, %s3824_s11  ;;  %3295 = vmatpush.msra.mxu1 %v3229_v21 }
 0x8a3   :  { %3317 = vmatpush.msra.mxu2 %v2830_v45  ;;  %3335 = vmatpush.msra.mxu0 %v3230_v15  ;;  %v8491_v32 = vpop.permute.xlu2 %3103  ;;  %v2774_v55 = vpop.permute.xlu0 %2773  ;;  %v11080_v15 = vld [vmem:[#allocation65_spill] sm:$0xff] }
 0x8a4   :  { %11071 = vst [vmem:[#allocation251_spill] sm:$0xff] %v8491_v32  ;;  %v8493_v48 = vpop.permute.xlu1 %2777  ;;  %v2795_v60 = vsel %vm11072_vm8, %v2774_v55, %v8365_v41  ;;  %v8501_v26 = vsel %vm11073_vm15, %v8328_v25, %v2774_v55  ;;  %v11081_v25 = vld [vmem:[#allocation68_spill] sm:$0xff]  ;;  %vm11113_vm8 = vmmov %vm11076_vm4 }
 0x8a5   :  { %11074 = vst [vmem:[#allocation232_spill] sm:$0xff] %v8501_v26  ;;  %v8510_v45 = vsel %vm11076_vm4, %v8365_v41, %v8493_v48  ;;  %v2797_v38 = vmul.f32 %v8501_v26, %v11077_v57  ;;  %v2798_v21 = vmul.f32 %v2795_v60, %v11078_v8  ;;  %v3221_v55 = vmul.f32 %v2795_v60, %v11080_v15  ;;  %v11083_v41 = vld [vmem:[#allocation72_spill] sm:$0xff]  ;;  %v11084_v60 = vld [vmem:[#allocation126_spill] sm:$0xff]  ;;  %vm11117_vm15 = vmmov %vm11089_vm5 }
 0x8a6   :  { %v3222_v12 = vmul.f32 %v8510_v45, %v11079_v49  ;;  %v3213_v2 = vmul.f32 %v2763_v0, %v11081_v25  ;;  %v3205_v57 = vmul.f32 %v8165_v10, %v11083_v41  ;;  %v2734_v25 = vmul.f32 %v8165_v10, %v11084_v60  ;;  %v11086_v0 = vld [vmem:[#allocation75_spill] sm:$0xff]  ;;  %v11092_v60 = vld [vmem:[#allocation132_spill] sm:$0xff] }
 0x8a7   :  { %3278 = vmatpush.msra.mxu3 %v2797_v38  ;;  %3318 = vmatpush.msra.mxu2 %v2798_v21  ;;  %v3197_v8 = vmul.f32 %v8029_v51, %v11086_v0  ;;  %vm11130_vm4 = vcmp.lt.s32.totalorder %v4258_v28, 120 }
 0x8a8   :  { %3296 = vmatpush.msra.mxu1 %v3221_v55  ;;  %3336 = vmatpush.msra.mxu0 %v3222_v12  ;;  %v11090_v12 = vld [vmem:[#allocation77_spill] sm:$0xff]  ;;  %v11091_v55 = vld [vmem:[#allocation84_spill] sm:$0xff] }
 0x8a9   :  { %3041 = vrot.lane.b32.xlu2 %v7933_v56, %s3830_s17  ;;  %2975 = vrot.lane.b32.xlu0 %v7931_v52, %s3832_s19  ;;  %v3189_v15 = vmul.f32 %v8025_v37, %v11090_v12 }
 0x8aa   :  { %2815 = vrot.lane.b32.xlu1 %v7931_v52, %s3823_s10  ;;  %3297 = vmatpush.msra.mxu1 %v3213_v2  ;;  %v11088_v2 = vld [vmem:[#allocation130_spill] sm:$0xff] }
 0x8ab   :  { %3319 = vmatpush.msra.mxu2 %v2766_v40  ;;  %v8530_v38 = vpop.permute.xlu2 %3071  ;;  %v8532_v44 = vpop.permute.xlu0 %3001  ;;  %v2702_v10 = vmul.f32 %v8029_v51, %v11088_v2  ;;  %v11093_v51 = vld [vmem:[#allocation86_spill] sm:$0xff] }
 0x8ac   :  { %11085 = vst [vmem:[#allocation239_spill] sm:$0xff] %v8530_v38  ;;  %v8536_v21 = vpop.permute.xlu1 %2745  ;;  %v8542_v49 = vsel %vm744_vm10, %v8332_v53, %v8530_v38  ;;  %3298 = vmatpush.msra.mxu1 %v3205_v57  ;;  %v2670_v53 = vmul.f32 %v8025_v37, %v11092_v60  ;;  %v3206_v57 = vmul.f32 %v8087_v46, %v11093_v51 }
 0x8ad   :  { %11087 = vst [vmem:[#allocation225_spill] sm:$0xff] %v8542_v49  ;;  %v8549_v40 = vsel %vm11089_vm5, %v2744_v17, %v8536_v21  ;;  %3320 = vmatpush.msra.mxu2 %v2734_v25  ;;  %v11094_v17 = vld [vmem:[#allocation88_spill] sm:$0xff]  ;;  %vm11131_vm5 = vmmov %vm11130_vm4 }
 0x8ae   :  { %v3214_v41 = vmul.f32 %v8549_v40, %v11091_v55  ;;  %3299 = vmatpush.msra.mxu1 %v3197_v8  ;;  %v3198_v25 = vmul.f32 %v8131_v34, %v11094_v17 }
 0x8af   :  { %3321 = vmatpush.msra.mxu2 %v2702_v10  ;;  %v11098_v10 = vld [vmem:[#allocation93_spill] sm:$0xff] }
 0x8b0   :  { %3300 = vmatpush.msra.mxu1 %v3189_v15  ;;  %3337 = vmatpush.msra.mxu0 %v3214_v41  ;;  %v3190_v12 = vmul.f32 %v8045_v36, %v11098_v10  ;;  %v11099_v15 = vld [vmem:[#allocation154_spill] sm:$0xff]  ;;  %v11100_v41 = vld [vmem:[#allocation7_spill] sm:$0xff] }
 0x8b1   :  { %3322 = vmatpush.msra.mxu2 %v2670_v53  ;;  %3009 = vrot.lane.b32.xlu2 %v7933_v56, %s3831_s18  ;;  %v2733_v60 = vmul.f32 %v8170_v18, %v11100_v41  ;;  %v11101_v53 = vld [vmem:[#allocation159_spill] sm:$0xff]  ;;  %v11110_v18 = vld [vmem:[#allocation133_spill] sm:$0xff] }
 0x8b2   :  { %2783 = vrot.lane.b32.xlu1 %v7931_v52, %s3822_s9  ;;  %3163 = vrot.lane.b32.xlu0 %v7901_v39, %s3833_s20  ;;  %v2701_v51 = vmul.f32 %v8070_v23, %v11101_v53 }
 0x8b3   :  { %3338 = vmatpush.msra.mxu0 %v3206_v57  ;;  %v8567_v37 = vpop.permute.xlu2 %3159  ;;  %v8569_v0 = vpop.permute.xlu0 %2755 }
 0x8b4   :  { %11095 = vst [vmem:[#allocation23_spill] sm:$0xff] %v8569_v0  ;;  %v8571_v8 = vpop.permute.xlu1 %2843  ;;  %v8577_v2 = vsel %vm11096_vm6, %v8569_v0, %v8123_v50  ;;  %v11102_v50 = vld [vmem:[#allocation162_spill] sm:$0xff]  ;;  %vm11135_vm6 = vcmask 719872  }
 0x8b5   :  { %11097 = vst [vmem:[#allocation3_spill] sm:$0xff] %v8577_v2  ;;  %3339 = vmatpush.msra.mxu0 %v3198_v25  ;;  %v2765_v55 = vmul.f32 %v8577_v2, %v11099_v15  ;;  %v2669_v57 = vmul.f32 %v8107_v35, %v11102_v50  ;;  %v11112_v0 = vld [vmem:[#allocation50_spill] sm:$0xff] }
 0x8b7   :  { %3340 = vmatpush.msra.mxu0 %v3190_v12  ;;  %3279 = vmatpush.msra.mxu3 %v2765_v55 }
 0x8b9   :  { %2977 = vrot.lane.b32.xlu2 %v7933_v56, %s3832_s19  ;;  %3280 = vmatpush.msra.mxu3 %v2733_v60 }
 0x8ba   :  { %2751 = vrot.lane.b32.xlu1 %v7931_v52, %s3821_s8  ;;  %3131 = vrot.lane.b32.xlu0 %v7901_v39, %s3834_s26 }
 0x8bb   :  { %v8595_v17 = vpop.permute.xlu2 %3073  ;;  %3281 = vmatpush.msra.mxu3 %v2701_v51  ;;  %v8597_v25 = vpop.permute.xlu0 %3003  ;;  %v11107_v51 = vld [vmem:[#allocation161_spill] sm:$0xff] }
 0x8bc   :  { %11103 = vst [vmem:[#allocation233_spill] sm:$0xff] %v8595_v17  ;;  %v8599_v10 = vpop.permute.xlu1 %2811  ;;  %v8605_v12 = vsel %vm636_vm12, %v8532_v44, %v8597_v25 }
 0x8bd   :  { %11104 = vst [vmem:[#allocation255_spill] sm:$0xff] %v8597_v25  ;;  %3282 = vmatpush.msra.mxu3 %v2669_v57 }
 0x8c1   :  { %2945 = vrot.lane.b32.xlu2 %v7933_v56, %s3827_s14 }
 0x8c2   :  { %2753 = vrot.lane.b32.xlu1 %v7933_v56, %s3821_s8  ;;  %2913 = vrot.lane.b32.xlu0 %v7933_v56, %s3826_s13 }
 0x8c3   :  { %v8613_v15 = vpop.permute.xlu2 %3161  ;;  %v8615_v55 = vpop.permute.xlu0 %2937 }
 0x8c4   :  { %v8617_v41 = vpop.permute.xlu1 %3105  ;;  %v3178_v60 = vsel %vm11105_vm7, %v8567_v37, %v8613_v15  ;;  %vm11136_vm7 = vmmov %vm11135_vm6 }
 0x8c5   :  { %v8627_v53 = vsel %vm798_vm9, %v8491_v32, %v8617_v41  ;;  %v3182_v50 = vmul.f32 %v3178_v60, %v11107_v51  ;;  %v11109_v51 = vld [vmem:[#allocation170_spill] sm:$0xff]  ;;  %v11122_v32 = vld [vmem:[#allocation100_spill] sm:$0xff] }
 0x8c6   :  { %11106 = vst [vmem:[#allocation158_spill] sm:$0xff] %v8627_v53  ;;  %v11120_v53 = vld [vmem:[#allocation175_spill] sm:$0xff] }
 0x8c7   :  { %3341 = vmatpush.msra.mxu0 %v3182_v50  ;;  %v3207_v38 = vmul.f32 %v8187_v59, %v11120_v53 }
 0x8c9   :  { %3135 = vrot.lane.b32.xlu2 %v7931_v52, %s3834_s26 }
 0x8ca   :  { %3169 = vrot.lane.b32.xlu1 %v7933_v56, %s3833_s20  ;;  %2881 = vrot.lane.b32.xlu0 %v7933_v56, %s3825_s12 }
 0x8cb   :  { %v2908_v57 = vpop.permute.xlu0 %2907 }
 0x8cc   :  { %v8636_v35 = vpop.permute.xlu1 %2779  ;;  %v8641_v23 = vsel %vm474_vm0, %v2908_v57, %v8459_v1  ;;  %v8646_v60 = vsel %vm474_vm0, %v8433_v61, %v2908_v57  ;;  %v8662_v61 = vsel %vm366_vm2, %v8407_v63, %v8571_v8 }
 0x8cd   :  { %11108 = vst [vmem:[#allocation257_spill] sm:$0xff] %v8641_v23  ;;  %v3255_v50 = vmul.f32 %v8646_v60, %v11109_v51  ;;  %v3256_v2 = vmul.f32 %v8641_v23, %v11110_v18  ;;  %v3239_v63 = vmul.f32 %v8662_v61, %v11112_v0  ;;  %v8685_v23 = vsel %vm11113_vm8, %v8493_v48, %v8636_v35 }
 0x8cf   :  { %3372 = vmatpush.msrb.mxu3 %v3255_v50  ;;  %3412 = vmatpush.msrb.mxu2 %v3256_v2  ;;  %v11111_v2 = vld [vmem:[#allocation171_spill] sm:$0xff]  ;;  %v8677_v50 = vsel %vm312_vm3, %v8387_v22, %v8599_v10 }
 0x8d1   :  { %3137 = vrot.lane.b32.xlu2 %v7933_v56, %s3834_s26 }
 0x8d2   :  { %3139 = vrot.lane.b32.xlu1 %v7935_v29, %s3834_s26  ;;  %2849 = vrot.lane.b32.xlu0 %v7933_v56, %s3824_s11 }
 0x8d3   :  { %v2876_v26 = vpop.permute.xlu0 %2875 }
 0x8d4   :  { %v8664_v57 = vpop.permute.xlu1 %3125  ;;  %v8669_v18 = vsel %vm420_vm1, %v8367_v14, %v2876_v26  ;;  %v11114_v14 = vld [vmem:[#allocation173_spill] sm:$0xff] }
 0x8d5   :  { %v3247_v51 = vmul.f32 %v8669_v18, %v11111_v2  ;;  %v3231_v25 = vmul.f32 %v8677_v50, %v11114_v14  ;;  %v11115_v2 = vld [vmem:[#allocation41_spill] sm:$0xff] }
 0x8d6   :  { %v3223_v22 = vmul.f32 %v8685_v23, %v11115_v2 }
 0x8d7   :  { %3373 = vmatpush.msrb.mxu3 %v3247_v51 }
 0x8d9   :  { %3374 = vmatpush.msrb.mxu3 %v3239_v63  ;;  %v11118_v63 = vld [vmem:[#allocation135_spill] sm:$0xff] }
 0x8da   :  { %2817 = vrot.lane.b32.xlu0 %v7933_v56, %s3823_s10 }
 0x8db   :  { %3375 = vmatpush.msrb.mxu3 %v3231_v25  ;;  %v8693_v49 = vpop.permute.xlu0 %2877  ;;  %v11119_v25 = vld [vmem:[#allocation174_spill] sm:$0xff] }
 0x8dc   :  { %v8695_v0 = vpop.permute.xlu1 %2747  ;;  %v8700_v48 = vsel %vm420_vm1, %v2876_v26, %v8693_v49  ;;  %v11121_v26 = vld [vmem:[#allocation176_spill] sm:$0xff] }
 0x8dd   :  { %11116 = vst [vmem:[#allocation227_spill] sm:$0xff] %v8700_v48  ;;  %v8706_v51 = vsel %vm11117_vm15, %v8536_v21, %v8695_v0  ;;  %v3248_v14 = vmul.f32 %v8700_v48, %v11118_v63  ;;  %3376 = vmatpush.msrb.mxu3 %v3223_v22  ;;  %v3199_v17 = vmul.f32 %v8127_v19, %v11121_v26  ;;  %vm11141_vm15 = vcmp.lt.s32.totalorder %v4258_v28, 9 }
 0x8de   :  { %v3215_v2 = vmul.f32 %v8706_v51, %v11119_v25  ;;  %v3191_v22 = vmul.f32 %v8041_v62, %v11122_v32  ;;  %v11124_v25 = vld [vmem:[#allocation139_spill] sm:$0xff] }
 0x8df   :  { %3413 = vmatpush.msrb.mxu2 %v3248_v14  ;;  %v8730_v14 = vpop.permute.xlu2 %3037 }
 0x8e0   :  { %3377 = vmatpush.msrb.mxu3 %v3215_v2 }
 0x8e2   :  { %2785 = vrot.lane.b32.xlu0 %v7933_v56, %s3822_s9  ;;  %3378 = vmatpush.msrb.mxu3 %v3207_v38  ;;  %v11129_v56 = vld [vmem:[#allocation143_spill] sm:$0xff] }
 0x8e3   :  { %v8718_v21 = vpop.permute.xlu0 %2845 }
 0x8e4   :  { %v8722_v63 = vpop.permute.xlu1 %3129  ;;  %3379 = vmatpush.msrb.mxu3 %v3199_v17  ;;  %v8728_v53 = vsel %vm366_vm2, %v8571_v8, %v8718_v21 }
 0x8e5   :  { %11123 = vst [vmem:[#allocation163_spill] sm:$0xff] %v8728_v53  ;;  %v3240_v2 = vmul.f32 %v8728_v53, %v11124_v25 }
 0x8e6   :  { %3380 = vmatpush.msrb.mxu3 %v3191_v22 }
 0x8e7   :  { %3414 = vmatpush.msrb.mxu2 %v3240_v2  ;;  %v8745_v26 = vpop.permute.xlu2 %3005 }
 0x8ea   :  { %3167 = vrot.lane.b32.xlu0 %v7931_v52, %s3833_s20 }
 0x8eb   :  { %v8736_v32 = vpop.permute.xlu0 %3157 }
 0x8ec   :  { %11125 = vst [vmem:[#allocation256_spill] sm:$0xff] %v8736_v32  ;;  %v8738_v38 = vpop.permute.xlu1 %3039  ;;  %v3179_v8 = vsel %vm11126_vm13, %v8736_v32, %v8567_v37  ;;  %vm11144_vm13 = vmmov %vm11141_vm15 }
 0x8ed   :  { %v3181_v17 = vmul.f32 %v3179_v8, %v10781_v11  ;;  %v3112_v8 = vsel %vm798_vm9, %v8253_v20, %v8231_v7 }
 0x8ef   :  { %3301 = vmatpush.msra.mxu1 %v3181_v17  ;;  %v8761_v11 = vpop.permute.xlu2 %3007  ;;  %v3113_v17 = vsel %vm798_vm9, %v8095_v27, %v8253_v20 }
 0x8f0   :  { %v3119_v48 = vmul.f32 %v3113_v17, %v10796_v24  ;;  %v3018_v24 = vsel %vm636_vm12, %v8158_v4, %v8532_v44  ;;  %v11137_v4 = vld [vmem:[#allocation169_spill] sm:$0xff] }
 0x8f2   :  { %3171 = vrot.lane.b32.xlu0 %v7935_v29, %s3833_s20 }
 0x8f3   :  { %v8749_v22 = vpop.permute.xlu0 %2813 }
 0x8f4   :  { %v8751_v25 = vpop.permute.xlu1 %2941  ;;  %v8757_v2 = vsel %vm312_vm3, %v8599_v10, %v8749_v22 }
 0x8f5   :  { %11127 = vst [vmem:[#allocation131_spill] sm:$0xff] %v8751_v25  ;;  %v3232_v37 = vmul.f32 %v8757_v2, %v11129_v56  ;;  %v11133_v25 = vld [vmem:[#allocation165_spill] sm:$0xff] }
 0x8f6   :  { %11128 = vst [vmem:[#allocation258_spill] sm:$0xff] %v8757_v2  ;;  %v11132_v2 = vld [vmem:[#allocation168_spill] sm:$0xff]  ;;  %v3120_v52 = vmul.f32 %v3112_v8, %v11133_v25 }
 0x8f7   :  { %3415 = vmatpush.msrb.mxu2 %v3232_v37  ;;  %v3081_v37 = vsel %vm744_vm10, %v8160_v54, %v8389_v47  ;;  %v8796_v54 = vld [vmem:[%s9439_s1 + $0x28] sm:$0xff]  ;;  %v11134_v47 = vld [vmem:[#allocation166_spill] sm:$0xff] }
 0x8fb   :  { %v3128_v29 = vpop.permute.xlu0 %3127 }
 0x8fc   :  { %v8771_v32 = vpop.permute.xlu1 %3107  ;;  %v3146_v56 = vsel %vm11130_vm4, %v3128_v29, %v8722_v63  ;;  %v3147_v10 = vsel %vm11131_vm5, %v8664_v57, %v3128_v29  ;;  %v3087_v29 = vmul.f32 %v3081_v37, %v10800_v33  ;;  %v8813_v33 = vpop.permute.xlu2 %2943  ;;  %v11146_v37 = vld [vmem:[#allocation187_spill] sm:$0xff]  ;;  %vm11150_vm4 = vcmp.lt.s32.totalorder %v4258_v28, 65  ;;  %vm11182_vm5 = vmmov %vm11113_vm8 }
 0x8fd   :  { %v8787_v27 = vsel %vm798_vm9, %v8617_v41, %v8771_v32  ;;  %v3149_v20 = vmul.f32 %v3147_v10, %v10795_v6  ;;  %v3150_v53 = vmul.f32 %v3146_v56, %v11132_v2  ;;  %v3088_v41 = vmul.f32 %v8395_v43, %v11134_v47  ;;  %v11140_v2 = vld [vmem:[#allocation124_spill] sm:$0xff]  ;;  %v11143_v56 = vld [vmem:[#allocation181_spill] sm:$0xff] }
 0x8fe   :  { %v3049_v6 = vsel %vm690_vm11, %v8305_v30, %v8345_v5  ;;  %v3055_v43 = vmul.f32 %v8315_v9, %v10805_v3  ;;  %v2985_v3 = vsel %vm582_vm14, %v8435_v13, %v8403_v58  ;;  %v3023_v9 = vmul.f32 %v3018_v24, %v10810_v42 }
 0x8ff   :  { %3302 = vmatpush.msra.mxu1 %v3149_v20  ;;  %3342 = vmatpush.msra.mxu0 %v3150_v53  ;;  %v3056_v44 = vmul.f32 %v3049_v6, %v11137_v4  ;;  %v2986_v53 = vsel %vm582_vm14, %v8178_v31, %v8435_v13  ;;  %v2954_v8 = vsel %vm11141_vm15, %v11140_v2, %v8615_v55  ;;  %v11142_v31 = vld [vmem:[#allocation82_spill] sm:$0xff]  ;;  %v11145_v13 = vld [vmem:[#allocation109_spill] sm:$0xff]  ;;  %vm11190_vm15 = vcmp.lt.s32.totalorder %v4258_v28, 120 }
 0x900   :  { %3763 = vmatmul.msk.f32.vlgmr.msra.gmra.mxu1 %vm11135_vm6, %v8796_v54  ;;  %3764 = vmatmul.msk.f32.vlgmr.msra.gmra.mxu0 %vm11136_vm7, %v8796_v54  ;;  %v2991_v17 = vmul.f32 %v2986_v53, %v11142_v31  ;;  %v2953_v42 = vsel %vm11144_vm13, %v8615_v55, %v11143_v56  ;;  %v2992_v10 = vmul.f32 %v2985_v3, %v11145_v13  ;;  %v11147_v20 = vld [vmem:[#allocation37_spill] sm:$0xff]  ;;  %v11151_v4 = vld [vmem:[#allocation58_spill] sm:$0xff]  ;;  %v11160_v13 = vld [vmem:[#allocation16_spill] sm:$0xff]  ;;  %vm11183_vm6 = vcmp.lt.s32.totalorder %v4258_v28, 119 }
 0x901   :  { %3347 = vmatpush.msrb.mxu1 %v3119_v48  ;;  %3387 = vmatpush.msrb.mxu0 %v3120_v52  ;;  %v11149_v6 = vld [vmem:[#allocation13_spill] sm:$0xff]  ;;  %v11152_v3 = vld [vmem:[#allocation190_spill] sm:$0xff]  ;;  %vm11184_vm7 = vmmov %vm11183_vm6 }
 0x902   :  { %vm11191_vm13 = vmmov %vm11190_vm15 }
 0x903   :  { %3348 = vmatpush.msrb.mxu1 %v3087_v29  ;;  %3388 = vmatpush.msrb.mxu0 %v3088_v41  ;;  %v8815_v52 = vpop.permute.xlu0 %2781  ;;  %v2960_v29 = vmul.f32 %v2953_v42, %v11147_v20  ;;  %v11148_v41 = vld [vmem:[#allocation188_spill] sm:$0xff] }
 0x904   :  { %v8819_v48 = vpop.permute.xlu1 %3075  ;;  %v8825_v30 = vsel %vm11113_vm8, %v8636_v35, %v8815_v52  ;;  %v11138_v35 = vld [vmem:[#allocation145_spill] sm:$0xff]  ;;  %v2927_v24 = vmul.f32 %v11149_v6, %v11148_v41  ;;  %v8869_v53 = vpop.permute.xlu2 %2911  ;;  %v11159_v42 = vld [vmem:[#allocation236_spill] sm:$0xff]  ;;  %v11164_v41 = vld [vmem:[#allocation231_spill] sm:$0xff] }
 0x905   :  { %3349 = vmatpush.msrb.mxu1 %v7921_v16  ;;  %3389 = vmatpush.msrb.mxu0 %v7901_v39  ;;  %v3224_v25 = vmul.f32 %v8825_v30, %v11138_v35  ;;  %v11139_v16 = vld [vmem:[#allocation67_spill] sm:$0xff]  ;;  %vm11189_vm8 = vmmov %vm11150_vm4 }
 0x906   :  { %v3024_v39 = vmul.f32 %v8605_v12, %v11139_v16  ;;  %v2959_v12 = vmul.f32 %v2954_v8, %v11146_v37  ;;  %v11157_v8 = vld [vmem:[#allocation266_spill] sm:$0xff] }
 0x907   :  { %3350 = vmatpush.msrb.mxu1 %v3055_v43  ;;  %3390 = vmatpush.msrb.mxu0 %v3056_v44  ;;  %v2928_v44 = vmul.f32 %v8646_v60, %v11151_v4  ;;  %v8886_v37 = vld [vmem:[%s9439_s1 + $0x20] sm:$0xff] }
 0x908   :  { %3416 = vmatpush.msrb.mxu2 %v3224_v25  ;;  %v11154_v25 = vld [vmem:[#allocation148_spill] sm:$0xff]  ;;  %3283 = vmatmul.f32.vlgmr.msra.gmra.mxu3 %v8886_v37 }
 0x909   :  { %3351 = vmatpush.msrb.mxu1 %v3023_v9  ;;  %3391 = vmatpush.msrb.mxu0 %v3024_v39  ;;  %v11153_v9 = vld [vmem:[#allocation157_spill] sm:$0xff]  ;;  %v11155_v39 = vld [vmem:[#allocation31_spill] sm:$0xff] }
 0x90a   :  { %v2895_v35 = vmul.f32 %v11153_v9, %v11152_v3  ;;  %v2896_v2 = vmul.f32 %v8669_v18, %v11155_v39  ;;  %v11162_v18 = vld [vmem:[#allocation177_spill] sm:$0xff]  ;;  %v11167_v3 = vld [vmem:[#allocation243_spill] sm:$0xff]  ;;  %v11169_v39 = vld [vmem:[#allocation180_spill] sm:$0xff]  ;;  %3323 = vmatmul.f32.vlgmr.msra.gmra.mxu2 %v8886_v37 }
 0x90b   :  { %3352 = vmatpush.msrb.mxu1 %v2991_v17  ;;  %3392 = vmatpush.msrb.mxu0 %v2992_v10  ;;  %v8855_v47 = vpop.permute.xlu0 %2749  ;;  %v11158_v17 = vld [vmem:[#allocation69_spill] sm:$0xff]  ;;  %v2864_v10 = vmul.f32 %v8662_v61, %v11160_v13  ;;  %v11166_v61 = vld [vmem:[#allocation156_spill] sm:$0xff] }
 0x90c   :  { %v8859_v43 = vpop.permute.xlu1 %2879  ;;  %v8865_v55 = vsel %vm11150_vm4, %v8695_v0, %v8855_v47  ;;  %v11156_v0 = vld [vmem:[#allocation150_spill] sm:$0xff]  ;;  %v2863_v60 = vmul.f32 %v11159_v42, %v11158_v17  ;;  %v3192_v9 = vmul.f32 %v11167_v3, %v11166_v61  ;;  %v8910_v42 = vpop.permute.xlu2 %3165  ;;  %v11173_v13 = vld [vmem:[#allocation80_spill] sm:$0xff]  ;;  %vm11205_vm4 = vcmask 719872  }
 0x90d   :  { %3353 = vmatpush.msrb.mxu1 %v2959_v12  ;;  %3393 = vmatpush.msrb.mxu0 %v2960_v29  ;;  %v3216_v16 = vmul.f32 %v8865_v55, %v11154_v25  ;;  %v3208_v31 = vmul.f32 %v11157_v8, %v11156_v0  ;;  %v11161_v12 = vld [vmem:[#allocation153_spill] sm:$0xff]  ;;  %v11163_v29 = vld [vmem:[#allocation71_spill] sm:$0xff] }
 0x90e   :  { %v3200_v20 = vmul.f32 %v11162_v18, %v11161_v12  ;;  %v2831_v6 = vmul.f32 %v11164_v41, %v11163_v29  ;;  %v11176_v29 = vld [vmem:[#allocation200_spill] sm:$0xff] }
 0x90f   :  { %3354 = vmatpush.msrb.mxu1 %v2927_v24  ;;  %3394 = vmatpush.msrb.mxu0 %v2928_v44  ;;  %v11165_v24 = vld [vmem:[#allocation20_spill] sm:$0xff] }
 0x910   :  { %3417 = vmatpush.msrb.mxu2 %v3216_v16  ;;  %v2832_v4 = vmul.f32 %v8677_v50, %v11165_v24  ;;  %v11170_v50 = vld [vmem:[#allocation78_spill] sm:$0xff]  ;;  %v11178_v24 = vld [vmem:[#allocation201_spill] sm:$0xff] }
 0x911   :  { %3355 = vmatpush.msrb.mxu1 %v2895_v35  ;;  %3395 = vmatpush.msrb.mxu0 %v2896_v2  ;;  %v11168_v35 = vld [vmem:[#allocation74_spill] sm:$0xff]  ;;  %v2800_v2 = vmul.f32 %v8685_v23, %v11169_v39  ;;  %v2767_v0 = vmul.f32 %v8549_v40, %v11170_v50  ;;  %v2736_v23 = vmul.f32 %v8187_v59, %v11173_v13  ;;  %v11187_v13 = vld [vmem:[#allocation51_spill] sm:$0xff] }
 0x912   :  { %3418 = vmatpush.msrb.mxu2 %v3208_v31  ;;  %v2799_v25 = vmul.f32 %v8510_v45, %v11168_v35  ;;  %v11171_v31 = vld [vmem:[#allocation182_spill] sm:$0xff]  ;;  %v11172_v45 = vld [vmem:[#allocation83_spill] sm:$0xff]  ;;  %v8922_v40 = vsel %vm474_vm0, %v8459_v1, %v8869_v53  ;;  %v2671_v59 = vmul.f32 %v8045_v36, %v11176_v29  ;;  %v11177_v1 = vld [vmem:[#allocation185_spill] sm:$0xff] }
 0x913   :  { %3356 = vmatpush.msrb.mxu1 %v2863_v60  ;;  %3396 = vmatpush.msrb.mxu0 %v2864_v10  ;;  %v8894_v44 = vpop.permute.xlu0 %2973  ;;  %v2768_v17 = vmul.f32 %v8706_v51, %v11171_v31  ;;  %v2735_v60 = vmul.f32 %v8087_v46, %v11172_v45  ;;  %v11174_v10 = vld [vmem:[#allocation85_spill] sm:$0xff]  ;;  %v11175_v51 = vld [vmem:[#allocation184_spill] sm:$0xff]  ;;  %v11181_v35 = vld [vmem:[#allocation206_spill] sm:$0xff] }
 0x914   :  { %v8901_v16 = vpop.permute.xlu1 %2847  ;;  %3419 = vmatpush.msrb.mxu2 %v3200_v20  ;;  %v2703_v12 = vmul.f32 %v8131_v34, %v11174_v10  ;;  %v2704_v20 = vmul.f32 %v8127_v19, %v11175_v51  ;;  %v8934_v34 = vsel %vm420_vm1, %v8693_v49, %v8859_v43  ;;  %v3257_v19 = vmul.f32 %v8922_v40, %v11178_v24  ;;  %v8958_v61 = vpop.permute.xlu2 %3133  ;;  %v11185_v31 = vld [vmem:[#allocation172_spill] sm:$0xff]  ;;  %v11186_v45 = vld [vmem:[#allocation195_spill] sm:$0xff] }
 0x915   :  { %3357 = vmatpush.msrb.mxu1 %v2831_v6  ;;  %3397 = vmatpush.msrb.mxu0 %v2832_v4  ;;  %v2672_v6 = vmul.f32 %v8041_v62, %v11177_v1  ;;  %v8946_v36 = vsel %vm366_vm2, %v8718_v21, %v8901_v16  ;;  %v11179_v4 = vld [vmem:[#allocation204_spill] sm:$0xff]  ;;  %v11180_v21 = vld [vmem:[#allocation127_spill] sm:$0xff]  ;;  %v11192_v1 = vld [vmem:[#allocation121_spill] sm:$0xff] }
 0x916   :  { %3420 = vmatpush.msrb.mxu2 %v3192_v9  ;;  %v3249_v49 = vmul.f32 %v8934_v34, %v11179_v4  ;;  %v3241_v9 = vmul.f32 %v8946_v36, %v11180_v21  ;;  %v11188_v10 = vld [vmem:[#allocation251_spill] sm:$0xff] }
 0x917   :  { %3358 = vmatpush.msrb.mxu1 %v2799_v25  ;;  %3398 = vmatpush.msrb.mxu0 %v2800_v2 }
 0x919   :  { %3359 = vmatpush.msrb.mxu1 %v2767_v0  ;;  %3399 = vmatpush.msrb.mxu0 %v2768_v17 }
 0x91b   :  { %3360 = vmatpush.msrb.mxu1 %v2735_v60  ;;  %3400 = vmatpush.msrb.mxu0 %v2736_v23  ;;  %v8926_v46 = vpop.permute.xlu0 %2975 }
 0x91c   :  { %v8936_v41 = vpop.permute.xlu1 %2815 }
 0x91d   :  { %3361 = vmatpush.msrb.mxu1 %v2703_v12  ;;  %3401 = vmatpush.msrb.mxu0 %v2704_v20  ;;  %v8954_v62 = vsel %vm312_vm3, %v8749_v22, %v8936_v41  ;;  %v3111_v12 = vsel %vm798_vm9, %v8231_v7, %v11188_v10  ;;  %v11206_v10 = vld [vmem:[#allocation207_spill] sm:$0xff] }
 0x91e   :  { %v3233_v25 = vmul.f32 %v8954_v62, %v11181_v35 }
 0x91f   :  { %3362 = vmatpush.msrb.mxu1 %v2671_v59  ;;  %3402 = vmatpush.msrb.mxu0 %v2672_v6  ;;  %v11193_v6 = vld [vmem:[#allocation90_spill] sm:$0xff] }
 0x920   :  { %3363 = vmatmul.f32.vlgmr.msrb.gmra.mxu1 %v8886_v37  ;;  %3403 = vmatmul.f32.vlgmr.msrb.gmra.mxu0 %v8886_v37 }
 0x921   :  { %3452 = vmatpush.msra.mxu1 %v3257_v19  ;;  %v11194_v19 = vld [vmem:[#allocation203_spill] sm:$0xff] }
 0x923   :  { %3453 = vmatpush.msra.mxu1 %v3249_v49  ;;  %v11195_v49 = vld [vmem:[#allocation54_spill] sm:$0xff] }
 0x924   :  { %v8964_v39 = vpop.permute.xlu1 %2783  ;;  %v3164_v2 = vpop.permute.xlu0 %3163  ;;  %v3121_v21 = vmul.f32 %v3111_v12, %v11195_v49  ;;  %v11207_v12 = vld [vmem:[#allocation268_spill] sm:$0xff] }
 0x925   :  { %3454 = vmatpush.msra.mxu1 %v3241_v9  ;;  %v8970_v22 = vsel %vm11182_vm5, %v8815_v52, %v8964_v39  ;;  %v3176_v50 = vsel %vm11183_vm6, %v3164_v2, %v8910_v42  ;;  %v3177_v0 = vsel %vm11184_vm7, %v8613_v15, %v3164_v2  ;;  %v8982_v52 = vpop.permute.xlu2 %3041  ;;  %v11196_v9 = vld [vmem:[#allocation233_spill] sm:$0xff]  ;;  %v11199_v2 = vld [vmem:[#allocation158_spill] sm:$0xff]  ;;  %v11211_v49 = vld [vmem:[#allocation32_spill] sm:$0xff]  ;;  %vm11219_vm5 = vcmp.lt.s32.totalorder %v4258_v28, 9 }
 0x926   :  { %v3225_v17 = vmul.f32 %v8970_v22, %v11185_v31  ;;  %v3183_v60 = vmul.f32 %v3177_v0, %v11186_v45  ;;  %v3184_v23 = vmul.f32 %v3176_v50, %v11187_v13  ;;  %v11201_v0 = vld [vmem:[#allocation245_spill] sm:$0xff]  ;;  %v11204_v13 = vld [vmem:[#allocation46_spill] sm:$0xff]  ;;  %vm11220_vm6 = vmmov %vm11219_vm5 }
 0x927   :  { %3455 = vmatpush.msra.mxu1 %v3233_v25  ;;  %v11198_v25 = vld [vmem:[#allocation147_spill] sm:$0xff]  ;;  %v11203_v45 = vld [vmem:[#allocation225_spill] sm:$0xff]  ;;  %vm11222_vm7 = vmmov %vm11205_vm4 }
 0x928   :  { %3381 = vmatpush.msrb.mxu3 %v3183_v60  ;;  %3421 = vmatpush.msrb.mxu2 %v3184_v23  ;;  %v3122_v50 = vmul.f32 %v11199_v2, %v11198_v25  ;;  %v11213_v25 = vld [vmem:[#allocation208_spill] sm:$0xff] }
 0x929   :  { %3456 = vmatpush.msra.mxu1 %v3225_v17  ;;  %v11202_v17 = vld [vmem:[#allocation205_spill] sm:$0xff] }
 0x92a   :  { %v3089_v60 = vmul.f32 %v11203_v45, %v11202_v17  ;;  %v11216_v17 = vld [vmem:[#allocation35_spill] sm:$0xff] }
 0x92c   :  { %v8988_v51 = vpop.permute.xlu1 %2751  ;;  %v3132_v15 = vpop.permute.xlu0 %3131 }
 0x92d   :  { %v8994_v20 = vsel %vm11189_vm8, %v8855_v47, %v8988_v51  ;;  %v3144_v29 = vsel %vm11190_vm15, %v3132_v15, %v8958_v61  ;;  %v3145_v59 = vsel %vm11191_vm13, %v8722_v63, %v3132_v15  ;;  %v11197_v47 = vld [vmem:[#allocation239_spill] sm:$0xff]  ;;  %v11200_v63 = vld [vmem:[#allocation152_spill] sm:$0xff]  ;;  %v3201_v15 = vmul.f32 %v11207_v12, %v11206_v10 }
 0x92e   :  { %v3217_v7 = vmul.f32 %v8994_v20, %v11192_v1  ;;  %v3151_v24 = vmul.f32 %v3145_v59, %v11193_v6  ;;  %v3152_v4 = vmul.f32 %v3144_v29, %v11194_v19  ;;  %v3078_v35 = vsel %vm744_vm10, %v11197_v47, %v11196_v9  ;;  %v11209_v19 = vld [vmem:[#allocation198_spill] sm:$0xff] }
 0x92f   :  { %v3209_v31 = vmul.f32 %v11201_v0, %v11200_v63  ;;  %v3090_v23 = vmul.f32 %v3078_v35, %v11204_v13  ;;  %v3048_v29 = vsel %vm690_vm11, %v8345_v5, %v8730_v14  ;;  %v3047_v59 = vsel %vm690_vm11, %v8730_v14, %v8738_v38  ;;  %v11212_v35 = vld [vmem:[#allocation226_spill] sm:$0xff] }
 0x930   :  { %3382 = vmatpush.msrb.mxu3 %v3151_v24  ;;  %3422 = vmatpush.msrb.mxu2 %v3152_v4  ;;  %v9036_v24 = vpop.permute.xlu2 %3009  ;;  %v11210_v4 = vld [vmem:[#allocation11_spill] sm:$0xff]  ;;  %v3015_v47 = vsel %vm636_vm12, %v8745_v26, %v8761_v11  ;;  %v3058_v2 = vmul.f32 %v3047_v59, %v11213_v25  ;;  %v11228_v25 = vld [vmem:[#allocation108_spill] sm:$0xff]  ;;  %vm11292_vm15 = vcmp.lt.s32.totalorder %v4258_v28, 119 }
 0x931   :  { %3457 = vmatpush.msra.mxu1 %v3217_v7  ;;  %3765 = vmatmul.msk.f32.vlgmr.msrb.gmra.mxu3 %vm11205_vm4, %v8796_v54  ;;  %v11208_v7 = vld [vmem:[#allocation255_spill] sm:$0xff]  ;;  %v3193_v14 = vmul.f32 %v11210_v4, %v11209_v19 }
 0x932   :  { %3427 = vmatpush.msra.mxu3 %v3121_v21  ;;  %3467 = vmatpush.msra.mxu2 %v3122_v50  ;;  %v3016_v6 = vsel %vm636_vm12, %v11208_v7, %v8745_v26  ;;  %v3057_v21 = vmul.f32 %v3048_v29, %v11211_v49  ;;  %v11214_v50 = vld [vmem:[#allocation186_spill] sm:$0xff]  ;;  %v2983_v26 = vsel %vm582_vm14, %v8894_v44, %v8926_v46  ;;  %v11224_v7 = vld [vmem:[#allocation12_spill] sm:$0xff]  ;;  %v11225_v19 = vld [vmem:[#allocation15_spill] sm:$0xff] }
 0x933   :  { %3458 = vmatpush.msra.mxu1 %v3209_v31  ;;  %v11215_v31 = vld [vmem:[#allocation160_spill] sm:$0xff]  ;;  %v3025_v45 = vmul.f32 %v3016_v6, %v11216_v17  ;;  %3766 = vmatmul.msk.f32.vlgmr.msrb.gmra.mxu2 %vm11222_vm7, %v8796_v54  ;;  %v11231_v17 = vld [vmem:[#allocation227_spill] sm:$0xff] }
 0x934   :  { %3428 = vmatpush.msra.mxu3 %v3089_v60  ;;  %3468 = vmatpush.msra.mxu2 %v3090_v23  ;;  %v9030_v1 = vpop.permute.xlu0 %2913  ;;  %v11217_v60 = vld [vmem:[#allocation209_spill] sm:$0xff]  ;;  %v11218_v23 = vld [vmem:[#allocation131_spill] sm:$0xff] }
 0x935   :  { %3459 = vmatpush.msra.mxu1 %v3201_v15  ;;  %v9042_v5 = vsel %vm474_vm0, %v8869_v53, %v9030_v1  ;;  %v2984_v53 = vsel %vm582_vm14, %v8403_v58, %v8894_v44  ;;  %v3026_v13 = vmul.f32 %v3015_v47, %v11217_v60  ;;  %v2952_v58 = vsel %vm11219_vm5, %v11143_v56, %v11218_v23  ;;  %v11221_v15 = vld [vmem:[#allocation26_spill] sm:$0xff]  ;;  %v11223_v44 = vld [vmem:[#allocation179_spill] sm:$0xff]  ;;  %v11227_v47 = vld [vmem:[#allocation257_spill] sm:$0xff] }
 0x936   :  { %3429 = vmatpush.msra.mxu3 %v11212_v35  ;;  %v3258_v63 = vmul.f32 %v9042_v5, %v11214_v50  ;;  %3469 = vmatpush.msra.mxu2 %v11215_v31  ;;  %v2951_v10 = vsel %vm11220_vm6, %v11218_v23, %v8813_v33  ;;  %v2993_v29 = vmul.f32 %v2984_v53, %v11221_v15  ;;  %v11229_v53 = vld [vmem:[#allocation211_spill] sm:$0xff]  ;;  %v11230_v31 = vld [vmem:[#allocation210_spill] sm:$0xff]  ;;  %v11233_v60 = vld [vmem:[#allocation112_spill] sm:$0xff] }
 0x937   :  { %3460 = vmatpush.msra.mxu1 %v3193_v14  ;;  %v2994_v59 = vmul.f32 %v2983_v26, %v11223_v44  ;;  %v2961_v6 = vmul.f32 %v2952_v58, %v11224_v7  ;;  %v2962_v14 = vmul.f32 %v2951_v10, %v11225_v19  ;;  %v2930_v50 = vmul.f32 %v8922_v40, %v11229_v53  ;;  %v11235_v58 = vld [vmem:[#allocation137_spill] sm:$0xff]  ;;  %v11236_v40 = vld [vmem:[#allocation114_spill] sm:$0xff] }
 0x938   :  { %3430 = vmatpush.msra.mxu3 %v3057_v21  ;;  %3470 = vmatpush.msra.mxu2 %v3058_v2  ;;  %v11226_v21 = vld [vmem:[#allocation164_spill] sm:$0xff]  ;;  %v2866_v10 = vmul.f32 %v8946_v36, %v11235_v58  ;;  %v11237_v15 = vld [vmem:[#allocation258_spill] sm:$0xff]  ;;  %v11240_v36 = vld [vmem:[#allocation39_spill] sm:$0xff] }
 0x939   :  { %3492 = vmatpush.msra.mxu0 %v3258_v63  ;;  %v2929_v35 = vmul.f32 %v11227_v47, %v11226_v21  ;;  %v9091_v63 = vpop.permute.xlu2 %2977  ;;  %v11241_v21 = vld [vmem:[#allocation91_spill] sm:$0xff] }
 0x93a   :  { %3431 = vmatpush.msra.mxu3 %v3025_v45  ;;  %3471 = vmatpush.msra.mxu2 %v3026_v13  ;;  %v2897_v45 = vmul.f32 %v11231_v17, %v11230_v31  ;;  %v11234_v13 = vld [vmem:[#allocation163_spill] sm:$0xff] }
 0x93b   :  { %v2865_v23 = vmul.f32 %v11234_v13, %v11233_v60  ;;  %v11246_v31 = vld [vmem:[#allocation95_spill] sm:$0xff]  ;;  %v2754_v60 = vpop.permute.xlu1 %2753 }
 0x93c   :  { %3432 = vmatpush.msra.mxu3 %v2993_v29  ;;  %v2882_v56 = vpop.permute.xlu0 %2881  ;;  %3472 = vmatpush.msra.mxu2 %v2994_v59  ;;  %v2833_v29 = vmul.f32 %v11237_v15, %v11236_v40  ;;  %v11238_v59 = vld [vmem:[#allocation141_spill] sm:$0xff]  ;;  %v2705_v17 = vmul.f32 %v11162_v18, %v11246_v31  ;;  %v11250_v13 = vld [vmem:[#allocation271_spill] sm:$0xff] }
 0x93d   :  { %v9083_v49 = vsel %vm420_vm1, %v8859_v43, %v2882_v56  ;;  %v11232_v43 = vld [vmem:[#allocation134_spill] sm:$0xff]  ;;  %v2834_v7 = vmul.f32 %v8954_v62, %v11238_v59  ;;  %v11253_v40 = vld [vmem:[#allocation55_spill] sm:$0xff]  ;;  %v11256_v59 = vld [vmem:[#allocation229_spill] sm:$0xff] }
 0x93e   :  { %v3250_v2 = vmul.f32 %v9083_v49, %v11228_v25  ;;  %3433 = vmatpush.msra.mxu3 %v2961_v6  ;;  %3473 = vmatpush.msra.mxu2 %v2962_v14  ;;  %v2898_v26 = vmul.f32 %v8934_v34, %v11232_v43  ;;  %v11239_v6 = vld [vmem:[#allocation117_spill] sm:$0xff]  ;;  %v2802_v14 = vmul.f32 %v8970_v22, %v11240_v36  ;;  %v11245_v22 = vld [vmem:[#allocation92_spill] sm:$0xff]  ;;  %v11254_v15 = vld [vmem:[#allocation223_spill] sm:$0xff] }
 0x93f   :  { %v2801_v19 = vmul.f32 %v8825_v30, %v11239_v6  ;;  %v11244_v30 = vld [vmem:[#allocation216_spill] sm:$0xff]  ;;  %v11248_v43 = vld [vmem:[#allocation213_spill] sm:$0xff] }
 0x940   :  { %3434 = vmatpush.msra.mxu3 %v2929_v35  ;;  %3493 = vmatpush.msra.mxu0 %v3250_v2  ;;  %v11242_v35 = vld [vmem:[#allocation120_spill] sm:$0xff]  ;;  %v2737_v53 = vmul.f32 %v11157_v8, %v11244_v30  ;;  %v11266_v31 = vld [vmem:[#allocation261_spill] sm:$0xff] }
 0x941   :  { %3474 = vmatpush.msra.mxu2 %v2930_v50  ;;  %v2769_v62 = vmul.f32 %v8865_v55, %v11242_v35  ;;  %v9118_v25 = vpop.permute.xlu2 %2945  ;;  %v11243_v2 = vld [vmem:[#allocation24_spill] sm:$0xff]  ;;  %v2738_v50 = vmul.f32 %v11201_v0, %v11245_v22  ;;  %v11247_v55 = vld [vmem:[#allocation234_spill] sm:$0xff]  ;;  %v11265_v22 = vld [vmem:[#allocation79_spill] sm:$0xff] }
 0x942   :  { %3435 = vmatpush.msra.mxu3 %v2897_v45  ;;  %v9132_v45 = vsel %vm474_vm0, %v9030_v1, %v11247_v55  ;;  %v11249_v0 = vld [vmem:[#allocation202_spill] sm:$0xff]  ;;  %v9146_v1 = vsel %vm420_vm1, %v2882_v56, %v11250_v13  ;;  %vm11264_vm0 = vmmov %vm11189_vm8  ;;  %vm11267_vm1 = vcmp.lt.s32.totalorder %v4258_v28, 64 }
 0x943   :  { %3475 = vmatpush.msra.mxu2 %v2898_v26  ;;  %v2706_v26 = vmul.f32 %v11207_v12, %v11248_v43  ;;  %v2673_v18 = vmul.f32 %v11167_v3, %v11249_v0  ;;  %v11252_v12 = vld [vmem:[#allocation199_spill] sm:$0xff]  ;;  %v11257_v56 = vld [vmem:[#allocation118_spill] sm:$0xff]  ;;  %vm11291_vm8 = vmmov %vm11191_vm13 }
 0x944   :  { %3436 = vmatpush.msra.mxu3 %v2865_v23  ;;  %v2850_v44 = vpop.permute.xlu0 %2849  ;;  %v11251_v23 = vld [vmem:[#allocation189_spill] sm:$0xff]  ;;  %v3251_v6 = vmul.f32 %v9146_v1, %v11257_v56  ;;  %v11270_v43 = vld [vmem:[#allocation230_spill] sm:$0xff]  ;;  %v11271_v0 = vld [vmem:[#allocation23_spill] sm:$0xff] }
 0x945   :  { %3476 = vmatpush.msra.mxu2 %v2866_v10  ;;  %v9108_v34 = vsel %vm366_vm2, %v8901_v16, %v2850_v44  ;;  %v2770_v16 = vmul.f32 %v8994_v20, %v11243_v2  ;;  %v2674_v10 = vmul.f32 %v11210_v4, %v11252_v12  ;;  %v11258_v4 = vld [vmem:[#allocation224_spill] sm:$0xff]  ;;  %v11263_v2 = vld [vmem:[#allocation6_spill] sm:$0xff]  ;;  %v11275_v12 = vld [vmem:[#allocation105_spill] sm:$0xff] }
 0x946   :  { %3437 = vmatpush.msra.mxu3 %v2833_v29  ;;  %v3242_v47 = vmul.f32 %v9108_v34, %v11241_v21  ;;  %v11255_v29 = vld [vmem:[#allocation228_spill] sm:$0xff]  ;;  %vm11295_vm13 = vmmov %vm11292_vm15 }
 0x947   :  { %3477 = vmatpush.msra.mxu2 %v2834_v7  ;;  %v3260_v3 = vmul.f32 %v11255_v29, %v11254_v15  ;;  %v9159_v7 = vsel %vm366_vm2, %v2850_v44, %v11256_v59  ;;  %vm11268_vm2 = vmmov %vm11267_vm1  ;;  %v3170_v15 = vpop.permute.xlu1 %3169  ;;  %v11278_v29 = vld [vmem:[#allocation42_spill] sm:$0xff]  ;;  %v11280_v59 = vld [vmem:[#allocation269_spill] sm:$0xff] }
 0x948   :  { %3438 = vmatpush.msra.mxu3 %v2801_v19  ;;  %3494 = vmatpush.msra.mxu0 %v3242_v47  ;;  %v11259_v19 = vld [vmem:[#allocation237_spill] sm:$0xff]  ;;  %v11261_v47 = vld [vmem:[#allocation47_spill] sm:$0xff]  ;;  %vm11304_vm4 = vmmov %vm11291_vm8 }
 0x949   :  { %3478 = vmatpush.msra.mxu2 %v2802_v14  ;;  %v3252_v36 = vmul.f32 %v11259_v19, %v11258_v4  ;;  %v11260_v14 = vld [vmem:[#allocation270_spill] sm:$0xff]  ;;  %v3136_v44 = vpop.permute.xlu2 %3135  ;;  %v3243_v35 = vmul.f32 %v9159_v7, %v11261_v47  ;;  %v11282_v4 = vld [vmem:[#allocation3_spill] sm:$0xff]  ;;  %vm11313_vm5 = vmmov %vm11304_vm4 }
 0x94a   :  { %3439 = vmatpush.msra.mxu3 %v2769_v62  ;;  %v11262_v62 = vld [vmem:[#allocation49_spill] sm:$0xff]  ;;  %vm11314_vm6 = vmmov %vm11295_vm13 }
 0x94b   :  { %3479 = vmatpush.msra.mxu2 %v2770_v16  ;;  %v3244_v16 = vmul.f32 %v11263_v2, %v11262_v62  ;;  %v11286_v62 = vld [vmem:[#allocation253_spill] sm:$0xff] }
 0x94c   :  { %3440 = vmatpush.msra.mxu3 %v2737_v53  ;;  %v2818_v20 = vpop.permute.xlu0 %2817  ;;  %v9179_v53 = vsel %vm11264_vm0, %v8988_v51, %v2754_v60 }
 0x94d   :  { %3480 = vmatpush.msra.mxu2 %v2738_v50  ;;  %v9139_v8 = vsel %vm312_vm3, %v8936_v41, %v2818_v20  ;;  %v3259_v41 = vmul.f32 %v9132_v45, %v11253_v40  ;;  %v9168_v21 = vsel %vm312_vm3, %v2818_v20, %v11260_v14  ;;  %v11269_v20 = vld [vmem:[#allocation142_spill] sm:$0xff]  ;;  %vm11272_vm3 = vmmov %vm11264_vm0  ;;  %v11277_v40 = vld [vmem:[#allocation192_spill] sm:$0xff] }
 0x94e   :  { %v3234_v58 = vmul.f32 %v9139_v8, %v11251_v23  ;;  %3441 = vmatpush.msra.mxu3 %v2705_v17  ;;  %v3235_v50 = vmul.f32 %v9168_v21, %v11265_v22  ;;  %v9198_v51 = vsel %vm11272_vm3, %v2754_v60, %v11271_v0  ;;  %v11274_v23 = vld [vmem:[#allocation221_spill] sm:$0xff]  ;;  %v11284_v14 = vld [vmem:[#allocation267_spill] sm:$0xff] }
 0x94f   :  { %3481 = vmatpush.msra.mxu2 %v2706_v26  ;;  %v3236_v26 = vmul.f32 %v11270_v43, %v11269_v20  ;;  %v3219_v60 = vmul.f32 %v9198_v51, %v11278_v29  ;;  %v11290_v20 = vld [vmem:[#allocation240_spill] sm:$0xff] }
 0x950   :  { %3442 = vmatpush.msra.mxu3 %v2673_v18  ;;  %3495 = vmatpush.msra.mxu0 %v3234_v58  ;;  %v11273_v18 = vld [vmem:[#allocation191_spill] sm:$0xff] }
 0x951   :  { %3482 = vmatpush.msra.mxu2 %v2674_v10  ;;  %3443 = vmatmul.f32.vlgmr.msra.gmra.mxu3 %v8886_v37  ;;  %v11276_v10 = vld [vmem:[#allocation232_spill] sm:$0xff]  ;;  %v3138_v0 = vpop.permute.xlu2 %3137 }
 0x952   :  { %3532 = vmatpush.msrb.mxu3 %v3259_v41  ;;  %3483 = vmatmul.f32.vlgmr.msra.gmra.mxu2 %v8886_v37  ;;  %v3218_v41 = vmul.f32 %v9179_v53, %v11277_v40  ;;  %v11297_v40 = vld [vmem:[#allocation197_spill] sm:$0xff] }
 0x953   :  { %3572 = vmatpush.msrb.mxu2 %v3260_v3  ;;  %v11279_v3 = vld [vmem:[#allocation194_spill] sm:$0xff] }
 0x954   :  { %3533 = vmatpush.msrb.mxu3 %v3251_v6  ;;  %v2786_v30 = vpop.permute.xlu0 %2785  ;;  %v3210_v56 = vmul.f32 %v11280_v59, %v11279_v3  ;;  %v11281_v6 = vld [vmem:[#allocation43_spill] sm:$0xff] }
 0x955   :  { %3573 = vmatpush.msrb.mxu2 %v3252_v36  ;;  %v9186_v17 = vsel %vm11267_vm1, %v2786_v30, %v11266_v31  ;;  %v9191_v55 = vsel %vm11268_vm2, %v8964_v39, %v2786_v30  ;;  %v3228_v39 = vmul.f32 %v11276_v10, %v11275_v12  ;;  %v3220_v19 = vmul.f32 %v11282_v4, %v11281_v6  ;;  %v11283_v36 = vld [vmem:[#allocation138_spill] sm:$0xff]  ;;  %v11288_v30 = vld [vmem:[#allocation265_spill] sm:$0xff]  ;;  %v11289_v31 = vld [vmem:[#allocation96_spill] sm:$0xff] }
 0x956   :  { %3534 = vmatpush.msrb.mxu3 %v3243_v35  ;;  %v3226_v13 = vmul.f32 %v9191_v55, %v11273_v18  ;;  %v3227_v58 = vmul.f32 %v9186_v17, %v11274_v23  ;;  %v3211_v47 = vmul.f32 %v11284_v14, %v11283_v36  ;;  %v11285_v35 = vld [vmem:[#allocation196_spill] sm:$0xff]  ;;  %v3203_v43 = vmul.f32 %v11290_v20, %v11289_v31  ;;  %v11302_v6 = vld [vmem:[#allocation33_spill] sm:$0xff]  ;;  %v11303_v4 = vld [vmem:[#allocation214_spill] sm:$0xff] }
 0x957   :  { %3574 = vmatpush.msrb.mxu2 %v3244_v16  ;;  %v3202_v2 = vmul.f32 %v11286_v62, %v11285_v35  ;;  %v11287_v16 = vld [vmem:[#allocation2_spill] sm:$0xff]  ;;  %v11294_v23 = vld [vmem:[#allocation4_spill] sm:$0xff]  ;;  %v3142_v36 = vsel %vm11304_vm4, %v3136_v44, %v3138_v0  ;;  %v11308_v31 = vld [vmem:[#allocation193_spill] sm:$0xff] }
 0x958   :  { %3535 = vmatpush.msrb.mxu3 %v3235_v50  ;;  %3496 = vmatpush.msra.mxu0 %v3226_v13  ;;  %v3212_v22 = vmul.f32 %v11288_v30, %v11287_v16  ;;  %v11293_v13 = vld [vmem:[#allocation29_spill] sm:$0xff]  ;;  %v11296_v10 = vld [vmem:[#allocation212_spill] sm:$0xff]  ;;  %v11306_v16 = vld [vmem:[#allocation218_spill] sm:$0xff] }
 0x959   :  { %3575 = vmatpush.msrb.mxu2 %v3236_v26  ;;  %v3143_v26 = vsel %vm11291_vm8, %v8958_v61, %v3136_v44  ;;  %v11299_v61 = vld [vmem:[#allocation97_spill] sm:$0xff]  ;;  %v3140_v44 = vpop.permute.xlu1 %3139 }
 0x95a   :  { %3536 = vmatpush.msrb.mxu3 %v3227_v58  ;;  %3497 = vmatpush.msra.mxu0 %v3218_v41  ;;  %v3204_v58 = vmul.f32 %v11294_v23, %v11293_v13  ;;  %v11298_v41 = vld [vmem:[#allocation242_spill] sm:$0xff]  ;;  %v11312_v13 = vld [vmem:[#allocation217_spill] sm:$0xff] }
 0x95b   :  { %3576 = vmatpush.msrb.mxu2 %v3228_v39  ;;  %v3194_v29 = vmul.f32 %v11298_v41, %v11297_v40 }
 0x95c   :  { %3537 = vmatpush.msrb.mxu3 %v3219_v60  ;;  %3498 = vmatpush.msra.mxu0 %v3210_v56  ;;  %v3168_v50 = vpop.permute.xlu0 %3167  ;;  %v11300_v60 = vld [vmem:[#allocation183_spill] sm:$0xff] }
 0x95d   :  { %3577 = vmatpush.msrb.mxu2 %v3220_v19  ;;  %v3175_v18 = vsel %vm11292_vm15, %v8910_v42, %v3168_v50  ;;  %v3174_v12 = vsel %vm11295_vm13, %v3168_v50, %v3170_v15  ;;  %v3195_v3 = vmul.f32 %v11300_v60, %v11299_v61  ;;  %v11301_v56 = vld [vmem:[#allocation87_spill] sm:$0xff]  ;;  %v3153_v19 = vmul.f32 %v3143_v26, %v11303_v4 }
 0x95e   :  { %3538 = vmatpush.msrb.mxu3 %v3211_v47  ;;  %v3185_v39 = vmul.f32 %v3175_v18, %v11296_v10  ;;  %3499 = vmatpush.msra.mxu0 %v3202_v2  ;;  %v3196_v42 = vmul.f32 %v11302_v6, %v11301_v56  ;;  %v11305_v47 = vld [vmem:[#allocation272_spill] sm:$0xff]  ;;  %v3077_v2 = vsel %vm744_vm10, %v11196_v9, %v8819_v48  ;;  %v11311_v18 = vld [vmem:[#allocation246_spill] sm:$0xff]  ;;  %v11322_v6 = vld [vmem:[#allocation103_spill] sm:$0xff] }
 0x95f   :  { %3578 = vmatpush.msrb.mxu2 %v3212_v22  ;;  %v3116_v35 = vsel %vm798_vm9, %v8771_v32, %v11305_v47  ;;  %v3186_v30 = vmul.f32 %v3174_v12, %v11306_v16  ;;  %v11307_v22 = vld [vmem:[#allocation215_spill] sm:$0xff]  ;;  %vm11309_vm9 = vmmov %vm11222_vm7  ;;  %v11310_v32 = vld [vmem:[#allocation28_spill] sm:$0xff]  ;;  %v3084_v9 = vsel %vm744_vm10, %v8819_v48, %v11311_v18  ;;  %v3091_v23 = vmul.f32 %v3077_v2, %v11312_v13 }
 0x960   :  { %3539 = vmatpush.msrb.mxu3 %v3203_v43  ;;  %3461 = vmatpush.msra.mxu1 %v3185_v39  ;;  %v3123_v50 = vmul.f32 %v8787_v27, %v11307_v22  ;;  %v3154_v43 = vmul.f32 %v3142_v36, %v11308_v31  ;;  %v3124_v26 = vmul.f32 %v3116_v35, %v11310_v32  ;;  %v11315_v39 = vld [vmem:[#allocation256_spill] sm:$0xff]  ;;  %vm11316_vm7 = vmmov %vm11314_vm6  ;;  %v11325_v47 = vld [vmem:[#allocation155_spill] sm:$0xff] }
 0x961   :  { %3579 = vmatpush.msrb.mxu2 %v3204_v58  ;;  %3500 = vmatpush.msra.mxu0 %v3194_v29  ;;  %v3046_v58 = vsel %vm690_vm11, %v8738_v38, %v8982_v52  ;;  %v3141_v12 = vsel %vm11313_vm5, %v3138_v0, %v3140_v44  ;;  %vm11317_vm10 = vmmov %vm11304_vm4  ;;  %v11318_v29 = vld [vmem:[#allocation64_spill] sm:$0xff]  ;;  %v2982_v35 = vsel %vm582_vm14, %v8926_v46, %v9091_v63  ;;  %v11326_v2 = vld [vmem:[#allocation10_spill] sm:$0xff] }
 0x962   :  { %3540 = vmatpush.msrb.mxu3 %v3195_v3  ;;  %3462 = vmatpush.msra.mxu1 %v3153_v19  ;;  %v3148_v40 = vsel %vm11317_vm10, %v3140_v44, %v8664_v57  ;;  %v11319_v3 = vld [vmem:[#allocation44_spill] sm:$0xff]  ;;  %vm11320_vm0 = vmmov %vm11309_vm9  ;;  %v3045_v57 = vsel %vm690_vm11, %v8982_v52, %v11322_v6  ;;  %v11324_v19 = vld [vmem:[#allocation21_spill] sm:$0xff]  ;;  %vm11330_vm11 = vcmp.lt.s32.totalorder %v4258_v28, 9 }
 0x963   :  { %3580 = vmatpush.msrb.mxu2 %v3196_v42  ;;  %3501 = vmatpush.msra.mxu0 %v3186_v30  ;;  %v11321_v38 = vld [vmem:[#allocation220_spill] sm:$0xff]  ;;  %v11323_v42 = vld [vmem:[#allocation219_spill] sm:$0xff]  ;;  %v3155_v36 = vmul.f32 %v3141_v12, %v11324_v19  ;;  %v11327_v16 = vld [vmem:[#allocation254_spill] sm:$0xff]  ;;  %v2950_v46 = vsel %vm11330_vm11, %v8813_v33, %v9118_v25 }
 0x964   :  { %3767 = vmatmul.msk.f32.vlgmr.msra.gmra.mxu1 %vm11309_vm9, %v8796_v54  ;;  %v3172_v27 = vpop.permute.xlu0 %3171  ;;  %v3092_v0 = vmul.f32 %v3084_v9, %v11321_v38  ;;  %v3059_v4 = vmul.f32 %v3046_v58, %v11323_v42  ;;  %v3013_v52 = vsel %vm636_vm12, %v9036_v24, %v11327_v16  ;;  %v11328_v30 = vld [vmem:[#allocation18_spill] sm:$0xff]  ;;  %v11331_v31 = vld [vmem:[#allocation235_spill] sm:$0xff]  ;;  %vm11336_vm1 = vmmov %vm11320_vm0 }
 0x965   :  { %3507 = vmatpush.msrb.mxu1 %v3123_v50  ;;  %3502 = vmatpush.msra.mxu0 %v3154_v43  ;;  %v3173_v10 = vsel %vm11314_vm6, %v3170_v15, %v3172_v27  ;;  %v3180_v48 = vsel %vm11316_vm7, %v3172_v27, %v11315_v39  ;;  %v3014_v15 = vsel %vm636_vm12, %v8761_v11, %v9036_v24  ;;  %v11329_v50 = vld [vmem:[#allocation53_spill] sm:$0xff]  ;;  %v11332_v43 = vld [vmem:[#allocation248_spill] sm:$0xff]  ;;  %vm11334_vm12 = vmmov %vm11320_vm0 }
 0x966   :  { %v3187_v61 = vmul.f32 %v3173_v10, %v11318_v29  ;;  %v3188_v56 = vmul.f32 %v3180_v48, %v11319_v3  ;;  %3768 = vmatmul.msk.f32.vlgmr.msra.gmra.mxu0 %vm11320_vm0, %v8796_v54  ;;  %v3156_v11 = vmul.f32 %v3148_v40, %v11326_v2  ;;  %v3027_v22 = vmul.f32 %v3014_v15, %v11328_v30  ;;  %v11333_v24 = vld [vmem:[#allocation5_spill] sm:$0xff]  ;;  %v11335_v18 = vld [vmem:[#allocation59_spill] sm:$0xff]  ;;  %v11337_v33 = vld [vmem:[#allocation244_spill] sm:$0xff] }
 0x967   :  { %3508 = vmatpush.msrb.mxu1 %v3091_v23  ;;  %3547 = vmatpush.msrb.mxu0 %v3124_v26  ;;  %v3060_v44 = vmul.f32 %v3045_v57, %v11329_v50  ;;  %v2981_v32 = vsel %vm582_vm14, %v9091_v63, %v11332_v43  ;;  %v2995_v26 = vmul.f32 %v2982_v35, %v11333_v24  ;;  %vm11338_vm2 = vmmov %vm11330_vm11  ;;  %v11339_v23 = vld [vmem:[#allocation222_spill] sm:$0xff]  ;;  %v11340_v63 = vld [vmem:[#allocation48_spill] sm:$0xff] }
 0x968   :  { %3541 = vmatpush.msrb.mxu3 %v3187_v61  ;;  %3581 = vmatpush.msrb.mxu2 %v3188_v56  ;;  %v3028_v9 = vmul.f32 %v3013_v52, %v11335_v18  ;;  %v2949_v13 = vsel %vm11338_vm2, %v9118_v25, %v11337_v33  ;;  %v2963_v27 = vmul.f32 %v2950_v46, %v11339_v23  ;;  %v11341_v12 = vld [vmem:[#allocation56_spill] sm:$0xff]  ;;  %v11342_v39 = vld [vmem:[#allocation94_spill] sm:$0xff]  ;;  %v11345_v25 = vld [vmem:[#allocation167_spill] sm:$0xff] }
 0x969   :  { %3509 = vmatpush.msrb.mxu1 %v11325_v47  ;;  %3548 = vmatpush.msrb.mxu0 %v3092_v0  ;;  %v2996_v58 = vmul.f32 %v2981_v32, %v11340_v63  ;;  %v2931_v10 = vmul.f32 %v9042_v5, %v11341_v12  ;;  %v2964_v48 = vmul.f32 %v2949_v13, %v11342_v39  ;;  %v11343_v40 = vld [vmem:[#allocation128_spill] sm:$0xff]  ;;  %v11344_v29 = vld [vmem:[#allocation34_spill] sm:$0xff]  ;;  %v11346_v3 = vld [vmem:[#allocation27_spill] sm:$0xff] }
 0x96a   :  { %3542 = vmatpush.msrb.mxu3 %v3155_v36  ;;  %3582 = vmatpush.msrb.mxu2 %v3156_v11  ;;  %v2932_v28 = vmul.f32 %v9132_v45, %v11344_v29  ;;  %v2867_v61 = vmul.f32 %v9108_v34, %v11345_v25  ;;  %v2900_v56 = vmul.f32 %v9146_v1, %v11346_v3  ;;  %v11347_v5 = vld [vmem:[#allocation106_spill] sm:$0xff]  ;;  %v11348_v0 = vld [vmem:[#allocation63_spill] sm:$0xff]  ;;  %v11350_v6 = vld [vmem:[#allocation40_spill] sm:$0xff] }
 0x96b   :  { %3510 = vmatpush.msrb.mxu1 %v3059_v4  ;;  %3549 = vmatpush.msrb.mxu0 %v11331_v31  ;;  %v2835_v38 = vmul.f32 %v9139_v8, %v11347_v5  ;;  %v11349_v15 = vld [vmem:[#allocation38_spill] sm:$0xff]  ;;  %v2836_v34 = vmul.f32 %v9168_v21, %v11350_v6  ;;  %v11351_v57 = vld [vmem:[#allocation52_spill] sm:$0xff]  ;;  %v11353_v4 = vld [vmem:[#allocation45_spill] sm:$0xff] }
 0x96c   :  { %3769 = vmatmul.msk.f32.vlgmr.msrb.gmra.mxu3 %vm11334_vm12, %v8796_v54  ;;  %3770 = vmatmul.msk.f32.vlgmr.msrb.gmra.mxu2 %vm11336_vm1, %v8796_v54  ;;  %v2899_v54 = vmul.f32 %v9083_v49, %v11343_v40  ;;  %v2868_v49 = vmul.f32 %v9159_v7, %v11348_v0  ;;  %v2803_v45 = vmul.f32 %v9191_v55, %v11349_v15  ;;  %v11352_v42 = vld [vmem:[#allocation178_spill] sm:$0xff]  ;;  %v11356_v47 = vld [vmem:[#allocation9_spill] sm:$0xff]  ;;  %v11357_v35 = vld [vmem:[#allocation36_spill] sm:$0xff] }
 0x96d   :  { %3511 = vmatpush.msrb.mxu1 %v3027_v22  ;;  %3550 = vmatpush.msrb.mxu0 %v3060_v44  ;;  %v2771_v1 = vmul.f32 %v9179_v53, %v11351_v57  ;;  %v2804_v8 = vmul.f32 %v9186_v17, %v11352_v42  ;;  %v2739_v7 = vmul.f32 %v11280_v59, %v11353_v4  ;;  %v11354_v19 = vld [vmem:[#allocation14_spill] sm:$0xff]  ;;  %v11359_v11 = vld [vmem:[#allocation17_spill] sm:$0xff] }
 0x96e   :  { %v2772_v55 = vmul.f32 %v9198_v51, %v11354_v19  ;;  %v11355_v36 = vld [vmem:[#allocation30_spill] sm:$0xff]  ;;  %v2740_v53 = vmul.f32 %v11284_v14, %v11356_v47  ;;  %v2675_v17 = vmul.f32 %v11298_v41, %v11357_v35  ;;  %v2676_v51 = vmul.f32 %v11300_v60, %v11359_v11 }
 0x96f   :  { %3512 = vmatpush.msrb.mxu1 %v2995_v26  ;;  %3551 = vmatpush.msrb.mxu0 %v3028_v9  ;;  %v2707_v21 = vmul.f32 %v11286_v62, %v11355_v36  ;;  %v11358_v2 = vld [vmem:[#allocation22_spill] sm:$0xff] }
 0x970   :  { %v2708_v59 = vmul.f32 %v11290_v20, %v11358_v2  ;;  %v3771_v2 = vld [vmem:[%s9440_s2 + $0x20] sm:$0xff] }
 0x971   :  { %3513 = vmatpush.msrb.mxu1 %v2963_v27  ;;  %3552 = vmatpush.msrb.mxu0 %v2996_v58 }
 0x973   :  { %3514 = vmatpush.msrb.mxu1 %v2931_v10  ;;  %3553 = vmatpush.msrb.mxu0 %v2964_v48 }
 0x975   :  { %3515 = vmatpush.msrb.mxu1 %v2899_v54  ;;  %3554 = vmatpush.msrb.mxu0 %v2932_v28 }
 0x977   :  { %3516 = vmatpush.msrb.mxu1 %v2867_v61  ;;  %3555 = vmatpush.msrb.mxu0 %v2900_v56 }
 0x979   :  { %3517 = vmatpush.msrb.mxu1 %v2835_v38  ;;  %3556 = vmatpush.msrb.mxu0 %v2868_v49 }
 0x97b   :  { %3518 = vmatpush.msrb.mxu1 %v2803_v45  ;;  %3557 = vmatpush.msrb.mxu0 %v2836_v34 }
 0x97d   :  { %3519 = vmatpush.msrb.mxu1 %v2771_v1  ;;  %3558 = vmatpush.msrb.mxu0 %v2804_v8  ;;  %v3304_v62 = vpop.f32.mrf.mxu1  ;;  %v3344_v52 = vpop.f32.mrf.mxu0  ;;  %v11360_v1 = vld [vmem:[#allocation8_spill] sm:$0xff] }
 0x97f   :  { %3520 = vmatpush.msrb.mxu1 %v2739_v7  ;;  %3559 = vmatpush.msrb.mxu0 %v2772_v55 }
 0x981   :  { %3521 = vmatpush.msrb.mxu1 %v2707_v21  ;;  %3560 = vmatpush.msrb.mxu0 %v2740_v53 }
 0x983   :  { %3522 = vmatpush.msrb.mxu1 %v2675_v17  ;;  %3561 = vmatpush.msrb.mxu0 %v2708_v59 }
 0x984   :  { %3523 = vmatmul.f32.vlgmr.msrb.gmra.mxu1 %v8886_v37 }
 0x985   :  { %3562 = vmatpush.msrb.mxu0 %v2676_v51 }
 0x986   :  { %3563 = vmatmul.f32.vlgmr.msrb.gmra.mxu0 %v8886_v37 }
 0x98b   :  { %v3284_v14 = vpop.f32.mrf.mxu3 }
 0x98c   :  { %v9363_v22 = vadd.f32 %v3304_v62, %v3284_v14  ;;  %v3772_v62 = vld [vmem:[%s9440_s2 + $0x28] sm:$0xff] }
 0x98d   :  { %v3324_v16 = vpop.f32.mrf.mxu2 }
 0x98e   :  { %v9365_v20 = vadd.f32 %v3344_v52, %v3324_v16  ;;  %v3597_v60 = vmul.f32 %v9363_v22, %v9363_v22 }
 0x990   :  { %v3598_v46 = vmul.f32 %v9365_v20, %v9365_v20  ;;  %v3587_v37 = vadd.f32 %v9365_v20, %v9363_v22 }
 0x992   :  { %v3605_v24 = vadd.f32 %v3598_v46, %v3597_v60 }
 0x99d   :  { %v3364_v41 = vpop.f32.mrf.mxu1  ;;  %v3404_v50 = vpop.f32.mrf.mxu0 }
 0x9b4   :  { %v3384_v30 = vpop.f32.mrf.mxu3 }
 0x9b5   :  { %v9371_v31 = vadd.f32 %v3384_v30, %v3364_v41 }
 0x9b6   :  { %v3424_v44 = vpop.f32.mrf.mxu2 }
 0x9b7   :  { %v3599_v26 = vmul.f32 %v9371_v31, %v9371_v31  ;;  %v3425_v18 = vadd.f32 %v3424_v44, %v3404_v50  ;;  %v3588_v9 = vadd.f32 %v3587_v37, %v9371_v31 }
 0x9b9   :  { %v3606_v27 = vadd.f32 %v3605_v24, %v3599_v26  ;;  %v3600_v63 = vmul.f32 %v3425_v18, %v3425_v18  ;;  %v3589_v58 = vadd.f32 %v3588_v9, %v3425_v18 }
 0x9bb   :  { %v3607_v39 = vadd.f32 %v3606_v27, %v3600_v63 }
 0x9d4   :  { %v3444_v43 = vpop.f32.mrf.mxu3 }
 0x9d5   :  { %v3484_v13 = vpop.f32.mrf.mxu2 }
 0x9e1   :  { %v3464_v32 = vpop.f32.mrf.mxu1 }
 0x9e2   :  { %v3465_v33 = vadd.f32 %v3464_v32, %v3444_v43 }
 0x9e3   :  { %v3504_v23 = vpop.f32.mrf.mxu0 }
 0x9e4   :  { %v3601_v12 = vmul.f32 %v3465_v33, %v3465_v33  ;;  %v3505_v10 = vadd.f32 %v3504_v23, %v3484_v13  ;;  %v3590_v48 = vadd.f32 %v3589_v58, %v3465_v33 }
 0x9e6   :  { %v3608_v54 = vadd.f32 %v3607_v39, %v3601_v12  ;;  %v3602_v29 = vmul.f32 %v3505_v10, %v3505_v10  ;;  %v3591_v25 = vadd.f32 %v3590_v48, %v3505_v10  ;;  %v3814_v48 = vld [vmem:[%s9437_s0 + $0x20] sm:$0xff] }
 0x9e8   :  { %v3609_v56 = vadd.f32 %v3608_v54, %v3602_v29  ;;  %v3815_v54 = vld [vmem:[%s9437_s0 + $0x28] sm:$0xff] }
 0x9ef   :  { %v3544_v40 = vpop.f32.mrf.mxu3  ;;  %v3584_v3 = vpop.f32.mrf.mxu2 }
 0xa01   :  { %v3524_v28 = vpop.f32.mrf.mxu1 }
 0xa02   :  { %v3545_v61 = vadd.f32 %v3544_v40, %v3524_v28  ;;  %v3816_v28 = vld [vmem:[%s9437_s0 + $0x30] sm:$0xff] }
 0xa03   :  { %v3564_v0 = vpop.f32.mrf.mxu0 }
 0xa04   :  { %v3592_v5 = vadd.f32 %v3591_v25, %v3545_v61  ;;  %v3603_v38 = vmul.f32 %v3545_v61, %v3545_v61  ;;  %v3585_v49 = vadd.f32 %v3584_v3, %v3564_v0 }
 0xa06   :  { %v3610_v15 = vadd.f32 %v3609_v56, %v3603_v38  ;;  %v3604_v45 = vmul.f32 %v3585_v49, %v3585_v49  ;;  %v3593_v6 = vadd.f32 %v3592_v5, %v3585_v49  ;;  %v3817_v5 = vld [vmem:[%s9437_s0 + $0x38] sm:$0xff] }
 0xa08   :  { %3594 = vadd.xlane.f32.xlu0 %v3593_v6  ;;  %v3611_v34 = vadd.f32 %v3610_v15, %v3604_v45 }
 0xa0a   :  { %3612 = vadd.xlane.f32.xlu2 %v3611_v34 }
 0xa7b   :  { %v3595_v57 = vpop.xlane.xlu0 %3594 }
 0xa7c   :  { %v3596_v42 = vmul.f32 %v3595_v57, %v11360_v1 }
 0xa7d   :  { %v3613_v8 = vpop.xlane.xlu2 %3612 }
 0xa7e   :  { %v3615_v4 = vmul.f32 %v3596_v42, %v3596_v42  ;;  %v3614_v7 = vmul.f32 %v3613_v8, %v11360_v1 }
 0xa80   :  { %v3616_v19 = vsub.f32 %v3614_v7, %v3615_v4 }
 0xa82   :  { %v3617_v55 = vmax.f32 %v3616_v19, 0.0 }
 0xa84   :  { %v3620_v36 = vadd.f32 1e-05, %v3617_v55 }
 0xa86   :  { %3800 = vrsqrt.f32 %v3620_v36  ;;  %vm3627_vm3 = vweird.f32 %v3620_v36 }
 0xa8c   :  { %v3801_v21 = vpop.eup %3800 }
 0xa8d   :  { %v3622_v47 = vmul.f32 %v3801_v21, %v3620_v36  ;;  %vm3628_vm14 = vweird.f32 %v3801_v21 }
 0xa8e   :  { %vm3629_vm8 = vmor %vm3627_vm3, %vm3628_vm14 }
 0xa8f   :  { %v3623_v53 = vmul.f32 %v3801_v21, %v3622_v47 }
 0xa91   :  { %v3624_v35 = vmul.f32 0.5, %v3623_v53 }
 0xa93   :  { %v3625_v17 = vsub.f32 1.5, %v3624_v35 }
 0xa95   :  { %v3626_v59 = vmul.f32 %v3801_v21, %v3625_v17 }
 0xa97   :  { %v3630_v11 = vsel %vm3629_vm8, %v3801_v21, %v3626_v59 }
 0xa98   :  { %v3631_v51 = vmul.f32 %v3771_v2, %v3630_v11 }
 0xa9a   :  { %3638 = vperm.xlu1 %3793, %v3631_v51   ;;  %v3634_v14 = vmul.f32 %v3631_v51, %v3596_v42 }
 0xa9c   :  { %v3635_v16 = vsub.f32 %v3772_v62, %v3634_v14 }
 0xaa2   :  { %3651 = vperm.xlu1 %3793, %v3635_v16  }
 0xb0c   :  { %v3639_v52 = vpop.permute.xlu1 %3638 }
 0xb0d   :  { %v3641_v41 = vmul.f32 %v3639_v52, %v9363_v22  ;;  %v3642_v30 = vmul.f32 %v3639_v52, %v9365_v20  ;;  %v3643_v50 = vmul.f32 %v3639_v52, %v9371_v31  ;;  %v3644_v44 = vmul.f32 %v3639_v52, %v3425_v18  ;;  %v3810_v22 = vld [vmem:[%s9437_s0] sm:$0xff]  ;;  %v3811_v31 = vld [vmem:[%s9437_s0 + $0x8] sm:$0xff] }
 0xb0e   :  { %v3645_v60 = vmul.f32 %v3639_v52, %v3465_v33  ;;  %v3646_v46 = vmul.f32 %v3639_v52, %v3505_v10  ;;  %v3647_v37 = vmul.f32 %v3639_v52, %v3545_v61  ;;  %v3648_v43 = vmul.f32 %v3639_v52, %v3585_v49  ;;  %v3812_v33 = vld [vmem:[%s9437_s0 + $0x10] sm:$0xff]  ;;  %v3813_v10 = vld [vmem:[%s9437_s0 + $0x18] sm:$0xff] }
 0xb14   :  { %v3652_v32 = vpop.permute.xlu1 %3651 }
 0xb15   :  { %v3654_v24 = vadd.f32 %v3652_v32, %v3641_v41  ;;  %v3655_v26 = vadd.f32 %v3652_v32, %v3642_v30  ;;  %v3656_v9 = vadd.f32 %v3652_v32, %v3643_v50  ;;  %v3657_v13 = vadd.f32 %v3652_v32, %v3644_v44 }
 0xb16   :  { %v3658_v23 = vadd.f32 %v3652_v32, %v3645_v60  ;;  %v3659_v27 = vadd.f32 %v3652_v32, %v3646_v46  ;;  %v3660_v63 = vadd.f32 %v3652_v32, %v3647_v37  ;;  %v3661_v58 = vadd.f32 %v3652_v32, %v3648_v43 }
 0xb17   :  { %v3662_v20 = vadd.f32 %v3810_v22, %v3654_v24  ;;  %v3663_v18 = vadd.f32 %v3811_v31, %v3655_v26  ;;  %v3664_v12 = vadd.f32 %v3812_v33, %v3656_v9  ;;  %v3665_v39 = vadd.f32 %v3813_v10, %v3657_v13 }
 0xb18   :  { %v3666_v40 = vadd.f32 %v3814_v48, %v3658_v23  ;;  %v3667_v29 = vadd.f32 %v3815_v54, %v3659_v27  ;;  %v3668_v25 = vadd.f32 %v3816_v28, %v3660_v63  ;;  %v3669_v38 = vadd.f32 %v3817_v5, %v3661_v58 }
 0xb19   :  { %v3670_v61 = vmax.f32 %v3662_v20, 0.0  ;;  %v3671_v3 = vmax.f32 %v3663_v18, 0.0  ;;  %v3672_v56 = vmax.f32 %v3664_v12, 0.0  ;;  %v3673_v0 = vmax.f32 %v3665_v39, 0.0 }
 0xb1a   :  { %v3674_v49 = vmax.f32 %v3666_v40, 0.0  ;;  %v3675_v15 = vmax.f32 %v3667_v29, 0.0  ;;  %v3676_v45 = vmax.f32 %v3668_v25, 0.0  ;;  %v3677_v6 = vmax.f32 %v3669_v38, 0.0 }
 0xb1b   :  { %3678 = vst [vmem:[%s9441_s4] sm:$0xff] %v3670_v61 }
 0xb1c   :  { %3679 = vst [vmem:[%s9441_s4 + $0x8] sm:$0xff] %v3671_v3 }
 0xb1d   :  { %3680 = vst [vmem:[%s9441_s4 + $0x10] sm:$0xff] %v3672_v56 }
 0xb1e   :  { %3681 = vst [vmem:[%s9441_s4 + $0x18] sm:$0xff] %v3673_v0 }
 0xb1f   :  { %3682 = vst [vmem:[%s9441_s4 + $0x20] sm:$0xff] %v3674_v49 }
 0xb20   :  { %3683 = vst [vmem:[%s9441_s4 + $0x28] sm:$0xff] %v3675_v15 }
 0xb21   :  { %3684 = vst [vmem:[%s9441_s4 + $0x30] sm:$0xff] %v3676_v45 }
 0xb22   :  { %3685 = vst [vmem:[%s9441_s4 + $0x38] sm:$0xff] %v3677_v6 }

</bundles_post_ra>
